<compile_context>
chip_gen: v6e
topology: v6e:2x2x1
jax: 0.10.0
libtpu: 0.0.40
codegen_flags: <defaults>
</compile_context>

<pallas_src>
import functools

import jax
import jax.numpy as jnp
from jax.experimental import pallas as pl
from jax.experimental.pallas import tpu as pltpu


# ---------------------------------------------------------------------------
# Kernel 1: fused conv_img  (folded 7x7 -> 3x3 conv, one MXU matmul per image)
# ---------------------------------------------------------------------------

def _conv_img_kernel(pt_ref, wf_ref, bf_ref, o_ref, tpad_ref, *, H, W, band):
    """Per-batch fused conv_img.

    pt_ref:   (147, H*W)  im2col patch slab (transposed: lanes = spatial)
    wf_ref:   (9, 147)    folded weights  wf[j,m] = sum_c W1[m,c] * W2[j,c]
    bf_ref:   (9, 1)      folded bias per 3x3 tap (b2 folded into center tap)
    o_ref:    (1, H*W)    ini_img, flat spatial
    tpad_ref: VMEM (9, H*W + 2*band) scratch: 9 tap planes with zero halos
    """
    HW = H * W

    # One MXU matmul: contributions of every 3x3 tap position for every pixel.
    t = jnp.dot(wf_ref[...], pt_ref[...], preferred_element_type=jnp.float32)
    t = t + bf_ref[...]                                   # (9, H*W)

    # Zero halo bands (emulate the 3x3 conv's zero padding of the intermediate),
    # then park the tap planes in flat spatial layout.
    tpad_ref[:, 0:band] = jnp.zeros((9, band), jnp.float32)
    tpad_ref[:, band + HW:band + HW + band] = jnp.zeros((9, band), jnp.float32)
    tpad_ref[:, band:band + HW] = t

    # 3x3 gather/add: out[p] = sum_j tap_j[p + dh*W + dw], with the column-wrap
    # masked (row out-of-range falls into the zero halo).  Register accumulator,
    # 9 lane-dense (1, H*W) adds.
    w_idx = jax.lax.broadcasted_iota(jnp.int32, (1, HW), 1) & (W - 1)
    acc = jnp.zeros((1, HW), jnp.float32)
    for j in range(9):
        dh, dw = j // 3 - 1, j % 3 - 1
        off = band + dh * W + dw
        v = tpad_ref[j:j + 1, off:off + HW]
        if dw == 1:
            v = jnp.where(w_idx < W - 1, v, 0.0)
        elif dw == -1:
            v = jnp.where(w_idx > 0, v, 0.0)
        acc = acc + v
    o_ref[...] = acc


def conv_img_fused(patches_t, wfold_t, bfold, H, W):
    B, K, HW = patches_t.shape
    assert W & (W - 1) == 0, "W must be a power of two (lane-mask trick)"
    band = ((W + 1 + 127) // 128) * 128
    kernel = functools.partial(_conv_img_kernel, H=H, W=W, band=band)
    return pl.pallas_call(
        kernel,
        out_shape=jax.ShapeDtypeStruct((B, 1, HW), jnp.float32),
        grid=(B,),
        in_specs=[
            pl.BlockSpec((None, K, HW), lambda b: (b, 0, 0)),
            pl.BlockSpec((9, K), lambda b: (0, 0)),
            pl.BlockSpec((9, 1), lambda b: (0, 0)),
        ],
        out_specs=pl.BlockSpec((None, 1, HW), lambda b: (b, 0, 0)),
        scratch_shapes=[pltpu.VMEM((9, HW + 2 * band), jnp.float32)],
        compiler_params=pltpu.CompilerParams(
            dimension_semantics=("parallel",)),
    )(patches_t, wfold_t, bfold)


# ---------------------------------------------------------------------------
# Kernel 2: Segformer stand-in projections + conv_feamap (single launch)
# ---------------------------------------------------------------------------

def _backbone_kernel(p8_ref, p4_ref, wh_ref, bh_ref, wf_ref, bf_ref,
                     wl_ref, bl_ref, fea_ref, log_ref, *, fdiv):
    hid = jnp.dot(p8_ref[...], wh_ref[...],
                  preferred_element_type=jnp.float32) + bh_ref[...]
    fea = jnp.dot(hid, wf_ref[...],
                  preferred_element_type=jnp.float32) + bf_ref[...]
    fea_ref[...] = fea * fdiv
    log_ref[...] = jnp.dot(p4_ref[...], wl_ref[...],
                           preferred_element_type=jnp.float32) + bl_ref[...]


def backbone_feamap(p8, p4, wh, bh, wf, bf, wl, bl, fdiv):
    kernel = functools.partial(_backbone_kernel, fdiv=float(fdiv))
    return pl.pallas_call(
        kernel,
        out_shape=(jax.ShapeDtypeStruct((p8.shape[0], wf.shape[1]), jnp.float32),
                   jax.ShapeDtypeStruct((p4.shape[0], wl.shape[1]), jnp.float32)),
    )(p8, p4, wh, bh, wf, bf, wl, bl)


# ---------------------------------------------------------------------------
# Kernel 3: fused resolution_trans (image + feamap paths) + attention matmul
# ---------------------------------------------------------------------------

def _attention_kernel(u_ref, g_ref, w1_ref, w2_ref, w1t_ref, w2t_ref, o_ref,
                      *, inv_p2):
    """Per-batch attention block, computed transposed (lanes = L_img).

    u_ref:  (p2, L_img)     unfold(ini_img)              (pre-MLP)
    g_ref:  (C*L_fea, p2)   unfold(feamap_c).T, stacked  (pre-MLP)
    w1/w2:  resolution_trans weights (p2,2p2) / (2p2,p2); w1t/w2t = transposes
    o_ref:  (C*L_fea, L_img) = attentions transposed
    """
    # image path, transposed:  A = relu(W2^T @ (W1^T @ U))
    h_img = jnp.dot(w1t_ref[...], u_ref[...], preferred_element_type=jnp.float32)
    a_img = jnp.maximum(
        jnp.dot(w2t_ref[...], h_img, preferred_element_type=jnp.float32), 0.0)
    # feamap path:  G = relu((g @ W1) @ W2)
    h_fea = jnp.dot(g_ref[...], w1_ref[...], preferred_element_type=jnp.float32)
    g_mlp = jnp.maximum(
        jnp.dot(h_fea, w2_ref[...], preferred_element_type=jnp.float32), 0.0)
    # attention (transposed):  att^T = G @ A / p2   -> lane-dense L_img stores
    o_ref[...] = jnp.dot(g_mlp, a_img,
                         preferred_element_type=jnp.float32) * inv_p2


def attention_fused(u, g, w1, w2):
    B, p2, L_img = u.shape
    CL = g.shape[1]
    h2 = w1.shape[1]
    kernel = functools.partial(_attention_kernel, inv_p2=1.0 / float(p2))
    return pl.pallas_call(
        kernel,
        out_shape=jax.ShapeDtypeStruct((B, CL, L_img), jnp.float32),
        grid=(B,),
        in_specs=[
            pl.BlockSpec((None, p2, L_img), lambda b: (b, 0, 0)),
            pl.BlockSpec((None, CL, p2), lambda b: (b, 0, 0)),
            pl.BlockSpec((p2, h2), lambda b: (0, 0)),
            pl.BlockSpec((h2, p2), lambda b: (0, 0)),
            pl.BlockSpec((h2, p2), lambda b: (0, 0)),
            pl.BlockSpec((p2, h2), lambda b: (0, 0)),
        ],
        out_specs=pl.BlockSpec((None, CL, L_img), lambda b: (b, 0, 0)),
        compiler_params=pltpu.CompilerParams(
            dimension_semantics=("parallel",)),
    )(u, g, w1, w2, w1.T, w2.T)


# ---------------------------------------------------------------------------
# Glue (im2col, unfold reorders, pooling, params) — plain JAX, tiny tensors
# ---------------------------------------------------------------------------

def _avg_pool(x_nhwc, s):
    B, H, W, C = x_nhwc.shape
    return x_nhwc.reshape(B, H // s, s, W // s, s, C).mean(axis=(2, 4))


def init_params(key, patch_size):
    p2 = patch_size * patch_size
    ks = jax.random.split(key, 10)

    def w(k, shape, scale=0.05):
        return scale * jax.random.normal(k, shape, jnp.float32)

    return dict(
        conv_img_w1=w(ks[0], (7, 7, 3, 64)),     # Conv2d(3, 64, 7x7, pad 3)  HWIO
        conv_img_b1=w(ks[1], (64,)),
        conv_img_w2=w(ks[2], (3, 3, 64, 1)),     # Conv2d(64, 1, 3x3, pad 1)  HWIO
        conv_img_b2=w(ks[3], (1,)),
        feamap_w=w(ks[4], (64, 10)),             # Conv2d(64, 10, 1x1)
        feamap_b=w(ks[5], (10,)),
        res_w1=w(ks[6], (p2, 2 * p2)),           # Linear(p2, 2*p2, bias=False)
        res_w2=w(ks[7], (2 * p2, p2)),           # Linear(2*p2, p2, bias=False)
        seg_hidden_w=w(ks[8], (3, 64)),          # Segformer stand-in projections
        seg_hidden_b=jnp.zeros((64,), jnp.float32),
        seg_logits_w=w(ks[9], (3, 10)),
        seg_logits_b=jnp.zeros((10,), jnp.float32),
    )


def encoder_forward(params, x_nchw, patch_size=4, attention_on_depth=1):
    B, _, H, W = x_nchw.shape
    p = patch_size
    p2 = p * p
    C_att = params['feamap_b'].shape[0]
    x = jnp.transpose(x_nchw, (0, 2, 3, 1))                       # NHWC

    # ---- conv_img: fold Conv(3->64,7x7,pad3) o Conv(64->1,3x3,pad1) ---------
    w1r = params['conv_img_w1'].reshape(7 * 7 * 3, 64)            # (147, 64)
    w2r = params['conv_img_w2'][:, :, :, 0].reshape(9, 64)        # (9, 64)
    wfold_t = w2r @ w1r.T                                         # (9, 147)
    bfold = (w2r @ params['conv_img_b1'])
    bfold = bfold.at[4].add(params['conv_img_b2'][0]).reshape(9, 1)

    # im2col slab, transposed so the kernel's lane dim is H*W (built once here,
    # DMA'd per batch element by the conv kernel's BlockSpec).
    xp = jnp.pad(x, ((0, 0), (3, 3), (3, 3), (0, 0)))
    xpt = jnp.transpose(xp, (0, 3, 1, 2))                         # (B,3,H+6,W+6)
    slabs = [xpt[:, :, i:i + H, j:j + W] for i in range(7) for j in range(7)]
    patches_t = jnp.stack(slabs, axis=1).reshape(B, 7 * 7 * 3, H * W)

    ini = conv_img_fused(patches_t, wfold_t, bfold, H, W)         # (B,1,H*W)
    ini = ini.reshape(B, H, W)

    # TODO(synk): the pretrained SegformerForSemanticSegmentation backbone cannot
    # be reproduced without its checkpoint; deterministic stand-in (avg-pool +
    # linear projection) produces hidden_states[1]-shaped features (B,H/8,W/8,64)
    # and logits (B,10,H/4,W/4).  conv_feamap (1x1, /4) is fused into the same
    # pallas_call.
    hid_in = _avg_pool(x, 8)
    Hh, Wh = hid_in.shape[1], hid_in.shape[2]
    log_in = _avg_pool(x, 4)
    Hl, Wl = log_in.shape[1], log_in.shape[2]
    fdiv = 1.0 / float((2 ** attention_on_depth) * (2 ** attention_on_depth))
    feamap_flat, logits_flat = backbone_feamap(
        hid_in.reshape(B * Hh * Wh, 3), log_in.reshape(B * Hl * Wl, 3),
        params['seg_hidden_w'], params['seg_hidden_b'].reshape(1, -1),
        params['feamap_w'], params['feamap_b'].reshape(1, -1),
        params['seg_logits_w'], params['seg_logits_b'].reshape(1, -1), fdiv)
    feamap = feamap_flat.reshape(B, Hh, Wh, C_att)
    logits = jnp.transpose(logits_flat.reshape(B, Hl, Wl, -1), (0, 3, 1, 2))

    # ---- unfold reorders (pure layout, tiny tensors) ------------------------
    L_img = (H // p) * (W // p)
    U = ini.reshape(B, H // p, p, W // p, p)
    U = U.transpose(0, 2, 4, 1, 3).reshape(B, p2, L_img)          # (B,p2,L_img)
    L_fea = (Hh // p) * (Wh // p)
    G = feamap.reshape(B, Hh // p, p, Wh // p, p, C_att)
    G = G.transpose(0, 5, 1, 3, 2, 4).reshape(B, C_att * L_fea, p2)

    # ---- resolution_trans (both paths) + attention, one fused launch --------
    att_t = attention_fused(U, G, params['res_w1'], params['res_w2'])
    attentions = att_t.reshape(B, C_att, L_fea, L_img).transpose(0, 1, 3, 2)
    return attentions, logits


if __name__ == "__main__":
    patch_size = 4
    key = jax.random.PRNGKey(0)
    k_x, k_p = jax.random.split(key)
    x = jax.random.normal(k_x, (2, 3, 64, 64), jnp.float32)       # NCHW like PyTorch
    params = init_params(k_p, patch_size)

    fwd = jax.jit(functools.partial(encoder_forward, patch_size=patch_size,
                                    attention_on_depth=1))
    attentions, logits = fwd(params, x)
    jax.block_until_ready((attentions, logits))
    assert attentions.shape == (2, 10, 256, 4), attentions.shape  # (B,10,L_img,L_fea)
    assert logits.shape == (2, 10, 16, 16), logits.shape          # (B,labels,H/4,W/4)
    print("KERNEL_OK")
</pallas_src>

<mosaic_0001>
module attributes {stable_mosaic.version = 11 : i64} {
  func.func @_conv_img_kernel(%arg0: i32, %arg1: memref<1x147x4096xf32, #tpu.memory_space<vmem>>, %arg2: memref<9x147xf32, #tpu.memory_space<vmem>>, %arg3: memref<9x1xf32, #tpu.memory_space<vmem>>, %arg4: memref<1x1x4096xf32, #tpu.memory_space<vmem>>, %arg5: memref<9x4352xf32, #tpu.memory_space<vmem>>) attributes {dimension_semantics = [#tpu.dimension_semantics<parallel>], iteration_bounds = array<i64: 2>, scalar_prefetch = 0 : i64, scratch_operands = 1 : i64, tpu.core_type = #tpu.core_type<tc>, window_params = [{transform_indices = @transform_0, window_bounds = array<i64: 1, 147, 4096>}, {pipeline_mode = #tpu.pipeline_mode<synchronous>, transform_indices = @transform_1, window_bounds = array<i64: 9, 147>}, {pipeline_mode = #tpu.pipeline_mode<synchronous>, transform_indices = @transform_2, window_bounds = array<i64: 9, 1>}, {transform_indices = @transform_3, window_bounds = array<i64: 1, 1, 4096>}]} {
    %c0 = arith.constant 0 : index
    %c0_0 = arith.constant 0 : index
    %0 = vector.load %arg2[%c0, %c0_0] : memref<9x147xf32, #tpu.memory_space<vmem>>, vector<9x147xf32>
    %c0_1 = arith.constant 0 : index
    %c0_2 = arith.constant 0 : index
    %c0_3 = arith.constant 0 : index
    %1 = vector.load %arg1[%c0_1, %c0_2, %c0_3] : memref<1x147x4096xf32, #tpu.memory_space<vmem>>, vector<1x147x4096xf32>
    %2 = vector.shape_cast %1 : vector<1x147x4096xf32> to vector<147x4096xf32>
    %cst = arith.constant dense<0.000000e+00> : vector<9x4096xf32>
    %3 = tpu.matmul %0, %2, %cst {dimension_numbers = #tpu.dot_dimension_numbers<[1], [0], [0], [1], [0, 0, 1, 1], [], []>} : vector<9x147xf32>, vector<147x4096xf32>, vector<9x4096xf32> -> vector<9x4096xf32>
    %c0_4 = arith.constant 0 : index
    %c0_5 = arith.constant 0 : index
    %4 = vector.load %arg3[%c0_4, %c0_5] : memref<9x1xf32, #tpu.memory_space<vmem>>, vector<9x1xf32>
    %5 = vector.broadcast %4 : vector<9x1xf32> to vector<9x4096xf32>
    %6 = arith.addf %3, %5 : vector<9x4096xf32>
    %cst_6 = arith.constant 0.000000e+00 : f32
    %7 = vector.broadcast %cst_6 : f32 to vector<9x128xf32>
    %c0_7 = arith.constant 0 : index
    %c0_8 = arith.constant 0 : index
    %8 = vector.load %arg5[%c0_7, %c0_8] : memref<9x4352xf32, #tpu.memory_space<vmem>>, vector<9x128xf32>
    tpu.vector_store %arg5[%c0_7, %c0_8], %7 {strides = array<i32>} : memref<9x4352xf32, #tpu.memory_space<vmem>>, vector<9x128xf32>,
    %cst_9 = arith.constant 0.000000e+00 : f32
    %9 = vector.broadcast %cst_9 : f32 to vector<9x128xf32>
    %c0_10 = arith.constant 0 : index
    %c4224 = arith.constant 4224 : index
    %10 = vector.load %arg5[%c0_10, %c4224] : memref<9x4352xf32, #tpu.memory_space<vmem>>, vector<9x128xf32>
    tpu.vector_store %arg5[%c0_10, %c4224], %9 {strides = array<i32>} : memref<9x4352xf32, #tpu.memory_space<vmem>>, vector<9x128xf32>,
    %c0_11 = arith.constant 0 : index
    %c128 = arith.constant 128 : index
    %11 = vector.load %arg5[%c0_11, %c128] : memref<9x4352xf32, #tpu.memory_space<vmem>>, vector<9x4096xf32>
    tpu.vector_store %arg5[%c0_11, %c128], %6 {strides = array<i32>} : memref<9x4352xf32, #tpu.memory_space<vmem>>, vector<9x4096xf32>,
    %12 = tpu.iota {dimensions = array<i32: 1>} : vector<1x4096xi32>
    %c63_i32 = arith.constant 63 : i32
    %13 = vector.broadcast %c63_i32 : i32 to vector<1x4096xi32>
    %14 = arith.andi %12, %13 : vector<1x4096xi32>
    %cst_12 = arith.constant 0.000000e+00 : f32
    %15 = vector.broadcast %cst_12 : f32 to vector<1x4096xf32>
    %c0_13 = arith.constant 0 : index
    %c63 = arith.constant 63 : index
    %16 = vector.load %arg5[%c0_13, %c63] : memref<9x4352xf32, #tpu.memory_space<vmem>>, vector<1x4096xf32>
    %c0_i32 = arith.constant 0 : i32
    %17 = vector.broadcast %c0_i32 : i32 to vector<1x4096xi32>
    %18 = arith.cmpi sgt, %14, %17 : vector<1x4096xi32>
    %cst_14 = arith.constant 0.000000e+00 : f32
    %19 = vector.broadcast %cst_14 : f32 to vector<1x4096xf32>
    %20 = arith.select %18, %16, %19 : vector<1x4096xi1>, vector<1x4096xf32>
    %21 = arith.addf %15, %20 : vector<1x4096xf32>
    %c1 = arith.constant 1 : index
    %c64 = arith.constant 64 : index
    %22 = vector.load %arg5[%c1, %c64] : memref<9x4352xf32, #tpu.memory_space<vmem>>, vector<1x4096xf32>
    %23 = arith.addf %21, %22 : vector<1x4096xf32>
    %c2 = arith.constant 2 : index
    %c65 = arith.constant 65 : index
    %24 = vector.load %arg5[%c2, %c65] : memref<9x4352xf32, #tpu.memory_space<vmem>>, vector<1x4096xf32>
    %c63_i32_15 = arith.constant 63 : i32
    %25 = vector.broadcast %c63_i32_15 : i32 to vector<1x4096xi32>
    %26 = arith.cmpi slt, %14, %25 : vector<1x4096xi32>
    %cst_16 = arith.constant 0.000000e+00 : f32
    %27 = vector.broadcast %cst_16 : f32 to vector<1x4096xf32>
    %28 = arith.select %26, %24, %27 : vector<1x4096xi1>, vector<1x4096xf32>
    %29 = arith.addf %23, %28 : vector<1x4096xf32>
    %c3 = arith.constant 3 : index
    %c127 = arith.constant 127 : index
    %30 = vector.load %arg5[%c3, %c127] : memref<9x4352xf32, #tpu.memory_space<vmem>>, vector<1x4096xf32>
    %c0_i32_17 = arith.constant 0 : i32
    %31 = vector.broadcast %c0_i32_17 : i32 to vector<1x4096xi32>
    %32 = arith.cmpi sgt, %14, %31 : vector<1x4096xi32>
    %cst_18 = arith.constant 0.000000e+00 : f32
    %33 = vector.broadcast %cst_18 : f32 to vector<1x4096xf32>
    %34 = arith.select %32, %30, %33 : vector<1x4096xi1>, vector<1x4096xf32>
    %35 = arith.addf %29, %34 : vector<1x4096xf32>
    %c4 = arith.constant 4 : index
    %c128_19 = arith.constant 128 : index
    %36 = vector.load %arg5[%c4, %c128_19] : memref<9x4352xf32, #tpu.memory_space<vmem>>, vector<1x4096xf32>
    %37 = arith.addf %35, %36 : vector<1x4096xf32>
    %c5 = arith.constant 5 : index
    %c129 = arith.constant 129 : index
    %38 = vector.load %arg5[%c5, %c129] : memref<9x4352xf32, #tpu.memory_space<vmem>>, vector<1x4096xf32>
    %c63_i32_20 = arith.constant 63 : i32
    %39 = vector.broadcast %c63_i32_20 : i32 to vector<1x4096xi32>
    %40 = arith.cmpi slt, %14, %39 : vector<1x4096xi32>
    %cst_21 = arith.constant 0.000000e+00 : f32
    %41 = vector.broadcast %cst_21 : f32 to vector<1x4096xf32>
    %42 = arith.select %40, %38, %41 : vector<1x4096xi1>, vector<1x4096xf32>
    %43 = arith.addf %37, %42 : vector<1x4096xf32>
    %c6 = arith.constant 6 : index
    %c191 = arith.constant 191 : index
    %44 = vector.load %arg5[%c6, %c191] : memref<9x4352xf32, #tpu.memory_space<vmem>>, vector<1x4096xf32>
    %c0_i32_22 = arith.constant 0 : i32
    %45 = vector.broadcast %c0_i32_22 : i32 to vector<1x4096xi32>
    %46 = arith.cmpi sgt, %14, %45 : vector<1x4096xi32>
    %cst_23 = arith.constant 0.000000e+00 : f32
    %47 = vector.broadcast %cst_23 : f32 to vector<1x4096xf32>
    %48 = arith.select %46, %44, %47 : vector<1x4096xi1>, vector<1x4096xf32>
    %49 = arith.addf %43, %48 : vector<1x4096xf32>
    %c7 = arith.constant 7 : index
    %c192 = arith.constant 192 : index
    %50 = vector.load %arg5[%c7, %c192] : memref<9x4352xf32, #tpu.memory_space<vmem>>, vector<1x4096xf32>
    %51 = arith.addf %49, %50 : vector<1x4096xf32>
    %c8 = arith.constant 8 : index
    %c193 = arith.constant 193 : index
    %52 = vector.load %arg5[%c8, %c193] : memref<9x4352xf32, #tpu.memory_space<vmem>>, vector<1x4096xf32>
    %c63_i32_24 = arith.constant 63 : i32
    %53 = vector.broadcast %c63_i32_24 : i32 to vector<1x4096xi32>
    %54 = arith.cmpi slt, %14, %53 : vector<1x4096xi32>
    %cst_25 = arith.constant 0.000000e+00 : f32
    %55 = vector.broadcast %cst_25 : f32 to vector<1x4096xf32>
    %56 = arith.select %54, %52, %55 : vector<1x4096xi1>, vector<1x4096xf32>
    %57 = arith.addf %51, %56 : vector<1x4096xf32>
    %c0_26 = arith.constant 0 : index
    %c0_27 = arith.constant 0 : index
    %c0_28 = arith.constant 0 : index
    %58 = vector.load %arg4[%c0_26, %c0_27, %c0_28] : memref<1x1x4096xf32, #tpu.memory_space<vmem>>, vector<1x1x4096xf32>
    %59 = vector.shape_cast %58 : vector<1x1x4096xf32> to vector<1x4096xf32>
    %60 = vector.shape_cast %57 : vector<1x4096xf32> to vector<1x1x4096xf32>
    tpu.vector_store %arg4[%c0_26, %c0_27, %c0_28], %60 {strides = array<i32>} : memref<1x1x4096xf32, #tpu.memory_space<vmem>>, vector<1x1x4096xf32>,
    return
  }
  func.func @transform_0(%arg0: i32) -> (i32, i32, i32) {
    %c0_i32 = arith.constant 0 : i32
    %c0_i32_0 = arith.constant 0 : i32
    %c0_i32_1 = arith.constant 0 : i32
    return %arg0, %c0_i32, %c0_i32_0 : i32, i32, i32
  }
  func.func @transform_1(%arg0: i32) -> (i32, i32) {
    %c0_i32 = arith.constant 0 : i32
    %c0_i32_0 = arith.constant 0 : i32
    %c0_i32_1 = arith.constant 0 : i32
    return %c0_i32, %c0_i32_0 : i32, i32
  }
  func.func @transform_2(%arg0: i32) -> (i32, i32) {
    %c0_i32 = arith.constant 0 : i32
    %c0_i32_0 = arith.constant 0 : i32
    %c0_i32_1 = arith.constant 0 : i32
    return %c0_i32, %c0_i32_0 : i32, i32
  }
  func.func @transform_3(%arg0: i32) -> (i32, i32, i32) {
    %c0_i32 = arith.constant 0 : i32
    %c0_i32_0 = arith.constant 0 : i32
    %c0_i32_1 = arith.constant 0 : i32
    return %arg0, %c0_i32, %c0_i32_0 : i32, i32, i32
  }
}

module attributes {stable_mosaic.version = 11 : i64} {
  func.func @_backbone_kernel(%arg0: memref<128x3xf32, #tpu.memory_space<vmem>>, %arg1: memref<512x3xf32, #tpu.memory_space<vmem>>, %arg2: memref<3x64xf32, #tpu.memory_space<vmem>>, %arg3: memref<1x64xf32, #tpu.memory_space<vmem>>, %arg4: memref<64x10xf32, #tpu.memory_space<vmem>>, %arg5: memref<1x10xf32, #tpu.memory_space<vmem>>, %arg6: memref<3x10xf32, #tpu.memory_space<vmem>>, %arg7: memref<1x10xf32, #tpu.memory_space<vmem>>, %arg8: memref<128x10xf32, #tpu.memory_space<vmem>>, %arg9: memref<512x10xf32, #tpu.memory_space<vmem>>) attributes {dimension_semantics = [], scalar_prefetch = 0 : i64, scratch_operands = 0 : i64, tpu.core_type = #tpu.core_type<tc>} {
    %c0 = arith.constant 0 : index
    %c0_0 = arith.constant 0 : index
    %0 = vector.load %arg0[%c0, %c0_0] : memref<128x3xf32, #tpu.memory_space<vmem>>, vector<128x3xf32>
    %c0_1 = arith.constant 0 : index
    %c0_2 = arith.constant 0 : index
    %1 = vector.load %arg2[%c0_1, %c0_2] : memref<3x64xf32, #tpu.memory_space<vmem>>, vector<3x64xf32>
    %cst = arith.constant dense<0.000000e+00> : vector<128x64xf32>
    %2 = tpu.matmul %0, %1, %cst {dimension_numbers = #tpu.dot_dimension_numbers<[1], [0], [0], [1], [0, 0, 1, 1], [], []>} : vector<128x3xf32>, vector<3x64xf32>, vector<128x64xf32> -> vector<128x64xf32>
    %c0_3 = arith.constant 0 : index
    %c0_4 = arith.constant 0 : index
    %3 = vector.load %arg3[%c0_3, %c0_4] : memref<1x64xf32, #tpu.memory_space<vmem>>, vector<1x64xf32>
    %4 = vector.broadcast %3 : vector<1x64xf32> to vector<128x64xf32>
    %5 = arith.addf %2, %4 : vector<128x64xf32>
    %c0_5 = arith.constant 0 : index
    %c0_6 = arith.constant 0 : index
    %6 = vector.load %arg4[%c0_5, %c0_6] : memref<64x10xf32, #tpu.memory_space<vmem>>, vector<64x10xf32>
    %cst_7 = arith.constant dense<0.000000e+00> : vector<128x10xf32>
    %7 = tpu.matmul %5, %6, %cst_7 {dimension_numbers = #tpu.dot_dimension_numbers<[1], [0], [0], [1], [0, 0, 1, 1], [], []>} : vector<128x64xf32>, vector<64x10xf32>, vector<128x10xf32> -> vector<128x10xf32>
    %c0_8 = arith.constant 0 : index
    %c0_9 = arith.constant 0 : index
    %8 = vector.load %arg5[%c0_8, %c0_9] : memref<1x10xf32, #tpu.memory_space<vmem>>, vector<1x10xf32>
    %9 = vector.broadcast %8 : vector<1x10xf32> to vector<128x10xf32>
    %10 = arith.addf %7, %9 : vector<128x10xf32>
    %cst_10 = arith.constant 2.500000e-01 : f32
    %11 = vector.broadcast %cst_10 : f32 to vector<128x10xf32>
    %12 = arith.mulf %10, %11 : vector<128x10xf32>
    %c0_11 = arith.constant 0 : index
    %c0_12 = arith.constant 0 : index
    %13 = vector.load %arg8[%c0_11, %c0_12] : memref<128x10xf32, #tpu.memory_space<vmem>>, vector<128x10xf32>
    tpu.vector_store %arg8[%c0_11, %c0_12], %12 {strides = array<i32>} : memref<128x10xf32, #tpu.memory_space<vmem>>, vector<128x10xf32>,
    %c0_13 = arith.constant 0 : index
    %c0_14 = arith.constant 0 : index
    %14 = vector.load %arg1[%c0_13, %c0_14] : memref<512x3xf32, #tpu.memory_space<vmem>>, vector<512x3xf32>
    %c0_15 = arith.constant 0 : index
    %c0_16 = arith.constant 0 : index
    %15 = vector.load %arg6[%c0_15, %c0_16] : memref<3x10xf32, #tpu.memory_space<vmem>>, vector<3x10xf32>
    %cst_17 = arith.constant dense<0.000000e+00> : vector<512x10xf32>
    %16 = tpu.matmul %14, %15, %cst_17 {dimension_numbers = #tpu.dot_dimension_numbers<[1], [0], [0], [1], [0, 0, 1, 1], [], []>} : vector<512x3xf32>, vector<3x10xf32>, vector<512x10xf32> -> vector<512x10xf32>
    %c0_18 = arith.constant 0 : index
    %c0_19 = arith.constant 0 : index
    %17 = vector.load %arg7[%c0_18, %c0_19] : memref<1x10xf32, #tpu.memory_space<vmem>>, vector<1x10xf32>
    %18 = vector.broadcast %17 : vector<1x10xf32> to vector<512x10xf32>
    %19 = arith.addf %16, %18 : vector<512x10xf32>
    %c0_20 = arith.constant 0 : index
    %c0_21 = arith.constant 0 : index
    %20 = vector.load %arg9[%c0_20, %c0_21] : memref<512x10xf32, #tpu.memory_space<vmem>>, vector<512x10xf32>
    tpu.vector_store %arg9[%c0_20, %c0_21], %19 {strides = array<i32>} : memref<512x10xf32, #tpu.memory_space<vmem>>, vector<512x10xf32>,
    return
  }
}

module attributes {stable_mosaic.version = 11 : i64} {
  func.func @_attention_kernel(%arg0: i32, %arg1: memref<1x16x256xf32, #tpu.memory_space<vmem>>, %arg2: memref<1x40x16xf32, #tpu.memory_space<vmem>>, %arg3: memref<16x32xf32, #tpu.memory_space<vmem>>, %arg4: memref<32x16xf32, #tpu.memory_space<vmem>>, %arg5: memref<32x16xf32, #tpu.memory_space<vmem>>, %arg6: memref<16x32xf32, #tpu.memory_space<vmem>>, %arg7: memref<1x40x256xf32, #tpu.memory_space<vmem>>) attributes {dimension_semantics = [#tpu.dimension_semantics<parallel>], iteration_bounds = array<i64: 2>, scalar_prefetch = 0 : i64, scratch_operands = 0 : i64, tpu.core_type = #tpu.core_type<tc>, window_params = [{transform_indices = @transform_0, window_bounds = array<i64: 1, 16, 256>}, {transform_indices = @transform_1, window_bounds = array<i64: 1, 40, 16>}, {pipeline_mode = #tpu.pipeline_mode<synchronous>, transform_indices = @transform_2, window_bounds = array<i64: 16, 32>}, {pipeline_mode = #tpu.pipeline_mode<synchronous>, transform_indices = @transform_3, window_bounds = array<i64: 32, 16>}, {pipeline_mode = #tpu.pipeline_mode<synchronous>, transform_indices = @transform_4, window_bounds = array<i64: 32, 16>}, {pipeline_mode = #tpu.pipeline_mode<synchronous>, transform_indices = @transform_5, window_bounds = array<i64: 16, 32>}, {transform_indices = @transform_6, window_bounds = array<i64: 1, 40, 256>}]} {
    %c0 = arith.constant 0 : index
    %c0_0 = arith.constant 0 : index
    %0 = vector.load %arg5[%c0, %c0_0] : memref<32x16xf32, #tpu.memory_space<vmem>>, vector<32x16xf32>
    %c0_1 = arith.constant 0 : index
    %c0_2 = arith.constant 0 : index
    %c0_3 = arith.constant 0 : index
    %1 = vector.load %arg1[%c0_1, %c0_2, %c0_3] : memref<1x16x256xf32, #tpu.memory_space<vmem>>, vector<1x16x256xf32>
    %2 = vector.shape_cast %1 : vector<1x16x256xf32> to vector<16x256xf32>
    %cst = arith.constant dense<0.000000e+00> : vector<32x256xf32>
    %3 = tpu.matmul %0, %2, %cst {dimension_numbers = #tpu.dot_dimension_numbers<[1], [0], [0], [1], [0, 0, 1, 1], [], []>} : vector<32x16xf32>, vector<16x256xf32>, vector<32x256xf32> -> vector<32x256xf32>
    %c0_4 = arith.constant 0 : index
    %c0_5 = arith.constant 0 : index
    %4 = vector.load %arg6[%c0_4, %c0_5] : memref<16x32xf32, #tpu.memory_space<vmem>>, vector<16x32xf32>
    %cst_6 = arith.constant dense<0.000000e+00> : vector<16x256xf32>
    %5 = tpu.matmul %4, %3, %cst_6 {dimension_numbers = #tpu.dot_dimension_numbers<[1], [0], [0], [1], [0, 0, 1, 1], [], []>} : vector<16x32xf32>, vector<32x256xf32>, vector<16x256xf32> -> vector<16x256xf32>
    %cst_7 = arith.constant 0.000000e+00 : f32
    %6 = vector.broadcast %cst_7 : f32 to vector<16x256xf32>
    %7 = arith.maximumf %5, %6 : vector<16x256xf32>
    %c0_8 = arith.constant 0 : index
    %c0_9 = arith.constant 0 : index
    %c0_10 = arith.constant 0 : index
    %8 = vector.load %arg2[%c0_8, %c0_9, %c0_10] : memref<1x40x16xf32, #tpu.memory_space<vmem>>, vector<1x40x16xf32>
    %9 = vector.shape_cast %8 : vector<1x40x16xf32> to vector<40x16xf32>
    %c0_11 = arith.constant 0 : index
    %c0_12 = arith.constant 0 : index
    %10 = vector.load %arg3[%c0_11, %c0_12] : memref<16x32xf32, #tpu.memory_space<vmem>>, vector<16x32xf32>
    %cst_13 = arith.constant dense<0.000000e+00> : vector<40x32xf32>
    %11 = tpu.matmul %9, %10, %cst_13 {dimension_numbers = #tpu.dot_dimension_numbers<[1], [0], [0], [1], [0, 0, 1, 1], [], []>} : vector<40x16xf32>, vector<16x32xf32>, vector<40x32xf32> -> vector<40x32xf32>
    %c0_14 = arith.constant 0 : index
    %c0_15 = arith.constant 0 : index
    %12 = vector.load %arg4[%c0_14, %c0_15] : memref<32x16xf32, #tpu.memory_space<vmem>>, vector<32x16xf32>
    %cst_16 = arith.constant dense<0.000000e+00> : vector<40x16xf32>
    %13 = tpu.matmul %11, %12, %cst_16 {dimension_numbers = #tpu.dot_dimension_numbers<[1], [0], [0], [1], [0, 0, 1, 1], [], []>} : vector<40x32xf32>, vector<32x16xf32>, vector<40x16xf32> -> vector<40x16xf32>
    %cst_17 = arith.constant 0.000000e+00 : f32
    %14 = vector.broadcast %cst_17 : f32 to vector<40x16xf32>
    %15 = arith.maximumf %13, %14 : vector<40x16xf32>
    %cst_18 = arith.constant dense<0.000000e+00> : vector<40x256xf32>
    %16 = tpu.matmul %15, %7, %cst_18 {dimension_numbers = #tpu.dot_dimension_numbers<[1], [0], [0], [1], [0, 0, 1, 1], [], []>} : vector<40x16xf32>, vector<16x256xf32>, vector<40x256xf32> -> vector<40x256xf32>
    %cst_19 = arith.constant 6.250000e-02 : f32
    %17 = vector.broadcast %cst_19 : f32 to vector<40x256xf32>
    %18 = arith.mulf %16, %17 : vector<40x256xf32>
    %c0_20 = arith.constant 0 : index
    %c0_21 = arith.constant 0 : index
    %c0_22 = arith.constant 0 : index
    %19 = vector.load %arg7[%c0_20, %c0_21, %c0_22] : memref<1x40x256xf32, #tpu.memory_space<vmem>>, vector<1x40x256xf32>
    %20 = vector.shape_cast %19 : vector<1x40x256xf32> to vector<40x256xf32>
    %21 = vector.shape_cast %18 : vector<40x256xf32> to vector<1x40x256xf32>
    tpu.vector_store %arg7[%c0_20, %c0_21, %c0_22], %21 {strides = array<i32>} : memref<1x40x256xf32, #tpu.memory_space<vmem>>, vector<1x40x256xf32>,
    return
  }
  func.func @transform_0(%arg0: i32) -> (i32, i32, i32) {
    %c0_i32 = arith.constant 0 : i32
    %c0_i32_0 = arith.constant 0 : i32
    %c0_i32_1 = arith.constant 0 : i32
    return %arg0, %c0_i32, %c0_i32_0 : i32, i32, i32
  }
  func.func @transform_1(%arg0: i32) -> (i32, i32, i32) {
    %c0_i32 = arith.constant 0 : i32
    %c0_i32_0 = arith.constant 0 : i32
    %c0_i32_1 = arith.constant 0 : i32
    return %arg0, %c0_i32, %c0_i32_0 : i32, i32, i32
  }
  func.func @transform_2(%arg0: i32) -> (i32, i32) {
    %c0_i32 = arith.constant 0 : i32
    %c0_i32_0 = arith.constant 0 : i32
    %c0_i32_1 = arith.constant 0 : i32
    return %c0_i32, %c0_i32_0 : i32, i32
  }
  func.func @transform_3(%arg0: i32) -> (i32, i32) {
    %c0_i32 = arith.constant 0 : i32
    %c0_i32_0 = arith.constant 0 : i32
    %c0_i32_1 = arith.constant 0 : i32
    return %c0_i32, %c0_i32_0 : i32, i32
  }
  func.func @transform_4(%arg0: i32) -> (i32, i32) {
    %c0_i32 = arith.constant 0 : i32
    %c0_i32_0 = arith.constant 0 : i32
    %c0_i32_1 = arith.constant 0 : i32
    return %c0_i32, %c0_i32_0 : i32, i32
  }
  func.func @transform_5(%arg0: i32) -> (i32, i32) {
    %c0_i32 = arith.constant 0 : i32
    %c0_i32_0 = arith.constant 0 : i32
    %c0_i32_1 = arith.constant 0 : i32
    return %c0_i32, %c0_i32_0 : i32, i32
  }
  func.func @transform_6(%arg0: i32) -> (i32, i32, i32) {
    %c0_i32 = arith.constant 0 : i32
    %c0_i32_0 = arith.constant 0 : i32
    %c0_i32_1 = arith.constant 0 : i32
    return %arg0, %c0_i32, %c0_i32_0 : i32, i32, i32
  }
}

</mosaic_0001>

<bundles_post_ra>
// kernel: squeeze.2
= control target key start
LH: loop header
LB: loop body
LE: loop exit
PB: predicated region body
PF: predicated region fallthrough
CT: control target
= control target key end

     0   :  { %vm51_vm0 = vcmask 523264   ;;  %s108_s0 = inlined_call_operand.vmem [shape: bf16[3,3,64], index: 0, kind: input, shape index: {}]   ;;  %s109_s1 = inlined_call_operand.vmem [shape: bf16[9,64], index: 1, kind: output, shape index: {}]  }
   0x1   :  { %v81_v0 = vld [vmem:[%s108_s0 + $0x2] sm:$0xf]   ;;  %v46_v1 = vld [vmem:[%s108_s0] sm:$0x3] }
   0x2   :  { %v18_v2 = vunpack.c.l.bf16 %v81_v0  ;;  %v47_v3 = vunpack.c.l.bf16 %v46_v1 }
   0x4   :  { %21 = vst [vmem:[#allocation1 + $0x10] ss:$-16 sps:$4 sm:$0xff] %v18_v2   ;;  %49 = vst [vmem:[#allocation1 + $0x8] sm:$0xf] %v47_v3 }
   0xb   :  { %v50_v4 = vld [vmem:[#allocation1 + $0x8] sm:$0x7]   ;;  %v54_v5 = vld [vmem:[#allocation1 + $0x10] sm:$0x7]   ;;  %v59_v6 = vld [vmem:[#allocation1] sm:$0x7]  }
   0xc   :  { %52 = vst.msk [vmem:[#allocation0] sm:$0x7] %vm51_vm0, %v50_v4   ;;  %57 = vst.msk [vmem:[#allocation0 + $0x3] sm:$0x7] %vm51_vm0, %v54_v5  }
   0xd   :  { %62 = vst.msk [vmem:[#allocation0 + $0x6] sm:$0x7] %vm51_vm0, %v59_v6  }
  0x14   :  { %v68_v7 = vld [vmem:[#allocation0] sm:$0xff]  ;;  %v74_v8 = vld [vmem:[#allocation0 + $0x8] sm:$0xff] }
  0x15   :  { %v87_v9 = vpack.c.bf16 %v74_v8, %v68_v7 }
  0x17   :  { %88 = vst [vmem:[%s109_s1] sm:$0xff] %v87_v9  }

// kernel: encoder_forward.3
= control target key start
LH: loop header
LB: loop body
LE: loop exit
PB: predicated region body
PF: predicated region fallthrough
CT: control target
= control target key end

     0   :  { %s5694_s12 = smov 0   ;;  %s9744_s0 = inlined_call_operand.vmem [shape: f32[2,147,4096], index: 0, kind: input, shape index: {}]   ;;  %s9745_s1 = inlined_call_operand.vmem [shape: f32[9,147], index: 1, kind: input, shape index: {}]   ;;  %s9746_s2 = inlined_call_operand.vmem [shape: f32[9,1], index: 2, kind: input, shape index: {}]   ;;  %s9747_s3 = inlined_call_operand.vmem [shape: f32[2,1,4096], index: 3, kind: output, shape index: {}]  }
   0x1 LB: > { %s5559_s13 = sadd.s32 4294967295, %s5664_s12   ;;  %p5563_p0 = scmp.ge.s32.totalorder %s5664_s12, 1  ;;  %s5664_s12 = sphi %s5694_s12, %s13_s12  }
   0x2   : > { %p137_p1 = scmp.lt.s32.totalorder %s5664_s12, 3 }
   0x4   : > { %p138_p2 = pnand %p5563_p0, %p137_p1 }
   0x6   : > { %141 = sbr.rel (%p138_p2) target bundleno = 1038 (0x40e), region = 32 }
   0xb   : > { %p160_p3 = scmp.lt.s32.totalorder %s5559_s13, 1  ;;  %v5705_v0 = vld [vmem:[%s9745_s1 + $0x8] sm:$0xff]  ;;  %vm793_vm0 = vcmask 154624   ;;  %v781_v1 = vld [vmem:[%s9746_s2] sm:$0xff]  ;;  %v5666_v2 = vmov 0   ;;  %vm800_vm1 = vcmask 1042432  }
   0xc   : > { %5568 = vmatprep.mubr.msk.f32.mxu0 %vm793_vm0, %v5705_v0  ;;  %5572 = vmatprep.mubr.msk.f32.mxu1 %vm793_vm0, %v5705_v0  ;;  %s5668_s15 = smov 127   ;;  %s5669_s16 = smov 65   ;;  %vm9835_vm2 = vcmask 531456   ;;  %vm9834_vm10 = vcmask 523264   ;;  %vm9838_vm13 = vcmask 515072  }
   0xd   : > { %s10857_s13 = smov (!%p160_p3, %s5559_s13), 1  ;;  %5649 = vset.pattern.permute.xlu0 %v5666_v2  ;;  %s5670_s17 = smov 64  }
   0xe   : > { %785 = vperm.xlu0 %5649, %v781_v1   ;;  %s5632_s18 = smul.u32 4864, %s10857_s13  ;;  %s5671_s24 = smov 63  }
   0xf   : > { %s5672_s25 = smov 1   ;;  %s5565_s26 = sshll.u32 %s10857_s13, 5 }
  0x10   : > { %s5720_s21 = scalar_lea.vmem %s9744_s0, %s5632_s18  ;;  %s7872_s29 = scalar_lea.vmem %s9747_s3, %s5565_s26 }
  0x11   : > { %v654_v3 = vld [vmem:[%s5720_s21 + $0xf08] sm:$0xff]  ;;  %v656_v4 = vld [vmem:[%s5720_s21 + $0xf18] sm:$0xff]  ;;  %v653_v5 = vld [vmem:[%s5720_s21 + $0xf00] sm:$0xff] }
  0x12   : > { %897 = vmatprep.subr.mxu0 %v654_v3  ;;  %974 = vmatprep.subr.mxu1 %v656_v4  ;;  %v655_v6 = vld [vmem:[%s5720_s21 + $0xf10] sm:$0xff]  ;;  %v622_v7 = vld [vmem:[%s5720_s21 + $0xe08] sm:$0xff]  ;;  %v624_v8 = vld [vmem:[%s5720_s21 + $0xe18] sm:$0xff] }
  0x13   : > { %898 = vmatpush1.msra.mxu0 %v653_v5  ;;  %975 = vmatpush1.msra.mxu1 %v655_v6  ;;  %v621_v9 = vld [vmem:[%s5720_s21 + $0xe00] sm:$0xff]  ;;  %v623_v10 = vld [vmem:[%s5720_s21 + $0xe10] sm:$0xff]  ;;  %v590_v11 = vld [vmem:[%s5720_s21 + $0xd08] sm:$0xff] }
  0x14   : > { %899 = vmatprep.subr.mxu0 %v622_v7  ;;  %976 = vmatprep.subr.mxu1 %v624_v8  ;;  %v592_v12 = vld [vmem:[%s5720_s21 + $0xd18] sm:$0xff]  ;;  %v589_v13 = vld [vmem:[%s5720_s21 + $0xd00] sm:$0xff]  ;;  %v591_v14 = vld [vmem:[%s5720_s21 + $0xd10] sm:$0xff] }
  0x15   : > { %900 = vmatpush1.msra.mxu0 %v621_v9  ;;  %977 = vmatpush1.msra.mxu1 %v623_v10  ;;  %v558_v15 = vld [vmem:[%s5720_s21 + $0xc08] sm:$0xff]  ;;  %v560_v16 = vld [vmem:[%s5720_s21 + $0xc18] sm:$0xff]  ;;  %v557_v17 = vld [vmem:[%s5720_s21 + $0xc00] sm:$0xff] }
  0x16   : > { %901 = vmatprep.subr.mxu0 %v590_v11  ;;  %978 = vmatprep.subr.mxu1 %v592_v12  ;;  %v559_v18 = vld [vmem:[%s5720_s21 + $0xc10] sm:$0xff]  ;;  %v526_v19 = vld [vmem:[%s5720_s21 + $0xb08] sm:$0xff]  ;;  %v528_v20 = vld [vmem:[%s5720_s21 + $0xb18] sm:$0xff] }
  0x17   : > { %902 = vmatpush1.msra.mxu0 %v589_v13  ;;  %979 = vmatpush1.msra.mxu1 %v591_v14  ;;  %v525_v21 = vld [vmem:[%s5720_s21 + $0xb00] sm:$0xff]  ;;  %v527_v22 = vld [vmem:[%s5720_s21 + $0xb10] sm:$0xff]  ;;  %v494_v23 = vld [vmem:[%s5720_s21 + $0xa08] sm:$0xff] }
  0x18   : > { %903 = vmatprep.subr.mxu0 %v558_v15  ;;  %980 = vmatprep.subr.mxu1 %v560_v16  ;;  %v496_v24 = vld [vmem:[%s5720_s21 + $0xa18] sm:$0xff]  ;;  %v493_v25 = vld [vmem:[%s5720_s21 + $0xa00] sm:$0xff]  ;;  %v495_v26 = vld [vmem:[%s5720_s21 + $0xa10] sm:$0xff] }
  0x19   : > { %904 = vmatpush1.msra.mxu0 %v557_v17  ;;  %981 = vmatpush1.msra.mxu1 %v559_v18  ;;  %v462_v27 = vld [vmem:[%s5720_s21 + $0x908] sm:$0xff]  ;;  %v464_v28 = vld [vmem:[%s5720_s21 + $0x918] sm:$0xff]  ;;  %v461_v29 = vld [vmem:[%s5720_s21 + $0x900] sm:$0xff] }
  0x1a   : > { %905 = vmatprep.subr.mxu0 %v526_v19  ;;  %982 = vmatprep.subr.mxu1 %v528_v20  ;;  %v463_v30 = vld [vmem:[%s5720_s21 + $0x910] sm:$0xff]  ;;  %v430_v31 = vld [vmem:[%s5720_s21 + $0x808] sm:$0xff]  ;;  %v432_v32 = vld [vmem:[%s5720_s21 + $0x818] sm:$0xff] }
  0x1b   : > { %906 = vmatpush1.msra.mxu0 %v525_v21  ;;  %983 = vmatpush1.msra.mxu1 %v527_v22  ;;  %v429_v33 = vld [vmem:[%s5720_s21 + $0x800] sm:$0xff]  ;;  %v431_v34 = vld [vmem:[%s5720_s21 + $0x810] sm:$0xff]  ;;  %v398_v35 = vld [vmem:[%s5720_s21 + $0x708] sm:$0xff] }
  0x1c   : > { %907 = vmatprep.subr.mxu0 %v494_v23  ;;  %984 = vmatprep.subr.mxu1 %v496_v24  ;;  %v400_v36 = vld [vmem:[%s5720_s21 + $0x718] sm:$0xff]  ;;  %v397_v37 = vld [vmem:[%s5720_s21 + $0x700] sm:$0xff]  ;;  %v399_v38 = vld [vmem:[%s5720_s21 + $0x710] sm:$0xff] }
  0x1d   : > { %908 = vmatpush1.msra.mxu0 %v493_v25  ;;  %985 = vmatpush1.msra.mxu1 %v495_v26  ;;  %v366_v39 = vld [vmem:[%s5720_s21 + $0x608] sm:$0xff]  ;;  %v368_v40 = vld [vmem:[%s5720_s21 + $0x618] sm:$0xff]  ;;  %v365_v41 = vld [vmem:[%s5720_s21 + $0x600] sm:$0xff] }
  0x1e   : > { %909 = vmatprep.subr.mxu0 %v462_v27  ;;  %986 = vmatprep.subr.mxu1 %v464_v28  ;;  %v367_v42 = vld [vmem:[%s5720_s21 + $0x610] sm:$0xff]  ;;  %v334_v43 = vld [vmem:[%s5720_s21 + $0x508] sm:$0xff]  ;;  %v336_v44 = vld [vmem:[%s5720_s21 + $0x518] sm:$0xff] }
  0x1f   : > { %910 = vmatpush1.msra.mxu0 %v461_v29  ;;  %987 = vmatpush1.msra.mxu1 %v463_v30  ;;  %v333_v45 = vld [vmem:[%s5720_s21 + $0x500] sm:$0xff]  ;;  %v335_v46 = vld [vmem:[%s5720_s21 + $0x510] sm:$0xff]  ;;  %v302_v47 = vld [vmem:[%s5720_s21 + $0x408] sm:$0xff] }
  0x20   : > { %911 = vmatprep.subr.mxu0 %v430_v31  ;;  %988 = vmatprep.subr.mxu1 %v432_v32  ;;  %v304_v48 = vld [vmem:[%s5720_s21 + $0x418] sm:$0xff]  ;;  %v301_v49 = vld [vmem:[%s5720_s21 + $0x400] sm:$0xff]  ;;  %v303_v50 = vld [vmem:[%s5720_s21 + $0x410] sm:$0xff] }
  0x21   : > { %912 = vmatpush1.msra.mxu0 %v429_v33  ;;  %989 = vmatpush1.msra.mxu1 %v431_v34  ;;  %v270_v51 = vld [vmem:[%s5720_s21 + $0x308] sm:$0xff]  ;;  %v272_v52 = vld [vmem:[%s5720_s21 + $0x318] sm:$0xff]  ;;  %v269_v53 = vld [vmem:[%s5720_s21 + $0x300] sm:$0xff] }
  0x22   : > { %913 = vmatprep.subr.mxu0 %v398_v35  ;;  %990 = vmatprep.subr.mxu1 %v400_v36  ;;  %v271_v54 = vld [vmem:[%s5720_s21 + $0x310] sm:$0xff]  ;;  %v238_v55 = vld [vmem:[%s5720_s21 + $0x208] sm:$0xff]  ;;  %v240_v56 = vld [vmem:[%s5720_s21 + $0x218] sm:$0xff] }
  0x23   : > { %914 = vmatpush1.msra.mxu0 %v397_v37  ;;  %991 = vmatpush1.msra.mxu1 %v399_v38  ;;  %v237_v57 = vld [vmem:[%s5720_s21 + $0x200] sm:$0xff]  ;;  %v239_v58 = vld [vmem:[%s5720_s21 + $0x210] sm:$0xff]  ;;  %v206_v59 = vld [vmem:[%s5720_s21 + $0x108] sm:$0xff] }
  0x24   : > { %915 = vmatprep.subr.mxu0 %v366_v39  ;;  %992 = vmatprep.subr.mxu1 %v368_v40  ;;  %v208_v60 = vld [vmem:[%s5720_s21 + $0x118] sm:$0xff]  ;;  %v205_v61 = vld [vmem:[%s5720_s21 + $0x100] sm:$0xff]  ;;  %v207_v62 = vld [vmem:[%s5720_s21 + $0x110] sm:$0xff] }
  0x25   : > { %916 = vmatpush1.msra.mxu0 %v365_v41  ;;  %993 = vmatpush1.msra.mxu1 %v367_v42  ;;  %v174_v63 = vld [vmem:[%s5720_s21 + $0x8] sm:$0xff]  ;;  %v176_v1 = vld [vmem:[%s5720_s21 + $0x18] sm:$0xff]  ;;  %v173_v2 = vld [vmem:[%s5720_s21] sm:$0xff] }
  0x26   : > { %917 = vmatprep.subr.mxu0 %v334_v43  ;;  %994 = vmatprep.subr.mxu1 %v336_v44  ;;  %v175_v3 = vld [vmem:[%s5720_s21 + $0x10] sm:$0xff]  ;;  %v750_v4 = vld [vmem:[%s5720_s21 + $0x1208] sm:$0x7]  ;;  %v752_v5 = vld [vmem:[%s5720_s21 + $0x1218] sm:$0x7] }
  0x27   : > { %918 = vmatpush1.msra.mxu0 %v333_v45  ;;  %995 = vmatpush1.msra.mxu1 %v335_v46  ;;  %v749_v6 = vld [vmem:[%s5720_s21 + $0x1200] sm:$0x7]  ;;  %v751_v7 = vld [vmem:[%s5720_s21 + $0x1210] sm:$0x7]  ;;  %v718_v8 = vld [vmem:[%s5720_s21 + $0x1108] sm:$0xff] }
  0x28   : > { %919 = vmatprep.subr.mxu0 %v302_v47  ;;  %996 = vmatprep.subr.mxu1 %v304_v48  ;;  %v720_v9 = vld [vmem:[%s5720_s21 + $0x1118] sm:$0xff]  ;;  %v717_v10 = vld [vmem:[%s5720_s21 + $0x1100] sm:$0xff]  ;;  %v719_v11 = vld [vmem:[%s5720_s21 + $0x1110] sm:$0xff] }
  0x29   : > { %920 = vmatpush1.msra.mxu0 %v301_v49  ;;  %997 = vmatpush1.msra.mxu1 %v303_v50  ;;  %v686_v12 = vld [vmem:[%s5720_s21 + $0x1008] sm:$0xff]  ;;  %v688_v13 = vld [vmem:[%s5720_s21 + $0x1018] sm:$0xff]  ;;  %v685_v14 = vld [vmem:[%s5720_s21 + $0x1000] sm:$0xff] }
  0x2a   : > { %921 = vmatprep.subr.mxu0 %v270_v51  ;;  %998 = vmatprep.subr.mxu1 %v272_v52  ;;  %v687_v15 = vld [vmem:[%s5720_s21 + $0x1010] sm:$0xff]  ;;  %v5805_v16 = vld [vmem:[%s9745_s1] sm:$0xff]  ;;  %v658_v17 = vld [vmem:[%s5720_s21 + $0xf28] sm:$0xff] }
  0x2b   : > { %922 = vmatpush1.msra.mxu0 %v269_v53  ;;  %999 = vmatpush1.msra.mxu1 %v271_v54  ;;  %v660_v18 = vld [vmem:[%s5720_s21 + $0xf38] sm:$0xff]  ;;  %v657_v19 = vld [vmem:[%s5720_s21 + $0xf20] sm:$0xff]  ;;  %v659_v20 = vld [vmem:[%s5720_s21 + $0xf30] sm:$0xff] }
  0x2c   : > { %923 = vmatprep.subr.mxu0 %v238_v55  ;;  %1000 = vmatprep.subr.mxu1 %v240_v56  ;;  %v626_v21 = vld [vmem:[%s5720_s21 + $0xe28] sm:$0xff]  ;;  %v628_v22 = vld [vmem:[%s5720_s21 + $0xe38] sm:$0xff]  ;;  %v625_v23 = vld [vmem:[%s5720_s21 + $0xe20] sm:$0xff] }
  0x2d   : > { %924 = vmatpush1.msra.mxu0 %v237_v57  ;;  %1001 = vmatpush1.msra.mxu1 %v239_v58  ;;  %v627_v24 = vld [vmem:[%s5720_s21 + $0xe30] sm:$0xff]  ;;  %v594_v25 = vld [vmem:[%s5720_s21 + $0xd28] sm:$0xff]  ;;  %v596_v26 = vld [vmem:[%s5720_s21 + $0xd38] sm:$0xff] }
  0x2e   : > { %925 = vmatprep.subr.mxu0 %v206_v59  ;;  %1002 = vmatprep.subr.mxu1 %v208_v60  ;;  %v593_v27 = vld [vmem:[%s5720_s21 + $0xd20] sm:$0xff]  ;;  %v595_v28 = vld [vmem:[%s5720_s21 + $0xd30] sm:$0xff]  ;;  %v562_v29 = vld [vmem:[%s5720_s21 + $0xc28] sm:$0xff] }
  0x2f   : > { %926 = vmatpush1.msra.mxu0 %v205_v61  ;;  %1003 = vmatpush1.msra.mxu1 %v207_v62  ;;  %v564_v30 = vld [vmem:[%s5720_s21 + $0xc38] sm:$0xff]  ;;  %v561_v31 = vld [vmem:[%s5720_s21 + $0xc20] sm:$0xff]  ;;  %v563_v32 = vld [vmem:[%s5720_s21 + $0xc30] sm:$0xff] }
  0x30   : > { %927 = vmatprep.subr.mxu0 %v174_v63  ;;  %1004 = vmatprep.subr.mxu1 %v176_v1  ;;  %v530_v33 = vld [vmem:[%s5720_s21 + $0xb28] sm:$0xff]  ;;  %v532_v34 = vld [vmem:[%s5720_s21 + $0xb38] sm:$0xff]  ;;  %v529_v35 = vld [vmem:[%s5720_s21 + $0xb20] sm:$0xff] }
  0x31   : > { %928 = vmatpush1.msra.mxu0 %v173_v2  ;;  %1005 = vmatpush1.msra.mxu1 %v175_v3  ;;  %v531_v36 = vld [vmem:[%s5720_s21 + $0xb30] sm:$0xff]  ;;  %v498_v37 = vld [vmem:[%s5720_s21 + $0xa28] sm:$0xff]  ;;  %v500_v38 = vld [vmem:[%s5720_s21 + $0xa38] sm:$0xff] }
  0x32   : > { %5566 = vmatprep.subr.msk.mxu0 %vm800_vm1, %v750_v4  ;;  %5570 = vmatprep.subr.msk.mxu1 %vm800_vm1, %v752_v5  ;;  %v497_v39 = vld [vmem:[%s5720_s21 + $0xa20] sm:$0xff]  ;;  %v499_v40 = vld [vmem:[%s5720_s21 + $0xa30] sm:$0xff]  ;;  %v466_v41 = vld [vmem:[%s5720_s21 + $0x928] sm:$0xff] }
  0x33   : > { %5567 = vmatpush2.msk.msra.mxu0 %vm800_vm1, %v749_v6  ;;  %5571 = vmatpush2.msk.msra.mxu1 %vm800_vm1, %v751_v7  ;;  %v468_v42 = vld [vmem:[%s5720_s21 + $0x938] sm:$0xff]  ;;  %v465_v43 = vld [vmem:[%s5720_s21 + $0x920] sm:$0xff]  ;;  %v467_v44 = vld [vmem:[%s5720_s21 + $0x930] sm:$0xff] }
  0x34   : > { %957 = vmatprep.subr.mxu0 %v718_v8  ;;  %1034 = vmatprep.subr.mxu1 %v720_v9  ;;  %v434_v45 = vld [vmem:[%s5720_s21 + $0x828] sm:$0xff]  ;;  %v436_v46 = vld [vmem:[%s5720_s21 + $0x838] sm:$0xff]  ;;  %v433_v47 = vld [vmem:[%s5720_s21 + $0x820] sm:$0xff] }
  0x35   : > { %958 = vmatpush2.msra.mxu0 %v717_v10  ;;  %1035 = vmatpush2.msra.mxu1 %v719_v11  ;;  %v435_v48 = vld [vmem:[%s5720_s21 + $0x830] sm:$0xff]  ;;  %v402_v49 = vld [vmem:[%s5720_s21 + $0x728] sm:$0xff]  ;;  %v404_v50 = vld [vmem:[%s5720_s21 + $0x738] sm:$0xff] }
  0x36   : > { %959 = vmatprep.subr.mxu0 %v686_v12  ;;  %1036 = vmatprep.subr.mxu1 %v688_v13  ;;  %v401_v51 = vld [vmem:[%s5720_s21 + $0x720] sm:$0xff]  ;;  %v403_v52 = vld [vmem:[%s5720_s21 + $0x730] sm:$0xff]  ;;  %v370_v53 = vld [vmem:[%s5720_s21 + $0x628] sm:$0xff] }
  0x37   : > { %960 = vmatpush2.msra.mxu0 %v685_v14  ;;  %1037 = vmatpush2.msra.mxu1 %v687_v15  ;;  %v372_v54 = vld [vmem:[%s5720_s21 + $0x638] sm:$0xff]  ;;  %v369_v55 = vld [vmem:[%s5720_s21 + $0x620] sm:$0xff]  ;;  %v371_v56 = vld [vmem:[%s5720_s21 + $0x630] sm:$0xff] }
  0x38   : > { %962 = vmatmul.mubr.f32.vlgmr.msra.gmra.mxu0 %v5805_v16  ;;  %1039 = vmatmul.mubr.f32.vlgmr.msra.gmra.mxu1 %v5805_v16  ;;  %v338_v57 = vld [vmem:[%s5720_s21 + $0x528] sm:$0xff]  ;;  %v340_v58 = vld [vmem:[%s5720_s21 + $0x538] sm:$0xff]  ;;  %v337_v59 = vld [vmem:[%s5720_s21 + $0x520] sm:$0xff] }
  0x39   : > { %1051 = vmatprep.subr.mxu0 %v658_v17  ;;  %1128 = vmatprep.subr.mxu1 %v660_v18  ;;  %v339_v60 = vld [vmem:[%s5720_s21 + $0x530] sm:$0xff]  ;;  %v306_v61 = vld [vmem:[%s5720_s21 + $0x428] sm:$0xff]  ;;  %v308_v62 = vld [vmem:[%s5720_s21 + $0x438] sm:$0xff] }
  0x3a   : > { %1052 = vmatpush1.msra.mxu0 %v657_v19  ;;  %1129 = vmatpush1.msra.mxu1 %v659_v20  ;;  %v305_v63 = vld [vmem:[%s5720_s21 + $0x420] sm:$0xff]  ;;  %v307_v1 = vld [vmem:[%s5720_s21 + $0x430] sm:$0xff]  ;;  %v274_v2 = vld [vmem:[%s5720_s21 + $0x328] sm:$0xff] }
  0x3b   : > { %1053 = vmatprep.subr.mxu0 %v626_v21  ;;  %1130 = vmatprep.subr.mxu1 %v628_v22  ;;  %v276_v3 = vld [vmem:[%s5720_s21 + $0x338] sm:$0xff]  ;;  %v273_v4 = vld [vmem:[%s5720_s21 + $0x320] sm:$0xff]  ;;  %v275_v5 = vld [vmem:[%s5720_s21 + $0x330] sm:$0xff] }
  0x3c   : > { %1054 = vmatpush1.msra.mxu0 %v625_v23  ;;  %1131 = vmatpush1.msra.mxu1 %v627_v24  ;;  %v242_v6 = vld [vmem:[%s5720_s21 + $0x228] sm:$0xff]  ;;  %v244_v7 = vld [vmem:[%s5720_s21 + $0x238] sm:$0xff]  ;;  %v241_v8 = vld [vmem:[%s5720_s21 + $0x220] sm:$0xff] }
  0x3d   : > { %1055 = vmatprep.subr.mxu0 %v594_v25  ;;  %1132 = vmatprep.subr.mxu1 %v596_v26  ;;  %v243_v9 = vld [vmem:[%s5720_s21 + $0x230] sm:$0xff]  ;;  %v210_v10 = vld [vmem:[%s5720_s21 + $0x128] sm:$0xff]  ;;  %v212_v11 = vld [vmem:[%s5720_s21 + $0x138] sm:$0xff] }
  0x3e   : > { %1056 = vmatpush1.msra.mxu0 %v593_v27  ;;  %1133 = vmatpush1.msra.mxu1 %v595_v28  ;;  %v209_v12 = vld [vmem:[%s5720_s21 + $0x120] sm:$0xff]  ;;  %v211_v13 = vld [vmem:[%s5720_s21 + $0x130] sm:$0xff]  ;;  %v178_v14 = vld [vmem:[%s5720_s21 + $0x28] sm:$0xff] }
  0x3f   : > { %1057 = vmatprep.subr.mxu0 %v562_v29  ;;  %1134 = vmatprep.subr.mxu1 %v564_v30  ;;  %v180_v15 = vld [vmem:[%s5720_s21 + $0x38] sm:$0xff]  ;;  %v177_v18 = vld [vmem:[%s5720_s21 + $0x20] sm:$0xff]  ;;  %v179_v19 = vld [vmem:[%s5720_s21 + $0x30] sm:$0xff] }
  0x40   : > { %1058 = vmatpush1.msra.mxu0 %v561_v31  ;;  %1135 = vmatpush1.msra.mxu1 %v563_v32  ;;  %v5874_v17 = vld [vmem:[%s9745_s1 + $0x18] sm:$0x1]  ;;  %v5881_v20 = vld [vmem:[%s9745_s1 + $0x10] sm:$0x1]  ;;  %v754_v21 = vld [vmem:[%s5720_s21 + $0x1228] sm:$0x7] }
  0x41   : > { %1059 = vmatprep.subr.mxu0 %v530_v33  ;;  %1136 = vmatprep.subr.mxu1 %v532_v34  ;;  %v756_v22 = vld [vmem:[%s5720_s21 + $0x1238] sm:$0x7]  ;;  %v753_v23 = vld [vmem:[%s5720_s21 + $0x1220] sm:$0x7]  ;;  %v755_v24 = vld [vmem:[%s5720_s21 + $0x1230] sm:$0x7] }
  0x42   : > { %1060 = vmatpush1.msra.mxu0 %v529_v35  ;;  %1137 = vmatpush1.msra.mxu1 %v531_v36  ;;  %v722_v25 = vld [vmem:[%s5720_s21 + $0x1128] sm:$0xff]  ;;  %v724_v26 = vld [vmem:[%s5720_s21 + $0x1138] sm:$0xff]  ;;  %v721_v27 = vld [vmem:[%s5720_s21 + $0x1120] sm:$0xff] }
  0x43   : > { %1061 = vmatprep.subr.mxu0 %v498_v37  ;;  %1138 = vmatprep.subr.mxu1 %v500_v38  ;;  %v723_v28 = vld [vmem:[%s5720_s21 + $0x1130] sm:$0xff]  ;;  %v690_v29 = vld [vmem:[%s5720_s21 + $0x1028] sm:$0xff]  ;;  %v692_v30 = vld [vmem:[%s5720_s21 + $0x1038] sm:$0xff] }
  0x44   : > { %1062 = vmatpush1.msra.mxu0 %v497_v39  ;;  %1139 = vmatpush1.msra.mxu1 %v499_v40  ;;  %v689_v31 = vld [vmem:[%s5720_s21 + $0x1020] sm:$0xff]  ;;  %v691_v32 = vld [vmem:[%s5720_s21 + $0x1030] sm:$0xff]  ;;  %v662_v33 = vld [vmem:[%s5720_s21 + $0xf48] sm:$0xff] }
  0x45   : > { %1063 = vmatprep.subr.mxu0 %v466_v41  ;;  %1140 = vmatprep.subr.mxu1 %v468_v42  ;;  %v664_v34 = vld [vmem:[%s5720_s21 + $0xf58] sm:$0xff]  ;;  %v661_v35 = vld [vmem:[%s5720_s21 + $0xf40] sm:$0xff]  ;;  %v663_v36 = vld [vmem:[%s5720_s21 + $0xf50] sm:$0xff] }
  0x46   : > { %1064 = vmatpush1.msra.mxu0 %v465_v43  ;;  %1141 = vmatpush1.msra.mxu1 %v467_v44  ;;  %v630_v37 = vld [vmem:[%s5720_s21 + $0xe48] sm:$0xff]  ;;  %v632_v38 = vld [vmem:[%s5720_s21 + $0xe58] sm:$0xff]  ;;  %v629_v39 = vld [vmem:[%s5720_s21 + $0xe40] sm:$0xff] }
  0x47   : > { %1065 = vmatprep.subr.mxu0 %v434_v45  ;;  %1142 = vmatprep.subr.mxu1 %v436_v46  ;;  %v631_v40 = vld [vmem:[%s5720_s21 + $0xe50] sm:$0xff]  ;;  %v598_v41 = vld [vmem:[%s5720_s21 + $0xd48] sm:$0xff]  ;;  %v600_v42 = vld [vmem:[%s5720_s21 + $0xd58] sm:$0xff] }
  0x48   : > { %1066 = vmatpush1.msra.mxu0 %v433_v47  ;;  %1143 = vmatpush1.msra.mxu1 %v435_v48  ;;  %v597_v43 = vld [vmem:[%s5720_s21 + $0xd40] sm:$0xff]  ;;  %v599_v44 = vld [vmem:[%s5720_s21 + $0xd50] sm:$0xff]  ;;  %v566_v45 = vld [vmem:[%s5720_s21 + $0xc48] sm:$0xff] }
  0x49   : > { %1067 = vmatprep.subr.mxu0 %v402_v49  ;;  %1144 = vmatprep.subr.mxu1 %v404_v50  ;;  %v568_v46 = vld [vmem:[%s5720_s21 + $0xc58] sm:$0xff]  ;;  %v565_v47 = vld [vmem:[%s5720_s21 + $0xc40] sm:$0xff]  ;;  %v567_v48 = vld [vmem:[%s5720_s21 + $0xc50] sm:$0xff] }
  0x4a   : > { %1068 = vmatpush1.msra.mxu0 %v401_v51  ;;  %1145 = vmatpush1.msra.mxu1 %v403_v52  ;;  %v534_v49 = vld [vmem:[%s5720_s21 + $0xb48] sm:$0xff]  ;;  %v536_v50 = vld [vmem:[%s5720_s21 + $0xb58] sm:$0xff]  ;;  %v533_v51 = vld [vmem:[%s5720_s21 + $0xb40] sm:$0xff] }
  0x4b   : > { %1069 = vmatprep.subr.mxu0 %v370_v53  ;;  %1146 = vmatprep.subr.mxu1 %v372_v54  ;;  %v535_v52 = vld [vmem:[%s5720_s21 + $0xb50] sm:$0xff]  ;;  %v502_v53 = vld [vmem:[%s5720_s21 + $0xa48] sm:$0xff]  ;;  %v504_v54 = vld [vmem:[%s5720_s21 + $0xa58] sm:$0xff] }
  0x4c   : > { %1070 = vmatpush1.msra.mxu0 %v369_v55  ;;  %1147 = vmatpush1.msra.mxu1 %v371_v56  ;;  %v501_v55 = vld [vmem:[%s5720_s21 + $0xa40] sm:$0xff]  ;;  %v503_v56 = vld [vmem:[%s5720_s21 + $0xa50] sm:$0xff] }
  0x4d   : > { %1071 = vmatprep.subr.mxu0 %v338_v57  ;;  %1148 = vmatprep.subr.mxu1 %v340_v58  ;;  %v470_v57 = vld [vmem:[%s5720_s21 + $0x948] sm:$0xff]  ;;  %v472_v58 = vld [vmem:[%s5720_s21 + $0x958] sm:$0xff] }
  0x4e   : > { %1072 = vmatpush1.msra.mxu0 %v337_v59  ;;  %1149 = vmatpush1.msra.mxu1 %v339_v60  ;;  %v469_v59 = vld [vmem:[%s5720_s21 + $0x940] sm:$0xff]  ;;  %v471_v60 = vld [vmem:[%s5720_s21 + $0x950] sm:$0xff] }
  0x4f   : > { %1073 = vmatprep.subr.mxu0 %v306_v61  ;;  %1150 = vmatprep.subr.mxu1 %v308_v62  ;;  %v438_v61 = vld [vmem:[%s5720_s21 + $0x848] sm:$0xff]  ;;  %v440_v62 = vld [vmem:[%s5720_s21 + $0x858] sm:$0xff] }
  0x50   : > { %1074 = vmatpush1.msra.mxu0 %v305_v63  ;;  %1151 = vmatpush1.msra.mxu1 %v307_v1  ;;  %v437_v63 = vld [vmem:[%s5720_s21 + $0x840] sm:$0xff]  ;;  %v439_v1 = vld [vmem:[%s5720_s21 + $0x850] sm:$0xff] }
  0x51   : > { %1075 = vmatprep.subr.mxu0 %v274_v2  ;;  %1152 = vmatprep.subr.mxu1 %v276_v3  ;;  %v406_v2 = vld [vmem:[%s5720_s21 + $0x748] sm:$0xff]  ;;  %v408_v3 = vld [vmem:[%s5720_s21 + $0x758] sm:$0xff] }
  0x52   : > { %1076 = vmatpush1.msra.mxu0 %v273_v4  ;;  %1153 = vmatpush1.msra.mxu1 %v275_v5  ;;  %v405_v4 = vld [vmem:[%s5720_s21 + $0x740] sm:$0xff]  ;;  %v407_v5 = vld [vmem:[%s5720_s21 + $0x750] sm:$0xff] }
  0x53   : > { %1077 = vmatprep.subr.mxu0 %v242_v6  ;;  %1154 = vmatprep.subr.mxu1 %v244_v7  ;;  %v374_v6 = vld [vmem:[%s5720_s21 + $0x648] sm:$0xff]  ;;  %v376_v7 = vld [vmem:[%s5720_s21 + $0x658] sm:$0xff] }
  0x54   : > { %1078 = vmatpush1.msra.mxu0 %v241_v8  ;;  %1155 = vmatpush1.msra.mxu1 %v243_v9  ;;  %v373_v8 = vld [vmem:[%s5720_s21 + $0x640] sm:$0xff]  ;;  %v375_v9 = vld [vmem:[%s5720_s21 + $0x650] sm:$0xff] }
  0x55   : > { %1079 = vmatprep.subr.mxu0 %v210_v10  ;;  %1156 = vmatprep.subr.mxu1 %v212_v11  ;;  %v342_v10 = vld [vmem:[%s5720_s21 + $0x548] sm:$0xff]  ;;  %v344_v11 = vld [vmem:[%s5720_s21 + $0x558] sm:$0xff] }
  0x56   : > { %1080 = vmatpush1.msra.mxu0 %v209_v12  ;;  %1157 = vmatpush1.msra.mxu1 %v211_v13  ;;  %v341_v12 = vld [vmem:[%s5720_s21 + $0x540] sm:$0xff]  ;;  %v343_v13 = vld [vmem:[%s5720_s21 + $0x550] sm:$0xff] }
  0x57   : > { %1081 = vmatprep.subr.mxu0 %v178_v14  ;;  %1158 = vmatprep.subr.mxu1 %v180_v15  ;;  %v310_v14 = vld [vmem:[%s5720_s21 + $0x448] sm:$0xff]  ;;  %v312_v15 = vld [vmem:[%s5720_s21 + $0x458] sm:$0xff] }
  0x58   : > { %5569 = vmatprep.mubr.msk.f32.mxu0 %vm793_vm0, %v5874_v17  ;;  %5573 = vmatprep.mubr.msk.f32.mxu1 %vm793_vm0, %v5874_v17 }
  0x59   : > { %1082 = vmatpush1.msra.mxu0 %v177_v18  ;;  %1159 = vmatpush1.msra.mxu1 %v179_v19  ;;  %v309_v18 = vld [vmem:[%s5720_s21 + $0x440] sm:$0xff]  ;;  %v311_v19 = vld [vmem:[%s5720_s21 + $0x450] sm:$0xff] }
  0x5a   : > { %968 = vmatmul.mubr.f32.gmra.mxu0 %v5881_v20  ;;  %1045 = vmatmul.mubr.f32.gmra.mxu1 %v5881_v20 }
  0x5b   : > { %5574 = vmatprep.subr.msk.mxu0 %vm800_vm1, %v754_v21  ;;  %5578 = vmatprep.subr.msk.mxu1 %vm800_vm1, %v756_v22  ;;  %v278_v21 = vld [vmem:[%s5720_s21 + $0x348] sm:$0xff]  ;;  %v280_v22 = vld [vmem:[%s5720_s21 + $0x358] sm:$0xff] }
  0x5c   : > { %5575 = vmatpush2.msk.msra.mxu0 %vm800_vm1, %v753_v23  ;;  %5579 = vmatpush2.msk.msra.mxu1 %vm800_vm1, %v755_v24  ;;  %v277_v23 = vld [vmem:[%s5720_s21 + $0x340] sm:$0xff]  ;;  %v279_v24 = vld [vmem:[%s5720_s21 + $0x350] sm:$0xff] }
  0x5d   : > { %1111 = vmatprep.subr.mxu0 %v722_v25  ;;  %1188 = vmatprep.subr.mxu1 %v724_v26  ;;  %v246_v25 = vld [vmem:[%s5720_s21 + $0x248] sm:$0xff]  ;;  %v248_v26 = vld [vmem:[%s5720_s21 + $0x258] sm:$0xff] }
  0x5e   : > { %1112 = vmatpush2.msra.mxu0 %v721_v27  ;;  %1189 = vmatpush2.msra.mxu1 %v723_v28  ;;  %v245_v27 = vld [vmem:[%s5720_s21 + $0x240] sm:$0xff]  ;;  %v247_v28 = vld [vmem:[%s5720_s21 + $0x250] sm:$0xff] }
  0x5f   : > { %1113 = vmatprep.subr.mxu0 %v690_v29  ;;  %1190 = vmatprep.subr.mxu1 %v692_v30  ;;  %v214_v29 = vld [vmem:[%s5720_s21 + $0x148] sm:$0xff]  ;;  %v216_v30 = vld [vmem:[%s5720_s21 + $0x158] sm:$0xff] }
  0x60   : > { %1114 = vmatpush2.msra.mxu0 %v689_v31  ;;  %5576 = vmatprep.mubr.msk.f32.mxu0 %vm793_vm0, %v5705_v0  ;;  %v213_v31 = vld [vmem:[%s5720_s21 + $0x140] sm:$0xff] }
  0x61   : > { %1191 = vmatpush2.msra.mxu1 %v691_v32  ;;  %5580 = vmatprep.mubr.msk.f32.mxu1 %vm793_vm0, %v5705_v0  ;;  %v215_v32 = vld [vmem:[%s5720_s21 + $0x150] sm:$0xff] }
  0x62   : > { %1116 = vmatmul.mubr.f32.vlgmr.msra.gmra.mxu0 %v5805_v16  ;;  %1193 = vmatmul.mubr.f32.vlgmr.msra.gmra.mxu1 %v5805_v16 }
  0x63   : > { %1205 = vmatprep.subr.mxu0 %v662_v33  ;;  %1282 = vmatprep.subr.mxu1 %v664_v34  ;;  %v182_v33 = vld [vmem:[%s5720_s21 + $0x48] sm:$0xff]  ;;  %v184_v34 = vld [vmem:[%s5720_s21 + $0x58] sm:$0xff] }
  0x64   : > { %1206 = vmatpush1.msra.mxu0 %v661_v35  ;;  %1283 = vmatpush1.msra.mxu1 %v663_v36  ;;  %v181_v35 = vld [vmem:[%s5720_s21 + $0x40] sm:$0xff]  ;;  %v183_v36 = vld [vmem:[%s5720_s21 + $0x50] sm:$0xff] }
  0x65   : > { %1207 = vmatprep.subr.mxu0 %v630_v37  ;;  %1284 = vmatprep.subr.mxu1 %v632_v38  ;;  %v758_v37 = vld [vmem:[%s5720_s21 + $0x1248] sm:$0x7]  ;;  %v760_v38 = vld [vmem:[%s5720_s21 + $0x1258] sm:$0x7] }
  0x66   : > { %5577 = vmatprep.mubr.msk.f32.mxu0 %vm793_vm0, %v5874_v17  ;;  %5581 = vmatprep.mubr.msk.f32.mxu1 %vm793_vm0, %v5874_v17 }
  0x67   : > { %1208 = vmatpush1.msra.mxu0 %v629_v39  ;;  %1285 = vmatpush1.msra.mxu1 %v631_v40  ;;  %v757_v39 = vld [vmem:[%s5720_s21 + $0x1240] sm:$0x7]  ;;  %v759_v40 = vld [vmem:[%s5720_s21 + $0x1250] sm:$0x7] }
  0x68   : > { %1122 = vmatmul.mubr.f32.gmra.mxu0 %v5881_v20  ;;  %1199 = vmatmul.mubr.f32.gmra.mxu1 %v5881_v20 }
  0x69   : > { %1209 = vmatprep.subr.mxu0 %v598_v41  ;;  %1286 = vmatprep.subr.mxu1 %v600_v42  ;;  %v726_v41 = vld [vmem:[%s5720_s21 + $0x1148] sm:$0xff]  ;;  %v728_v42 = vld [vmem:[%s5720_s21 + $0x1158] sm:$0xff] }
  0x6a   : > { %1210 = vmatpush1.msra.mxu0 %v597_v43  ;;  %1287 = vmatpush1.msra.mxu1 %v599_v44  ;;  %v725_v43 = vld [vmem:[%s5720_s21 + $0x1140] sm:$0xff]  ;;  %v727_v44 = vld [vmem:[%s5720_s21 + $0x1150] sm:$0xff] }
  0x6b   : > { %1211 = vmatprep.subr.mxu0 %v566_v45  ;;  %1288 = vmatprep.subr.mxu1 %v568_v46  ;;  %v694_v45 = vld [vmem:[%s5720_s21 + $0x1048] sm:$0xff]  ;;  %v696_v46 = vld [vmem:[%s5720_s21 + $0x1058] sm:$0xff] }
  0x6c   : > { %1212 = vmatpush1.msra.mxu0 %v565_v47  ;;  %1289 = vmatpush1.msra.mxu1 %v567_v48  ;;  %v693_v47 = vld [vmem:[%s5720_s21 + $0x1040] sm:$0xff]  ;;  %v695_v48 = vld [vmem:[%s5720_s21 + $0x1050] sm:$0xff] }
  0x6d   : > { %1213 = vmatprep.subr.mxu0 %v534_v49  ;;  %1290 = vmatprep.subr.mxu1 %v536_v50  ;;  %v666_v49 = vld [vmem:[%s5720_s21 + $0xf68] sm:$0xff]  ;;  %v668_v50 = vld [vmem:[%s5720_s21 + $0xf78] sm:$0xff] }
  0x6e   : > { %1214 = vmatpush1.msra.mxu0 %v533_v51  ;;  %1291 = vmatpush1.msra.mxu1 %v535_v52  ;;  %v665_v51 = vld [vmem:[%s5720_s21 + $0xf60] sm:$0xff]  ;;  %v667_v52 = vld [vmem:[%s5720_s21 + $0xf70] sm:$0xff] }
  0x6f   : > { %1215 = vmatprep.subr.mxu0 %v502_v53  ;;  %1292 = vmatprep.subr.mxu1 %v504_v54  ;;  %v634_v53 = vld [vmem:[%s5720_s21 + $0xe68] sm:$0xff]  ;;  %v636_v54 = vld [vmem:[%s5720_s21 + $0xe78] sm:$0xff] }
  0x70   : > { %1216 = vmatpush1.msra.mxu0 %v501_v55  ;;  %1293 = vmatpush1.msra.mxu1 %v503_v56  ;;  %v633_v55 = vld [vmem:[%s5720_s21 + $0xe60] sm:$0xff]  ;;  %v635_v56 = vld [vmem:[%s5720_s21 + $0xe70] sm:$0xff] }
  0x71   : > { %1217 = vmatprep.subr.mxu0 %v470_v57  ;;  %1294 = vmatprep.subr.mxu1 %v472_v58  ;;  %v604_v57 = vld [vmem:[%s5720_s21 + $0xd78] sm:$0xff]  ;;  %v601_v58 = vld [vmem:[%s5720_s21 + $0xd60] sm:$0xff] }
  0x72   : > { %1218 = vmatpush1.msra.mxu0 %v469_v59  ;;  %1295 = vmatpush1.msra.mxu1 %v471_v60  ;;  %v603_v59 = vld [vmem:[%s5720_s21 + $0xd70] sm:$0xff]  ;;  %v5667_v60 = vmov 0.0  }
  0x73   : > { %1219 = vmatprep.subr.mxu0 %v438_v61  ;;  %1296 = vmatprep.subr.mxu1 %v440_v62  ;;  %2129 = vst [vmem:[#allocation2] sm:$0xff] %v5667_v60  ;;  %2131 = vst [vmem:[#allocation2 + $0x108] sm:$0xff] %v5667_v60  ;;  %v570_v61 = vld [vmem:[%s5720_s21 + $0xc68] sm:$0xff]  ;;  %v572_v62 = vld [vmem:[%s5720_s21 + $0xc78] sm:$0xff] }
  0x74   : > { %1220 = vmatpush1.msra.mxu0 %v437_v63  ;;  %1297 = vmatpush1.msra.mxu1 %v439_v1  ;;  %2132 = vst [vmem:[#allocation2 + $0x218] sm:$0x1] %v5667_v60  ;;  %v569_v63 = vld [vmem:[%s5720_s21 + $0xc60] sm:$0xff]  ;;  %v571_v1 = vld [vmem:[%s5720_s21 + $0xc70] sm:$0xff] }
  0x75   : > { %1221 = vmatprep.subr.mxu0 %v406_v2  ;;  %1298 = vmatprep.subr.mxu1 %v408_v3  ;;  %v538_v2 = vld [vmem:[%s5720_s21 + $0xb68] sm:$0xff]  ;;  %v540_v3 = vld [vmem:[%s5720_s21 + $0xb78] sm:$0xff]  ;;  %v731_v60 = vld [vmem:[%s5720_s21 + $0x1170] sm:$0xff] }
  0x76   : > { %1222 = vmatpush1.msra.mxu0 %v405_v4  ;;  %1299 = vmatpush1.msra.mxu1 %v407_v5  ;;  %v537_v4 = vld [vmem:[%s5720_s21 + $0xb60] sm:$0xff]  ;;  %v539_v5 = vld [vmem:[%s5720_s21 + $0xb70] sm:$0xff] }
  0x77   : > { %1223 = vmatprep.subr.mxu0 %v374_v6  ;;  %1300 = vmatprep.subr.mxu1 %v376_v7  ;;  %v506_v6 = vld [vmem:[%s5720_s21 + $0xa68] sm:$0xff]  ;;  %v508_v7 = vld [vmem:[%s5720_s21 + $0xa78] sm:$0xff] }
  0x78   : > { %1224 = vmatpush1.msra.mxu0 %v373_v8  ;;  %1301 = vmatpush1.msra.mxu1 %v375_v9  ;;  %v505_v8 = vld [vmem:[%s5720_s21 + $0xa60] sm:$0xff]  ;;  %v507_v9 = vld [vmem:[%s5720_s21 + $0xa70] sm:$0xff] }
  0x79   : > { %1225 = vmatprep.subr.mxu0 %v342_v10  ;;  %1302 = vmatprep.subr.mxu1 %v344_v11  ;;  %v474_v10 = vld [vmem:[%s5720_s21 + $0x968] sm:$0xff]  ;;  %v476_v11 = vld [vmem:[%s5720_s21 + $0x978] sm:$0xff] }
  0x7a   : > { %1226 = vmatpush1.msra.mxu0 %v341_v12  ;;  %1303 = vmatpush1.msra.mxu1 %v343_v13  ;;  %v473_v12 = vld [vmem:[%s5720_s21 + $0x960] sm:$0xff]  ;;  %v475_v13 = vld [vmem:[%s5720_s21 + $0x970] sm:$0xff] }
  0x7b   : > { %1227 = vmatprep.subr.mxu0 %v310_v14  ;;  %1304 = vmatprep.subr.mxu1 %v312_v15  ;;  %v442_v14 = vld [vmem:[%s5720_s21 + $0x868] sm:$0xff]  ;;  %v444_v15 = vld [vmem:[%s5720_s21 + $0x878] sm:$0xff] }
  0x7c   : > { %1228 = vmatpush1.msra.mxu0 %v309_v18  ;;  %1305 = vmatpush1.msra.mxu1 %v311_v19  ;;  %v441_v18 = vld [vmem:[%s5720_s21 + $0x860] sm:$0xff]  ;;  %v443_v19 = vld [vmem:[%s5720_s21 + $0x870] sm:$0xff] }
  0x7d   : > { %1229 = vmatprep.subr.mxu0 %v278_v21  ;;  %1306 = vmatprep.subr.mxu1 %v280_v22  ;;  %v410_v21 = vld [vmem:[%s5720_s21 + $0x768] sm:$0xff]  ;;  %v412_v22 = vld [vmem:[%s5720_s21 + $0x778] sm:$0xff] }
  0x7e   : > { %1230 = vmatpush1.msra.mxu0 %v277_v23  ;;  %1307 = vmatpush1.msra.mxu1 %v279_v24  ;;  %v409_v23 = vld [vmem:[%s5720_s21 + $0x760] sm:$0xff]  ;;  %v411_v24 = vld [vmem:[%s5720_s21 + $0x770] sm:$0xff] }
  0x7f   : > { %1231 = vmatprep.subr.mxu0 %v246_v25  ;;  %1308 = vmatprep.subr.mxu1 %v248_v26  ;;  %v378_v25 = vld [vmem:[%s5720_s21 + $0x668] sm:$0xff]  ;;  %v380_v26 = vld [vmem:[%s5720_s21 + $0x678] sm:$0xff] }
  0x80   : > { %1232 = vmatpush1.msra.mxu0 %v245_v27  ;;  %1309 = vmatpush1.msra.mxu1 %v247_v28  ;;  %v377_v27 = vld [vmem:[%s5720_s21 + $0x660] sm:$0xff]  ;;  %v379_v28 = vld [vmem:[%s5720_s21 + $0x670] sm:$0xff] }
  0x81   : > { %1233 = vmatprep.subr.mxu0 %v214_v29  ;;  %1310 = vmatprep.subr.mxu1 %v216_v30  ;;  %v346_v29 = vld [vmem:[%s5720_s21 + $0x568] sm:$0xff]  ;;  %v348_v30 = vld [vmem:[%s5720_s21 + $0x578] sm:$0xff] }
  0x82   : > { %1234 = vmatpush1.msra.mxu0 %v213_v31  ;;  %1311 = vmatpush1.msra.mxu1 %v215_v32  ;;  %v345_v31 = vld [vmem:[%s5720_s21 + $0x560] sm:$0xff]  ;;  %v347_v32 = vld [vmem:[%s5720_s21 + $0x570] sm:$0xff] }
  0x83   : > { %1235 = vmatprep.subr.mxu0 %v182_v33  ;;  %1312 = vmatprep.subr.mxu1 %v184_v34  ;;  %v314_v33 = vld [vmem:[%s5720_s21 + $0x468] sm:$0xff]  ;;  %v316_v34 = vld [vmem:[%s5720_s21 + $0x478] sm:$0xff] }
  0x84   : > { %1236 = vmatpush1.msra.mxu0 %v181_v35  ;;  %1313 = vmatpush1.msra.mxu1 %v183_v36  ;;  %v313_v35 = vld [vmem:[%s5720_s21 + $0x460] sm:$0xff]  ;;  %v315_v36 = vld [vmem:[%s5720_s21 + $0x470] sm:$0xff] }
  0x85   : > { %5582 = vmatprep.subr.msk.mxu0 %vm800_vm1, %v758_v37  ;;  %5586 = vmatprep.subr.msk.mxu1 %vm800_vm1, %v760_v38  ;;  %v282_v37 = vld [vmem:[%s5720_s21 + $0x368] sm:$0xff]  ;;  %v284_v38 = vld [vmem:[%s5720_s21 + $0x378] sm:$0xff] }
  0x86   : > { %5583 = vmatpush2.msk.msra.mxu0 %vm800_vm1, %v757_v39  ;;  %5587 = vmatpush2.msk.msra.mxu1 %vm800_vm1, %v759_v40  ;;  %v281_v39 = vld [vmem:[%s5720_s21 + $0x360] sm:$0xff]  ;;  %v283_v40 = vld [vmem:[%s5720_s21 + $0x370] sm:$0xff] }
  0x87   : > { %1265 = vmatprep.subr.mxu0 %v726_v41  ;;  %1342 = vmatprep.subr.mxu1 %v728_v42  ;;  %v250_v41 = vld [vmem:[%s5720_s21 + $0x268] sm:$0xff]  ;;  %v252_v42 = vld [vmem:[%s5720_s21 + $0x278] sm:$0xff] }
  0x88   : > { %1266 = vmatpush2.msra.mxu0 %v725_v43  ;;  %1343 = vmatpush2.msra.mxu1 %v727_v44  ;;  %v782_v43 = vld [vmem:[%s9746_s2 + $0x8] sm:$0x1]  ;;  %v249_v44 = vld [vmem:[%s5720_s21 + $0x260] sm:$0xff] }
  0x89   : > { %1267 = vmatprep.subr.mxu0 %v694_v45  ;;  %1344 = vmatprep.subr.mxu1 %v696_v46  ;;  %v251_v45 = vld [vmem:[%s5720_s21 + $0x270] sm:$0xff]  ;;  %v218_v46 = vld [vmem:[%s5720_s21 + $0x168] sm:$0xff] }
  0x8a   : > { %1268 = vmatpush2.msra.mxu0 %v693_v47  ;;  %5584 = vmatprep.mubr.msk.f32.mxu0 %vm793_vm0, %v5705_v0  ;;  %v220_v47 = vld [vmem:[%s5720_s21 + $0x178] sm:$0xff] }
  0x8b   : > { %1345 = vmatpush2.msra.mxu1 %v695_v48  ;;  %5588 = vmatprep.mubr.msk.f32.mxu1 %vm793_vm0, %v5705_v0  ;;  %v602_v0 = vld [vmem:[%s5720_s21 + $0xd68] sm:$0xff]  ;;  %v217_v48 = vld [vmem:[%s5720_s21 + $0x160] sm:$0xff] }
  0x8c   : > { %1270 = vmatmul.mubr.f32.vlgmr.msra.gmra.mxu0 %v5805_v16  ;;  %1347 = vmatmul.mubr.f32.vlgmr.msra.gmra.mxu1 %v5805_v16 }
  0x8d   : > { %1359 = vmatprep.subr.mxu0 %v666_v49  ;;  %1436 = vmatprep.subr.mxu1 %v668_v50  ;;  %v219_v49 = vld [vmem:[%s5720_s21 + $0x170] sm:$0xff]  ;;  %v186_v50 = vld [vmem:[%s5720_s21 + $0x68] sm:$0xff] }
  0x8e   : > { %1360 = vmatpush1.msra.mxu0 %v665_v51  ;;  %1437 = vmatpush1.msra.mxu1 %v667_v52  ;;  %v188_v51 = vld [vmem:[%s5720_s21 + $0x78] sm:$0xff]  ;;  %v185_v52 = vld [vmem:[%s5720_s21 + $0x60] sm:$0xff] }
  0x8f   : > { %1361 = vmatprep.subr.mxu0 %v634_v53  ;;  %1438 = vmatprep.subr.mxu1 %v636_v54  ;;  %v187_v53 = vld [vmem:[%s5720_s21 + $0x70] sm:$0xff]  ;;  %v762_v54 = vld [vmem:[%s5720_s21 + $0x1268] sm:$0x7] }
  0x90   : > { %5585 = vmatprep.mubr.msk.f32.mxu0 %vm793_vm0, %v5874_v17  ;;  %5589 = vmatprep.mubr.msk.f32.mxu1 %vm793_vm0, %v5874_v17 }
  0x91   : > { %1362 = vmatpush1.msra.mxu0 %v633_v55  ;;  %1439 = vmatpush1.msra.mxu1 %v635_v56  ;;  %v764_v55 = vld [vmem:[%s5720_s21 + $0x1278] sm:$0x7]  ;;  %v761_v56 = vld [vmem:[%s5720_s21 + $0x1260] sm:$0x7] }
  0x92   : > { %1276 = vmatmul.mubr.f32.gmra.mxu0 %v5881_v20  ;;  %1353 = vmatmul.mubr.f32.gmra.mxu1 %v5881_v20 }
  0x93   : > { %1363 = vmatprep.subr.mxu0 %v602_v0  ;;  %1440 = vmatprep.subr.mxu1 %v604_v57  ;;  %v763_v0 = vld [vmem:[%s5720_s21 + $0x1270] sm:$0x7]  ;;  %v730_v57 = vld [vmem:[%s5720_s21 + $0x1168] sm:$0xff] }
  0x94   : > { %1364 = vmatpush1.msra.mxu0 %v601_v58  ;;  %1441 = vmatpush1.msra.mxu1 %v603_v59  ;;  %v732_v58 = vld [vmem:[%s5720_s21 + $0x1178] sm:$0xff]  ;;  %v729_v59 = vld [vmem:[%s5720_s21 + $0x1160] sm:$0xff] }
  0x95   : > { %1365 = vmatprep.subr.mxu0 %v570_v61  ;;  %1442 = vmatprep.subr.mxu1 %v572_v62  ;;  %v698_v61 = vld [vmem:[%s5720_s21 + $0x1068] sm:$0xff]  ;;  %v700_v62 = vld [vmem:[%s5720_s21 + $0x1078] sm:$0xff] }
  0x96   : > { %1366 = vmatpush1.msra.mxu0 %v569_v63  ;;  %1443 = vmatpush1.msra.mxu1 %v571_v1  ;;  %v697_v63 = vld [vmem:[%s5720_s21 + $0x1060] sm:$0xff]  ;;  %v699_v1 = vld [vmem:[%s5720_s21 + $0x1070] sm:$0xff] }
  0x97   : > { %1367 = vmatprep.subr.mxu0 %v538_v2  ;;  %1444 = vmatprep.subr.mxu1 %v540_v3  ;;  %v670_v2 = vld [vmem:[%s5720_s21 + $0xf88] sm:$0xff] }
  0x98   : > { %1368 = vmatpush1.msra.mxu0 %v537_v4  ;;  %1445 = vmatpush1.msra.mxu1 %v539_v5  ;;  %v6096_v3 = vld [vmem:[%s9745_s1 + $0x8] sm:$0xff]  ;;  %v672_v4 = vld [vmem:[%s5720_s21 + $0xf98] sm:$0xff]  ;;  %v669_v5 = vld [vmem:[%s5720_s21 + $0xf80] sm:$0xff] }
  0x99   : > { %1369 = vmatprep.subr.mxu0 %v506_v6  ;;  %1446 = vmatprep.subr.mxu1 %v508_v7  ;;  %v671_v6 = vld [vmem:[%s5720_s21 + $0xf90] sm:$0xff]  ;;  %v638_v7 = vld [vmem:[%s5720_s21 + $0xe88] sm:$0xff] }
  0x9a   : > { %1370 = vmatpush1.msra.mxu0 %v505_v8  ;;  %1447 = vmatpush1.msra.mxu1 %v507_v9  ;;  %v640_v8 = vld [vmem:[%s5720_s21 + $0xe98] sm:$0xff]  ;;  %v637_v9 = vld [vmem:[%s5720_s21 + $0xe80] sm:$0xff] }
  0x9b   : > { %1371 = vmatprep.subr.mxu0 %v474_v10  ;;  %1448 = vmatprep.subr.mxu1 %v476_v11  ;;  %v639_v10 = vld [vmem:[%s5720_s21 + $0xe90] sm:$0xff]  ;;  %v606_v11 = vld [vmem:[%s5720_s21 + $0xd88] sm:$0xff] }
  0x9c   : > { %1372 = vmatpush1.msra.mxu0 %v473_v12  ;;  %1449 = vmatpush1.msra.mxu1 %v475_v13  ;;  %v605_v12 = vld [vmem:[%s5720_s21 + $0xd80] sm:$0xff]  ;;  %v607_v13 = vld [vmem:[%s5720_s21 + $0xd90] sm:$0xff] }
  0x9d   : > { %1373 = vmatprep.subr.mxu0 %v442_v14  ;;  %1450 = vmatprep.subr.mxu1 %v444_v15  ;;  %v574_v14 = vld [vmem:[%s5720_s21 + $0xc88] sm:$0xff]  ;;  %v576_v15 = vld [vmem:[%s5720_s21 + $0xc98] sm:$0xff] }
  0x9e   : > { %1374 = vmatpush1.msra.mxu0 %v441_v18  ;;  %1451 = vmatpush1.msra.mxu1 %v443_v19  ;;  %v573_v18 = vld [vmem:[%s5720_s21 + $0xc80] sm:$0xff]  ;;  %v542_v19 = vld [vmem:[%s5720_s21 + $0xb88] sm:$0xff] }
  0x9f   : > { %1375 = vmatprep.subr.mxu0 %v410_v21  ;;  %1452 = vmatprep.subr.mxu1 %v412_v22  ;;  %v544_v21 = vld [vmem:[%s5720_s21 + $0xb98] sm:$0xff]  ;;  %v541_v22 = vld [vmem:[%s5720_s21 + $0xb80] sm:$0xff] }
  0xa0   : > { %1376 = vmatpush1.msra.mxu0 %v409_v23  ;;  %1453 = vmatpush1.msra.mxu1 %v411_v24  ;;  %v510_v23 = vld [vmem:[%s5720_s21 + $0xa88] sm:$0xff]  ;;  %v512_v24 = vld [vmem:[%s5720_s21 + $0xa98] sm:$0xff] }
  0xa1   : > { %1377 = vmatprep.subr.mxu0 %v378_v25  ;;  %1454 = vmatprep.subr.mxu1 %v380_v26  ;;  %v509_v25 = vld [vmem:[%s5720_s21 + $0xa80] sm:$0xff]  ;;  %v511_v26 = vld [vmem:[%s5720_s21 + $0xa90] sm:$0xff] }
  0xa2   : > { %1378 = vmatpush1.msra.mxu0 %v377_v27  ;;  %1455 = vmatpush1.msra.mxu1 %v379_v28  ;;  %v478_v27 = vld [vmem:[%s5720_s21 + $0x988] sm:$0xff]  ;;  %v480_v28 = vld [vmem:[%s5720_s21 + $0x998] sm:$0xff] }
  0xa3   : > { %1379 = vmatprep.subr.mxu0 %v346_v29  ;;  %1456 = vmatprep.subr.mxu1 %v348_v30  ;;  %v477_v29 = vld [vmem:[%s5720_s21 + $0x980] sm:$0xff]  ;;  %v479_v30 = vld [vmem:[%s5720_s21 + $0x990] sm:$0xff] }
  0xa4   : > { %1380 = vmatpush1.msra.mxu0 %v345_v31  ;;  %1457 = vmatpush1.msra.mxu1 %v347_v32  ;;  %v446_v31 = vld [vmem:[%s5720_s21 + $0x888] sm:$0xff]  ;;  %v448_v32 = vld [vmem:[%s5720_s21 + $0x898] sm:$0xff] }
  0xa5   : > { %1381 = vmatprep.subr.mxu0 %v314_v33  ;;  %1458 = vmatprep.subr.mxu1 %v316_v34  ;;  %v445_v33 = vld [vmem:[%s5720_s21 + $0x880] sm:$0xff]  ;;  %v447_v34 = vld [vmem:[%s5720_s21 + $0x890] sm:$0xff] }
  0xa6   : > { %1382 = vmatpush1.msra.mxu0 %v313_v35  ;;  %1459 = vmatpush1.msra.mxu1 %v315_v36  ;;  %v414_v35 = vld [vmem:[%s5720_s21 + $0x788] sm:$0xff]  ;;  %v416_v36 = vld [vmem:[%s5720_s21 + $0x798] sm:$0xff] }
  0xa7   : > { %1383 = vmatprep.subr.mxu0 %v282_v37  ;;  %1460 = vmatprep.subr.mxu1 %v284_v38  ;;  %v413_v37 = vld [vmem:[%s5720_s21 + $0x780] sm:$0xff]  ;;  %v415_v38 = vld [vmem:[%s5720_s21 + $0x790] sm:$0xff] }
  0xa8   : > { %1384 = vmatpush1.msra.mxu0 %v281_v39  ;;  %1461 = vmatpush1.msra.mxu1 %v283_v40  ;;  %v382_v39 = vld [vmem:[%s5720_s21 + $0x688] sm:$0xff]  ;;  %v384_v40 = vld [vmem:[%s5720_s21 + $0x698] sm:$0xff] }
  0xa9   : > { %1385 = vmatprep.subr.mxu0 %v250_v41  ;;  %1462 = vmatprep.subr.mxu1 %v252_v42  ;;  %v381_v41 = vld [vmem:[%s5720_s21 + $0x680] sm:$0xff]  ;;  %v383_v42 = vld [vmem:[%s5720_s21 + $0x690] sm:$0xff] }
  0xaa   : > { %790 = vperm.xlu0 %5649, %v782_v43   ;;  %1386 = vmatpush1.msra.mxu0 %v249_v44  ;;  %v350_v43 = vld [vmem:[%s5720_s21 + $0x588] sm:$0xff]  ;;  %v352_v44 = vld [vmem:[%s5720_s21 + $0x598] sm:$0xff] }
  0xab   : > { %1463 = vmatpush1.msra.mxu1 %v251_v45  ;;  %1387 = vmatprep.subr.mxu0 %v218_v46  ;;  %v349_v45 = vld [vmem:[%s5720_s21 + $0x580] sm:$0xff]  ;;  %v351_v46 = vld [vmem:[%s5720_s21 + $0x590] sm:$0xff] }
  0xac   : > { %1464 = vmatprep.subr.mxu1 %v220_v47  ;;  %1388 = vmatpush1.msra.mxu0 %v217_v48  ;;  %v318_v47 = vld [vmem:[%s5720_s21 + $0x488] sm:$0xff]  ;;  %v320_v48 = vld [vmem:[%s5720_s21 + $0x498] sm:$0xff] }
  0xad   : > { %1465 = vmatpush1.msra.mxu1 %v219_v49  ;;  %1389 = vmatprep.subr.mxu0 %v186_v50  ;;  %v317_v49 = vld [vmem:[%s5720_s21 + $0x480] sm:$0xff]  ;;  %v319_v50 = vld [vmem:[%s5720_s21 + $0x490] sm:$0xff] }
  0xae   : > { %1466 = vmatprep.subr.mxu1 %v188_v51  ;;  %1390 = vmatpush1.msra.mxu0 %v185_v52  ;;  %v286_v51 = vld [vmem:[%s5720_s21 + $0x388] sm:$0xff]  ;;  %v288_v52 = vld [vmem:[%s5720_s21 + $0x398] sm:$0xff] }
  0xaf   : > { %1467 = vmatpush1.msra.mxu1 %v187_v53  ;;  %5590 = vmatprep.subr.msk.mxu0 %vm800_vm1, %v762_v54  ;;  %v285_v53 = vld [vmem:[%s5720_s21 + $0x380] sm:$0xff]  ;;  %v287_v54 = vld [vmem:[%s5720_s21 + $0x390] sm:$0xff] }
  0xb0   : > { %5594 = vmatprep.subr.msk.mxu1 %vm800_vm1, %v764_v55  ;;  %5591 = vmatpush2.msk.msra.mxu0 %vm800_vm1, %v761_v56  ;;  %v254_v55 = vld [vmem:[%s5720_s21 + $0x288] sm:$0xff]  ;;  %v256_v56 = vld [vmem:[%s5720_s21 + $0x298] sm:$0xff] }
  0xb1   : > { %5595 = vmatpush2.msk.msra.mxu1 %vm800_vm1, %v763_v0  ;;  %1419 = vmatprep.subr.mxu0 %v730_v57  ;;  %v253_v0 = vld [vmem:[%s5720_s21 + $0x280] sm:$0xff]  ;;  %v255_v57 = vld [vmem:[%s5720_s21 + $0x290] sm:$0xff] }
  0xb2   : > { %1496 = vmatprep.subr.mxu1 %v732_v58  ;;  %1420 = vmatpush2.msra.mxu0 %v729_v59  ;;  %v222_v58 = vld [vmem:[%s5720_s21 + $0x188] sm:$0xff]  ;;  %v224_v59 = vld [vmem:[%s5720_s21 + $0x198] sm:$0xff] }
  0xb3   : > { %1497 = vmatpush2.msra.mxu1 %v731_v60  ;;  %1421 = vmatprep.subr.mxu0 %v698_v61  ;;  %v221_v60 = vld [vmem:[%s5720_s21 + $0x180] sm:$0xff]  ;;  %v223_v61 = vld [vmem:[%s5720_s21 + $0x190] sm:$0xff] }
  0xb4   : > { %1498 = vmatprep.subr.mxu1 %v700_v62  ;;  %1422 = vmatpush2.msra.mxu0 %v697_v63  ;;  %v190_v62 = vld [vmem:[%s5720_s21 + $0x88] sm:$0xff]  ;;  %v192_v63 = vld [vmem:[%s5720_s21 + $0x98] sm:$0xff] }
  0xb5   : > { %5592 = vmatprep.mubr.msk.f32.mxu0 %vm793_vm0, %v6096_v3  ;;  %1499 = vmatpush2.msra.mxu1 %v699_v1  ;;  %v189_v1 = vld [vmem:[%s5720_s21 + $0x80] sm:$0xff] }
  0xb6   : > { %5596 = vmatprep.mubr.msk.f32.mxu1 %vm793_vm0, %v6096_v3  ;;  %1424 = vmatmul.mubr.f32.vlgmr.msra.gmra.mxu0 %v5805_v16 }
  0xb7   : > { %1501 = vmatmul.mubr.f32.vlgmr.msra.gmra.mxu1 %v5805_v16  ;;  %1513 = vmatprep.subr.mxu0 %v670_v2  ;;  %v608_v16 = vld [vmem:[%s5720_s21 + $0xd98] sm:$0xff]  ;;  %v191_v2 = vld [vmem:[%s5720_s21 + $0x90] sm:$0xff] }
  0xb8   : > { %1590 = vmatprep.subr.mxu1 %v672_v4  ;;  %1514 = vmatpush1.msra.mxu0 %v669_v5  ;;  %v766_v4 = vld [vmem:[%s5720_s21 + $0x1288] sm:$0x7]  ;;  %v768_v5 = vld [vmem:[%s5720_s21 + $0x1298] sm:$0x7] }
  0xb9   : > { %1591 = vmatpush1.msra.mxu1 %v671_v6  ;;  %1515 = vmatprep.subr.mxu0 %v638_v7  ;;  %v765_v6 = vld [vmem:[%s5720_s21 + $0x1280] sm:$0x7]  ;;  %v767_v7 = vld [vmem:[%s5720_s21 + $0x1290] sm:$0x7] }
  0xba   : > { %1592 = vmatprep.subr.mxu1 %v640_v8  ;;  %5593 = vmatprep.mubr.msk.f32.mxu0 %vm793_vm0, %v5874_v17  ;;  %v734_v8 = vld [vmem:[%s5720_s21 + $0x1188] sm:$0xff] }
  0xbb   : > { %5597 = vmatprep.mubr.msk.f32.mxu1 %vm793_vm0, %v5874_v17  ;;  %1516 = vmatpush1.msra.mxu0 %v637_v9  ;;  %v575_v17 = vld [vmem:[%s5720_s21 + $0xc90] sm:$0xff]  ;;  %v736_v9 = vld [vmem:[%s5720_s21 + $0x1198] sm:$0xff] }
  0xbc   : > { %1593 = vmatpush1.msra.mxu1 %v639_v10  ;;  %1430 = vmatmul.mubr.f32.gmra.mxu0 %v5881_v20  ;;  %v733_v10 = vld [vmem:[%s5720_s21 + $0x1180] sm:$0xff] }
  0xbd   : > { %1507 = vmatmul.mubr.f32.gmra.mxu1 %v5881_v20  ;;  %1517 = vmatprep.subr.mxu0 %v606_v11  ;;  %v543_v20 = vld [vmem:[%s5720_s21 + $0xb90] sm:$0xff] }
  0xbe   : > { %1594 = vmatprep.subr.mxu1 %v608_v16  ;;  %1518 = vmatpush1.msra.mxu0 %v605_v12  ;;  %v735_v11 = vld [vmem:[%s5720_s21 + $0x1190] sm:$0xff]  ;;  %v702_v16 = vld [vmem:[%s5720_s21 + $0x1088] sm:$0xff]  ;;  %v704_v12 = vld [vmem:[%s5720_s21 + $0x1098] sm:$0xff] }
  0xbf   : > { %1595 = vmatpush1.msra.mxu1 %v607_v13  ;;  %1519 = vmatprep.subr.mxu0 %v574_v14  ;;  %v701_v13 = vld [vmem:[%s5720_s21 + $0x1080] sm:$0xff]  ;;  %v703_v14 = vld [vmem:[%s5720_s21 + $0x1090] sm:$0xff] }
  0xc0   : > { %1596 = vmatprep.subr.mxu1 %v576_v15  ;;  %1520 = vmatpush1.msra.mxu0 %v573_v18  ;;  %v674_v15 = vld [vmem:[%s5720_s21 + $0xfa8] sm:$0xff]  ;;  %v676_v18 = vld [vmem:[%s5720_s21 + $0xfb8] sm:$0xff] }
  0xc1   : > { %1597 = vmatpush1.msra.mxu1 %v575_v17  ;;  %1521 = vmatprep.subr.mxu0 %v542_v19  ;;  %v673_v17 = vld [vmem:[%s5720_s21 + $0xfa0] sm:$0xff] }
  0xc2   : > { %1598 = vmatprep.subr.mxu1 %v544_v21  ;;  %1522 = vmatpush1.msra.mxu0 %v541_v22  ;;  %v6199_v19 = vld [vmem:[%s9745_s1] sm:$0xff]  ;;  %v675_v21 = vld [vmem:[%s5720_s21 + $0xfb0] sm:$0xff]  ;;  %v642_v22 = vld [vmem:[%s5720_s21 + $0xea8] sm:$0xff] }
  0xc3   : > { %1599 = vmatpush1.msra.mxu1 %v543_v20  ;;  %1523 = vmatprep.subr.mxu0 %v510_v23  ;;  %v644_v20 = vld [vmem:[%s5720_s21 + $0xeb8] sm:$0xff]  ;;  %v641_v23 = vld [vmem:[%s5720_s21 + $0xea0] sm:$0xff] }
  0xc4   : > { %1600 = vmatprep.subr.mxu1 %v512_v24  ;;  %1524 = vmatpush1.msra.mxu0 %v509_v25  ;;  %v643_v24 = vld [vmem:[%s5720_s21 + $0xeb0] sm:$0xff]  ;;  %v6211_v25 = vld [vmem:[%s9745_s1 + $0x18] sm:$0x1] }
  0xc5   : > { %1601 = vmatpush1.msra.mxu1 %v511_v26  ;;  %1525 = vmatprep.subr.mxu0 %v478_v27  ;;  %v610_v26 = vld [vmem:[%s5720_s21 + $0xda8] sm:$0xff]  ;;  %v612_v27 = vld [vmem:[%s5720_s21 + $0xdb8] sm:$0xff] }
  0xc6   : > { %1602 = vmatprep.subr.mxu1 %v480_v28  ;;  %1526 = vmatpush1.msra.mxu0 %v477_v29  ;;  %v609_v28 = vld [vmem:[%s5720_s21 + $0xda0] sm:$0xff]  ;;  %v6223_v29 = vld [vmem:[%s9745_s1 + $0x10] sm:$0x1] }
  0xc7   : > { %1603 = vmatpush1.msra.mxu1 %v479_v30  ;;  %1527 = vmatprep.subr.mxu0 %v446_v31  ;;  %v611_v30 = vld [vmem:[%s5720_s21 + $0xdb0] sm:$0xff]  ;;  %v578_v31 = vld [vmem:[%s5720_s21 + $0xca8] sm:$0xff] }
  0xc8   : > { %1604 = vmatprep.subr.mxu1 %v448_v32  ;;  %1528 = vmatpush1.msra.mxu0 %v445_v33  ;;  %v580_v32 = vld [vmem:[%s5720_s21 + $0xcb8] sm:$0xff]  ;;  %v577_v33 = vld [vmem:[%s5720_s21 + $0xca0] sm:$0xff] }
  0xc9   : > { %1605 = vmatpush1.msra.mxu1 %v447_v34  ;;  %1529 = vmatprep.subr.mxu0 %v414_v35  ;;  %v579_v34 = vld [vmem:[%s5720_s21 + $0xcb0] sm:$0xff]  ;;  %v546_v35 = vld [vmem:[%s5720_s21 + $0xba8] sm:$0xff] }
  0xca   : > { %1606 = vmatprep.subr.mxu1 %v416_v36  ;;  %1530 = vmatpush1.msra.mxu0 %v413_v37  ;;  %v548_v36 = vld [vmem:[%s5720_s21 + $0xbb8] sm:$0xff]  ;;  %v545_v37 = vld [vmem:[%s5720_s21 + $0xba0] sm:$0xff] }
  0xcb   : > { %1607 = vmatpush1.msra.mxu1 %v415_v38  ;;  %1531 = vmatprep.subr.mxu0 %v382_v39  ;;  %v547_v38 = vld [vmem:[%s5720_s21 + $0xbb0] sm:$0xff]  ;;  %v514_v39 = vld [vmem:[%s5720_s21 + $0xaa8] sm:$0xff] }
  0xcc   : > { %1608 = vmatprep.subr.mxu1 %v384_v40  ;;  %1532 = vmatpush1.msra.mxu0 %v381_v41  ;;  %v516_v40 = vld [vmem:[%s5720_s21 + $0xab8] sm:$0xff]  ;;  %v513_v41 = vld [vmem:[%s5720_s21 + $0xaa0] sm:$0xff] }
  0xcd   : > { %1609 = vmatpush1.msra.mxu1 %v383_v42  ;;  %1533 = vmatprep.subr.mxu0 %v350_v43  ;;  %v515_v42 = vld [vmem:[%s5720_s21 + $0xab0] sm:$0xff]  ;;  %v482_v43 = vld [vmem:[%s5720_s21 + $0x9a8] sm:$0xff] }
  0xce   : > { %1610 = vmatprep.subr.mxu1 %v352_v44  ;;  %1534 = vmatpush1.msra.mxu0 %v349_v45  ;;  %v484_v44 = vld [vmem:[%s5720_s21 + $0x9b8] sm:$0xff]  ;;  %v481_v45 = vld [vmem:[%s5720_s21 + $0x9a0] sm:$0xff] }
  0xcf   : > { %1611 = vmatpush1.msra.mxu1 %v351_v46  ;;  %1535 = vmatprep.subr.mxu0 %v318_v47  ;;  %v483_v46 = vld [vmem:[%s5720_s21 + $0x9b0] sm:$0xff]  ;;  %v450_v47 = vld [vmem:[%s5720_s21 + $0x8a8] sm:$0xff] }
  0xd0   : > { %1612 = vmatprep.subr.mxu1 %v320_v48  ;;  %1536 = vmatpush1.msra.mxu0 %v317_v49  ;;  %v452_v48 = vld [vmem:[%s5720_s21 + $0x8b8] sm:$0xff]  ;;  %v449_v49 = vld [vmem:[%s5720_s21 + $0x8a0] sm:$0xff] }
  0xd1   : > { %1613 = vmatpush1.msra.mxu1 %v319_v50  ;;  %1537 = vmatprep.subr.mxu0 %v286_v51  ;;  %v451_v50 = vld [vmem:[%s5720_s21 + $0x8b0] sm:$0xff]  ;;  %v418_v51 = vld [vmem:[%s5720_s21 + $0x7a8] sm:$0xff] }
  0xd2   : > { %1614 = vmatprep.subr.mxu1 %v288_v52  ;;  %1538 = vmatpush1.msra.mxu0 %v285_v53  ;;  %v420_v52 = vld [vmem:[%s5720_s21 + $0x7b8] sm:$0xff]  ;;  %v417_v53 = vld [vmem:[%s5720_s21 + $0x7a0] sm:$0xff] }
  0xd3   : > { %1615 = vmatpush1.msra.mxu1 %v287_v54  ;;  %1539 = vmatprep.subr.mxu0 %v254_v55  ;;  %v419_v54 = vld [vmem:[%s5720_s21 + $0x7b0] sm:$0xff]  ;;  %v386_v55 = vld [vmem:[%s5720_s21 + $0x6a8] sm:$0xff] }
  0xd4   : > { %1616 = vmatprep.subr.mxu1 %v256_v56  ;;  %1540 = vmatpush1.msra.mxu0 %v253_v0  ;;  %v388_v56 = vld [vmem:[%s5720_s21 + $0x6b8] sm:$0xff]  ;;  %v385_v0 = vld [vmem:[%s5720_s21 + $0x6a0] sm:$0xff] }
  0xd5   : > { %1617 = vmatpush1.msra.mxu1 %v255_v57  ;;  %1541 = vmatprep.subr.mxu0 %v222_v58  ;;  %v387_v57 = vld [vmem:[%s5720_s21 + $0x6b0] sm:$0xff]  ;;  %v354_v58 = vld [vmem:[%s5720_s21 + $0x5a8] sm:$0xff] }
  0xd6   : > { %1618 = vmatprep.subr.mxu1 %v224_v59  ;;  %1542 = vmatpush1.msra.mxu0 %v221_v60  ;;  %v356_v59 = vld [vmem:[%s5720_s21 + $0x5b8] sm:$0xff]  ;;  %v353_v60 = vld [vmem:[%s5720_s21 + $0x5a0] sm:$0xff] }
  0xd7   : > { %1619 = vmatpush1.msra.mxu1 %v223_v61  ;;  %1543 = vmatprep.subr.mxu0 %v190_v62  ;;  %v355_v61 = vld [vmem:[%s5720_s21 + $0x5b0] sm:$0xff]  ;;  %v322_v62 = vld [vmem:[%s5720_s21 + $0x4a8] sm:$0xff] }
  0xd8   : > { %1620 = vmatprep.subr.mxu1 %v192_v63  ;;  %1544 = vmatpush1.msra.mxu0 %v189_v1  ;;  %v6261_v63 = vpop.permute.xlu0 %785  ;;  %v324_v1 = vld [vmem:[%s5720_s21 + $0x4b8] sm:$0xff] }
  0xd9   : > { %1621 = vmatpush1.msra.mxu1 %v191_v2  ;;  %5598 = vmatprep.subr.msk.mxu0 %vm800_vm1, %v766_v4  ;;  %v321_v2 = vld [vmem:[%s5720_s21 + $0x4a0] sm:$0xff]  ;;  %v323_v4 = vld [vmem:[%s5720_s21 + $0x4b0] sm:$0xff] }
  0xda   : > { %5602 = vmatprep.subr.msk.mxu1 %vm800_vm1, %v768_v5  ;;  %5599 = vmatpush2.msk.msra.mxu0 %vm800_vm1, %v765_v6  ;;  %v290_v5 = vld [vmem:[%s5720_s21 + $0x3a8] sm:$0xff] }
  0xdb   : > { %5603 = vmatpush2.msk.msra.mxu1 %vm800_vm1, %v767_v7  ;;  %1573 = vmatprep.subr.mxu0 %v734_v8  ;;  %v292_v8 = vld [vmem:[%s5720_s21 + $0x3b8] sm:$0xff] }
  0xdc   : > { %1650 = vmatprep.subr.mxu1 %v736_v9  ;;  %1574 = vmatpush2.msra.mxu0 %v733_v10  ;;  %v289_v9 = vld [vmem:[%s5720_s21 + $0x3a0] sm:$0xff] }
  0xdd   : > { %1651 = vmatpush2.msra.mxu1 %v735_v11  ;;  %1575 = vmatprep.subr.mxu0 %v702_v16  ;;  %v291_v16 = vld [vmem:[%s5720_s21 + $0x3b0] sm:$0xff] }
  0xde   : > { %1652 = vmatprep.subr.mxu1 %v704_v12  ;;  %1576 = vmatpush2.msra.mxu0 %v701_v13  ;;  %v258_v12 = vld [vmem:[%s5720_s21 + $0x2a8] sm:$0xff] }
  0xdf   : > { %5600 = vmatprep.mubr.msk.f32.mxu0 %vm793_vm0, %v6096_v3  ;;  %1653 = vmatpush2.msra.mxu1 %v703_v14 }
  0xe0   : > { %5604 = vmatprep.mubr.msk.f32.mxu1 %vm793_vm0, %v6096_v3  ;;  %1578 = vmatmul.mubr.f32.vlgmr.msra.gmra.mxu0 %v6199_v19 }
  0xe1   : > { %1655 = vmatmul.mubr.f32.vlgmr.msra.gmra.mxu1 %v6199_v19  ;;  %1667 = vmatprep.subr.mxu0 %v674_v15  ;;  %v260_v15 = vld [vmem:[%s5720_s21 + $0x2b8] sm:$0xff] }
  0xe2   : > { %1744 = vmatprep.subr.mxu1 %v676_v18  ;;  %1668 = vmatpush1.msra.mxu0 %v673_v17  ;;  %v257_v18 = vld [vmem:[%s5720_s21 + $0x2a0] sm:$0xff] }
  0xe3   : > { %1745 = vmatpush1.msra.mxu1 %v675_v21  ;;  %1669 = vmatprep.subr.mxu0 %v642_v22  ;;  %v259_v22 = vld [vmem:[%s5720_s21 + $0x2b0] sm:$0xff] }
  0xe4   : > { %1746 = vmatprep.subr.mxu1 %v644_v20  ;;  %5601 = vmatprep.mubr.msk.f32.mxu0 %vm793_vm0, %v6211_v25  ;;  %v226_v20 = vld [vmem:[%s5720_s21 + $0x1a8] sm:$0xff] }
  0xe5   : > { %5605 = vmatprep.mubr.msk.f32.mxu1 %vm793_vm0, %v6211_v25  ;;  %1670 = vmatpush1.msra.mxu0 %v641_v23  ;;  %v228_v23 = vld [vmem:[%s5720_s21 + $0x1b8] sm:$0xff] }
  0xe6   : > { %1747 = vmatpush1.msra.mxu1 %v643_v24  ;;  %1584 = vmatmul.mubr.f32.gmra.mxu0 %v6223_v29  ;;  %v225_v24 = vld [vmem:[%s5720_s21 + $0x1a0] sm:$0xff] }
  0xe7   : > { %1661 = vmatmul.mubr.f32.gmra.mxu1 %v6223_v29  ;;  %1671 = vmatprep.subr.mxu0 %v610_v26  ;;  %v227_v26 = vld [vmem:[%s5720_s21 + $0x1b0] sm:$0xff] }
  0xe8   : > { %1748 = vmatprep.subr.mxu1 %v612_v27  ;;  %1672 = vmatpush1.msra.mxu0 %v609_v28  ;;  %v194_v27 = vld [vmem:[%s5720_s21 + $0xa8] sm:$0xff]  ;;  %v196_v28 = vld [vmem:[%s5720_s21 + $0xb8] sm:$0xff] }
  0xe9   : > { %1749 = vmatpush1.msra.mxu1 %v611_v30  ;;  %1673 = vmatprep.subr.mxu0 %v578_v31  ;;  %v193_v30 = vld [vmem:[%s5720_s21 + $0xa0] sm:$0xff]  ;;  %v195_v31 = vld [vmem:[%s5720_s21 + $0xb0] sm:$0xff] }
  0xea   : > { %1750 = vmatprep.subr.mxu1 %v580_v32  ;;  %1674 = vmatpush1.msra.mxu0 %v577_v33  ;;  %v770_v32 = vld [vmem:[%s5720_s21 + $0x12a8] sm:$0x7]  ;;  %v772_v33 = vld [vmem:[%s5720_s21 + $0x12b8] sm:$0x7] }
  0xeb   : > { %1751 = vmatpush1.msra.mxu1 %v579_v34  ;;  %1675 = vmatprep.subr.mxu0 %v546_v35  ;;  %v769_v34 = vld [vmem:[%s5720_s21 + $0x12a0] sm:$0x7]  ;;  %v771_v35 = vld [vmem:[%s5720_s21 + $0x12b0] sm:$0x7] }
  0xec   : > { %1752 = vmatprep.subr.mxu1 %v548_v36  ;;  %1676 = vmatpush1.msra.mxu0 %v545_v37  ;;  %v738_v36 = vld [vmem:[%s5720_s21 + $0x11a8] sm:$0xff]  ;;  %v740_v37 = vld [vmem:[%s5720_s21 + $0x11b8] sm:$0xff] }
  0xed   : > { %1753 = vmatpush1.msra.mxu1 %v547_v38  ;;  %1677 = vmatprep.subr.mxu0 %v514_v39  ;;  %v737_v38 = vld [vmem:[%s5720_s21 + $0x11a0] sm:$0xff]  ;;  %v739_v39 = vld [vmem:[%s5720_s21 + $0x11b0] sm:$0xff] }
  0xee   : > { %1754 = vmatprep.subr.mxu1 %v516_v40  ;;  %1678 = vmatpush1.msra.mxu0 %v513_v41  ;;  %v706_v40 = vld [vmem:[%s5720_s21 + $0x10a8] sm:$0xff]  ;;  %v708_v41 = vld [vmem:[%s5720_s21 + $0x10b8] sm:$0xff] }
  0xef   : > { %1755 = vmatpush1.msra.mxu1 %v515_v42  ;;  %1679 = vmatprep.subr.mxu0 %v482_v43  ;;  %v705_v42 = vld [vmem:[%s5720_s21 + $0x10a0] sm:$0xff]  ;;  %v707_v43 = vld [vmem:[%s5720_s21 + $0x10b0] sm:$0xff] }
  0xf0   : > { %1756 = vmatprep.subr.mxu1 %v484_v44  ;;  %1680 = vmatpush1.msra.mxu0 %v481_v45  ;;  %v678_v44 = vld [vmem:[%s5720_s21 + $0xfc8] sm:$0xff]  ;;  %v680_v45 = vld [vmem:[%s5720_s21 + $0xfd8] sm:$0xff] }
  0xf1   : > { %1757 = vmatpush1.msra.mxu1 %v483_v46  ;;  %1681 = vmatprep.subr.mxu0 %v450_v47  ;;  %v677_v46 = vld [vmem:[%s5720_s21 + $0xfc0] sm:$0xff]  ;;  %v679_v47 = vld [vmem:[%s5720_s21 + $0xfd0] sm:$0xff] }
  0xf2   : > { %1758 = vmatprep.subr.mxu1 %v452_v48  ;;  %1682 = vmatpush1.msra.mxu0 %v449_v49  ;;  %v646_v48 = vld [vmem:[%s5720_s21 + $0xec8] sm:$0xff]  ;;  %v648_v49 = vld [vmem:[%s5720_s21 + $0xed8] sm:$0xff] }
  0xf3   : > { %1759 = vmatpush1.msra.mxu1 %v451_v50  ;;  %1683 = vmatprep.subr.mxu0 %v418_v51  ;;  %v645_v50 = vld [vmem:[%s5720_s21 + $0xec0] sm:$0xff]  ;;  %v614_v51 = vld [vmem:[%s5720_s21 + $0xdc8] sm:$0xff] }
  0xf4   : > { %1760 = vmatprep.subr.mxu1 %v420_v52  ;;  %1684 = vmatpush1.msra.mxu0 %v417_v53  ;;  %v616_v52 = vld [vmem:[%s5720_s21 + $0xdd8] sm:$0xff]  ;;  %v613_v53 = vld [vmem:[%s5720_s21 + $0xdc0] sm:$0xff] }
  0xf5   : > { %1761 = vmatpush1.msra.mxu1 %v419_v54  ;;  %1685 = vmatprep.subr.mxu0 %v386_v55  ;;  %v615_v54 = vld [vmem:[%s5720_s21 + $0xdd0] sm:$0xff]  ;;  %v582_v55 = vld [vmem:[%s5720_s21 + $0xcc8] sm:$0xff] }
  0xf6   : > { %1762 = vmatprep.subr.mxu1 %v388_v56  ;;  %1686 = vmatpush1.msra.mxu0 %v385_v0  ;;  %v584_v56 = vld [vmem:[%s5720_s21 + $0xcd8] sm:$0xff]  ;;  %v581_v0 = vld [vmem:[%s5720_s21 + $0xcc0] sm:$0xff] }
  0xf7   : > { %1763 = vmatpush1.msra.mxu1 %v387_v57  ;;  %1687 = vmatprep.subr.mxu0 %v354_v58  ;;  %v583_v57 = vld [vmem:[%s5720_s21 + $0xcd0] sm:$0xff]  ;;  %v550_v58 = vld [vmem:[%s5720_s21 + $0xbc8] sm:$0xff] }
  0xf8   : > { %1764 = vmatprep.subr.mxu1 %v356_v59  ;;  %1688 = vmatpush1.msra.mxu0 %v353_v60  ;;  %v963_v6 = vpop.f32.mrf.mxu0  ;;  %v1040_v7 = vpop.f32.mrf.mxu1  ;;  %v552_v59 = vld [vmem:[%s5720_s21 + $0xbd8] sm:$0xff]  ;;  %v549_v60 = vld [vmem:[%s5720_s21 + $0xbc0] sm:$0xff] }
  0xf9   : > { %1765 = vmatpush1.msra.mxu1 %v355_v61  ;;  %1689 = vmatprep.subr.mxu0 %v322_v62  ;;  %v964_v10 = vadd.f32 %v963_v6, %v6261_v63  ;;  %v1041_v11 = vadd.f32 %v1040_v7, %v6261_v63  ;;  %v551_v61 = vld [vmem:[%s5720_s21 + $0xbd0] sm:$0xff]  ;;  %v518_v62 = vld [vmem:[%s5720_s21 + $0xac8] sm:$0xff]  ;;  %v488_v6 = vld [vmem:[%s5720_s21 + $0x9d8] sm:$0xff] }
  0xfa   : > { %1766 = vmatprep.subr.mxu1 %v324_v1  ;;  %1690 = vmatpush1.msra.mxu0 %v321_v2  ;;  %v965_v13 = vpop.f32.mrf.mxu0  ;;  %v1042_v14 = vpop.f32.mrf.mxu1  ;;  %v520_v1 = vld [vmem:[%s5720_s21 + $0xad8] sm:$0xff]  ;;  %v517_v2 = vld [vmem:[%s5720_s21 + $0xac0] sm:$0xff] }
  0xfb   : > { %1767 = vmatpush1.msra.mxu1 %v323_v4  ;;  %1691 = vmatprep.subr.mxu0 %v290_v5  ;;  %v966_v17 = vadd.f32 %v965_v13, %v6261_v63  ;;  %2133 = vst [vmem:[#allocation2 + $0x8] sm:$0xff] %v964_v10  ;;  %2135 = vst [vmem:[#allocation2 + $0x18] sm:$0xff] %v1041_v11  ;;  %v1043_v21 = vadd.f32 %v1042_v14, %v6261_v63  ;;  %v519_v4 = vld [vmem:[%s5720_s21 + $0xad0] sm:$0xff]  ;;  %v486_v5 = vld [vmem:[%s5720_s21 + $0x9c8] sm:$0xff] }
  0xfc   : > { %1768 = vmatprep.subr.mxu1 %v292_v8  ;;  %1692 = vmatpush1.msra.mxu0 %v289_v9  ;;  %v485_v7 = vld [vmem:[%s5720_s21 + $0x9c0] sm:$0xff]  ;;  %v487_v8 = vld [vmem:[%s5720_s21 + $0x9d0] sm:$0xff]  ;;  %v454_v9 = vld [vmem:[%s5720_s21 + $0x8c8] sm:$0xff] }
  0xfd   : > { %1769 = vmatpush1.msra.mxu1 %v291_v16  ;;  %1693 = vmatprep.subr.mxu0 %v258_v12  ;;  %2134 = vst [vmem:[#allocation2 + $0x10] sm:$0xff] %v966_v17  ;;  %2136 = vst [vmem:[#allocation2 + $0x20] sm:$0xff] %v1043_v21  ;;  %v456_v10 = vld [vmem:[%s5720_s21 + $0x8d8] sm:$0xff]  ;;  %v453_v11 = vld [vmem:[%s5720_s21 + $0x8c0] sm:$0xff] }
  0xfe   : > { %1770 = vmatprep.subr.mxu1 %v260_v15  ;;  %1694 = vmatpush1.msra.mxu0 %v257_v18  ;;  %v455_v16 = vld [vmem:[%s5720_s21 + $0x8d0] sm:$0xff]  ;;  %v422_v12 = vld [vmem:[%s5720_s21 + $0x7c8] sm:$0xff]  ;;  %v424_v13 = vld [vmem:[%s5720_s21 + $0x7d8] sm:$0xff] }
  0xff   : > { %1771 = vmatpush1.msra.mxu1 %v259_v22  ;;  %1695 = vmatprep.subr.mxu0 %v226_v20  ;;  %v421_v14 = vld [vmem:[%s5720_s21 + $0x7c0] sm:$0xff]  ;;  %v423_v15 = vld [vmem:[%s5720_s21 + $0x7d0] sm:$0xff]  ;;  %v390_v18 = vld [vmem:[%s5720_s21 + $0x6c8] sm:$0xff] }
 0x100   : > { %1772 = vmatprep.subr.mxu1 %v228_v23  ;;  %1696 = vmatpush1.msra.mxu0 %v225_v24  ;;  %v392_v22 = vld [vmem:[%s5720_s21 + $0x6d8] sm:$0xff]  ;;  %v389_v20 = vld [vmem:[%s5720_s21 + $0x6c0] sm:$0xff]  ;;  %v391_v23 = vld [vmem:[%s5720_s21 + $0x6d0] sm:$0xff] }
 0x101   : > { %1773 = vmatpush1.msra.mxu1 %v227_v26  ;;  %1697 = vmatprep.subr.mxu0 %v194_v27  ;;  %v358_v24 = vld [vmem:[%s5720_s21 + $0x5c8] sm:$0xff]  ;;  %v360_v26 = vld [vmem:[%s5720_s21 + $0x5d8] sm:$0xff]  ;;  %v357_v27 = vld [vmem:[%s5720_s21 + $0x5c0] sm:$0xff] }
 0x102   : > { %1774 = vmatprep.subr.mxu1 %v196_v28  ;;  %1698 = vmatpush1.msra.mxu0 %v193_v30  ;;  %v359_v28 = vld [vmem:[%s5720_s21 + $0x5d0] sm:$0xff]  ;;  %v326_v30 = vld [vmem:[%s5720_s21 + $0x4c8] sm:$0xff] }
 0x103   : > { %1775 = vmatpush1.msra.mxu1 %v195_v31  ;;  %5606 = vmatprep.subr.msk.mxu0 %vm800_vm1, %v770_v32 }
 0x104   : > { %5610 = vmatprep.subr.msk.mxu1 %vm800_vm1, %v772_v33  ;;  %5607 = vmatpush2.msk.msra.mxu0 %vm800_vm1, %v769_v34  ;;  %v328_v33 = vld [vmem:[%s5720_s21 + $0x4d8] sm:$0xff]  ;;  %v325_v34 = vld [vmem:[%s5720_s21 + $0x4c0] sm:$0xff] }
 0x105   : > { %5611 = vmatpush2.msk.msra.mxu1 %vm800_vm1, %v771_v35  ;;  %1727 = vmatprep.subr.mxu0 %v738_v36  ;;  %v327_v35 = vld [vmem:[%s5720_s21 + $0x4d0] sm:$0xff]  ;;  %v294_v36 = vld [vmem:[%s5720_s21 + $0x3c8] sm:$0xff] }
 0x106   : > { %1804 = vmatprep.subr.mxu1 %v740_v37  ;;  %1728 = vmatpush2.msra.mxu0 %v737_v38 }
 0x107   : > { %1805 = vmatpush2.msra.mxu1 %v739_v39  ;;  %1729 = vmatprep.subr.mxu0 %v706_v40  ;;  %v296_v39 = vld [vmem:[%s5720_s21 + $0x3d8] sm:$0xff]  ;;  %v293_v40 = vld [vmem:[%s5720_s21 + $0x3c0] sm:$0xff] }
 0x108   : > { %1806 = vmatprep.subr.mxu1 %v708_v41  ;;  %1730 = vmatpush2.msra.mxu0 %v705_v42 }
 0x109   : > { %5608 = vmatprep.mubr.msk.f32.mxu0 %vm793_vm0, %v6096_v3  ;;  %1807 = vmatpush2.msra.mxu1 %v707_v43  ;;  %v295_v43 = vld [vmem:[%s5720_s21 + $0x3d0] sm:$0xff] }
 0x10a   : > { %5612 = vmatprep.mubr.msk.f32.mxu1 %vm793_vm0, %v6096_v3  ;;  %1732 = vmatmul.mubr.f32.vlgmr.msra.gmra.mxu0 %v6199_v19  ;;  %v647_v3 = vld [vmem:[%s5720_s21 + $0xed0] sm:$0xff] }
 0x10b   : > { %1809 = vmatmul.mubr.f32.vlgmr.msra.gmra.mxu1 %v6199_v19  ;;  %1821 = vmatprep.subr.mxu0 %v678_v44  ;;  %v262_v44 = vld [vmem:[%s5720_s21 + $0x2c8] sm:$0xff] }
 0x10c   : > { %1898 = vmatprep.subr.mxu1 %v680_v45  ;;  %1822 = vmatpush1.msra.mxu0 %v677_v46 }
 0x10d   : > { %1899 = vmatpush1.msra.mxu1 %v679_v47  ;;  %1823 = vmatprep.subr.mxu0 %v646_v48  ;;  %v264_v47 = vld [vmem:[%s5720_s21 + $0x2d8] sm:$0xff]  ;;  %v261_v48 = vld [vmem:[%s5720_s21 + $0x2c0] sm:$0xff] }
 0x10e   : > { %1900 = vmatprep.subr.mxu1 %v648_v49  ;;  %5609 = vmatprep.mubr.msk.f32.mxu0 %vm793_vm0, %v6211_v25 }
 0x10f   : > { %5613 = vmatprep.mubr.msk.f32.mxu1 %vm793_vm0, %v6211_v25  ;;  %1824 = vmatpush1.msra.mxu0 %v645_v50 }
 0x110   : > { %1901 = vmatpush1.msra.mxu1 %v647_v3  ;;  %1738 = vmatmul.mubr.f32.gmra.mxu0 %v6223_v29 }
 0x111   : > { %1815 = vmatmul.mubr.f32.gmra.mxu1 %v6223_v29  ;;  %1825 = vmatprep.subr.mxu0 %v614_v51  ;;  %v263_v51 = vld [vmem:[%s5720_s21 + $0x2d0] sm:$0xff] }
 0x112   : > { %1902 = vmatprep.subr.mxu1 %v616_v52  ;;  %1826 = vmatpush1.msra.mxu0 %v613_v53  ;;  %v230_v52 = vld [vmem:[%s5720_s21 + $0x1c8] sm:$0xff] }
 0x113   : > { %1903 = vmatpush1.msra.mxu1 %v615_v54  ;;  %1827 = vmatprep.subr.mxu0 %v582_v55 }
 0x114   : > { %1904 = vmatprep.subr.mxu1 %v584_v56  ;;  %1828 = vmatpush1.msra.mxu0 %v581_v0  ;;  %v232_v56 = vld [vmem:[%s5720_s21 + $0x1d8] sm:$0xff]  ;;  %v229_v0 = vld [vmem:[%s5720_s21 + $0x1c0] sm:$0xff] }
 0x115   : > { %1905 = vmatpush1.msra.mxu1 %v583_v57  ;;  %1829 = vmatprep.subr.mxu0 %v550_v58  ;;  %v231_v58 = vld [vmem:[%s5720_s21 + $0x1d0] sm:$0xff] }
 0x116   : > { %1906 = vmatprep.subr.mxu1 %v552_v59  ;;  %1830 = vmatpush1.msra.mxu0 %v549_v60  ;;  %v198_v59 = vld [vmem:[%s5720_s21 + $0xc8] sm:$0xff] }
 0x117   : > { %1907 = vmatpush1.msra.mxu1 %v551_v61  ;;  %1831 = vmatprep.subr.mxu0 %v518_v62  ;;  %v200_v62 = vld [vmem:[%s5720_s21 + $0xd8] sm:$0xff] }
 0x118   : > { %1908 = vmatprep.subr.mxu1 %v520_v1  ;;  %1832 = vmatpush1.msra.mxu0 %v517_v2  ;;  %v197_v1 = vld [vmem:[%s5720_s21 + $0xc0] sm:$0xff] }
 0x119   : > { %1909 = vmatpush1.msra.mxu1 %v519_v4  ;;  %1833 = vmatprep.subr.mxu0 %v486_v5  ;;  %v199_v5 = vld [vmem:[%s5720_s21 + $0xd0] sm:$0xff] }
 0x11a   : > { %1910 = vmatprep.subr.mxu1 %v488_v6  ;;  %1834 = vmatpush1.msra.mxu0 %v485_v7  ;;  %v969_v17 = vpop.f32.mrf.mxu0  ;;  %v1046_v21 = vpop.f32.mrf.mxu1  ;;  %v774_v6 = vld [vmem:[%s5720_s21 + $0x12c8] sm:$0x7] }
 0x11b   : > { %1911 = vmatpush1.msra.mxu1 %v487_v8  ;;  %1835 = vmatprep.subr.mxu0 %v454_v9  ;;  %v776_v9 = vld [vmem:[%s5720_s21 + $0x12d8] sm:$0x7] }
 0x11c   : > { %1912 = vmatprep.subr.mxu1 %v456_v10  ;;  %1836 = vmatpush1.msra.mxu0 %v453_v11  ;;  %v971_v31 = vpop.f32.mrf.mxu0  ;;  %v1048_v32 = vpop.f32.mrf.mxu1  ;;  %v773_v10 = vld [vmem:[%s5720_s21 + $0x12c0] sm:$0x7] }
 0x11d   : > { %1913 = vmatpush1.msra.mxu1 %v455_v16  ;;  %1837 = vmatprep.subr.mxu0 %v422_v12  ;;  %v775_v12 = vld [vmem:[%s5720_s21 + $0x12d0] sm:$0x7] }
 0x11e   : > { %1914 = vmatprep.subr.mxu1 %v424_v13  ;;  %1838 = vmatpush1.msra.mxu0 %v421_v14  ;;  %v742_v13 = vld [vmem:[%s5720_s21 + $0x11c8] sm:$0xff]  ;;  %v744_v14 = vld [vmem:[%s5720_s21 + $0x11d8] sm:$0xff] }
 0x11f   : > { %1915 = vmatpush1.msra.mxu1 %v423_v15  ;;  %1839 = vmatprep.subr.mxu0 %v390_v18  ;;  %v741_v15 = vld [vmem:[%s5720_s21 + $0x11c0] sm:$0xff]  ;;  %v743_v18 = vld [vmem:[%s5720_s21 + $0x11d0] sm:$0xff] }
 0x120   : > { %1916 = vmatprep.subr.mxu1 %v392_v22  ;;  %1840 = vmatpush1.msra.mxu0 %v389_v20  ;;  %v709_v22 = vld [vmem:[%s5720_s21 + $0x10c0] sm:$0xff]  ;;  %v711_v20 = vld [vmem:[%s5720_s21 + $0x10d0] sm:$0xff] }
 0x121   : > { %1917 = vmatpush1.msra.mxu1 %v391_v23  ;;  %1841 = vmatprep.subr.mxu0 %v358_v24  ;;  %v682_v23 = vld [vmem:[%s5720_s21 + $0xfe8] sm:$0xff]  ;;  %v9748_v24 = vlaneseq }
 0x122   : > { %1918 = vmatprep.subr.mxu1 %v360_v26  ;;  %1842 = vmatpush1.msra.mxu0 %v357_v27  ;;  %v1117_v37 = vpop.f32.mrf.mxu0  ;;  %v1194_v38 = vpop.f32.mrf.mxu1  ;;  %v6412_v26 = vld [vmem:[%s9745_s1 + $0x8] sm:$0xff]  ;;  %v684_v27 = vld [vmem:[%s5720_s21 + $0xff8] sm:$0xff] }
 0x123   : > { %1919 = vmatpush1.msra.mxu1 %v359_v28  ;;  %1843 = vmatprep.subr.mxu0 %v326_v30  ;;  %v1118_v41 = vadd.f32 %v1117_v37, %v6261_v63  ;;  %v1195_v42 = vadd.f32 %v1194_v38, %v6261_v63  ;;  %v681_v28 = vld [vmem:[%s5720_s21 + $0xfe0] sm:$0xff]  ;;  %v683_v30 = vld [vmem:[%s5720_s21 + $0xff0] sm:$0xff] }
 0x124   : > { %1920 = vmatprep.subr.mxu1 %v328_v33  ;;  %1844 = vmatpush1.msra.mxu0 %v325_v34  ;;  %v1119_v45 = vpop.f32.mrf.mxu0  ;;  %v1196_v46 = vpop.f32.mrf.mxu1  ;;  %v649_v33 = vld [vmem:[%s5720_s21 + $0xee0] sm:$0xff]  ;;  %v6427_v34 = vshrl.u32 %v9748_v24, 7  ;;  %v619_v38 = vld [vmem:[%s5720_s21 + $0xdf0] sm:$0xff] }
 0x125   : > { %1921 = vmatpush1.msra.mxu1 %v327_v35  ;;  %1845 = vmatprep.subr.mxu0 %v294_v36  ;;  %v6371_v49 = vpop.permute.xlu0 %790  ;;  %2137 = vst [vmem:[#allocation2 + $0x28] sm:$0xff] %v1118_v41  ;;  %2139 = vst [vmem:[#allocation2 + $0x38] sm:$0xff] %v1195_v42  ;;  %v1120_v50 = vadd.f32 %v1119_v45, %v6261_v63  ;;  %v1197_v3 = vadd.f32 %v1196_v46, %v6261_v63  ;;  %v651_v35 = vld [vmem:[%s5720_s21 + $0xef0] sm:$0xff]  ;;  %v620_v36 = vld [vmem:[%s5720_s21 + $0xdf8] sm:$0xff] }
 0x126   : > { %1922 = vmatprep.subr.mxu1 %v296_v39  ;;  %1846 = vmatpush1.msra.mxu0 %v293_v40  ;;  %v972_v53 = vadd.f32 %v971_v31, %v6371_v49  ;;  %v970_v54 = vadd.f32 %v969_v17, %v6371_v49  ;;  %v1047_v55 = vadd.f32 %v1046_v21, %v6371_v49  ;;  %v710_v17 = vld [vmem:[%s5720_s21 + $0x10c8] sm:$0xff]  ;;  %v712_v21 = vld [vmem:[%s5720_s21 + $0x10d8] sm:$0xff]  ;;  %v617_v37 = vld [vmem:[%s5720_s21 + $0xde0] sm:$0xff]  ;;  %v6441_v40 = vsub.s32 0, %v6427_v34 }
 0x127   : > { %1923 = vmatpush1.msra.mxu1 %v295_v43  ;;  %1847 = vmatprep.subr.mxu0 %v262_v44  ;;  %v1049_v57 = vadd.f32 %v1048_v32, %v6371_v49  ;;  %2138 = vst [vmem:[#allocation2 + $0x30] sm:$0xff] %v1120_v50  ;;  %2140 = vst [vmem:[#allocation2 + $0x40] sm:$0xff] %v1197_v3  ;;  %v650_v31 = vld [vmem:[%s5720_s21 + $0xee8] sm:$0xff]  ;;  %v652_v32 = vld [vmem:[%s5720_s21 + $0xef8] sm:$0xff] }
 0x128   : > { %1924 = vmatprep.subr.mxu1 %v264_v47  ;;  %1848 = vmatpush1.msra.mxu0 %v261_v48  ;;  %2166 = vst [vmem:[#allocation2 + $0x120] sm:$0x1] %v972_v53  ;;  %2165 = vst [vmem:[#allocation2 + $0x118] sm:$0x1] %v970_v54  ;;  %v1123_v60 = vpop.f32.mrf.mxu0  ;;  %v1200_v61 = vpop.f32.mrf.mxu1  ;;  %v586_v39 = vld [vmem:[%s5720_s21 + $0xce8] sm:$0xff]  ;;  %v585_v41 = vld [vmem:[%s5720_s21 + $0xce0] sm:$0xff] }
 0x129   : > { %2167 = vst [vmem:[#allocation2 + $0x128] sm:$0x1] %v1047_v55  ;;  %1925 = vmatpush1.msra.mxu1 %v263_v51  ;;  %1849 = vmatprep.subr.mxu0 %v230_v52  ;;  %2168 = vst [vmem:[#allocation2 + $0x130] sm:$0x1] %v1049_v57  ;;  %v1124_v2 = vadd.f32 %v1123_v60, %v6371_v49  ;;  %v1201_v4 = vadd.f32 %v1200_v61, %v6371_v49  ;;  %v587_v43 = vld [vmem:[%s5720_s21 + $0xcf0] sm:$0xff]  ;;  %v554_v44 = vld [vmem:[%s5720_s21 + $0xbe8] sm:$0xff] }
 0x12a   : > { %1926 = vmatprep.subr.mxu1 %v232_v56  ;;  %1850 = vmatpush1.msra.mxu0 %v229_v0  ;;  %v1125_v7 = vpop.f32.mrf.mxu0  ;;  %v1202_v8 = vpop.f32.mrf.mxu1  ;;  %9990 = vst [vmem:[#allocation3_spill] sm:$0xff] %v6427_v34  ;;  %v3922_v42 = vld [vmem:[#allocation2 + $0x10d] ss:$8 sm:$0x1]  ;;  %v556_v45 = vld [vmem:[%s5720_s21 + $0xbf8] sm:$0xff]  ;;  %v553_v46 = vld [vmem:[%s5720_s21 + $0xbe0] sm:$0xff] }
 0x12b   : > { %1927 = vmatpush1.msra.mxu1 %v231_v58  ;;  %1851 = vmatprep.subr.mxu0 %v198_v59  ;;  %2169 = vst [vmem:[#allocation2 + $0x138] sm:$0x1] %v1124_v2  ;;  %2171 = vst [vmem:[#allocation2 + $0x148] sm:$0x1] %v1201_v4  ;;  %v1126_v11 = vadd.f32 %v1125_v7, %v6371_v49  ;;  %v1203_v16 = vadd.f32 %v1202_v8, %v6371_v49  ;;  %v522_v47 = vld [vmem:[%s5720_s21 + $0xae8] sm:$0xff]  ;;  %v524_v50 = vld [vmem:[%s5720_s21 + $0xaf8] sm:$0xff] }
 0x12c   : > { %1928 = vmatprep.subr.mxu1 %v200_v62  ;;  %1852 = vmatpush1.msra.mxu0 %v197_v1  ;;  %v4059_v48 = vrot.slane %v3922_v42, %v6441_v40  ;;  %v521_v3 = vld [vmem:[%s5720_s21 + $0xae0] sm:$0xff]  ;;  %v523_v51 = vld [vmem:[%s5720_s21 + $0xaf0] sm:$0xff]  ;;  %v4272_v52 = vld [vmem:[#allocation2 + $0x10e] ss:$8 sm:$0x1] }
 0x12d   : > { %1929 = vmatpush1.msra.mxu1 %v199_v5  ;;  %5614 = vmatprep.subr.msk.mxu0 %vm800_vm1, %v774_v6  ;;  %2170 = vst [vmem:[#allocation2 + $0x140] sm:$0x1] %v1126_v11  ;;  %2172 = vst [vmem:[#allocation2 + $0x150] sm:$0x1] %v1203_v16  ;;  %v490_v54 = vld [vmem:[%s5720_s21 + $0x9e8] sm:$0xff]  ;;  %v492_v55 = vld [vmem:[%s5720_s21 + $0x9f8] sm:$0xff]  ;;  %v4409_v60 = vrot.slane %v4272_v52, %v6441_v40 }
 0x12e   : > { %5618 = vmatprep.subr.msk.mxu1 %vm800_vm1, %v776_v9  ;;  %5615 = vmatpush2.msk.msra.mxu0 %vm800_vm1, %v773_v10  ;;  %v4621_v53 = vld [vmem:[#allocation2 + $0x10f] ss:$8 sm:$0x1]  ;;  %v2263_v56 = vld [vmem:[#allocation2] ss:$8 sm:$0xf0] }
 0x12f   : > { %5619 = vmatpush2.msk.msra.mxu1 %vm800_vm1, %v775_v12  ;;  %1881 = vmatprep.subr.mxu0 %v742_v13  ;;  %v489_v0 = vld [vmem:[%s5720_s21 + $0x9e0] sm:$0xff]  ;;  %v491_v57 = vld [vmem:[%s5720_s21 + $0x9f0] sm:$0xff]  ;;  %v458_v58 = vld [vmem:[%s5720_s21 + $0x8e8] sm:$0xff]  ;;  %v4758_v61 = vrot.slane %v4621_v53, %v6441_v40  ;;  %v6470_v5 = vsub.s32 2, %v6427_v34 }
 0x130   : > { %1958 = vmatprep.subr.mxu1 %v744_v14  ;;  %1882 = vmatpush2.msra.mxu0 %v741_v15  ;;  %v460_v59 = vld [vmem:[%s5720_s21 + $0x8f8] sm:$0xff]  ;;  %v457_v2 = vld [vmem:[%s5720_s21 + $0x8e0] sm:$0xff]  ;;  %v459_v4 = vld [vmem:[%s5720_s21 + $0x8f0] sm:$0xff] }
 0x131   : > { %1959 = vmatpush2.msra.mxu1 %v743_v18  ;;  %1883 = vmatprep.subr.mxu0 %v710_v17  ;;  %v2262_v62 = vld [vmem:[#allocation2] ss:$8 sm:$0xf] }
 0x132   : > { %1960 = vmatprep.subr.mxu1 %v712_v21  ;;  %1884 = vmatpush2.msra.mxu0 %v709_v22  ;;  %v6465_v1 = vor.u32 %v2263_v56, %v2262_v62  ;;  %v426_v6 = vld [vmem:[%s5720_s21 + $0x7e8] sm:$0xff]  ;;  %v428_v7 = vld [vmem:[%s5720_s21 + $0x7f8] sm:$0xff]  ;;  %v425_v8 = vld [vmem:[%s5720_s21 + $0x7e0] sm:$0xff]  ;;  %v6491_v22 = vsub.s32 4, %v6427_v34 }
 0x133   : > { %5616 = vmatprep.mubr.msk.f32.mxu0 %vm793_vm0, %v6412_v26  ;;  %1961 = vmatpush2.msra.mxu1 %v711_v20  ;;  %v427_v9 = vld [vmem:[%s5720_s21 + $0x7f0] sm:$0xff]  ;;  %v394_v10 = vld [vmem:[%s5720_s21 + $0x6e8] sm:$0xff]  ;;  %v396_v11 = vld [vmem:[%s5720_s21 + $0x6f8] sm:$0xff]  ;;  %v6494_v20 = vsub.s32 1, %v6427_v34 }
 0x134   : > { %5620 = vmatprep.mubr.msk.f32.mxu1 %vm793_vm0, %v6412_v26  ;;  %1886 = vmatmul.mubr.f32.vlgmr.msra.gmra.mxu0 %v6199_v19  ;;  %v393_v16 = vld [vmem:[%s5720_s21 + $0x6e0] sm:$0xff]  ;;  %v395_v12 = vld [vmem:[%s5720_s21 + $0x6f0] sm:$0xff]  ;;  %v2327_v13 = vrot.slane %v6465_v1, %v6470_v5  ;;  %v2319_v14 = vrot.slane %v6465_v1, %v6441_v40  ;;  %v362_v15 = vld [vmem:[%s5720_s21 + $0x5e8] sm:$0xff]  ;;  %9991 = vst [vmem:[#allocation4_spill] sm:$0xff] %v6491_v22 }
 0x135   : > { %1963 = vmatmul.mubr.f32.vlgmr.msra.gmra.mxu1 %v6199_v19  ;;  %1975 = vmatprep.subr.mxu0 %v682_v23  ;;  %v618_v19 = vld [vmem:[%s5720_s21 + $0xde8] sm:$0xff]  ;;  %v364_v18 = vld [vmem:[%s5720_s21 + $0x5f8] sm:$0xff]  ;;  %v361_v17 = vld [vmem:[%s5720_s21 + $0x5e0] sm:$0xff] }
 0x136   : > { %2052 = vmatprep.subr.mxu1 %v684_v27  ;;  %1976 = vmatpush1.msra.mxu0 %v681_v28  ;;  %v363_v21 = vld [vmem:[%s5720_s21 + $0x5f0] sm:$0xff]  ;;  %v330_v28 = vld [vmem:[%s5720_s21 + $0x4e8] sm:$0xff]  ;;  %v300_v42 = vld [vmem:[%s5720_s21 + $0x3f8] sm:$0xff] }
 0x137   : > { %2053 = vmatpush1.msra.mxu1 %v683_v30  ;;  %1977 = vmatprep.subr.mxu0 %v650_v31  ;;  %v332_v30 = vld [vmem:[%s5720_s21 + $0x4f8] sm:$0xff]  ;;  %v267_v52 = vld [vmem:[%s5720_s21 + $0x2f0] sm:$0xff] }
 0x138   : > { %2054 = vmatprep.subr.mxu1 %v652_v32  ;;  %5617 = vmatprep.mubr.msk.f32.mxu0 %vm793_vm0, %v6211_v25 }
 0x139   : > { %5621 = vmatprep.mubr.msk.f32.mxu1 %vm793_vm0, %v6211_v25  ;;  %1978 = vmatpush1.msra.mxu0 %v649_v33  ;;  %v588_v25 = vld [vmem:[%s5720_s21 + $0xcf8] sm:$0xff]  ;;  %v329_v33 = vld [vmem:[%s5720_s21 + $0x4e0] sm:$0xff] }
 0x13a   : > { %2055 = vmatpush1.msra.mxu1 %v651_v35  ;;  %1892 = vmatmul.mubr.f32.gmra.mxu0 %v6223_v29  ;;  %v331_v35 = vld [vmem:[%s5720_s21 + $0x4f0] sm:$0xff] }
 0x13b   : > { %1969 = vmatmul.mubr.f32.gmra.mxu1 %v6223_v29  ;;  %1979 = vmatprep.subr.mxu0 %v618_v19  ;;  %v555_v29 = vld [vmem:[%s5720_s21 + $0xbf0] sm:$0xff] }
 0x13c   : > { %2056 = vmatprep.subr.mxu1 %v620_v36  ;;  %1980 = vmatpush1.msra.mxu0 %v617_v37 }
 0x13d   : > { %2057 = vmatpush1.msra.mxu1 %v619_v38  ;;  %1981 = vmatprep.subr.mxu0 %v586_v39  ;;  %v2335_v39 = vrot.slane %v6465_v1, %v6491_v22 }
 0x13e   : > { %2058 = vmatprep.subr.mxu1 %v588_v25  ;;  %1982 = vmatpush1.msra.mxu0 %v585_v41  ;;  %v2323_v25 = vrot.slane %v6465_v1, %v6494_v20  ;;  %v298_v41 = vld [vmem:[%s5720_s21 + $0x3e8] sm:$0xff] }
 0x13f   : > { %2059 = vmatpush1.msra.mxu1 %v587_v43  ;;  %1983 = vmatprep.subr.mxu0 %v554_v44  ;;  %v6513_v43 = vsub.s32 6, %v6427_v34  ;;  %v297_v44 = vld [vmem:[%s5720_s21 + $0x3e0] sm:$0xff] }
 0x140   : > { %2060 = vmatprep.subr.mxu1 %v556_v45  ;;  %1984 = vmatpush1.msra.mxu0 %v553_v46  ;;  %v299_v45 = vld [vmem:[%s5720_s21 + $0x3f0] sm:$0xff]  ;;  %v6518_v46 = vsub.s32 3, %v6427_v34 }
 0x141   : > { %2061 = vmatpush1.msra.mxu1 %v555_v29  ;;  %1985 = vmatprep.subr.mxu0 %v522_v47  ;;  %9992 = vst [vmem:[#allocation5_spill] sm:$0xff] %v6513_v43  ;;  %v266_v29 = vld [vmem:[%s5720_s21 + $0x2e8] sm:$0xff]  ;;  %v268_v47 = vld [vmem:[%s5720_s21 + $0x2f8] sm:$0xff] }
 0x142   : > { %2062 = vmatprep.subr.mxu1 %v524_v50  ;;  %4124 = vrot.lane.b32.xlu0 %v4059_v48, %s5668_s15 }
 0x143   : > { %1986 = vmatpush1.msra.mxu0 %v521_v3  ;;  %2063 = vmatpush1.msra.mxu1 %v523_v51  ;;  %v2645_v3 = vld [vmem:[#allocation2 + $0x1] ss:$8 sm:$0xf0] }
 0x144   : > { %1987 = vmatprep.subr.mxu0 %v490_v54  ;;  %2064 = vmatprep.subr.mxu1 %v492_v55  ;;  %v265_v51 = vld [vmem:[%s5720_s21 + $0x2e0] sm:$0xff]  ;;  %v2343_v55 = vrot.slane %v6465_v1, %v6513_v43 }
 0x145   : > { %1988 = vmatpush1.msra.mxu0 %v489_v0  ;;  %2065 = vmatpush1.msra.mxu1 %v491_v57  ;;  %v2644_v57 = vld [vmem:[#allocation2 + $0x1] ss:$8 sm:$0xf] }
 0x146   : > { %1989 = vmatprep.subr.mxu0 %v458_v58  ;;  %2066 = vmatprep.subr.mxu1 %v460_v59  ;;  %v2331_v58 = vrot.slane %v6465_v1, %v6518_v46  ;;  %v234_v59 = vld [vmem:[%s5720_s21 + $0x1e8] sm:$0xff] }
 0x147   : > { %4474 = vrot.lane.b32.xlu1 %v4409_v60, %s5669_s16  ;;  %4823 = vrot.lane.b32.xlu0 %v4758_v61, %s5670_s17  ;;  %v236_v60 = vld [vmem:[%s5720_s21 + $0x1f8] sm:$0xff] }
 0x148   : > { %1990 = vmatpush1.msra.mxu0 %v457_v2  ;;  %2067 = vmatpush1.msra.mxu1 %v459_v4  ;;  %v6536_v2 = vor.u32 %v2645_v3, %v2644_v57  ;;  %v233_v4 = vld [vmem:[%s5720_s21 + $0x1e0] sm:$0xff] }
 0x149   : > { %1991 = vmatprep.subr.mxu0 %v426_v6  ;;  %2068 = vmatprep.subr.mxu1 %v428_v7  ;;  %v235_v6 = vld [vmem:[%s5720_s21 + $0x1f0] sm:$0xff]  ;;  %v6541_v7 = vsub.s32 5, %v6427_v34 }
 0x14a   : > { %1992 = vmatpush1.msra.mxu0 %v425_v8  ;;  %2069 = vmatpush1.msra.mxu1 %v427_v9  ;;  %v202_v8 = vld [vmem:[%s5720_s21 + $0xe8] sm:$0xff]  ;;  %v204_v9 = vld [vmem:[%s5720_s21 + $0xf8] sm:$0xff] }
 0x14b   : > { %1993 = vmatprep.subr.mxu0 %v394_v10  ;;  %2070 = vmatprep.subr.mxu1 %v396_v11  ;;  %v201_v10 = vld [vmem:[%s5720_s21 + $0xe0] sm:$0xff]  ;;  %v203_v11 = vld [vmem:[%s5720_s21 + $0xf0] sm:$0xff] }
 0x14c   : > { %1994 = vmatpush1.msra.mxu0 %v393_v16  ;;  %2071 = vmatpush1.msra.mxu1 %v395_v12  ;;  %v1271_v23 = vpop.f32.mrf.mxu0  ;;  %v1348_v27 = vpop.f32.mrf.mxu1  ;;  %v2673_v16 = vrot.slane %v6536_v2, %v6494_v20  ;;  %v2339_v12 = vrot.slane %v6465_v1, %v6541_v7 }
 0x14d   : > { %2452 = vrot.lane.b32.xlu0 %v2327_v13, %s5669_s16  ;;  %2448 = vrot.lane.b32.xlu1 %v2319_v14, %s5669_s16  ;;  %v1272_v31 = vadd.f32 %v1271_v23, %v6261_v63  ;;  %v1349_v32 = vadd.f32 %v1348_v27, %v6261_v63  ;;  %v778_v13 = vld [vmem:[%s5720_s21 + $0x12e8] sm:$0x7]  ;;  %v780_v14 = vld [vmem:[%s5720_s21 + $0x12f8] sm:$0x7] }
 0x14e   : > { %1995 = vmatprep.subr.mxu0 %v362_v15  ;;  %2072 = vmatprep.subr.mxu1 %v364_v18  ;;  %v1273_v19 = vpop.f32.mrf.mxu0  ;;  %v1350_v36 = vpop.f32.mrf.mxu1  ;;  %v777_v15 = vld [vmem:[%s5720_s21 + $0x12e0] sm:$0x7]  ;;  %v779_v18 = vld [vmem:[%s5720_s21 + $0x12f0] sm:$0x7]  ;;  %v748_v23 = vld [vmem:[%s5720_s21 + $0x11f8] sm:$0xff] }
 0x14f   : > { %1996 = vmatpush1.msra.mxu0 %v361_v17  ;;  %2073 = vmatpush1.msra.mxu1 %v363_v21  ;;  %2141 = vst [vmem:[#allocation2 + $0x48] sm:$0xff] %v1272_v31  ;;  %2143 = vst [vmem:[#allocation2 + $0x58] sm:$0xff] %v1349_v32  ;;  %v1274_v37 = vadd.f32 %v1273_v19, %v6261_v63  ;;  %v1351_v38 = vadd.f32 %v1350_v36, %v6261_v63  ;;  %v6558_v17 = vsub.s32 7, %v6427_v34  ;;  %v746_v21 = vld [vmem:[%s5720_s21 + $0x11e8] sm:$0xff]  ;;  %v745_v27 = vld [vmem:[%s5720_s21 + $0x11e0] sm:$0xff] }
 0x150   : > { %1997 = vmatprep.subr.mxu0 %v330_v28  ;;  %2074 = vmatprep.subr.mxu1 %v332_v30  ;;  %v747_v28 = vld [vmem:[%s5720_s21 + $0x11f0] sm:$0xff]  ;;  %v2681_v30 = vrot.slane %v6536_v2, %v6518_v46  ;;  %v714_v32 = vld [vmem:[%s5720_s21 + $0x10e8] sm:$0xff]  ;;  %v2669_v36 = vrot.slane %v6536_v2, %v6441_v40 }
 0x151   : > { %1998 = vmatpush1.msra.mxu0 %v329_v33  ;;  %2075 = vmatpush1.msra.mxu1 %v331_v35  ;;  %2142 = vst [vmem:[#allocation2 + $0x50] sm:$0xff] %v1274_v37  ;;  %2144 = vst [vmem:[#allocation2 + $0x60] sm:$0xff] %v1351_v38  ;;  %v2347_v31 = vrot.slane %v6465_v1, %v6558_v17  ;;  %v716_v33 = vld [vmem:[%s5720_s21 + $0x10f8] sm:$0xff]  ;;  %v713_v35 = vld [vmem:[%s5720_s21 + $0x10e0] sm:$0xff]  ;;  %v2689_v1 = vrot.slane %v6536_v2, %v6541_v7 }
 0x152   : > { %2456 = vrot.lane.b32.xlu0 %v2335_v39, %s5669_s16  ;;  %2450 = vrot.lane.b32.xlu1 %v2323_v25, %s5669_s16  ;;  %v1277_v48 = vpop.f32.mrf.mxu0  ;;  %v1354_v50 = vpop.f32.mrf.mxu1  ;;  %9993 = vst [vmem:[#allocation6_spill] sm:$0xff] %v6558_v17  ;;  %v715_v19 = vld [vmem:[%s5720_s21 + $0x10f0] sm:$0xff]  ;;  %v5655_v38 = vld [vmem:[%s9745_s1] sm:$0xff] }
 0x153   : > { %1999 = vmatprep.subr.mxu0 %v298_v41  ;;  %2076 = vmatprep.subr.mxu1 %v300_v42  ;;  %v1278_v53 = vadd.f32 %v1277_v48, %v6371_v49  ;;  %v1355_v54 = vadd.f32 %v1354_v50, %v6371_v49  ;;  %v2963_v37 = vld [vmem:[#allocation2 + $0x2] ss:$8 sm:$0xf0]  ;;  %v2697_v41 = vrot.slane %v6536_v2, %v6558_v17 }
 0x154   : > { %2000 = vmatpush1.msra.mxu0 %v297_v44  ;;  %2077 = vmatpush1.msra.mxu1 %v299_v45  ;;  %v1279_v56 = vpop.f32.mrf.mxu0  ;;  %v1356_v0 = vpop.f32.mrf.mxu1  ;;  %v2962_v39 = vld [vmem:[#allocation2 + $0x2] ss:$8 sm:$0xf]  ;;  %v2677_v42 = vrot.slane %v6536_v2, %v6470_v5  ;;  %v5657_v44 = vld [vmem:[%s9745_s1 + $0x10] sm:$0x1]  ;;  %v2693_v48 = vrot.slane %v6536_v2, %v6513_v43 }
 0x155   : > { %2001 = vmatprep.subr.mxu0 %v266_v29  ;;  %2078 = vmatprep.subr.mxu1 %v268_v47  ;;  %2173 = vst [vmem:[#allocation2 + $0x158] sm:$0x1] %v1278_v53  ;;  %2175 = vst [vmem:[#allocation2 + $0x168] sm:$0x1] %v1355_v54  ;;  %v1280_v61 = vadd.f32 %v1279_v56, %v6371_v49  ;;  %v1357_v62 = vadd.f32 %v1356_v0, %v6371_v49 }
 0x156   : > { %2002 = vmatpush1.msra.mxu0 %v265_v51  ;;  %2079 = vmatpush1.msra.mxu1 %v267_v52  ;;  %v2964_v25 = vor.u32 %v2963_v37, %v2962_v39  ;;  %v2685_v29 = vrot.slane %v6536_v2, %v6491_v22  ;;  %v3345_v51 = vld [vmem:[#allocation2 + $0x3] ss:$8 sm:$0xf0]  ;;  %v4257_v37 = vld [vmem:[#allocation2 + $0xe] ss:$8 sm:$0xf0] }
 0x157   : > { %2460 = vrot.lane.b32.xlu0 %v2343_v55, %s5669_s16  ;;  %2454 = vrot.lane.b32.xlu1 %v2331_v58, %s5669_s16  ;;  %2174 = vst [vmem:[#allocation2 + $0x160] sm:$0x1] %v1280_v61  ;;  %2176 = vst [vmem:[#allocation2 + $0x170] sm:$0x1] %v1357_v62 }
 0x158   : > { %2003 = vmatprep.subr.mxu0 %v234_v59  ;;  %2080 = vmatprep.subr.mxu1 %v236_v60  ;;  %v3019_v45 = vrot.slane %v2964_v25, %v6441_v40  ;;  %v3027_v47 = vrot.slane %v2964_v25, %v6470_v5  ;;  %v3035_v50 = vrot.slane %v2964_v25, %v6491_v22  ;;  %v3344_v53 = vld [vmem:[#allocation2 + $0x3] ss:$8 sm:$0xf]  ;;  %v4260_v24 = vld [vmem:[#allocation2 + $0x4e] ss:$8 sm:$0xf] }
 0x159   : > { %2004 = vmatpush1.msra.mxu0 %v233_v4  ;;  %2081 = vmatpush1.msra.mxu1 %v235_v6  ;;  %v3023_v3 = vrot.slane %v2964_v25, %v6494_v20  ;;  %v3346_v56 = vor.u32 %v3345_v51, %v3344_v53  ;;  %v3043_v0 = vrot.slane %v2964_v25, %v6513_v43 }
 0x15a   : > { %2005 = vmatprep.subr.mxu0 %v202_v8  ;;  %2082 = vmatprep.subr.mxu1 %v204_v9  ;;  %v3031_v57 = vrot.slane %v2964_v25, %v6518_v46  ;;  %v3039_v4 = vrot.slane %v2964_v25, %v6541_v7 }
 0x15b   : > { %2006 = vmatpush1.msra.mxu0 %v201_v10  ;;  %2083 = vmatpush1.msra.mxu1 %v203_v11  ;;  %v3373_v2 = vrot.slane %v3346_v56, %v6494_v20 }
 0x15c   : > { %2800 = vrot.lane.b32.xlu0 %v2673_v16, %s5670_s17  ;;  %2458 = vrot.lane.b32.xlu1 %v2339_v12, %s5669_s16 }
 0x15d   : > { %5622 = vmatprep.subr.msk.mxu0 %vm800_vm1, %v778_v13  ;;  %5626 = vmatprep.subr.msk.mxu1 %vm800_vm1, %v780_v14  ;;  %v3381_v13 = vrot.slane %v3346_v56, %v6518_v46  ;;  %v3047_v14 = vrot.slane %v2964_v25, %v6558_v17 }
 0x15e   : > { %5623 = vmatpush2.msk.msra.mxu0 %vm800_vm1, %v777_v15  ;;  %5627 = vmatpush2.msk.msra.mxu1 %vm800_vm1, %v779_v18  ;;  %v3389_v18 = vrot.slane %v3346_v56, %v6541_v7 }
 0x15f   : > { %2035 = vmatprep.subr.mxu0 %v746_v21  ;;  %2112 = vmatprep.subr.mxu1 %v748_v23  ;;  %v3369_v21 = vrot.slane %v3346_v56, %v6441_v40  ;;  %v3907_v23 = vld [vmem:[#allocation2 + $0xd] ss:$8 sm:$0xf0] }
 0x160   : > { %2036 = vmatpush2.msra.mxu0 %v745_v27  ;;  %2113 = vmatpush2.msra.mxu1 %v747_v28  ;;  %v3906_v27 = vld [vmem:[#allocation2 + $0xd] ss:$8 sm:$0xf] }
 0x161   : > { %2804 = vrot.lane.b32.xlu0 %v2681_v30, %s5670_s17  ;;  %2462 = vrot.lane.b32.xlu1 %v2347_v31, %s5669_s16  ;;  %v3908_v28 = vor.u32 %v3907_v23, %v3906_v27  ;;  %v3397_v30 = vrot.slane %v3346_v56, %v6558_v17  ;;  %v3377_v31 = vrot.slane %v3346_v56, %v6470_v5 }
 0x162   : > { %2037 = vmatprep.subr.mxu0 %v714_v32  ;;  %2114 = vmatprep.subr.mxu1 %v716_v33  ;;  %v3385_v33 = vrot.slane %v3346_v56, %v6491_v22 }
 0x163   : > { %2038 = vmatpush2.msra.mxu0 %v713_v35  ;;  %5624 = vmatprep.mubr.msk.f32.mxu0 %vm793_vm0, %v6412_v26  ;;  %v3931_v32 = vrot.slane %v3908_v28, %v6441_v40  ;;  %v3939_v35 = vrot.slane %v3908_v28, %v6470_v5  ;;  %v3943_v25 = vrot.slane %v3908_v28, %v6518_v46 }
 0x164   : > { %2115 = vmatpush2.msra.mxu1 %v715_v19  ;;  %5628 = vmatprep.mubr.msk.f32.mxu1 %vm793_vm0, %v6412_v26  ;;  %v5656_v26 = vld [vmem:[%s9745_s1 + $0x18] sm:$0x1]  ;;  %v3393_v19 = vrot.slane %v3346_v56, %v6513_v43  ;;  %v4606_v56 = vld [vmem:[#allocation2 + $0xf] ss:$8 sm:$0xf0] }
 0x165   : > { %2040 = vmatmul.mubr.f32.vlgmr.msra.gmra.mxu0 %v5655_v38  ;;  %2117 = vmatmul.mubr.f32.vlgmr.msra.gmra.mxu1 %v5655_v38  ;;  %v4256_v38 = vld [vmem:[#allocation2 + $0xe] ss:$8 sm:$0xf] }
 0x166   : > { %2808 = vrot.lane.b32.xlu0 %v2689_v1, %s5670_s17  ;;  %2798 = vrot.lane.b32.xlu1 %v2669_v36, %s5670_s17  ;;  %v3947_v1 = vrot.slane %v3908_v28, %v6491_v22  ;;  %v3935_v36 = vrot.slane %v3908_v28, %v6494_v20  ;;  %v4258_v39 = vor.u32 %v4257_v37, %v4256_v38 }
 0x167   : > { %5625 = vmatprep.mubr.msk.f32.mxu0 %vm793_vm0, %v5656_v26  ;;  %5629 = vmatprep.mubr.msk.f32.mxu1 %vm793_vm0, %v5656_v26  ;;  %v3955_v26 = vrot.slane %v3908_v28, %v6513_v43  ;;  %vm10120_vm0 = vcmask 7168  }
 0x168   : > { %v4301_v53 = vrot.slane %v4258_v39, %v6541_v7 }
 0x169   : > { %2046 = vmatmul.mubr.f32.gmra.mxu0 %v5657_v44  ;;  %2123 = vmatmul.mubr.f32.gmra.mxu1 %v5657_v44  ;;  %v4293_v44 = vrot.slane %v4258_v39, %v6518_v46 }
 0x16a   : > { %2812 = vrot.lane.b32.xlu0 %v2697_v41, %s5670_s17  ;;  %2802 = vrot.lane.b32.xlu1 %v2677_v42, %s5670_s17  ;;  %v4285_v41 = vrot.slane %v4258_v39, %v6494_v20  ;;  %v3951_v42 = vrot.slane %v3908_v28, %v6541_v7 }
 0x16e   : > { %3148 = vrot.lane.b32.xlu0 %v3019_v45, %s5671_s24  ;;  %2806 = vrot.lane.b32.xlu1 %v2685_v29, %s5670_s17  ;;  %v3959_v45 = vrot.slane %v3908_v28, %v6558_v17 }
 0x172   : > { %3152 = vrot.lane.b32.xlu0 %v3027_v47, %s5671_s24  ;;  %2810 = vrot.lane.b32.xlu1 %v2693_v48, %s5670_s17 }
 0x176   : > { %3156 = vrot.lane.b32.xlu0 %v3035_v50, %s5671_s24  ;;  %3150 = vrot.lane.b32.xlu1 %v3023_v3, %s5671_s24  ;;  %v1425_v52 = vpop.f32.mrf.mxu0 }
 0x177   : > { %v1426_v54 = vadd.f32 %v1425_v52, %v6261_v63  ;;  %v1502_v55 = vpop.f32.mrf.mxu1 }
 0x178   : > { %v1503_v58 = vadd.f32 %v1502_v55, %v6261_v63  ;;  %v1427_v59 = vpop.f32.mrf.mxu0 }
 0x179   : > { %2145 = vst [vmem:[#allocation2 + $0x68] sm:$0xff] %v1426_v54  ;;  %v1428_v60 = vadd.f32 %v1427_v59, %v6261_v63  ;;  %v1504_v61 = vpop.f32.mrf.mxu1  ;;  %v4281_v54 = vrot.slane %v4258_v39, %v6441_v40 }
 0x17a   : > { %3160 = vrot.lane.b32.xlu0 %v3043_v0, %s5671_s24  ;;  %3154 = vrot.lane.b32.xlu1 %v3031_v57, %s5671_s24  ;;  %2147 = vst [vmem:[#allocation2 + $0x78] sm:$0xff] %v1503_v58  ;;  %v1505_v62 = vadd.f32 %v1504_v61, %v6261_v63  ;;  %v4605_v57 = vld [vmem:[#allocation2 + $0xf] ss:$8 sm:$0xf]  ;;  %v4309_v61 = vrot.slane %v4258_v39, %v6558_v17 }
 0x17b   : > { %2146 = vst [vmem:[#allocation2 + $0x70] sm:$0xff] %v1428_v60  ;;  %v4607_v60 = vor.u32 %v4606_v56, %v4605_v57 }
 0x17c   : > { %2148 = vst [vmem:[#allocation2 + $0x80] sm:$0xff] %v1505_v62  ;;  %v1431_v6 = vpop.f32.mrf.mxu0  ;;  %v4289_v62 = vrot.slane %v4258_v39, %v6470_v5 }
 0x17d   : > { %v1432_v8 = vadd.f32 %v1431_v6, %v6371_v49  ;;  %v1508_v9 = vpop.f32.mrf.mxu1  ;;  %v4654_v27 = vrot.slane %v4607_v60, %v6513_v43  ;;  %v4642_v28 = vrot.slane %v4607_v60, %v6518_v46 }
 0x17e   : > { %3500 = vrot.lane.b32.xlu0 %v3373_v2, %s5672_s25  ;;  %3158 = vrot.lane.b32.xlu1 %v3039_v4, %s5671_s24  ;;  %v1509_v10 = vadd.f32 %v1508_v9, %v6371_v49  ;;  %v1433_v11 = vpop.f32.mrf.mxu0 }
 0x17f   : > { %2177 = vst [vmem:[#allocation2 + $0x178] sm:$0x1] %v1432_v8  ;;  %v1434_v16 = vadd.f32 %v1433_v11, %v6371_v49  ;;  %v1510_v12 = vpop.f32.mrf.mxu1  ;;  %v4297_v11 = vrot.slane %v4258_v39, %v6491_v22 }
 0x180   : > { %2179 = vst [vmem:[#allocation2 + $0x188] sm:$0x1] %v1509_v10  ;;  %v1511_v15 = vadd.f32 %v1510_v12, %v6371_v49  ;;  %v4630_v10 = vrot.slane %v4607_v60, %v6441_v40  ;;  %v4305_v12 = vrot.slane %v4258_v39, %v6513_v43 }
 0x181   : > { %2178 = vst [vmem:[#allocation2 + $0x180] sm:$0x1] %v1434_v16  ;;  %v4638_v16 = vrot.slane %v4607_v60, %v6470_v5 }
 0x182   : > { %3504 = vrot.lane.b32.xlu0 %v3381_v13, %s5672_s25  ;;  %3162 = vrot.lane.b32.xlu1 %v3047_v14, %s5671_s24  ;;  %2180 = vst [vmem:[#allocation2 + $0x190] sm:$0x1] %v1511_v15  ;;  %v4646_v13 = vrot.slane %v4607_v60, %v6491_v22  ;;  %v4634_v14 = vrot.slane %v4607_v60, %v6494_v20 }
 0x186   : > { %3508 = vrot.lane.b32.xlu0 %v3389_v18, %s5672_s25  ;;  %3498 = vrot.lane.b32.xlu1 %v3369_v21, %s5672_s25  ;;  %v4923_v18 = vld [vmem:[#allocation2 + $0x118] ss:$8 sm:$0xf0] }
 0x187   : > { %v4922_v21 = vld [vmem:[#allocation2 + $0x118] ss:$8 sm:$0xf] }
 0x188   : > { %v4924_v23 = vor.u32 %v4923_v18, %v4922_v21  ;;  %v2648_v18 = vld [vmem:[#allocation2 + $0x41] ss:$8 sm:$0xf] }
 0x18a   : > { %3512 = vrot.lane.b32.xlu0 %v3397_v30, %s5672_s25  ;;  %3502 = vrot.lane.b32.xlu1 %v3377_v31, %s5672_s25  ;;  %v4967_v37 = vrot.slane %v4924_v23, %v6541_v7  ;;  %v4947_v38 = vrot.slane %v4924_v23, %v6441_v40 }
 0x18e   : > { %4060 = vrot.lane.b32.xlu0 %v3931_v32, %s5668_s15  ;;  %3506 = vrot.lane.b32.xlu1 %v3385_v33, %s5672_s25  ;;  %v4951_v32 = vrot.slane %v4924_v23, %v6494_v20  ;;  %v4650_v33 = vrot.slane %v4607_v60, %v6541_v7 }
 0x192   : > { %4064 = vrot.lane.b32.xlu0 %v3939_v35, %s5668_s15  ;;  %3510 = vrot.lane.b32.xlu1 %v3393_v19, %s5672_s25 }
 0x196   : > { %4068 = vrot.lane.b32.xlu0 %v3947_v1, %s5668_s15  ;;  %4062 = vrot.lane.b32.xlu1 %v3935_v36, %s5668_s15  ;;  %v4959_v1 = vrot.slane %v4924_v23, %v6518_v46  ;;  %v4658_v36 = vrot.slane %v4607_v60, %v6558_v17  ;;  %v4971_v60 = vrot.slane %v4924_v23, %v6513_v43 }
 0x19a   : > { %4072 = vrot.lane.b32.xlu0 %v3955_v26, %s5668_s15  ;;  %4066 = vrot.lane.b32.xlu1 %v3943_v25, %s5668_s15  ;;  %v2267_v25 = vld [vmem:[#allocation2 + $0x40] ss:$8 sm:$0xf0] }
 0x19e   : > { %4412 = vrot.lane.b32.xlu0 %v4285_v41, %s5669_s16  ;;  %4070 = vrot.lane.b32.xlu1 %v3951_v42, %s5668_s15  ;;  %v2266_v41 = vld [vmem:[#allocation2 + $0x40] ss:$8 sm:$0xf] }
 0x19f   : > { %v6731_v42 = vor.u32 %v2267_v25, %v2266_v41 }
 0x1a0   : > { %v1579_v29 = vpop.f32.mrf.mxu0 }
 0x1a1   : > { %v1580_v47 = vadd.f32 %v1579_v29, %v6261_v63  ;;  %v1656_v48 = vpop.f32.mrf.mxu1 }
 0x1a2   : > { %4416 = vrot.lane.b32.xlu0 %v4293_v44, %s5669_s16  ;;  %4074 = vrot.lane.b32.xlu1 %v3959_v45, %s5668_s15  ;;  %v1657_v50 = vadd.f32 %v1656_v48, %v6261_v63  ;;  %v1581_v3 = vpop.f32.mrf.mxu0  ;;  %v4975_v44 = vrot.slane %v4924_v23, %v6558_v17  ;;  %v4955_v45 = vrot.slane %v4924_v23, %v6470_v5 }
 0x1a3   : > { %2149 = vst [vmem:[#allocation2 + $0x88] sm:$0xff] %v1580_v47  ;;  %v1582_v51 = vadd.f32 %v1581_v3, %v6261_v63  ;;  %v1658_v52 = vpop.f32.mrf.mxu1 }
 0x1a4   : > { %2151 = vst [vmem:[#allocation2 + $0x98] sm:$0xff] %v1657_v50  ;;  %v1659_v55 = vadd.f32 %v1658_v52, %v6261_v63  ;;  %v4963_v52 = vrot.slane %v4924_v23, %v6491_v22 }
 0x1a5   : > { %2150 = vst [vmem:[#allocation2 + $0x90] sm:$0xff] %v1582_v51  ;;  %v2351_v51 = vrot.slane %v6731_v42, %v6441_v40 }
 0x1a6   : > { %4420 = vrot.lane.b32.xlu0 %v4301_v53, %s5669_s16  ;;  %4410 = vrot.lane.b32.xlu1 %v4281_v54, %s5669_s16  ;;  %2152 = vst [vmem:[#allocation2 + $0xa0] sm:$0xff] %v1659_v55  ;;  %v1585_v0 = vpop.f32.mrf.mxu0 }
 0x1a7   : > { %v1586_v58 = vadd.f32 %v1585_v0, %v6371_v49  ;;  %v1662_v59 = vpop.f32.mrf.mxu1 }
 0x1a8   : > { %v1663_v2 = vadd.f32 %v1662_v59, %v6371_v49  ;;  %v1587_v4 = vpop.f32.mrf.mxu0  ;;  %v2359_v59 = vrot.slane %v6731_v42, %v6470_v5 }
 0x1a9   : > { %2181 = vst [vmem:[#allocation2 + $0x198] sm:$0x1] %v1586_v58  ;;  %v1588_v6 = vadd.f32 %v1587_v4, %v6371_v49  ;;  %v1664_v8 = vpop.f32.mrf.mxu1 }
 0x1aa   : > { %4424 = vrot.lane.b32.xlu0 %v4309_v61, %s5669_s16  ;;  %4414 = vrot.lane.b32.xlu1 %v4289_v62, %s5669_s16  ;;  %2183 = vst [vmem:[#allocation2 + $0x1a8] sm:$0x1] %v1663_v2  ;;  %v1665_v9 = vadd.f32 %v1664_v8, %v6371_v49 }
 0x1ab   : > { %2182 = vst [vmem:[#allocation2 + $0x1a0] sm:$0x1] %v1588_v6 }
 0x1ac   : > { %2184 = vst [vmem:[#allocation2 + $0x1b0] sm:$0x1] %v1665_v9 }
 0x1ae   : > { %4759 = vrot.lane.b32.xlu0 %v4630_v10, %s5670_s17  ;;  %4418 = vrot.lane.b32.xlu1 %v4297_v11, %s5669_s16  ;;  %v2367_v11 = vrot.slane %v6731_v42, %v6491_v22 }
 0x1b2   : > { %4763 = vrot.lane.b32.xlu0 %v4638_v16, %s5670_s17  ;;  %4422 = vrot.lane.b32.xlu1 %v4305_v12, %s5669_s16  ;;  %v2355_v16 = vrot.slane %v6731_v42, %v6494_v20 }
 0x1b4   : > { %v6699_v15 = vpop.permute.xlu0 %4124 }
 0x1b5   : > { %9994 = vst [vmem:[#allocation7_spill] sm:$0xff] %v6699_v15 }
 0x1b6   : > { %4767 = vrot.lane.b32.xlu0 %v4646_v13, %s5670_s17  ;;  %4761 = vrot.lane.b32.xlu1 %v4634_v14, %s5670_s17  ;;  %v2649_v13 = vld [vmem:[#allocation2 + $0x41] ss:$8 sm:$0xf0] }
 0x1b7   : > { %v2650_v21 = vor.u32 %v2649_v13, %v2648_v18 }
 0x1b9   : > { %v6705_v30 = vpop.permute.xlu1 %4474  ;;  %v6707_v31 = vpop.permute.xlu0 %4823  ;;  %v2713_v41 = vrot.slane %v2650_v21, %v6518_v46 }
 0x1ba   : > { %9995 = vst [vmem:[#allocation8_spill] sm:$0xff] %v6705_v30  ;;  %9996 = vst [vmem:[#allocation9_spill] sm:$0xff] %v6707_v31  ;;  %4771 = vrot.lane.b32.xlu0 %v4654_v27, %s5670_s17  ;;  %4765 = vrot.lane.b32.xlu1 %v4642_v28, %s5670_s17  ;;  %v2375_v28 = vrot.slane %v6731_v42, %v6513_v43 }
 0x1be   : > { %5078 = vrot.lane.b32.xlu0 %v4951_v32, %s5671_s24  ;;  %4769 = vrot.lane.b32.xlu1 %v4650_v33, %s5670_s17  ;;  %v2363_v32 = vrot.slane %v6731_v42, %v6518_v46 }
 0x1bf   : > { %v6715_v35 = vpop.permute.xlu0 %2452  ;;  %v6717_v19 = vpop.permute.xlu1 %2448 }
 0x1c2   : > { %5082 = vrot.lane.b32.xlu0 %v4959_v1, %s5671_s24  ;;  %4773 = vrot.lane.b32.xlu1 %v4658_v36, %s5670_s17  ;;  %v2705_v36 = vrot.slane %v2650_v21, %v6494_v20 }
 0x1c4   : > { %v6725_v39 = vpop.permute.xlu0 %2456  ;;  %v6727_v26 = vpop.permute.xlu1 %2450 }
 0x1c6   : > { %5086 = vrot.lane.b32.xlu0 %v4967_v37, %s5671_s24  ;;  %5076 = vrot.lane.b32.xlu1 %v4947_v38, %s5671_s24  ;;  %v2371_v37 = vrot.slane %v6731_v42, %v6541_v7 }
 0x1c9   : > { %v6735_v29 = vpop.permute.xlu0 %2460  ;;  %v6737_v47 = vpop.permute.xlu1 %2454 }
 0x1ca   : > { %5090 = vrot.lane.b32.xlu0 %v4975_v44, %s5671_s24  ;;  %5080 = vrot.lane.b32.xlu1 %v4955_v45, %s5671_s24  ;;  %v1733_v48 = vpop.f32.mrf.mxu0  ;;  %v2379_v44 = vrot.slane %v6731_v42, %v6558_v17 }
 0x1cb   : > { %v1734_v50 = vadd.f32 %v1733_v48, %v6261_v63  ;;  %v1810_v3 = vpop.f32.mrf.mxu1 }
 0x1cc   : > { %v1811_v53 = vadd.f32 %v1810_v3, %v6261_v63  ;;  %v1735_v54 = vpop.f32.mrf.mxu0  ;;  %v2701_v3 = vrot.slane %v2650_v21, %v6441_v40 }
 0x1cd   : > { %2153 = vst [vmem:[#allocation2 + $0xa8] sm:$0xff] %v1734_v50  ;;  %v1736_v55 = vadd.f32 %v1735_v54, %v6261_v63  ;;  %v1812_v56 = vpop.f32.mrf.mxu1  ;;  %v2721_v50 = vrot.slane %v2650_v21, %v6541_v7 }
 0x1ce   : > { %2464 = vrot.lane.b32.xlu0 %v2351_v51, %s5669_s16  ;;  %5084 = vrot.lane.b32.xlu1 %v4963_v52, %s5671_s24  ;;  %v6749_v0 = vpop.permute.xlu0 %2800  ;;  %v6751_v57 = vpop.permute.xlu1 %2458  ;;  %2155 = vst [vmem:[#allocation2 + $0xb8] sm:$0xff] %v1811_v53  ;;  %v1813_v58 = vadd.f32 %v1812_v56, %v6261_v63  ;;  %v2967_v51 = vld [vmem:[#allocation2 + $0x42] ss:$8 sm:$0xf0]  ;;  %v2709_v56 = vrot.slane %v2650_v21, %v6470_v5 }
 0x1cf   : > { %2154 = vst [vmem:[#allocation2 + $0xb0] sm:$0xff] %v1736_v55  ;;  %v2966_v52 = vld [vmem:[#allocation2 + $0x42] ss:$8 sm:$0xf]  ;;  %v2729_v55 = vrot.slane %v2650_v21, %v6558_v17 }
 0x1d0   : > { %2156 = vst [vmem:[#allocation2 + $0xc0] sm:$0xff] %v1813_v58  ;;  %v1739_v61 = vpop.f32.mrf.mxu0  ;;  %v6809_v53 = vor.u32 %v2967_v51, %v2966_v52 }
 0x1d1   : > { %v1740_v62 = vadd.f32 %v1739_v61, %v6371_v49  ;;  %v1816_v2 = vpop.f32.mrf.mxu1  ;;  %v2717_v61 = vrot.slane %v2650_v21, %v6491_v22 }
 0x1d2   : > { %2468 = vrot.lane.b32.xlu0 %v2359_v59, %s5669_s16  ;;  %5088 = vrot.lane.b32.xlu1 %v4971_v60, %s5671_s24  ;;  %v1817_v4 = vadd.f32 %v1816_v2, %v6371_v49  ;;  %v1741_v6 = vpop.f32.mrf.mxu0  ;;  %v3051_v60 = vrot.slane %v6809_v53, %v6441_v40  ;;  %v3055_v13 = vrot.slane %v6809_v53, %v6494_v20 }
 0x1d3   : > { %v6761_v8 = vpop.permute.xlu0 %2804  ;;  %v6763_v9 = vpop.permute.xlu1 %2462  ;;  %2185 = vst [vmem:[#allocation2 + $0x1b8] sm:$0x1] %v1740_v62  ;;  %v1742_v10 = vadd.f32 %v1741_v6, %v6371_v49  ;;  %v2725_v6 = vrot.slane %v2650_v21, %v6513_v43  ;;  %v3063_v51 = vrot.slane %v6809_v53, %v6518_v46 }
 0x1d4   : > { %9997 = vst [vmem:[#allocation10_spill] sm:$0xff] %v6763_v9  ;;  %2187 = vst [vmem:[#allocation2 + $0x1c8] sm:$0x1] %v1817_v4  ;;  %v1818_v12 = vpop.f32.mrf.mxu1  ;;  %v3059_v4 = vrot.slane %v6809_v53, %v6470_v5 }
 0x1d5   : > { %2186 = vst [vmem:[#allocation2 + $0x1c0] sm:$0x1] %v1742_v10  ;;  %v1819_v14 = vadd.f32 %v1818_v12, %v6371_v49  ;;  %v3349_v10 = vld [vmem:[#allocation2 + $0x43] ss:$8 sm:$0xf0]  ;;  %v3067_v12 = vrot.slane %v6809_v53, %v6491_v22 }
 0x1d6   : > { %2472 = vrot.lane.b32.xlu0 %v2367_v11, %s5669_s16  ;;  %2466 = vrot.lane.b32.xlu1 %v2355_v16, %s5669_s16 }
 0x1d7   : > { %2188 = vst [vmem:[#allocation2 + $0x1d0] sm:$0x1] %v1819_v14 }
 0x1d8   : > { %v6773_v23 = vpop.permute.xlu0 %2808  ;;  %v6775_v27 = vpop.permute.xlu1 %2798 }
 0x1da   : > { %2476 = vrot.lane.b32.xlu0 %v2375_v28, %s5669_s16  ;;  %2470 = vrot.lane.b32.xlu1 %v2363_v32, %s5669_s16  ;;  %v3348_v28 = vld [vmem:[#allocation2 + $0x43] ss:$8 sm:$0xf] }
 0x1dc   : > { %v6783_v33 = vpop.permute.xlu0 %2812  ;;  %v6785_v1 = vpop.permute.xlu1 %2802 }
 0x1dd   : > { %9998 = vst [vmem:[#allocation11_spill] sm:$0xff] %v6783_v33 }
 0x1de   : > { %2816 = vrot.lane.b32.xlu0 %v2705_v36, %s5670_s17  ;;  %2474 = vrot.lane.b32.xlu1 %v2371_v37, %s5669_s16  ;;  %v6849_v36 = vor.u32 %v3349_v10, %v3348_v28 }
 0x1e0   : > { %v6792_v38 = vpop.permute.xlu0 %3148  ;;  %v6794_v25 = vpop.permute.xlu1 %2806  ;;  %v3405_v10 = vrot.slane %v6849_v36, %v6494_v20 }
 0x1e2   : > { %2820 = vrot.lane.b32.xlu0 %v2713_v41, %s5670_s17  ;;  %2478 = vrot.lane.b32.xlu1 %v2379_v44, %s5669_s16 }
 0x1e4   : > { %v6801_v45 = vpop.permute.xlu0 %3152  ;;  %v6803_v48 = vpop.permute.xlu1 %2810 }
 0x1e6   : > { %2824 = vrot.lane.b32.xlu0 %v2721_v50, %s5670_s17  ;;  %2814 = vrot.lane.b32.xlu1 %v2701_v3, %s5670_s17  ;;  %v3075_v3 = vrot.slane %v6809_v53, %v6513_v43 }
 0x1e8   : > { %v6811_v42 = vpop.permute.xlu0 %3156  ;;  %v6813_v54 = vpop.permute.xlu1 %3150 }
 0x1ea   : > { %2828 = vrot.lane.b32.xlu0 %v2729_v55, %s5670_s17  ;;  %2818 = vrot.lane.b32.xlu1 %v2709_v56, %s5670_s17 }
 0x1ec   : > { %v6819_v58 = vpop.permute.xlu0 %3160  ;;  %v6821_v59 = vpop.permute.xlu1 %3154 }
 0x1ee   : > { %3164 = vrot.lane.b32.xlu0 %v3051_v60, %s5671_s24  ;;  %2822 = vrot.lane.b32.xlu1 %v2717_v61, %s5670_s17 }
 0x1f0   : > { %v6828_v62 = vpop.permute.xlu0 %3500  ;;  %v6830_v2 = vpop.permute.xlu1 %3158 }
 0x1f2   : > { %3168 = vrot.lane.b32.xlu0 %v3059_v4, %s5671_s24  ;;  %2826 = vrot.lane.b32.xlu1 %v2725_v6, %s5670_s17 }
 0x1f4   : > { %v6837_v11 = vpop.permute.xlu0 %3504  ;;  %v6839_v16 = vpop.permute.xlu1 %3162 }
 0x1f5   : > { %v1887_v14 = vpop.f32.mrf.mxu0  ;;  %v1964_v18 = vpop.f32.mrf.mxu1 }
 0x1f6   : > { %3172 = vrot.lane.b32.xlu0 %v3067_v12, %s5671_s24  ;;  %3166 = vrot.lane.b32.xlu1 %v3055_v13, %s5671_s24  ;;  %v1888_v21 = vadd.f32 %v1887_v14, %v6261_v63  ;;  %v1965_v32 = vadd.f32 %v1964_v18, %v6261_v63  ;;  %v3071_v12 = vrot.slane %v6809_v53, %v6541_v7 }
 0x1f7   : > { %v1889_v37 = vpop.f32.mrf.mxu0  ;;  %v1966_v41 = vpop.f32.mrf.mxu1 }
 0x1f8   : > { %v6851_v44 = vpop.permute.xlu0 %3508  ;;  %v6853_v50 = vpop.permute.xlu1 %3498  ;;  %2157 = vst [vmem:[#allocation2 + $0xc8] sm:$0xff] %v1888_v21  ;;  %2159 = vst [vmem:[#allocation2 + $0xd8] sm:$0xff] %v1965_v32  ;;  %v1890_v52 = vadd.f32 %v1889_v37, %v6261_v63  ;;  %v1967_v55 = vadd.f32 %v1966_v41, %v6261_v63  ;;  %v3413_v41 = vrot.slane %v6849_v36, %v6518_v46 }
 0x1f9   : > { %9999 = vst [vmem:[#allocation12_spill] sm:$0xff] %v6851_v44 }
 0x1fa   : > { %3176 = vrot.lane.b32.xlu0 %v3075_v3, %s5671_s24  ;;  %3170 = vrot.lane.b32.xlu1 %v3063_v51, %s5671_s24  ;;  %2158 = vst [vmem:[#allocation2 + $0xd0] sm:$0xff] %v1890_v52  ;;  %2160 = vst [vmem:[#allocation2 + $0xe0] sm:$0xff] %v1967_v55  ;;  %v1893_v56 = vpop.f32.mrf.mxu0  ;;  %v3079_v3 = vrot.slane %v6809_v53, %v6558_v17  ;;  %v3421_v55 = vrot.slane %v6849_v36, %v6541_v7  ;;  %v3910_v53 = vld [vmem:[#allocation2 + $0x4d] ss:$8 sm:$0xf] }
 0x1fb   : > { %v1894_v60 = vadd.f32 %v1893_v56, %v6371_v49  ;;  %v1970_v61 = vpop.f32.mrf.mxu1  ;;  %v3401_v56 = vrot.slane %v6849_v36, %v6441_v40 }
 0x1fc   : > { %v6864_v4 = vpop.permute.xlu0 %3512  ;;  %v6866_v6 = vpop.permute.xlu1 %3502  ;;  %v1971_v13 = vadd.f32 %v1970_v61, %v6371_v49 }
 0x1fd   : > { %10000 = vst [vmem:[#allocation13_spill] sm:$0xff] %v6864_v4  ;;  %2189 = vst [vmem:[#allocation2 + $0x1d8] sm:$0x1] %v1894_v60  ;;  %v1895_v14 = vpop.f32.mrf.mxu0  ;;  %v1972_v18 = vpop.f32.mrf.mxu1  ;;  %v3911_v60 = vld [vmem:[#allocation2 + $0x4d] ss:$8 sm:$0xf0] }
 0x1fe   : > { %3516 = vrot.lane.b32.xlu0 %v3405_v10, %s5672_s25  ;;  %3174 = vrot.lane.b32.xlu1 %v3071_v12, %s5671_s24  ;;  %2191 = vst [vmem:[#allocation2 + $0x1e8] sm:$0x1] %v1971_v13  ;;  %v1896_v28 = vadd.f32 %v1895_v14, %v6371_v49  ;;  %v1973_v21 = vadd.f32 %v1972_v18, %v6371_v49 }
 0x1ff   : > { %v3912_v61 = vor.u32 %v3911_v60, %v3910_v53  ;;  %v3429_v13 = vrot.slane %v6849_v36, %v6558_v17  ;;  %v3409_v14 = vrot.slane %v6849_v36, %v6470_v5  ;;  %v3425_v60 = vrot.slane %v6849_v36, %v6513_v43 }
 0x200   : > { %v6877_v32 = vpop.permute.xlu0 %4060  ;;  %v6879_v37 = vpop.permute.xlu1 %3506  ;;  %2190 = vst [vmem:[#allocation2 + $0x1e0] sm:$0x1] %v1896_v28  ;;  %2192 = vst [vmem:[#allocation2 + $0x1f0] sm:$0x1] %v1973_v21 }
 0x201   : > { %10001 = vst [vmem:[#allocation14_spill] sm:$0xff] %v6877_v32  ;;  %v3963_v21 = vrot.slane %v3912_v61, %v6441_v40  ;;  %v3975_v30 = vrot.slane %v3912_v61, %v6518_v46 }
 0x202   : > { %3520 = vrot.lane.b32.xlu0 %v3413_v41, %s5672_s25  ;;  %3178 = vrot.lane.b32.xlu1 %v3079_v3, %s5671_s24  ;;  %v3417_v41 = vrot.slane %v6849_v36, %v6491_v22 }
 0x204   : > { %v6887_v51 = vpop.permute.xlu0 %4064  ;;  %v6889_v52 = vpop.permute.xlu1 %3510 }
 0x205   : > { %10002 = vst [vmem:[#allocation15_spill] sm:$0xff] %v6887_v51  ;;  %10003 = vst [vmem:[#allocation16_spill] sm:$0xff] %v6889_v52  ;;  %v3915_v51 = vld [vmem:[#allocation2 + $0x8d] ss:$8 sm:$0xf0]  ;;  %v2516_v52 = vsel %vm9835_vm2, %v6727_v26, %v6715_v35 }
 0x206   : > { %3524 = vrot.lane.b32.xlu0 %v3421_v55, %s5672_s25  ;;  %3514 = vrot.lane.b32.xlu1 %v3401_v56, %s5672_s25  ;;  %v3971_v56 = vrot.slane %v3912_v61, %v6470_v5 }
 0x208   : > { %v6897_v10 = vpop.permute.xlu0 %4068  ;;  %v6899_v12 = vpop.permute.xlu1 %4062 }
 0x209   : > { %10004 = vst [vmem:[#allocation17_spill] sm:$0xff] %v6897_v10  ;;  %10005 = vst [vmem:[#allocation18_spill] sm:$0xff] %v6899_v12  ;;  %v5673_v12 = vmov 1966171168  }
 0x20a   : > { %3528 = vrot.lane.b32.xlu0 %v3429_v13, %s5672_s25  ;;  %3518 = vrot.lane.b32.xlu1 %v3409_v14, %s5672_s25  ;;  %v3979_v14 = vrot.slane %v3912_v61, %v6491_v22  ;;  %v7292_v4 = vunpack.c.l.s4 %v5673_v12  ;;  %v2519_v12 = vsel %vm9835_vm2, %v6725_v39, %v6751_v57 }
 0x20c   : > { %v6907_v18 = vpop.permute.xlu0 %4072  ;;  %v6909_v28 = vpop.permute.xlu1 %4066  ;;  %10097 = vst [vmem:[#allocation87_spill] sm:$0xff] %v7292_v4 }
 0x20d   : > { %10006 = vst [vmem:[#allocation19_spill] sm:$0xff] %v6907_v18  ;;  %10007 = vst [vmem:[#allocation20_spill] sm:$0xff] %v6909_v28  ;;  %v10083_v28 = vmov 0 }
 0x20e   : > { %4076 = vrot.lane.b32.xlu0 %v3963_v21, %s5668_s15  ;;  %3522 = vrot.lane.b32.xlu1 %v3417_v41, %s5672_s25  ;;  %v3967_v21 = vrot.slane %v3912_v61, %v6494_v20  ;;  %v4261_v41 = vld [vmem:[#allocation2 + $0x4e] ss:$8 sm:$0xf0] }
 0x20f   : > { %v6933_v31 = vor.u32 %v4261_v41, %v4260_v24 }
 0x210   : > { %v6916_v3 = vpop.permute.xlu0 %4412  ;;  %v6918_v55 = vpop.permute.xlu1 %4070 }
 0x211   : > { %10008 = vst [vmem:[#allocation21_spill] sm:$0xff] %v6916_v3  ;;  %10009 = vst [vmem:[#allocation22_spill] sm:$0xff] %v6918_v55  ;;  %v4317_v24 = vrot.slane %v6933_v31, %v6494_v20  ;;  %v4321_v18 = vrot.slane %v6933_v31, %v6470_v5 }
 0x212   : > { %4080 = vrot.lane.b32.xlu0 %v3971_v56, %s5668_s15  ;;  %3526 = vrot.lane.b32.xlu1 %v3425_v60, %s5672_s25  ;;  %v3987_v60 = vrot.slane %v3912_v61, %v6513_v43 }
 0x214   : > { %v6925_v53 = vpop.permute.xlu0 %4416  ;;  %v6927_v13 = vpop.permute.xlu1 %4074 }
 0x215   : > { %10010 = vst [vmem:[#allocation23_spill] sm:$0xff] %v6925_v53  ;;  %10011 = vst [vmem:[#allocation24_spill] sm:$0xff] %v6927_v13 }
 0x216   : > { %4084 = vrot.lane.b32.xlu0 %v3979_v14, %s5668_s15  ;;  %4078 = vrot.lane.b32.xlu1 %v3967_v21, %s5668_s15  ;;  %v3983_v21 = vrot.slane %v3912_v61, %v6541_v7 }
 0x218   : > { %v6935_v36 = vpop.permute.xlu0 %4420  ;;  %v6937_v56 = vpop.permute.xlu1 %4410 }
 0x219   : > { %10012 = vst [vmem:[#allocation25_spill] sm:$0xff] %v6935_v36  ;;  %10013 = vst [vmem:[#allocation26_spill] sm:$0xff] %v6937_v56 }
 0x21a   : > { %4088 = vrot.lane.b32.xlu0 %v3987_v60, %s5668_s15  ;;  %4082 = vrot.lane.b32.xlu1 %v3975_v30, %s5668_s15  ;;  %v4325_v30 = vrot.slane %v6933_v31, %v6518_v46  ;;  %v3991_v60 = vrot.slane %v3912_v61, %v6558_v17 }
 0x21c   : > { %v6943_v15 = vpop.permute.xlu0 %4424  ;;  %v6945_v14 = vpop.permute.xlu1 %4414 }
 0x21d   : > { %10014 = vst [vmem:[#allocation27_spill] sm:$0xff] %v6943_v15  ;;  %10015 = vst [vmem:[#allocation28_spill] sm:$0xff] %v6945_v14 }
 0x21e   : > { %4428 = vrot.lane.b32.xlu0 %v4317_v24, %s5669_s16  ;;  %4086 = vrot.lane.b32.xlu1 %v3983_v21, %s5668_s15  ;;  %v4333_v24 = vrot.slane %v6933_v31, %v6541_v7  ;;  %v4313_v21 = vrot.slane %v6933_v31, %v6441_v40 }
 0x220   : > { %v6952_v41 = vpop.permute.xlu0 %4759  ;;  %v6954_v34 = vpop.permute.xlu1 %4418 }
 0x221   : > { %10016 = vst [vmem:[#allocation29_spill] sm:$0xff] %v6952_v41  ;;  %10017 = vst [vmem:[#allocation30_spill] sm:$0xff] %v6954_v34  ;;  %v4610_v41 = vld [vmem:[#allocation2 + $0x4f] ss:$8 sm:$0xf0] }
 0x222   : > { %4432 = vrot.lane.b32.xlu0 %v4325_v30, %s5669_s16  ;;  %4090 = vrot.lane.b32.xlu1 %v3991_v60, %s5668_s15  ;;  %v4609_v30 = vld [vmem:[#allocation2 + $0x4f] ss:$8 sm:$0xf] }
 0x224   : > { %v6961_v15 = vpop.permute.xlu0 %4763  ;;  %v6963_v36 = vpop.permute.xlu1 %4422 }
 0x225   : > { %10018 = vst [vmem:[#allocation31_spill] sm:$0xff] %v6961_v15  ;;  %10019 = vst [vmem:[#allocation32_spill] sm:$0xff] %v6963_v36  ;;  %v2041_v34 = vpop.f32.mrf.mxu0  ;;  %v2118_v53 = vpop.f32.mrf.mxu1  ;;  %v6973_v36 = vor.u32 %v4610_v41, %v4609_v30 }
 0x226   : > { %v2042_v14 = vadd.f32 %v2041_v34, %v6261_v63  ;;  %v2119_v61 = vadd.f32 %v2118_v53, %v6261_v63  ;;  %4436 = vrot.lane.b32.xlu0 %v4333_v24, %s5669_s16  ;;  %4426 = vrot.lane.b32.xlu1 %v4313_v21, %s5669_s16  ;;  %v4341_v53 = vrot.slane %v6933_v31, %v6558_v17 }
 0x227   : > { %v2043_v60 = vpop.f32.mrf.mxu0  ;;  %v2120_v15 = vpop.f32.mrf.mxu1 }
 0x228   : > { %2161 = vst [vmem:[#allocation2 + $0xe8] sm:$0xff] %v2042_v14  ;;  %2163 = vst [vmem:[#allocation2 + $0xf8] sm:$0xff] %v2119_v61  ;;  %v2044_v56 = vadd.f32 %v2043_v60, %v6261_v63  ;;  %v2121_v3 = vadd.f32 %v2120_v15, %v6261_v63  ;;  %v6977_v13 = vpop.permute.xlu0 %4767  ;;  %v6979_v34 = vpop.permute.xlu1 %4761 }
 0x229   : > { %10020 = vst [vmem:[#allocation33_spill] sm:$0xff] %v6977_v13  ;;  %10021 = vst [vmem:[#allocation34_spill] sm:$0xff] %v6979_v34  ;;  %v2047_v24 = vpop.f32.mrf.mxu0  ;;  %v2124_v21 = vpop.f32.mrf.mxu1 }
 0x22a   : > { %2162 = vst [vmem:[#allocation2 + $0xf0] sm:$0xff] %v2044_v56  ;;  %2164 = vst [vmem:[#allocation2 + $0x100] sm:$0xff] %v2121_v3  ;;  %v2048_v14 = vadd.f32 %v2047_v24, %v6371_v49  ;;  %v2125_v41 = vadd.f32 %v2124_v21, %v6371_v49  ;;  %4440 = vrot.lane.b32.xlu0 %v4341_v53, %s5669_s16  ;;  %4430 = vrot.lane.b32.xlu1 %v4321_v18, %s5669_s16 }
 0x22b   : > { %v2049_v63 = vpop.f32.mrf.mxu0  ;;  %v2126_v15 = vpop.f32.mrf.mxu1  ;;  %v4662_v3 = vrot.slane %v6973_v36, %v6441_v40  ;;  %v4329_v53 = vrot.slane %v6933_v31, %v6491_v22  ;;  %v4337_v21 = vrot.slane %v6933_v31, %v6513_v43 }
 0x22c   : > { %2193 = vst [vmem:[#allocation2 + $0x1f8] sm:$0x1] %v2048_v14  ;;  %2195 = vst [vmem:[#allocation2 + $0x208] sm:$0x1] %v2125_v41  ;;  %v2050_v61 = vadd.f32 %v2049_v63, %v6371_v49  ;;  %v2127_v30 = vadd.f32 %v2126_v15, %v6371_v49  ;;  %v6991_v60 = vpop.permute.xlu0 %4771  ;;  %v6993_v56 = vpop.permute.xlu1 %4765  ;;  %v4670_v49 = vrot.slane %v6973_v36, %v6470_v5 }
 0x22d   : > { %10022 = vst [vmem:[#allocation35_spill] sm:$0xff] %v6991_v60  ;;  %10023 = vst [vmem:[#allocation36_spill] sm:$0xff] %v6993_v56  ;;  %v4678_v63 = vrot.slane %v6973_v36, %v6491_v22  ;;  %v4927_v15 = vld [vmem:[#allocation2 + $0x158] ss:$8 sm:$0xf0] }
 0x22e   : > { %2194 = vst [vmem:[#allocation2 + $0x200] sm:$0x1] %v2050_v61  ;;  %2196 = vst [vmem:[#allocation2 + $0x210] sm:$0x1] %v2127_v30  ;;  %4775 = vrot.lane.b32.xlu0 %v4662_v3, %s5670_s17  ;;  %4434 = vrot.lane.b32.xlu1 %v4329_v53, %s5669_s16  ;;  %v4666_v61 = vrot.slane %v6973_v36, %v6494_v20 }
 0x22f   : > { %v4926_v30 = vld [vmem:[#allocation2 + $0x158] ss:$8 sm:$0xf]  ;;  %v3694_v56 = vld [vmem:[#allocation2 + $0xc] ss:$8 sm:$0xf] }
 0x230   : > { %v7001_v18 = vpop.permute.xlu0 %5078  ;;  %v7003_v24 = vpop.permute.xlu1 %4769  ;;  %v4928_v31 = vor.u32 %v4927_v15, %v4926_v30  ;;  %v2270_v60 = vld [vmem:[#allocation2 + $0x80] ss:$8 sm:$0xf] }
 0x231   : > { %10024 = vst [vmem:[#allocation37_spill] sm:$0xff] %v7001_v18  ;;  %10025 = vst [vmem:[#allocation38_spill] sm:$0xff] %v7003_v24 }
 0x232   : > { %4779 = vrot.lane.b32.xlu0 %v4670_v49, %s5670_s17  ;;  %4438 = vrot.lane.b32.xlu1 %v4337_v21, %s5669_s16  ;;  %v4686_v49 = vrot.slane %v6973_v36, %v6513_v43  ;;  %v4674_v21 = vrot.slane %v6973_v36, %v6518_v46  ;;  %v4983_v15 = vrot.slane %v4928_v31, %v6494_v20 }
 0x233   : > { %v4979_v24 = vrot.slane %v4928_v31, %v6441_v40 }
 0x234   : > { %v7011_v14 = vpop.permute.xlu0 %5082  ;;  %v7013_v41 = vpop.permute.xlu1 %4773 }
 0x235   : > { %10026 = vst [vmem:[#allocation39_spill] sm:$0xff] %v7011_v14  ;;  %10027 = vst [vmem:[#allocation40_spill] sm:$0xff] %v7013_v41 }
 0x236   : > { %4783 = vrot.lane.b32.xlu0 %v4678_v63, %s5670_s17  ;;  %4777 = vrot.lane.b32.xlu1 %v4666_v61, %s5670_s17  ;;  %v4682_v61 = vrot.slane %v6973_v36, %v6541_v7 }
 0x238   : > { %v7021_v3 = vpop.permute.xlu0 %5086  ;;  %v7023_v53 = vpop.permute.xlu1 %5076 }
 0x239   : > { %10028 = vst [vmem:[#allocation41_spill] sm:$0xff] %v7021_v3  ;;  %10029 = vst [vmem:[#allocation42_spill] sm:$0xff] %v7023_v53 }
 0x23a   : > { %4787 = vrot.lane.b32.xlu0 %v4686_v49, %s5670_s17  ;;  %4781 = vrot.lane.b32.xlu1 %v4674_v21, %s5670_s17  ;;  %v4991_v49 = vrot.slane %v4928_v31, %v6518_v46  ;;  %v4690_v21 = vrot.slane %v6973_v36, %v6558_v17 }
 0x23c   : > { %v7031_v41 = vpop.permute.xlu0 %5090  ;;  %v7033_v63 = vpop.permute.xlu1 %5080 }
 0x23d   : > { %10030 = vst [vmem:[#allocation43_spill] sm:$0xff] %v7031_v41  ;;  %10031 = vst [vmem:[#allocation44_spill] sm:$0xff] %v7033_v63 }
 0x23e   : > { %5094 = vrot.lane.b32.xlu0 %v4983_v15, %s5671_s24  ;;  %4785 = vrot.lane.b32.xlu1 %v4682_v61, %s5670_s17  ;;  %v4999_v15 = vrot.slane %v4928_v31, %v6541_v7  ;;  %v2271_v61 = vld [vmem:[#allocation2 + $0x80] ss:$8 sm:$0xf0] }
 0x23f   : > { %v2272_v18 = vor.u32 %v2271_v61, %v2270_v60  ;;  %v4995_v60 = vrot.slane %v4928_v31, %v6491_v22 }
 0x240   : > { %v7040_v30 = vpop.permute.xlu0 %2464  ;;  %v7042_v3 = vpop.permute.xlu1 %5084 }
 0x241   : > { %10032 = vst [vmem:[#allocation45_spill] sm:$0xff] %v7040_v30  ;;  %10033 = vst [vmem:[#allocation46_spill] sm:$0xff] %v7042_v3 }
 0x242   : > { %5098 = vrot.lane.b32.xlu0 %v4991_v49, %s5671_s24  ;;  %4789 = vrot.lane.b32.xlu1 %v4690_v21, %s5670_s17  ;;  %v5007_v21 = vrot.slane %v4928_v31, %v6558_v17 }
 0x244   : > { %v7049_v41 = vpop.permute.xlu0 %2468  ;;  %v7051_v53 = vpop.permute.xlu1 %5088 }
 0x245   : > { %10034 = vst [vmem:[#allocation47_spill] sm:$0xff] %v7049_v41  ;;  %10035 = vst [vmem:[#allocation48_spill] sm:$0xff] %v7051_v53  ;;  %v4987_v41 = vrot.slane %v4928_v31, %v6470_v5 }
 0x246   : > { %5102 = vrot.lane.b32.xlu0 %v4999_v15, %s5671_s24  ;;  %5092 = vrot.lane.b32.xlu1 %v4979_v24, %s5671_s24  ;;  %v2383_v15 = vrot.slane %v2272_v18, %v6441_v40 }
 0x248   : > { %v7057_v36 = vpop.permute.xlu0 %2472  ;;  %v7059_v49 = vpop.permute.xlu1 %2466 }
 0x249   : > { %10036 = vst [vmem:[#allocation49_spill] sm:$0xff] %v7057_v36  ;;  %10037 = vst [vmem:[#allocation50_spill] sm:$0xff] %v7059_v49 }
 0x24a   : > { %5106 = vrot.lane.b32.xlu0 %v5007_v21, %s5671_s24  ;;  %5096 = vrot.lane.b32.xlu1 %v4987_v41, %s5671_s24  ;;  %v2391_v21 = vrot.slane %v2272_v18, %v6470_v5  ;;  %v5003_v41 = vrot.slane %v4928_v31, %v6513_v43 }
 0x24c   : > { %v7065_v53 = vpop.permute.xlu0 %2476  ;;  %v7067_v63 = vpop.permute.xlu1 %2470 }
 0x24d   : > { %10038 = vst [vmem:[#allocation51_spill] sm:$0xff] %v7065_v53  ;;  %10039 = vst [vmem:[#allocation52_spill] sm:$0xff] %v7067_v63  ;;  %v2653_v63 = vld [vmem:[#allocation2 + $0x81] ss:$8 sm:$0xf0] }
 0x24e   : > { %2480 = vrot.lane.b32.xlu0 %v2383_v15, %s5669_s16  ;;  %5100 = vrot.lane.b32.xlu1 %v4995_v60, %s5671_s24  ;;  %v2399_v15 = vrot.slane %v2272_v18, %v6491_v22  ;;  %v2387_v60 = vrot.slane %v2272_v18, %v6494_v20 }
 0x250   : > { %v7073_v24 = vpop.permute.xlu0 %2816  ;;  %v7075_v61 = vpop.permute.xlu1 %2474 }
 0x251   : > { %10040 = vst [vmem:[#allocation53_spill] sm:$0xff] %v7073_v24  ;;  %10041 = vst [vmem:[#allocation54_spill] sm:$0xff] %v7075_v61  ;;  %v2652_v24 = vld [vmem:[#allocation2 + $0x81] ss:$8 sm:$0xf] }
 0x252   : > { %2484 = vrot.lane.b32.xlu0 %v2391_v21, %s5669_s16  ;;  %5104 = vrot.lane.b32.xlu1 %v5003_v41, %s5671_s24  ;;  %v2654_v61 = vor.u32 %v2653_v63, %v2652_v24  ;;  %v2407_v41 = vrot.slane %v2272_v18, %v6513_v43  ;;  %v2403_v63 = vrot.slane %v2272_v18, %v6541_v7 }
 0x254   : > { %v7081_v53 = vpop.permute.xlu0 %2820  ;;  %v7083_v36 = vpop.permute.xlu1 %2478 }
 0x255   : > { %10042 = vst [vmem:[#allocation55_spill] sm:$0xff] %v7081_v53  ;;  %10043 = vst [vmem:[#allocation56_spill] sm:$0xff] %v7083_v36  ;;  %v2395_v53 = vrot.slane %v2272_v18, %v6518_v46 }
 0x256   : > { %2488 = vrot.lane.b32.xlu0 %v2399_v15, %s5669_s16  ;;  %2482 = vrot.lane.b32.xlu1 %v2387_v60, %s5669_s16  ;;  %v2737_v15 = vrot.slane %v2654_v61, %v6494_v20 }
 0x258   : > { %v7089_v31 = vpop.permute.xlu0 %2824  ;;  %v7091_v21 = vpop.permute.xlu1 %2814 }
 0x259   : > { %10044 = vst [vmem:[#allocation57_spill] sm:$0xff] %v7089_v31  ;;  %10045 = vst [vmem:[#allocation58_spill] sm:$0xff] %v7091_v21 }
 0x25a   : > { %2492 = vrot.lane.b32.xlu0 %v2407_v41, %s5669_s16  ;;  %2486 = vrot.lane.b32.xlu1 %v2395_v53, %s5669_s16  ;;  %v2745_v41 = vrot.slane %v2654_v61, %v6518_v46  ;;  %v2411_v53 = vrot.slane %v2272_v18, %v6558_v17 }
 0x25c   : > { %v7097_v36 = vpop.permute.xlu0 %2828  ;;  %v7099_v49 = vpop.permute.xlu1 %2818 }
 0x25d   : > { %10046 = vst [vmem:[#allocation59_spill] sm:$0xff] %v7097_v36  ;;  %10047 = vst [vmem:[#allocation60_spill] sm:$0xff] %v7099_v49  ;;  %v2971_v49 = vld [vmem:[#allocation2 + $0x82] ss:$8 sm:$0xf0] }
 0x25e   : > { %2832 = vrot.lane.b32.xlu0 %v2737_v15, %s5670_s17  ;;  %2490 = vrot.lane.b32.xlu1 %v2403_v63, %s5669_s16  ;;  %v2753_v15 = vrot.slane %v2654_v61, %v6541_v7  ;;  %v2733_v63 = vrot.slane %v2654_v61, %v6441_v40 }
 0x260   : > { %v7105_v24 = vpop.permute.xlu0 %3164  ;;  %v7107_v60 = vpop.permute.xlu1 %2822 }
 0x261   : > { %10048 = vst [vmem:[#allocation61_spill] sm:$0xff] %v7105_v24  ;;  %10049 = vst [vmem:[#allocation62_spill] sm:$0xff] %v7107_v60  ;;  %v2970_v60 = vld [vmem:[#allocation2 + $0x82] ss:$8 sm:$0xf] }
 0x262   : > { %2836 = vrot.lane.b32.xlu0 %v2745_v41, %s5670_s17  ;;  %2494 = vrot.lane.b32.xlu1 %v2411_v53, %s5669_s16  ;;  %v7121_v13 = vor.u32 %v2971_v49, %v2970_v60  ;;  %v2761_v53 = vrot.slane %v2654_v61, %v6558_v17  ;;  %v2749_v60 = vrot.slane %v2654_v61, %v6491_v22 }
 0x264   : > { %v7113_v36 = vpop.permute.xlu0 %3168  ;;  %v7115_v31 = vpop.permute.xlu1 %2826  ;;  %v3083_v49 = vrot.slane %v7121_v13, %v6441_v40  ;;  %v3095_v3 = vrot.slane %v7121_v13, %v6518_v46 }
 0x265   : > { %10050 = vst [vmem:[#allocation63_spill] sm:$0xff] %v7113_v36  ;;  %10051 = vst [vmem:[#allocation64_spill] sm:$0xff] %v7115_v31  ;;  %v2741_v31 = vrot.slane %v2654_v61, %v6470_v5 }
 0x266   : > { %2840 = vrot.lane.b32.xlu0 %v2753_v15, %s5670_s17  ;;  %2830 = vrot.lane.b32.xlu1 %v2733_v63, %s5670_s17 }
 0x268   : > { %v7123_v18 = vpop.permute.xlu0 %3172  ;;  %v7125_v41 = vpop.permute.xlu1 %3166 }
 0x269   : > { %10052 = vst [vmem:[#allocation65_spill] sm:$0xff] %v7123_v18  ;;  %10053 = vst [vmem:[#allocation66_spill] sm:$0xff] %v7125_v41  ;;  %v3087_v41 = vrot.slane %v7121_v13, %v6494_v20 }
 0x26a   : > { %2844 = vrot.lane.b32.xlu0 %v2761_v53, %s5670_s17  ;;  %2834 = vrot.lane.b32.xlu1 %v2741_v31, %s5670_s17  ;;  %v3091_v31 = vrot.slane %v7121_v13, %v6470_v5  ;;  %v2757_v53 = vrot.slane %v2654_v61, %v6513_v43  ;;  %v3352_v61 = vld [vmem:[#allocation2 + $0x83] ss:$8 sm:$0xf] }
 0x26c   : > { %v7131_v36 = vpop.permute.xlu0 %3176  ;;  %v7133_v15 = vpop.permute.xlu1 %3170 }
 0x26d   : > { %10054 = vst [vmem:[#allocation67_spill] sm:$0xff] %v7131_v36  ;;  %10055 = vst [vmem:[#allocation68_spill] sm:$0xff] %v7133_v15 }
 0x26e   : > { %3180 = vrot.lane.b32.xlu0 %v3083_v49, %s5671_s24  ;;  %2838 = vrot.lane.b32.xlu1 %v2749_v60, %s5670_s17  ;;  %v3099_v49 = vrot.slane %v7121_v13, %v6491_v22  ;;  %v10060_v60 = vlaneseq }
 0x270   : > { %v7140_v63 = vpop.permute.xlu0 %3516  ;;  %v7142_v18 = vpop.permute.xlu1 %3174 }
 0x271   : > { %10056 = vst [vmem:[#allocation69_spill] sm:$0xff] %v7140_v63  ;;  %10057 = vst [vmem:[#allocation70_spill] sm:$0xff] %v7142_v18  ;;  %v7156_v63 = vand.u32 127, %v10060_v60  ;;  %v3353_v18 = vld [vmem:[#allocation2 + $0x83] ss:$8 sm:$0xf0]  ;;  %v3107_v60 = vrot.slane %v7121_v13, %v6513_v43 }
 0x272   : > { %3184 = vrot.lane.b32.xlu0 %v3091_v31, %s5671_s24  ;;  %2842 = vrot.lane.b32.xlu1 %v2757_v53, %s5670_s17  ;;  %v3695_v31 = vld [vmem:[#allocation2 + $0xc] ss:$8 sm:$0xf0]  ;;  %v7162_v53 = vor.u32 %v3353_v18, %v3352_v61 }
 0x273   : > { %10061 = vst [vmem:[#allocation73_spill] sm:$0xff] %v7156_v63  ;;  %v2199_v14 = vadd.s32 128, %v7156_v63  ;;  %v7177_v18 = vadd.s32 256, %v7156_v63  ;;  %v7184_v61 = vadd.s32 512, %v7156_v63  ;;  %v2230_v21 = vand.u32 63, %v7156_v63 }
 0x274   : > { %v7149_v36 = vpop.permute.xlu0 %3520  ;;  %v7151_v15 = vpop.permute.xlu1 %3178  ;;  %v3445_v24 = vrot.slane %v7162_v53, %v6518_v46  ;;  %v3433_v32 = vrot.slane %v7162_v53, %v6441_v40 }
 0x275   : > { %10058 = vst [vmem:[#allocation71_spill] sm:$0xff] %v7149_v36  ;;  %10059 = vst [vmem:[#allocation72_spill] sm:$0xff] %v7151_v15  ;;  %vm7226_vm4 = vcmp.gt.s32.totalorder %v2230_v21, 0  ;;  %vm7284_vm11 = vcmp.lt.s32.totalorder %v2230_v21, 63  ;;  %v2518_v21 = vsel %vm9835_vm2, %v6737_v47, %v6725_v39  ;;  %v2865_v39 = vsel %vm9834_vm10, %v6775_v27, %v6749_v0 }
 0x276   : > { %3188 = vrot.lane.b32.xlu0 %v3099_v49, %s5671_s24  ;;  %3182 = vrot.lane.b32.xlu1 %v3087_v41, %s5671_s24  ;;  %v7174_v49 = vor.u32 %v3695_v31, %v3694_v56  ;;  %v7181_v41 = vadd.s32 384, %v7156_v63  ;;  %v3437_v56 = vrot.slane %v7162_v53, %v6494_v20  ;;  %v2231_v31 = vand.u32 63, %v2199_v14 }
 0x278   : > { %v7164_v36 = vpop.permute.xlu0 %3524  ;;  %v7166_v15 = vpop.permute.xlu1 %3514  ;;  %10064 = vst [vmem:[#allocation76_spill] sm:$0xff] %v7174_v49  ;;  %v2233_v14 = vand.u32 63, %v7181_v41  ;;  %vm7217_vm3 = vcmp.gt.s32.totalorder %v2231_v31, 0  ;;  %v10073_v41 = vand.u32 63, %v7177_v18  ;;  %vm7288_vm12 = vcmp.lt.s32.totalorder %v2231_v31, 63 }
 0x279   : > { %10062 = vst [vmem:[#allocation74_spill] sm:$0xff] %v7164_v36  ;;  %10063 = vst [vmem:[#allocation75_spill] sm:$0xff] %v7166_v15  ;;  %v7187_v36 = vadd.s32 640, %v7156_v63  ;;  %v2520_v31 = vsel %vm9835_vm2, %v6751_v57, %v6735_v29 }
 0x27a   : > { %3192 = vrot.lane.b32.xlu0 %v3107_v60, %s5671_s24  ;;  %3186 = vrot.lane.b32.xlu1 %v3095_v3, %s5671_s24  ;;  %v7196_v60 = vadd.s32 768, %v7156_v63  ;;  %v3103_v3 = vrot.slane %v7121_v13, %v6541_v7  ;;  %vm7239_vm5 = vcmp.gt.s32.totalorder %v10073_v41, 0  ;;  %vm7248_vm6 = vcmp.gt.s32.totalorder %v2233_v14, 0 }
 0x27b   : > { %v10082_v41 = vand.u32 63, %v7187_v36  ;;  %vm7349_vm15 = vcmp.lt.s32.totalorder %v2233_v14, 63 }
 0x27c   : > { %v7189_v34 = vpop.permute.xlu0 %3528  ;;  %v7191_v15 = vpop.permute.xlu1 %3518  ;;  %v10088_v49 = vand.u32 63, %v7196_v60 }
 0x27d   : > { %10065 = vst [vmem:[#allocation77_spill] sm:$0xff] %v7189_v34  ;;  %10066 = vst [vmem:[#allocation78_spill] sm:$0xff] %v7191_v15  ;;  %vm7260_vm8 = vcmp.gt.s32.totalorder %v10082_v41, 0  ;;  %v7277_v41 = vadd.s32 896, %v7156_v63  ;;  %v10190_v34 = vld [vmem:[#allocation11_spill] sm:$0xff] }
 0x27e   : > { %3532 = vrot.lane.b32.xlu0 %v3437_v56, %s5672_s25  ;;  %3190 = vrot.lane.b32.xlu1 %v3103_v3, %s5671_s24  ;;  %v3111_v3 = vrot.slane %v7121_v13, %v6558_v17  ;;  %v10084_v28 = vsel %vm7260_vm8, 4294967295, %v10083_v28  ;;  %vm7272_vm9 = vcmp.gt.s32.totalorder %v10088_v49, 0  ;;  %v10095_v49 = vmov 0  ;;  %v3914_v63 = vld [vmem:[#allocation2 + $0x8d] ss:$8 sm:$0xf] }
 0x27f   : > { %10085 = vst [vmem:[#allocation82_spill] sm:$0xff] %v10084_v28  ;;  %10092 = vst [vmem:[#allocation86_spill] sm:$0xff] %v7277_v41  ;;  %v10096_v49 = vsel %vm7288_vm12, 4294967295, %v10095_v49  ;;  %v2584_v57 = vsel %vm7260_vm8, %v2520_v31, 0.0  ;;  %v2871_v41 = vsel %vm9834_vm10, %v6803_v48, %v6783_v33 }
 0x280   : > { %v7211_v10 = vpop.permute.xlu0 %4076  ;;  %v7213_v56 = vpop.permute.xlu1 %3522  ;;  %v4614_v31 = vld [vmem:[#allocation2 + $0x8f] ss:$8 sm:$0xf0] }
 0x281   : > { %10067 = vst [vmem:[#allocation79_spill] sm:$0xff] %v7211_v10  ;;  %10068 = vst [vmem:[#allocation80_spill] sm:$0xff] %v7213_v56  ;;  %v10079_v10 = vmov 0 }
 0x282   : > { %3536 = vrot.lane.b32.xlu0 %v3445_v24, %s5672_s25  ;;  %3194 = vrot.lane.b32.xlu1 %v3111_v3, %s5671_s24  ;;  %v10078_v24 = vand.u32 63, %v7184_v61  ;;  %v3453_v3 = vrot.slane %v7162_v53, %v6541_v7 }
 0x284   : > { %vm7254_vm7 = vcmp.gt.s32.totalorder %v10078_v24, 0  ;;  %v7264_v13 = vpop.permute.xlu0 %4080  ;;  %v7266_v30 = vpop.permute.xlu1 %3526  ;;  %v10089_v24 = vmov 0 }
 0x285   : > { %v10080_v10 = vsel %vm7254_vm7, 4294967295, %v10079_v10  ;;  %10086 = vst [vmem:[#allocation83_spill] sm:$0xff] %v7264_v13  ;;  %10087 = vst [vmem:[#allocation84_spill] sm:$0xff] %v7266_v30  ;;  %v10090_v24 = vsel %vm7272_vm9, 4294967295, %v10089_v24  ;;  %v2515_v13 = vsel %vm9835_vm2, %v6717_v19, %v6727_v26  ;;  %v10093_v30 = vmov 0 }
 0x286   : > { %10081 = vst [vmem:[#allocation81_spill] sm:$0xff] %v10080_v10  ;;  %10091 = vst [vmem:[#allocation85_spill] sm:$0xff] %v10090_v24  ;;  %v10094_v30 = vsel %vm7284_vm11, 4294967295, %v10093_v30  ;;  %3540 = vrot.lane.b32.xlu0 %v3453_v3, %s5672_s25  ;;  %v2517_v19 = vsel %vm9835_vm2, %v6715_v35, %v6737_v47  ;;  %3530 = vrot.lane.b32.xlu1 %v3433_v32, %s5672_s25  ;;  %v2521_v26 = vsel %vm9835_vm2, %v6735_v29, %v6763_v9  ;;  %v10108_v24 = vmov 0 }
 0x287   : > { %v7314_v3 = vor.u32 %v3915_v51, %v3914_v63  ;;  %v3461_v47 = vrot.slane %v7162_v53, %v6558_v17  ;;  %v3441_v32 = vrot.slane %v7162_v53, %v6470_v5  ;;  %v2580_v29 = vsel %vm7217_vm3, %v2516_v52, 0.0 }
 0x288   : > { %v7316_v35 = vpop.permute.xlu0 %4084  ;;  %v7318_v44 = vpop.permute.xlu1 %4078  ;;  %v2581_v51 = vsel %vm7239_vm5, %v2517_v19, 0.0  ;;  %v2582_v63 = vsel %vm7248_vm6, %v2518_v21, 0.0  ;;  %v2583_v27 = vsel %vm7254_vm7, %v2519_v12, 0.0  ;;  %v2585_v52 = vsel %vm7272_vm9, %v2521_v26, 0.0 }
 0x289   : > { %10098 = vst [vmem:[#allocation88_spill] sm:$0xff] %v7316_v35  ;;  %10099 = vst [vmem:[#allocation89_spill] sm:$0xff] %v7318_v44  ;;  %v2579_v35 = vsel %vm7226_vm4, %v2515_v13, 0.0  ;;  %v4265_v44 = vld [vmem:[#allocation2 + $0x8e] ss:$8 sm:$0xf0]  ;;  %v2866_v26 = vsel %vm9834_vm10, %v6749_v0, %v6785_v1  ;;  %v3995_v21 = vrot.slane %v7314_v3, %v6441_v40  ;;  %v2869_v0 = vsel %vm9834_vm10, %v6794_v25, %v6773_v23 }
 0x28a   : > { %3544 = vrot.lane.b32.xlu0 %v3461_v47, %s5672_s25  ;;  %v10100_v19 = vand.u32 63, %v7177_v18  ;;  %3534 = vrot.lane.b32.xlu1 %v3441_v32, %s5672_s25  ;;  %v2929_v12 = vadd.f32 %v2865_v39, %v2579_v35  ;;  %v2867_v18 = vsel %vm9834_vm10, %v6785_v1, %v6761_v8  ;;  %v4931_v47 = vld [vmem:[#allocation2 + $0x198] ss:$8 sm:$0xf0]  ;;  %v2868_v35 = vsel %vm9834_vm10, %v6761_v8, %v6794_v25 }
 0x28b   : > { %v4264_v32 = vld [vmem:[#allocation2 + $0x8e] ss:$8 sm:$0xf]  ;;  %v2870_v1 = vsel %vm9834_vm10, %v6773_v23, %v6803_v48  ;;  %v3449_v39 = vrot.slane %v7162_v53, %v6491_v22  ;;  %v3215_v8 = vsel %vm9838_vm13, %v6792_v38, %v6813_v54  ;;  %v3216_v25 = vsel %vm9838_vm13, %v6813_v54, %v6801_v45 }
 0x28c   : > { %vm7345_vm14 = vcmp.lt.s32.totalorder %v10100_v19, 63  ;;  %v7361_v14 = vpop.permute.xlu0 %4088  ;;  %v7363_v19 = vpop.permute.xlu1 %4082  ;;  %v7378_v4 = vor.u32 %v4265_v44, %v4264_v32  ;;  %v10107_v23 = vand.u32 63, %v7184_v61  ;;  %v2930_v32 = vadd.f32 %v2866_v26, %v2580_v29 }
 0x28d   : > { %10105 = vst [vmem:[#allocation90_spill] sm:$0xff] %v7361_v14  ;;  %10106 = vst [vmem:[#allocation91_spill] sm:$0xff] %v7363_v19  ;;  %v4613_v14 = vld [vmem:[#allocation2 + $0x8f] ss:$8 sm:$0xf]  ;;  %v2931_v48 = vadd.f32 %v2867_v18, %v2581_v51  ;;  %v2932_v38 = vadd.f32 %v2868_v35, %v2582_v63  ;;  %v2933_v28 = vadd.f32 %v2869_v0, %v2583_v27  ;;  %v10110_v54 = vand.u32 63, %v7187_v36 }
 0x28e   : > { %v4930_v19 = vld [vmem:[#allocation2 + $0x198] ss:$8 sm:$0xf]  ;;  %vm7391_vm1 = vcmp.lt.s32.totalorder %v10107_v23, 63  ;;  %4092 = vrot.lane.b32.xlu0 %v3995_v21, %s5668_s15  ;;  %v7396_v44 = vor.u32 %v4614_v31, %v4613_v14  ;;  %3538 = vrot.lane.b32.xlu1 %v3449_v39, %s5672_s25  ;;  %v7401_v10 = vadd.f32 %v2870_v1, %v2584_v57  ;;  %v10113_v21 = vand.u32 63, %v7196_v60 }
 0x28f   : > { %v10109_v24 = vsel %vm7391_vm1, 4294967295, %v10108_v24  ;;  %v7398_v33 = vor.u32 %v4931_v47, %v4930_v19  ;;  %vm7405_vm10 = vcmp.lt.s32.totalorder %v10110_v54, 63  ;;  %v4003_v57 = vrot.slane %v7314_v3, %v6470_v5 }
 0x290   : > { %vm7411_vm2 = vcmp.lt.s32.totalorder %v10113_v21, 63  ;;  %v7415_v29 = vpop.permute.xlu0 %4428  ;;  %v7417_v51 = vpop.permute.xlu1 %4086  ;;  %v7421_v63 = vadd.f32 %v2871_v41, %v2585_v52  ;;  %v3279_v36 = vsel %vm7284_vm11, %v3215_v8, 0.0  ;;  %v3280_v27 = vsel %vm7288_vm12, %v3216_v25, 0.0  ;;  %vm10121_vm12 = vmmov %vm10120_vm0  ;;  %v10128_v25 = vld [vmem:[#allocation13_spill] sm:$0xff] }
 0x291   : > { %10116 = vst [vmem:[#allocation92_spill] sm:$0xff] %v7415_v29  ;;  %10117 = vst [vmem:[#allocation93_spill] sm:$0xff] %v7417_v51  ;;  %v3457_v60 = vrot.slane %v7162_v53, %v6513_v43  ;;  %v4011_v26 = vrot.slane %v7314_v3, %v6491_v22  ;;  %v3999_v18 = vrot.slane %v7314_v3, %v6494_v20 }
 0x292   : > { %4096 = vrot.lane.b32.xlu0 %v4003_v57, %s5668_s15  ;;  %v4019_v41 = vrot.slane %v7314_v3, %v6513_v43  ;;  %v4007_v52 = vrot.slane %v7314_v3, %v6518_v46  ;;  %v3217_v47 = vsel %vm9838_vm13, %v6801_v45, %v6821_v59  ;;  %v3218_v53 = vsel %vm9838_vm13, %v6821_v59, %v6811_v42  ;;  %v10125_v57 = vld [vmem:[#allocation12_spill] sm:$0xff] }
 0x293   : > { %3542 = vrot.lane.b32.xlu1 %v3457_v60, %s5672_s25  ;;  %v4349_v14 = vrot.slane %v7378_v4, %v6494_v20  ;;  %v4015_v19 = vrot.slane %v7314_v3, %v6541_v7  ;;  %v3311_v35 = vadd.f32 %v3279_v36, %v2929_v12  ;;  %v3312_v0 = vadd.f32 %v3280_v27, %v2930_v32 }
 0x294   : > { %v7449_v1 = vpop.permute.xlu0 %4432  ;;  %v7451_v39 = vpop.permute.xlu1 %4090  ;;  %v3281_v32 = vsel %vm7345_vm14, %v3217_v47, 0.0  ;;  %v3282_v54 = vsel %vm7349_vm15, %v3218_v53, 0.0  ;;  %v3219_v21 = vsel %vm9838_vm13, %v6811_v42, %v6830_v2  ;;  %v3565_v36 = vsel %vm10120_vm0, %v6853_v50, %v6828_v62 }
 0x295   : > { %10118 = vst [vmem:[#allocation94_spill] sm:$0xff] %v7449_v1  ;;  %10119 = vst [vmem:[#allocation95_spill] sm:$0xff] %v7451_v39  ;;  %v3566_v27 = vsel %vm10121_vm12, %v6828_v62, %v6866_v6  ;;  %v3221_v50 = vsel %vm9838_vm13, %v6819_v58, %v6839_v16  ;;  %v3567_v62 = vsel %vm10120_vm0, %v6866_v6, %v6837_v11  ;;  %v3629_v6 = vsel %vm7226_vm4, %v3565_v36, 0.0 }
 0x296   : > { %4100 = vrot.lane.b32.xlu0 %v4011_v26, %s5668_s15  ;;  %v3220_v26 = vsel %vm9838_vm13, %v6830_v2, %v6819_v58  ;;  %vm10122_vm12 = vmmov %vm10120_vm0  ;;  %v3313_v42 = vadd.f32 %v3281_v32, %v2931_v48  ;;  %v3314_v60 = vadd.f32 %v3282_v54, %v2932_v38  ;;  %v3283_v2 = vsel %vm7391_vm1, %v3219_v21, 0.0 }
 0x297   : > { %4094 = vrot.lane.b32.xlu1 %v3999_v18, %s5668_s15  ;;  %v3568_v18 = vsel %vm10122_vm12, %v6837_v11, %v6879_v37  ;;  %vm10126_vm13 = vmmov %vm10120_vm0  ;;  %v3630_v23 = vsel %vm7217_vm3, %v3566_v27, 0.0  ;;  %v10127_v11 = vld [vmem:[#allocation16_spill] sm:$0xff]  ;;  %v3284_v38 = vsel %vm7405_vm10, %v3220_v26, 0.0  ;;  %v3631_v32 = vsel %vm7239_vm5, %v3567_v62, 0.0  ;;  %v10135_v26 = vld [vmem:[#allocation18_spill] sm:$0xff] }
 0x298   : > { %v7498_v47 = vpop.permute.xlu0 %4436  ;;  %v7500_v53 = vpop.permute.xlu1 %4426  ;;  %v3569_v58 = vsel %vm10126_vm13, %v6879_v37, %v10125_v57  ;;  %v3570_v12 = vsel %vm10120_vm0, %v10125_v57, %v10127_v11  ;;  %vm10129_vm12 = vmmov %vm10120_vm0  ;;  %v3285_v37 = vsel %vm7411_vm2, %v3221_v50, 0.0  ;;  %v3632_v54 = vsel %vm7248_vm6, %v3568_v18, 0.0  ;;  %v10133_v18 = vld [vmem:[#allocation85_spill] sm:$0xff] }
 0x299   : > { %10123 = vst [vmem:[#allocation96_spill] sm:$0xff] %v7498_v47  ;;  %10124 = vst [vmem:[#allocation97_spill] sm:$0xff] %v7500_v53  ;;  %v3571_v48 = vsel %vm10129_vm12, %v10127_v11, %v10128_v25  ;;  %v3315_v21 = vadd.f32 %v3283_v2, %v2933_v28  ;;  %v3633_v36 = vsel %vm7254_vm7, %v3569_v58, 0.0  ;;  %v3661_v50 = vadd.f32 %v3629_v6, %v3311_v35  ;;  %v10136_v35 = vld [vmem:[#allocation14_spill] sm:$0xff] }
 0x29a   : > { %4104 = vrot.lane.b32.xlu0 %v4019_v41, %s5668_s15  ;;  %v3662_v11 = vadd.f32 %v3630_v23, %v3312_v0  ;;  %v3634_v8 = vsel %vm7260_vm8, %v3570_v12, 0.0  ;;  %v3316_v2 = vadd.f32 %v3284_v38, %v7401_v10  ;;  %v3317_v58 = vadd.f32 %v3285_v37, %v7421_v63  ;;  %v10138_v23 = vld [vmem:[#allocation15_spill] sm:$0xff]  ;;  %v10144_v38 = vld [vmem:[#allocation86_spill] sm:$0xff] }
 0x29b   : > { %4098 = vrot.lane.b32.xlu1 %v4007_v52, %s5668_s15  ;;  %v3635_v52 = vsel %vm7272_vm9, %v3571_v48, 0.0  ;;  %v3663_v59 = vadd.f32 %v3631_v32, %v3313_v42  ;;  %v3664_v45 = vadd.f32 %v3632_v54, %v3314_v60  ;;  %v3665_v41 = vadd.f32 %v3633_v36, %v3315_v21  ;;  %v10140_v42 = vld [vmem:[#allocation20_spill] sm:$0xff]  ;;  %v10142_v60 = vld [vmem:[#allocation17_spill] sm:$0xff] }
 0x29c   : > { %v7529_v27 = vpop.permute.xlu0 %4440  ;;  %v7539_v28 = vpop.permute.xlu1 %4430  ;;  %vm10137_vm13 = vcmask 1039360   ;;  %v3666_v6 = vadd.f32 %v3634_v8, %v3316_v2  ;;  %v3667_v63 = vadd.f32 %v3635_v52, %v3317_v58  ;;  %v10145_v37 = vand.u32 63, %v10144_v38  ;;  %v10152_v21 = vld [vmem:[#allocation76_spill] sm:$0xff]  ;;  %v10155_v58 = vld [vmem:[#allocation22_spill] sm:$0xff] }
 0x29d   : > { %10131 = vst [vmem:[#allocation12_spill] sm:$0xff] %v7529_v27  ;;  %10134 = vst [vmem:[#allocation16_spill] sm:$0xff] %v7539_v28  ;;  %v4127_v0 = vsel %vm10137_vm13, %v10136_v35, %v10135_v26  ;;  %v10153_v36 = vrot.slane %v10152_v21, %v6441_v40  ;;  %v10154_v52 = vrot.slane %v10152_v21, %v6494_v20 }
 0x29e   : > { %4444 = vrot.lane.b32.xlu0 %v4349_v14, %s5669_s16  ;;  %vm10139_vm0 = vmmov %vm10137_vm13  ;;  %vm7561_vm13 = vcmp.gt.s32.totalorder %v10145_v37, 0  ;;  %v4191_v38 = vsel %vm7284_vm11, %v4127_v0, 0.0  ;;  %v10167_v10 = vrot.slane %v10152_v21, %v6513_v43  ;;  %v10196_v57 = vrot.slane %v7378_v4, %v6470_v5 }
 0x29f   : > { %v4128_v12 = vsel %vm10139_vm0, %v10135_v26, %v10138_v23  ;;  %4102 = vrot.lane.b32.xlu1 %v4015_v19, %s5668_s15  ;;  %vm10141_vm12 = vmmov %vm10139_vm0  ;;  %v10148_v19 = vmov %v10145_v37  ;;  %v3873_v26 = vadd.f32 %v10153_v36, %v3661_v50  ;;  %v3874_v2 = vadd.f32 %v10154_v52, %v3662_v11 }
 0x2a0   : > { %v4129_v14 = vsel %vm10141_vm12, %v10138_v23, %v10140_v42  ;;  %vm10143_vm9 = vmmov %vm10139_vm0  ;;  %vm7567_vm0 = vcmp.lt.s32.totalorder %v10148_v19, 63  ;;  %v7571_v8 = vpop.permute.xlu0 %4775  ;;  %v7582_v23 = vpop.permute.xlu1 %4434  ;;  %vm10157_vm12 = vnez %v10096_v49  ;;  %v10158_v50 = vrot.slane %v10152_v21, %v6470_v5 }
 0x2a1   : > { %v4130_v48 = vsel %vm10143_vm9, %v10140_v42, %v10142_v60  ;;  %10151 = vst [vmem:[#allocation13_spill] sm:$0xff] %v7571_v8  ;;  %v4131_v35 = vsel %vm10143_vm9, %v10142_v60, %v10155_v58  ;;  %10156 = vst [vmem:[#allocation81_spill] sm:$0xff] %v7582_v23  ;;  %v4192_v37 = vsel %vm10157_vm12, %v4128_v12, 0.0  ;;  %v10159_v11 = vrot.slane %v10152_v21, %v6518_v46  ;;  %v10161_v12 = vld [vmem:[#allocation19_spill] sm:$0xff]  ;;  %v10170_v23 = vld [vmem:[#allocation26_spill] sm:$0xff] }
 0x2a2   : > { %v3875_v19 = vadd.f32 %v10158_v50, %v3663_v59  ;;  %v10160_v60 = vrot.slane %v7378_v4, %v6518_v46  ;;  %v4193_v52 = vsel %vm7345_vm14, %v4129_v14, 0.0  ;;  %v4194_v0 = vsel %vm7349_vm15, %v4130_v48, 0.0  ;;  %v10162_v59 = vld [vmem:[#allocation24_spill] sm:$0xff]  ;;  %vm10163_vm11 = vmmov %vm10143_vm9 }
 0x2a3   : > { %v3876_v36 = vadd.f32 %v10159_v11, %v3664_v45  ;;  %v4132_v42 = vsel %vm10143_vm9, %v10155_v58, %v10161_v12  ;;  %v4133_v50 = vsel %vm10163_vm11, %v10161_v12, %v10162_v59  ;;  %v10164_v45 = vrot.slane %v7314_v3, %v6558_v17 }
 0x2a4   : > { %4448 = vrot.lane.b32.xlu0 %v10160_v60, %s5669_s16  ;;  %v10165_v11 = vrot.slane %v10152_v21, %v6491_v22  ;;  %v10166_v48 = vrot.slane %v10152_v21, %v6541_v7  ;;  %v4195_v58 = vsel %vm7391_vm1, %v4131_v35, 0.0  ;;  %v3879_v12 = vadd.f32 %v10167_v10, %v3667_v63  ;;  %v7625_v27 = vpop.permute.xlu0 %4779 }
 0x2a5   : > { %4106 = vrot.lane.b32.xlu1 %v10164_v45, %s5668_s15  ;;  %10168 = vst [vmem:[#allocation82_spill] sm:$0xff] %v7625_v27  ;;  %v4223_v47 = vadd.f32 %v4191_v38, %v3873_v26  ;;  %v4224_v3 = vadd.f32 %v4192_v37, %v3874_v2  ;;  %v10169_v45 = vld [vmem:[#allocation21_spill] sm:$0xff]  ;;  %vm10171_vm11 = vcmask 531456   ;;  %v4226_v35 = vadd.f32 %v4194_v0, %v3876_v36  ;;  %v10176_v2 = vld [vmem:[#allocation23_spill] sm:$0xff]  ;;  %v10178_v38 = vld [vmem:[#allocation30_spill] sm:$0xff] }
 0x2a6   : > { %v3877_v14 = vadd.f32 %v10165_v11, %v3665_v41  ;;  %v3878_v60 = vadd.f32 %v10166_v48, %v3666_v6  ;;  %v4476_v1 = vsel %vm10171_vm11, %v10170_v23, %v10169_v45  ;;  %v10172_v41 = vld [vmem:[#allocation28_spill] sm:$0xff]  ;;  %vm10173_vm9 = vmmov %vm10171_vm11  ;;  %v7633_v6 = vpop.permute.xlu1 %4438  ;;  %v4225_v48 = vadd.f32 %v4193_v52, %v3875_v19  ;;  %v10179_v19 = vld [vmem:[#allocation25_spill] sm:$0xff] }
 0x2a7   : > { %v4477_v11 = vsel %vm10173_vm9, %v10169_v45, %v10172_v41  ;;  %10174 = vst [vmem:[#allocation85_spill] sm:$0xff] %v7633_v6  ;;  %v4196_v28 = vsel %vm7405_vm10, %v4132_v42, 0.0  ;;  %v4197_v10 = vsel %vm7411_vm2, %v4133_v50, 0.0  ;;  %v10175_v63 = vrot.slane %v7378_v4, %v6541_v7  ;;  %vm10177_vm11 = vmmov %vm10173_vm9  ;;  %v10182_v50 = vld [vmem:[#allocation45_spill] sm:$0xff] }
 0x2a8   : > { %v4227_v26 = vadd.f32 %v4195_v58, %v3877_v14  ;;  %v4478_v23 = vsel %vm10177_vm11, %v10172_v41, %v10176_v2  ;;  %v4479_v37 = vsel %vm10173_vm9, %v10176_v2, %v10178_v38  ;;  %vm10180_vm1 = vmmov %vm10173_vm9  ;;  %v10181_v36 = vrot.slane %v7378_v4, %v6441_v40  ;;  %v10183_v14 = vld [vmem:[#allocation10_spill] sm:$0xff]  ;;  %v10185_v45 = vld [vmem:[#allocation61_spill] sm:$0xff] }
 0x2a9   : > { %4452 = vrot.lane.b32.xlu0 %v10175_v63, %s5669_s16  ;;  %v4480_v42 = vsel %vm10180_vm1, %v10178_v38, %v10179_v19  ;;  %v4540_v52 = vsel %vm7226_vm4, %v4476_v1, 0.0  ;;  %v4541_v0 = vsel %vm7217_vm3, %v4477_v11, 0.0  ;;  %vm10184_vm11 = vmmov %vm10180_vm1  ;;  %vm10186_vm9 = vcmask 515072   ;;  %v7666_v63 = vpop.permute.xlu0 %4783  ;;  %v10189_v1 = vld [vmem:[#allocation58_spill] sm:$0xff] }
 0x2aa   : > { %4442 = vrot.lane.b32.xlu1 %v10181_v36, %s5669_s16  ;;  %v2522_v58 = vsel %vm10184_vm11, %v10183_v14, %v10182_v50  ;;  %v3222_v41 = vsel %vm10186_vm9, %v6839_v16, %v10185_v45  ;;  %10187 = vst [vmem:[#allocation18_spill] sm:$0xff] %v7666_v63  ;;  %v4228_v2 = vadd.f32 %v4196_v28, %v3878_v60  ;;  %v10188_v36 = vld [vmem:[#allocation32_spill] sm:$0xff]  ;;  %vm10191_vm3 = vcmask 523264   ;;  %v7676_v27 = vpop.permute.xlu1 %4777  ;;  %v10193_v60 = vld [vmem:[#allocation75_spill] sm:$0xff]  ;;  %vm10210_vm11 = vmmov %vm10186_vm9 }
 0x2ab   : > { %v7668_v38 = vadd.f32 %v4197_v10, %v3879_v12  ;;  %v4481_v55 = vsel %vm10180_vm1, %v10179_v19, %v10188_v36  ;;  %v2872_v11 = vsel %vm10191_vm3, %v10190_v34, %v10189_v1  ;;  %10192 = vst [vmem:[#allocation14_spill] sm:$0xff] %v7676_v27  ;;  %v4542_v14 = vsel %vm7239_vm5, %v4478_v23, 0.0  ;;  %v10197_v23 = vld [vmem:[#allocation27_spill] sm:$0xff]  ;;  %vm10198_vm5 = vmmov %vm10180_vm1 }
 0x2ac   : > { %v4543_v16 = vsel %vm7248_vm6, %v4479_v37, 0.0  ;;  %v4544_v28 = vsel %vm7254_vm7, %v4480_v42, 0.0  ;;  %vm10194_vm4 = vcmask 7168   ;;  %v10195_v10 = vrot.slane %v7378_v4, %v6558_v17  ;;  %vm10201_vm6 = vmmov %vm10191_vm3  ;;  %v10204_v27 = vld [vmem:[#allocation31_spill] sm:$0xff] }
 0x2ad   : > { %v3572_v12 = vsel %vm10194_vm4, %v10128_v25, %v10193_v60  ;;  %v4572_v19 = vadd.f32 %v4540_v52, %v4223_v47  ;;  %v4573_v34 = vadd.f32 %v4541_v0, %v4224_v3  ;;  %v2586_v15 = vsel %vm7561_vm13, %v2522_v58, 0.0  ;;  %v10199_v47 = vld [vmem:[#allocation34_spill] sm:$0xff]  ;;  %v10200_v3 = vld [vmem:[#allocation29_spill] sm:$0xff]  ;;  %v7707_v0 = vpop.permute.xlu0 %4787  ;;  %vm10205_vm7 = vmmov %vm10191_vm3 }
 0x2ae   : > { %4456 = vrot.lane.b32.xlu0 %v10195_v10, %s5669_s16  ;;  %v3286_v56 = vsel %vm7567_vm0, %v3222_v41, 0.0  ;;  %4446 = vrot.lane.b32.xlu1 %v10196_v57, %s5669_s16  ;;  %v4482_v25 = vsel %vm10198_vm5, %v10188_v36, %v10197_v23  ;;  %v4545_v37 = vsel %vm7260_vm8, %v4481_v55, 0.0  ;;  %v4825_v42 = vsel %vm10201_vm6, %v10200_v3, %v10199_v47  ;;  %10202 = vst [vmem:[#allocation15_spill] sm:$0xff] %v7707_v0  ;;  %v7711_v63 = vpop.permute.xlu1 %4781  ;;  %v10206_v36 = vld [vmem:[#allocation36_spill] sm:$0xff]  ;;  %vm10207_vm8 = vmmov %vm10191_vm3  ;;  %v10208_v3 = vld [vmem:[#allocation46_spill] sm:$0xff] }
 0x2af   : > { %v2936_v52 = vadd.f32 %v2872_v11, %v2586_v15  ;;  %v4574_v58 = vadd.f32 %v4542_v14, %v4225_v48  ;;  %v4575_v41 = vadd.f32 %v4543_v16, %v4226_v35  ;;  %v4576_v10 = vadd.f32 %v4544_v28, %v4227_v26  ;;  %10203 = vst [vmem:[#allocation20_spill] sm:$0xff] %v7711_v63  ;;  %v10209_v11 = vld [vmem:[#allocation39_spill] sm:$0xff]  ;;  %v10213_v28 = vld [vmem:[#allocation33_spill] sm:$0xff]  ;;  %vm10214_vm1 = vmmov %vm10191_vm3 }
 0x2b0   : > { %v3636_v57 = vsel %vm7561_vm13, %v3572_v12, 0.0  ;;  %v4826_v62 = vsel %vm10205_vm7, %v10199_v47, %v10204_v27  ;;  %v4827_v55 = vsel %vm10207_vm8, %v10204_v27, %v10206_v36  ;;  %v5145_v15 = vsel %vm10210_vm11, %v10209_v11, %v10208_v3  ;;  %v10217_v47 = vld [vmem:[#allocation37_spill] sm:$0xff]  ;;  %vm10218_vm3 = vmmov %vm10210_vm11  ;;  %v10224_v0 = vld [vmem:[#allocation38_spill] sm:$0xff] }
 0x2b1   : > { %v3318_v48 = vadd.f32 %v3286_v56, %v2936_v52  ;;  %v10211_v35 = vrot.slane %v7396_v44, %v6441_v40  ;;  %vm10212_vm9 = vnez %v10133_v18  ;;  %v4577_v14 = vadd.f32 %v4545_v37, %v4228_v2  ;;  %v10216_v56 = vld [vmem:[#allocation44_spill] sm:$0xff]  ;;  %vm10219_vm4 = vmmov %vm10218_vm3  ;;  %v10220_v2 = vld [vmem:[#allocation79_spill] sm:$0xff]  ;;  %v7744_v37 = vpop.permute.xlu0 %5094 }
 0x2b2   : > { %v4546_v26 = vsel %vm10212_vm9, %v4482_v25, 0.0  ;;  %v4889_v16 = vadd.f32 %v4825_v42, %v4572_v19  ;;  %v4828_v12 = vsel %vm10214_vm1, %v10206_v36, %v10213_v28  ;;  %v10215_v27 = vrot.slane %v7378_v4, %v6491_v22  ;;  %10222 = vst [vmem:[#allocation17_spill] sm:$0xff] %v7744_v37  ;;  %vm10225_vm6 = vmmov %vm10214_vm1  ;;  %v7751_v6 = vpop.permute.xlu1 %4785 }
 0x2b3   : > { %4791 = vrot.lane.b32.xlu0 %v10211_v35, %s5670_s17  ;;  %v5143_v52 = vsel %vm10218_vm3, %v10217_v47, %v10216_v56  ;;  %v5144_v18 = vsel %vm10219_vm4, %v10216_v56, %v10209_v11  ;;  %v3668_v25 = vadd.f32 %v3636_v57, %v3318_v48  ;;  %vm10221_vm5 = vcmask 1039360   ;;  %v10223_v35 = vld [vmem:[#allocation35_spill] sm:$0xff]  ;;  %10226 = vst [vmem:[#allocation86_spill] sm:$0xff] %v7751_v6  ;;  %v10227_v57 = vld [vmem:[#allocation42_spill] sm:$0xff]  ;;  %vm10228_vm7 = vmmov %vm10218_vm3 }
 0x2b4   : > { %4450 = vrot.lane.b32.xlu1 %v10215_v27, %s5669_s16  ;;  %v4134_v19 = vsel %vm10221_vm5, %v10162_v59, %v10220_v2  ;;  %v4890_v42 = vadd.f32 %v4826_v62, %v4573_v34  ;;  %v4891_v36 = vadd.f32 %v4827_v55, %v4574_v58  ;;  %v4830_v27 = vsel %vm10225_vm6, %v10224_v0, %v10223_v35  ;;  %v10229_v48 = vld [vmem:[#allocation48_spill] sm:$0xff]  ;;  %v10230_v59 = vld [vmem:[#allocation41_spill] sm:$0xff]  ;;  %vm10231_vm8 = vmmov %vm10218_vm3 }
 0x2b5   : > { %v5209_v63 = vsel %vm7349_vm15, %v5145_v15, 0.0  ;;  %v4892_v29 = vadd.f32 %v4828_v12, %v4575_v41  ;;  %v5142_v11 = vsel %vm10228_vm7, %v10227_v57, %v10217_v47  ;;  %v5147_v56 = vsel %vm10231_vm8, %v10230_v59, %v10229_v48  ;;  %vm10234_vm15 = vmmov %vm10214_vm1  ;;  %v7785_v9 = vpop.permute.xlu0 %5098  ;;  %v10239_v47 = vld [vmem:[#allocation40_spill] sm:$0xff] }
 0x2b6   : > { %vm10232_vm11 = vcmask 531456   ;;  %v10233_v13 = vrot.slane %v7396_v44, %v6470_v5  ;;  %v4829_v58 = vsel %vm10234_vm15, %v10213_v28, %v10224_v0  ;;  %v5207_v41 = vsel %vm10157_vm12, %v5143_v52, 0.0  ;;  %vm10236_vm9 = vmmov %vm10218_vm3  ;;  %10238 = vst [vmem:[#allocation76_spill] sm:$0xff] %v7785_v9 }
 0x2b7   : > { %v4483_v34 = vsel %vm10232_vm11, %v10197_v23, %v7500_v53  ;;  %v5208_v62 = vsel %vm7345_vm14, %v5144_v18, 0.0  ;;  %v4198_v55 = vsel %vm7567_vm0, %v4134_v19, 0.0  ;;  %v10235_v23 = vrot.slane %v7378_v4, %v6513_v43  ;;  %vm10240_vm14 = vmmov %vm10214_vm1  ;;  %v10243_v18 = vld [vmem:[#allocation43_spill] sm:$0xff] }
 0x2b8   : > { %4795 = vrot.lane.b32.xlu0 %v10233_v13, %s5670_s17  ;;  %v4894_v15 = vadd.f32 %v4830_v27, %v4577_v14  ;;  %v5146_v12 = vsel %vm10236_vm9, %v10208_v3, %v10230_v59  ;;  %v5241_v0 = vadd.f32 %v5209_v63, %v4892_v29  ;;  %v10237_v49 = vrot.slane %v10152_v21, %v6558_v17  ;;  %v7796_v29 = vpop.permute.xlu1 %4789  ;;  %vm10244_vm1 = vmmov %vm10218_vm3 }
 0x2b9   : > { %4454 = vrot.lane.b32.xlu1 %v10235_v23, %s5669_s16  ;;  %v4831_v52 = vsel %vm10240_vm14, %v10223_v35, %v10239_v47  ;;  %vm10241_vm12 = vnez %v10094_v30  ;;  %v5211_v14 = vsel %vm7405_vm10, %v5147_v56, 0.0  ;;  %v4547_v3 = vsel %vm7561_vm13, %v4483_v34, 0.0  ;;  %10242 = vst [vmem:[#allocation22_spill] sm:$0xff] %v7796_v29  ;;  %vm10247_vm13 = vmmov %vm10225_vm6  ;;  %v7815_v59 = vpop.permute.xlu0 %5102  ;;  %v4618_v29 = vld [vmem:[#allocation2 + $0xcf] ss:$8 sm:$0xf0] }
 0x2ba   : > { %v3880_v28 = vadd.f32 %v10237_v49, %v3668_v25  ;;  %v5206_v4 = vsel %vm10241_vm12, %v5142_v11, 0.0  ;;  %v5239_v63 = vadd.f32 %v5207_v41, %v4890_v42  ;;  %v5240_v21 = vadd.f32 %v5208_v62, %v4891_v36  ;;  %10249 = vst [vmem:[#allocation19_spill] sm:$0xff] %v7815_v59  ;;  %vm10255_vm3 = vmmov %vm10244_vm1 }
 0x2bb   : > { %v5148_v25 = vsel %vm10244_vm1, %v10229_v48, %v10243_v18  ;;  %v10245_v30 = vrot.slane %v7396_v44, %v6491_v22  ;;  %v4578_v61 = vadd.f32 %v4546_v26, %v7668_v38  ;;  %v4893_v35 = vadd.f32 %v4829_v58, %v4576_v10  ;;  %v10250_v10 = vld [vmem:[#allocation3_spill] sm:$0xff] }
 0x2bc   : > { %v4230_v19 = vadd.f32 %v4198_v55, %v3880_v28  ;;  %vm10246_vm10 = vnez %v10109_v24  ;;  %v4832_v42 = vsel %vm10247_vm13, %v10239_v47, %v7571_v8  ;;  %v10248_v36 = vrot.slane %v7396_v44, %v6494_v20  ;;  %v10251_v26 = vld [vmem:[#allocation87_spill] sm:$0xff]  ;;  %v7824_v13 = vpop.permute.xlu1 %5092 }
 0x2bd   : > { %4799 = vrot.lane.b32.xlu0 %v10245_v30, %s5670_s17  ;;  %v5210_v32 = vsel %vm10246_vm10, %v5146_v12, 0.0  ;;  %v5238_v27 = vadd.f32 %v5206_v4, %v4889_v16  ;;  %v5303_v57 = vcombine.low %v5240_v21, %v5241_v0  ;;  %v5243_v11 = vadd.f32 %v5211_v14, %v4894_v15  ;;  %10254 = vst [vmem:[#allocation21_spill] sm:$0xff] %v7824_v13  ;;  %v7841_v47 = vpop.permute.xlu0 %5106 }
 0x2be   : > { %4793 = vrot.lane.b32.xlu1 %v10248_v36, %s5670_s17  ;;  %v4579_v48 = vadd.f32 %v4547_v3, %v4230_v19  ;;  %v4895_v38 = vadd.f32 %v4831_v52, %v4578_v61  ;;  %v10252_v24 = vunpack.c.0.s8 %v10251_v26  ;;  %v5212_v34 = vsel %vm7411_vm2, %v5148_v25, 0.0  ;;  %10257 = vst [vmem:[#allocation26_spill] sm:$0xff] %v7841_v47  ;;  %v2278_v26 = vld [vmem:[#allocation2 + $0x100] ss:$8 sm:$0x1] }
 0x2bf   : > { %v4706_v58 = vrot.slane %v7396_v44, %v6518_v46  ;;  %v5302_v16 = vcombine.low %v5238_v27, %v5239_v63  ;;  %v5242_v41 = vadd.f32 %v5210_v32, %v4893_v35  ;;  %v5149_v55 = vsel %vm10255_vm3, %v10243_v18, %v7824_v13  ;;  %v4268_v47 = vld [vmem:[#allocation2 + $0xce] ss:$8 sm:$0xf] }
 0x2c0   : > { %v7820_v56 = vsub.s32 %v10252_v24, %v10250_v10  ;;  %v4896_v62 = vadd.f32 %v4832_v42, %v4579_v48  ;;  %v10256_v23 = vrot.slane %v7396_v44, %v6513_v43  ;;  %v5213_v31 = vsel %vm7567_vm0, %v5149_v55, 0.0  ;;  %v7843_v52 = vpop.permute.xlu1 %5096  ;;  %v3699_v55 = vld [vmem:[#allocation2 + $0x4c] ss:$8 sm:$0xf0] }
 0x2c1   : > { %v5015_v15 = vrot.slane %v7398_v33, %v6494_v20  ;;  %v5244_v0 = vadd.f32 %v5212_v34, %v4895_v38  ;;  %v5304_v49 = vcombine.low %v5242_v41, %v5243_v11  ;;  %10258 = vst [vmem:[#allocation28_spill] sm:$0xff] %v7843_v52  ;;  %v4714_v4 = vrot.slane %v7396_v44, %v6541_v7  ;;  %v7852_v18 = vpop.permute.xlu0 %2480 }
 0x2c2   : > { %10253 = vst [vmem:[#allocation24_spill] sm:$0xff] %v7820_v56  ;;  %4803 = vrot.lane.b32.xlu0 %v10256_v23, %s5670_s17  ;;  %4797 = vrot.lane.b32.xlu1 %v4706_v58, %s5670_s17  ;;  %v5319_v12 = vrot.slane %v5303_v57, %v7820_v56  ;;  %v5245_v28 = vadd.f32 %v5213_v31, %v4896_v62  ;;  %10259 = vst [vmem:[#allocation23_spill] sm:$0xff] %v7852_v18  ;;  %v2275_v58 = vld [vmem:[#allocation2 + $0xc0] ss:$8 sm:$0xf0]  ;;  %v10293_v13 = vmov 0 }
 0x2c3   : > { %v5312_v54 = vrot.slane %v5302_v16, %v7820_v56  ;;  %v5326_v63 = vrot.slane %v5304_v49, %v7820_v56  ;;  %v5023_v25 = vrot.slane %v7398_v33, %v6518_v46  ;;  %v4722_v30 = vrot.slane %v7396_v44, %v6558_v17  ;;  %v2978_v62 = vld [vmem:[#allocation2 + $0x102] ss:$8 sm:$0x1]  ;;  %v2274_v23 = vld [vmem:[#allocation2 + $0xc0] ss:$8 sm:$0xf] }
 0x2c4   : > { %v5305_v14 = vcombine.low %v5244_v0, %v5245_v28  ;;  %v7856_v19 = vpop.permute.xlu1 %5100  ;;  %v5031_v36 = vrot.slane %v7398_v33, %v6541_v7  ;;  %v5011_v27 = vrot.slane %v7398_v33, %v6441_v40  ;;  %v5039_v48 = vrot.slane %v7398_v33, %v6558_v17  ;;  %v3698_v0 = vld [vmem:[#allocation2 + $0x4c] ss:$8 sm:$0xf] }
 0x2c5   : > { %v5334_v3 = vcombine.low %v5312_v54, %v5319_v12  ;;  %10260 = vst [vmem:[#allocation30_spill] sm:$0xff] %v7856_v19  ;;  %v7865_v42 = vpop.permute.xlu0 %2484  ;;  %v5019_v10 = vrot.slane %v7398_v33, %v6470_v5  ;;  %v2447_v34 = vrot.slane %v2278_v26, %v6441_v40  ;;  %v5027_v41 = vrot.slane %v7398_v33, %v6491_v22  ;;  %v10270_v54 = vld [vmem:[#allocation73_spill] sm:$0xff] }
 0x2c6   : > { %5110 = vrot.lane.b32.xlu0 %v5015_v15, %s5671_s24  ;;  %4801 = vrot.lane.b32.xlu1 %v4714_v4, %s5670_s17  ;;  %v5333_v21 = vrot.slane %v5305_v14, %v7820_v56  ;;  %10261 = vst [vmem:[#allocation25_spill] sm:$0xff] %v7865_v42  ;;  %v7900_v31 = vor.u32 %v2275_v58, %v2274_v23  ;;  %v7912_v14 = vadd.s32 1024, %v10270_v54  ;;  %v2975_v23 = vld [vmem:[#allocation2 + $0xc2] ss:$8 sm:$0xf0]  ;;  %vm10314_vm15 = vcmask 531456  }
 0x2c7   : > { %v5342_v35 = vrot.slane %v5334_v3, %v7820_v56  ;;  %v3147_v12 = vrot.slane %v2978_v62, %v6441_v40  ;;  %v5035_v28 = vrot.slane %v7398_v33, %v6513_v43  ;;  %v7909_v4 = vor.u32 %v3699_v55, %v3698_v0  ;;  %v2660_v3 = vld [vmem:[#allocation2 + $0x101] ss:$8 sm:$0x1]  ;;  %v3919_v26 = vld [vmem:[#allocation2 + $0xcd] ss:$8 sm:$0xf0]  ;;  %vm10321_vm14 = vmmov %vm10314_vm15 }
 0x2c8   : > { %v5335_v61 = vcombine.low %v5326_v63, %v5333_v21  ;;  %v7874_v44 = vpop.permute.xlu1 %5104  ;;  %v3703_v63 = vld [vmem:[#allocation2 + $0x8c] ss:$8 sm:$0xf0]  ;;  %v7916_v21 = vadd.s32 1152, %v10270_v54  ;;  %v7926_v33 = vadd.s32 1536, %v10270_v54  ;;  %v2423_v58 = vrot.slane %v7900_v31, %v6470_v5  ;;  %vm10324_vm12 = vmmov %vm10321_vm14 }
 0x2c9   : > { %10262 = vst [vmem:[#allocation45_spill] sm:$0xff] %v7874_v44  ;;  %v7881_v11 = vpop.permute.xlu0 %2488  ;;  %10269 = vst [vmem:[#allocation27_spill] sm:$0xff] %v7909_v4  ;;  %v2657_v62 = vld [vmem:[#allocation2 + $0xc1] ss:$8 sm:$0xf0]  ;;  %v10282_v19 = vand.u32 63, %v7912_v14 }
 0x2ca   : > { %5114 = vrot.lane.b32.xlu0 %v5023_v25, %s5671_s24  ;;  %4805 = vrot.lane.b32.xlu1 %v4722_v30, %s5670_s17  ;;  %v5349_v32 = vrot.slane %v5335_v61, %v7820_v56  ;;  %10263 = vst [vmem:[#allocation10_spill] sm:$0xff] %v7881_v11  ;;  %v7919_v25 = vadd.s32 1280, %v10270_v54  ;;  %v7922_v30 = vadd.s32 1408, %v10270_v54  ;;  %v7929_v61 = vadd.s32 1664, %v10270_v54  ;;  %vm10326_vm1 = vmmov %vm10324_vm12  ;;  %v10366_v11 = vld [vmem:[#allocation55_spill] sm:$0xff]  ;;  %v10373_v42 = vld [vmem:[#allocation64_spill] sm:$0xff] }
 0x2cb   : > { %v4269_v56 = vld [vmem:[#allocation2 + $0xce] ss:$8 sm:$0xf0]  ;;  %v3918_v0 = vld [vmem:[#allocation2 + $0xcd] ss:$8 sm:$0xf]  ;;  %vm10329_vm10 = vmmov %vm10326_vm1 }
 0x2cc   : > { %v5350_v57 = vcombine.low %v5342_v35, %v5349_v32  ;;  %v7885_v38 = vpop.permute.xlu1 %2482  ;;  %v7932_v35 = vadd.s32 1792, %v10270_v54  ;;  %v4617_v44 = vld [vmem:[#allocation2 + $0xcf] ss:$8 sm:$0xf]  ;;  %v8001_v6 = vor.u32 %v3919_v26, %v3918_v0  ;;  %vm8013_vm2 = vcmp.gt.s32.totalorder %v10282_v19, 0 }
 0x2cd   : > { %10264 = vst [vmem:[#allocation61_spill] sm:$0xff] %v7885_v38  ;;  %v7891_v24 = vpop.permute.xlu0 %2492  ;;  %v8009_v9 = vor.u32 %v4618_v29, %v4617_v44  ;;  %v2439_v26 = vrot.slane %v7900_v31, %v6513_v43  ;;  %v10285_v29 = vand.u32 63, %v7916_v21  ;;  %v2435_v19 = vrot.slane %v7900_v31, %v6541_v7 }
 0x2ce   : > { %5118 = vrot.lane.b32.xlu0 %v5031_v36, %s5671_s24  ;;  %5108 = vrot.lane.b32.xlu1 %v5011_v27, %s5671_s24  ;;  %5502 = vst [vmem:[%s7872_s29] sm:$0xff] %v5350_v57  ;;  %10265 = vst [vmem:[#allocation32_spill] sm:$0xff] %v7891_v24  ;;  %v2415_v36 = vrot.slane %v7900_v31, %v6441_v40  ;;  %v3702_v27 = vld [vmem:[#allocation2 + $0x8c] ss:$8 sm:$0xf]  ;;  %v10289_v52 = vand.u32 63, %v7919_v25  ;;  %v10296_v37 = vand.u32 63, %v7926_v33 }
 0x2cf   : > { %10278 = vst [vmem:[#allocation44_spill] sm:$0xff] %v8001_v6  ;;  %10281 = vst [vmem:[#allocation35_spill] sm:$0xff] %v8009_v9  ;;  %vm8026_vm0 = vcmp.gt.s32.totalorder %v10285_v29, 0  ;;  %v10299_v8 = vand.u32 63, %v7929_v61  ;;  %v10330_v6 = vand.u32 63, %v7919_v25  ;;  %v8213_v25 = vadd.s32 2176, %v10270_v54 }
 0x2d0   : > { %v7894_v16 = vpop.permute.xlu1 %2486  ;;  %vm8051_vm4 = vcmp.gt.s32.totalorder %v10289_v52, 0  ;;  %vm8073_vm6 = vcmp.gt.s32.totalorder %v10296_v37, 0  ;;  %v10300_v52 = vmov 0  ;;  %v10304_v37 = vand.u32 63, %v7912_v14  ;;  %v10328_v14 = vld [vmem:[#allocation54_spill] sm:$0xff]  ;;  %v10362_v24 = vld [vmem:[#allocation53_spill] sm:$0xff] }
 0x2d1   : > { %10266 = vst [vmem:[#allocation58_spill] sm:$0xff] %v7894_v16  ;;  %v7902_v15 = vpop.permute.xlu0 %2832  ;;  %vm8097_vm7 = vcmp.gt.s32.totalorder %v10299_v8, 0  ;;  %v10305_v8 = vmov 0  ;;  %vm8192_vm13 = vcmp.lt.s32.totalorder %v10330_v6, 63  ;;  %v8210_v6 = vadd.s32 2048, %v10270_v54  ;;  %v10371_v16 = vld [vmem:[#allocation57_spill] sm:$0xff] }
 0x2d2   : > { %5122 = vrot.lane.b32.xlu0 %v5039_v48, %s5671_s24  ;;  %5112 = vrot.lane.b32.xlu1 %v5019_v10, %s5671_s24  ;;  %10267 = vst [vmem:[#allocation11_spill] sm:$0xff] %v7902_v15  ;;  %v2797_v48 = vrot.slane %v2660_v3, %v6441_v40  ;;  %v7941_v10 = vor.u32 %v3703_v63, %v3702_v27  ;;  %v3356_v3 = vld [vmem:[#allocation2 + $0xc3] ss:$8 sm:$0xf]  ;;  %v10301_v52 = vsel %vm8097_vm7, 4294967295, %v10300_v52  ;;  %vm8113_vm8 = vcmp.lt.s32.totalorder %v10304_v37, 63 }
 0x2d3   : > { %10302 = vst [vmem:[#allocation48_spill] sm:$0xff] %v10301_v52  ;;  %v10306_v8 = vsel %vm8113_vm8, 4294967295, %v10305_v8 }
 0x2d4   : > { %v7905_v49 = vpop.permute.xlu1 %2490  ;;  %10273 = vst [vmem:[#allocation31_spill] sm:$0xff] %v7941_v10  ;;  %10307 = vst [vmem:[#allocation40_spill] sm:$0xff] %v10306_v8  ;;  %v10308_v10 = vand.u32 63, %v7916_v21 }
 0x2d5   : > { %10268 = vst [vmem:[#allocation75_spill] sm:$0xff] %v7905_v49  ;;  %v7934_v32 = vpop.permute.xlu0 %2836  ;;  %v10364_v49 = vld [vmem:[#allocation60_spill] sm:$0xff] }
 0x2d6   : > { %2512 = vrot.lane.b32.xlu0 %v2447_v34, %s5669_s16  ;;  %5116 = vrot.lane.b32.xlu1 %v5027_v41, %s5671_s24  ;;  %10271 = vst [vmem:[#allocation34_spill] sm:$0xff] %v7934_v32  ;;  %v3360_v41 = vld [vmem:[#allocation2 + $0x103] ss:$8 sm:$0x1]  ;;  %vm8119_vm11 = vcmp.lt.s32.totalorder %v10308_v10, 63  ;;  %v10315_v10 = vand.u32 63, %v7932_v35 }
 0x2d7   : > { %v2974_v34 = vld [vmem:[#allocation2 + $0xc2] ss:$8 sm:$0xf]  ;;  %v10342_v32 = vand.u32 63, %v7926_v33 }
 0x2d8   : > { %v7938_v57 = vpop.permute.xlu1 %2494  ;;  %v7989_v59 = vor.u32 %v2975_v23, %v2974_v34  ;;  %v2419_v23 = vrot.slane %v7900_v31, %v6494_v20  ;;  %vm8140_vm9 = vcmp.gt.s32.totalorder %v10315_v10, 0  ;;  %v10323_v10 = vld [vmem:[#allocation52_spill] sm:$0xff] }
 0x2d9   : > { %10272 = vst [vmem:[#allocation29_spill] sm:$0xff] %v7938_v57  ;;  %v7958_v27 = vpop.permute.xlu0 %2840  ;;  %v10360_v57 = vld [vmem:[#allocation56_spill] sm:$0xff] }
 0x2da   : > { %3212 = vrot.lane.b32.xlu0 %v3147_v12, %s5671_s24  ;;  %5120 = vrot.lane.b32.xlu1 %v5035_v28, %s5671_s24  ;;  %v2656_v28 = vld [vmem:[#allocation2 + $0xc1] ss:$8 sm:$0xf]  ;;  %10274 = vst [vmem:[#allocation36_spill] sm:$0xff] %v7958_v27 }
 0x2db   : > { %v3357_v12 = vld [vmem:[#allocation2 + $0xc3] ss:$8 sm:$0xf0]  ;;  %v7971_v55 = vor.u32 %v2657_v62, %v2656_v28  ;;  %v8145_v62 = vadd.s32 1920, %v10270_v54 }
 0x2dc   : > { %v7968_v63 = vpop.permute.xlu1 %2830  ;;  %v7999_v28 = vor.u32 %v3357_v12, %v3356_v3  ;;  %v10292_v3 = vand.u32 63, %v7922_v30  ;;  %v10320_v12 = vld [vmem:[#allocation47_spill] sm:$0xff] }
 0x2dd   : > { %10275 = vst [vmem:[#allocation46_spill] sm:$0xff] %v7968_v63  ;;  %v10346_v63 = vand.u32 63, %v7929_v61  ;;  %v10375_v18 = vrot.slane %v7971_v55, %v6441_v40 }
 0x2de   : > { %2496 = vrot.lane.b32.xlu0 %v2415_v36, %s5669_s16  ;;  %2862 = vrot.lane.b32.xlu1 %v2797_v48, %s5670_s17  ;;  %v3497_v36 = vrot.slane %v3360_v41, %v6441_v40  ;;  %v7991_v48 = vpop.permute.xlu0 %2844  ;;  %10277 = vst [vmem:[#allocation33_spill] sm:$0xff] %v7999_v28  ;;  %vm8057_vm5 = vcmp.gt.s32.totalorder %v10292_v3, 0  ;;  %v10297_v3 = vmov 0 }
 0x2df   : > { %10276 = vst [vmem:[#allocation39_spill] sm:$0xff] %v7991_v48  ;;  %v10294_v13 = vsel %vm8057_vm5, 4294967295, %v10293_v13  ;;  %v10298_v3 = vsel %vm8073_vm6, 4294967295, %v10297_v3  ;;  %v10316_v48 = vmov 0 }
 0x2e0   : > { %v8005_v34 = vpop.permute.xlu1 %2834  ;;  %v10317_v48 = vsel %vm8140_vm9, 4294967295, %v10316_v48 }
 0x2e1   : > { %10280 = vst [vmem:[#allocation79_spill] sm:$0xff] %v8005_v34  ;;  %10318 = vst [vmem:[#allocation87_spill] sm:$0xff] %v10317_v48  ;;  %v10343_v34 = vmov 0 }
 0x2e2   : > { %2500 = vrot.lane.b32.xlu0 %v2423_v58, %s5669_s16  ;;  %3562 = vrot.lane.b32.xlu1 %v3497_v36, %s5672_s25  ;;  %v2431_v36 = vrot.slane %v7900_v31, %v6491_v22  ;;  %v8003_v58 = vor.u32 %v4269_v56, %v4268_v47  ;;  %v2427_v56 = vrot.slane %v7900_v31, %v6518_v46 }
 0x2e3   : > { %v2769_v47 = vrot.slane %v7971_v55, %v6494_v20 }
 0x2e4   : > { %10279 = vst [vmem:[#allocation37_spill] sm:$0xff] %v8003_v58  ;;  %v8061_v29 = vpop.permute.xlu1 %2838  ;;  %v10456_v58 = vld [vmem:[#allocation81_spill] sm:$0xff] }
 0x2e5   : > { %10295 = vst [vmem:[#allocation42_spill] sm:$0xff] %v8061_v29 }
 0x2e6   : > { %2504 = vrot.lane.b32.xlu0 %v2431_v36, %s5669_s16  ;;  %2498 = vrot.lane.b32.xlu1 %v2419_v23, %s5669_s16  ;;  %v8039_v36 = vpop.permute.xlu0 %3180 }
 0x2e7   : > { %10288 = vst [vmem:[#allocation38_spill] sm:$0xff] %v8039_v36  ;;  %v10309_v36 = vmov 0 }
 0x2e8   : > { %v10310_v36 = vsel %vm8119_vm11, 4294967295, %v10309_v36 }
 0x2e9   : > { %10311 = vst [vmem:[#allocation43_spill] sm:$0xff] %v10310_v36 }
 0x2ea   : > { %2508 = vrot.lane.b32.xlu0 %v2439_v26, %s5669_s16  ;;  %2502 = vrot.lane.b32.xlu1 %v2427_v56, %s5669_s16  ;;  %v8101_v23 = vpop.permute.xlu0 %3184  ;;  %v8123_v56 = vpop.permute.xlu1 %2842  ;;  %v10313_v26 = vld [vmem:[#allocation50_spill] sm:$0xff] }
 0x2eb   : > { %10303 = vst [vmem:[#allocation41_spill] sm:$0xff] %v8101_v23  ;;  %10312 = vst [vmem:[#allocation3_spill] sm:$0xff] %v8123_v56  ;;  %v8136_v21 = vsel %vm10314_vm15, %v10182_v50, %v10313_v26  ;;  %v2524_v50 = vsel %vm10321_vm14, %v10313_v26, %v10320_v12  ;;  %vm8234_vm14 = vcmp.lt.s32.totalorder %v10342_v32, 63 }
 0x2ec   : > { %10319 = vst [vmem:[#allocation50_spill] sm:$0xff] %v8145_v62  ;;  %v2587_v23 = vsel %vm8013_vm2, %v8136_v21, 0.0  ;;  %v2588_v26 = vsel %vm8026_vm0, %v2524_v50, 0.0  ;;  %v10340_v62 = vld [vmem:[#allocation51_spill] sm:$0xff]  ;;  %vm10341_vm15 = vmmov %vm10326_vm1  ;;  %v10344_v34 = vsel %vm8234_vm14, 4294967295, %v10343_v34 }
 0x2ed   : > { %v2528_v29 = vsel %vm10341_vm15, %v10328_v14, %v10340_v62  ;;  %10345 = vst [vmem:[#allocation51_spill] sm:$0xff] %v10344_v34 }
 0x2ee   : > { %2848 = vrot.lane.b32.xlu0 %v2769_v47, %s5670_s17  ;;  %2506 = vrot.lane.b32.xlu1 %v2435_v19, %s5669_s16  ;;  %v8162_v56 = vpop.permute.xlu0 %3188  ;;  %v2525_v47 = vsel %vm10324_vm12, %v10320_v12, %v10323_v10  ;;  %v8181_v27 = vpop.permute.xlu1 %3182  ;;  %v10331_v12 = vmov 0  ;;  %v10335_v19 = vand.u32 63, %v7922_v30  ;;  %v10339_v30 = vrot.slane %v7900_v31, %v6558_v17 }
 0x2ef   : > { %10322 = vst [vmem:[#allocation47_spill] sm:$0xff] %v8162_v56  ;;  %v10325_v56 = vld [vmem:[#allocation49_spill] sm:$0xff]  ;;  %10327 = vst [vmem:[#allocation52_spill] sm:$0xff] %v8181_v27  ;;  %v10332_v12 = vsel %vm8192_vm13, 4294967295, %v10331_v12  ;;  %v10334_v27 = vrot.slane %v7971_v55, %v6518_v46  ;;  %vm8240_vm12 = vcmp.lt.s32.totalorder %v10346_v63, 63  ;;  %v10347_v31 = vmov 0 }
 0x2f0   : > { %v2526_v37 = vsel %vm10326_vm1, %v10323_v10, %v10325_v56  ;;  %v2527_v21 = vsel %vm10329_vm10, %v10325_v56, %v10328_v14  ;;  %10333 = vst [vmem:[#allocation49_spill] sm:$0xff] %v10332_v12  ;;  %vm8205_vm3 = vcmp.lt.s32.totalorder %v10335_v19, 63  ;;  %v10336_v56 = vmov 0  ;;  %v10357_v63 = vld [vmem:[#allocation63_spill] sm:$0xff] }
 0x2f1   : > { %v10337_v56 = vsel %vm8205_vm3, 4294967295, %v10336_v56  ;;  %v8216_v10 = vadd.s32 2304, %v10270_v54  ;;  %v2589_v19 = vsel %vm8051_vm4, %v2525_v47, 0.0  ;;  %v2590_v50 = vsel %vm8057_vm5, %v2526_v37, 0.0 }
 0x2f2   : > { %2852 = vrot.lane.b32.xlu0 %v10334_v27, %s5670_s17  ;;  %10338 = vst [vmem:[#allocation54_spill] sm:$0xff] %v10337_v56  ;;  %v8219_v27 = vadd.s32 2432, %v10270_v54  ;;  %2510 = vrot.lane.b32.xlu1 %v10339_v30, %s5669_s16  ;;  %v10348_v31 = vsel %vm8240_vm12, 4294967295, %v10347_v31  ;;  %v10350_v47 = vand.u32 63, %v7932_v35  ;;  %v10351_v37 = vmov 0  ;;  %v8253_v33 = vpop.permute.xlu0 %3192  ;;  %v10355_v30 = vld [vmem:[#allocation66_spill] sm:$0xff]  ;;  %v8266_v15 = vpop.permute.xlu1 %3186 }
 0x2f3   : > { %10349 = vst [vmem:[#allocation98_spill] sm:$0xff] %v10348_v31  ;;  %v8251_v14 = vadd.s32 2560, %v10270_v54  ;;  %10354 = vst [vmem:[#allocation100_spill] sm:$0xff] %v8253_v33  ;;  %v2591_v32 = vsel %vm8073_vm6, %v2527_v21, 0.0  ;;  %vm10356_vm10 = vcmask 515072   ;;  %vm10361_vm5 = vcmask 531456  }
 0x2f4   : > { %vm8246_vm1 = vcmp.lt.s32.totalorder %v10350_v47, 63  ;;  %v3223_v61 = vsel %vm10356_vm10, %v10185_v45, %v10355_v30  ;;  %vm10358_vm15 = vmmov %vm10356_vm10  ;;  %v8264_v47 = vadd.s32 2688, %v10270_v54  ;;  %10359 = vst [vmem:[#allocation66_spill] sm:$0xff] %v8266_v15  ;;  %v2529_v33 = vsel %vm10361_vm5, %v10340_v62, %v10360_v57  ;;  %v10369_v57 = vld [vmem:[#allocation62_spill] sm:$0xff] }
 0x2f5   : > { %v10352_v37 = vsel %vm8246_vm1, 4294967295, %v10351_v37  ;;  %v3224_v35 = vsel %vm10358_vm15, %v10355_v30, %v10357_v63  ;;  %vm10363_vm6 = vcmask 523264   ;;  %v10368_v15 = vrot.slane %v7971_v55, %v6541_v7 }
 0x2f6   : > { %10353 = vst [vmem:[#allocation99_spill] sm:$0xff] %v10352_v37  ;;  %v2873_v21 = vsel %vm10363_vm6, %v10189_v1, %v10362_v24  ;;  %vm10365_vm10 = vmmov %vm10363_vm6  ;;  %v2592_v62 = vsel %vm8097_vm7, %v2528_v29, 0.0  ;;  %2846 = vrot.lane.b32.xlu1 %v10375_v18, %s5670_s17  ;;  %v3288_v38 = vsel %vm8119_vm11, %v3224_v35, 0.0  ;;  %v8309_v28 = vpop.permute.xlu0 %3532  ;;  %v8313_v51 = vpop.permute.xlu1 %3190  ;;  %v10446_v9 = vand.u32 63, %v8216_v10  ;;  %v10524_v37 = vld [vmem:[#allocation36_spill] sm:$0xff] }
 0x2f7   : > { %v2874_v45 = vsel %vm10365_vm10, %v10362_v24, %v10364_v49  ;;  %vm10367_vm15 = vmmov %vm10363_vm6  ;;  %2856 = vrot.lane.b32.xlu0 %v10368_v15, %s5670_s17  ;;  %v10376_v15 = vld [vmem:[#allocation59_spill] sm:$0xff]  ;;  %10378 = vst [vmem:[#allocation63_spill] sm:$0xff] %v8309_v28  ;;  %v2937_v53 = vadd.f32 %v2873_v21, %v2587_v23  ;;  %v10382_v23 = vld [vmem:[#allocation65_spill] sm:$0xff]  ;;  %v10459_v52 = vand.u32 63, %v8251_v14 }
 0x2f8   : > { %v2875_v30 = vsel %vm10367_vm15, %v10364_v49, %v10366_v11  ;;  %vm10370_vm5 = vmmov %vm10363_vm6  ;;  %v2938_v18 = vadd.f32 %v2874_v45, %v2588_v26  ;;  %v10389_v21 = vld [vmem:[#allocation72_spill] sm:$0xff] }
 0x2f9   : > { %v2876_v1 = vsel %vm10370_vm5, %v10366_v11, %v10369_v57  ;;  %vm10372_vm6 = vmmov %vm10370_vm5  ;;  %v3287_v11 = vsel %vm8113_vm8, %v3223_v61, 0.0  ;;  %v2939_v39 = vadd.f32 %v2875_v30, %v2589_v19  ;;  %v10379_v61 = vld [vmem:[#allocation68_spill] sm:$0xff]  ;;  %v10385_v19 = vld [vmem:[#allocation70_spill] sm:$0xff] }
 0x2fa   : > { %v2877_v24 = vsel %vm10372_vm6, %v10369_v57, %v10371_v16  ;;  %vm10374_vm10 = vmmov %vm10370_vm5  ;;  %v8307_v57 = vadd.s32 2816, %v10270_v54  ;;  %v10381_v54 = vrot.slane %v7971_v55, %v6558_v17  ;;  %v3319_v36 = vadd.f32 %v3287_v11, %v2937_v53  ;;  %v8341_v30 = vpop.permute.xlu0 %3536  ;;  %v10396_v11 = vld [vmem:[#allocation80_spill] sm:$0xff] }
 0x2fb   : > { %v2878_v49 = vsel %vm10374_vm10, %v10371_v16, %v10373_v42  ;;  %vm10377_vm15 = vmmov %vm10370_vm5  ;;  %v2593_v16 = vsel %vm8140_vm9, %v2529_v33, 0.0  ;;  %vm10380_vm5 = vcmask 515072   ;;  %v3320_v33 = vadd.f32 %v3288_v38, %v2938_v18  ;;  %v10390_v38 = vld [vmem:[#allocation69_spill] sm:$0xff]  ;;  %v8354_v18 = vpop.permute.xlu1 %3194 }
 0x2fc   : > { %v2879_v29 = vsel %vm10377_vm15, %v10373_v42, %v10376_v15  ;;  %v2940_v42 = vadd.f32 %v2876_v1, %v2590_v50  ;;  %v2941_v15 = vadd.f32 %v2877_v24, %v2591_v32  ;;  %v2942_v8 = vadd.f32 %v2878_v49, %v2592_v62  ;;  %2860 = vrot.lane.b32.xlu0 %v10381_v54, %s5670_s17  ;;  %vm10383_vm6 = vmmov %vm10380_vm5  ;;  %v10392_v1 = vld [vmem:[#allocation78_spill] sm:$0xff]  ;;  %v10394_v49 = vld [vmem:[#allocation71_spill] sm:$0xff] }
 0x2fd   : > { %v3225_v35 = vsel %vm10380_vm5, %v10357_v63, %v10379_v61  ;;  %v2943_v28 = vadd.f32 %v2879_v29, %v2593_v16  ;;  %v3226_v26 = vsel %vm10383_vm6, %v10379_v61, %v10382_v23  ;;  %v10384_v50 = vrot.slane %v7971_v55, %v6470_v5  ;;  %vm10386_vm10 = vmmov %vm10380_vm5  ;;  %v10387_v63 = vld [vmem:[#allocation67_spill] sm:$0xff]  ;;  %10398 = vst [vmem:[#allocation53_spill] sm:$0xff] %v8354_v18  ;;  %v10399_v61 = vld [vmem:[#allocation74_spill] sm:$0xff] }
 0x2fe   : > { %v3227_v32 = vsel %vm10386_vm10, %v10382_v23, %v10385_v19  ;;  %vm10388_vm15 = vmmov %vm10380_vm5  ;;  %v3229_v53 = vsel %vm10380_vm5, %v10387_v63, %v10389_v21  ;;  %vm10391_vm6 = vcmask 7168   ;;  %v3289_v62 = vsel %vm8192_vm13, %v3225_v35, 0.0  ;;  %v10401_v23 = vld [vmem:[#allocation84_spill] sm:$0xff] }
 0x2ff   : > { %2850 = vrot.lane.b32.xlu1 %v10384_v50, %s5670_s17  ;;  %v3228_v54 = vsel %vm10388_vm15, %v10385_v19, %v10387_v63  ;;  %v3573_v45 = vsel %vm10391_vm6, %v10193_v60, %v10390_v38  ;;  %vm10393_vm10 = vmmov %vm10391_vm6  ;;  %v3290_v60 = vsel %vm8205_vm3, %v3226_v26, 0.0  ;;  %v10403_v19 = vld [vmem:[#allocation77_spill] sm:$0xff]  ;;  %v3291_v26 = vsel %vm8234_vm14, %v3227_v32, 0.0 }
 0x300   : > { %v3574_v24 = vsel %vm10393_vm10, %v10390_v38, %v10392_v1  ;;  %vm10395_vm15 = vmmov %vm10391_vm6  ;;  %v10405_v38 = vrot.slane %v7989_v59, %v6441_v40  ;;  %v10528_v34 = vand.u32 63, %v8307_v57 }
 0x301   : > { %v3575_v29 = vsel %vm10395_vm15, %v10392_v1, %v10394_v49  ;;  %vm10397_vm5 = vmmov %vm10391_vm6  ;;  %v3292_v1 = vsel %vm8240_vm12, %v3228_v54, 0.0 }
 0x302   : > { %v3576_v16 = vsel %vm10397_vm5, %v10394_v49, %v10396_v11  ;;  %vm10400_vm6 = vmmov %vm10397_vm5  ;;  %3196 = vrot.lane.b32.xlu0 %v10405_v38, %s5671_s24  ;;  %v3293_v49 = vsel %vm8246_vm1, %v3229_v53, 0.0  ;;  %v3638_v38 = vsel %vm8026_vm0, %v3574_v24, 0.0  ;;  %v3639_v32 = vsel %vm8051_vm4, %v3575_v29, 0.0 }
 0x303   : > { %v3577_v35 = vsel %vm10400_vm6, %v10396_v11, %v10399_v61  ;;  %vm10402_vm10 = vmmov %vm10397_vm5  ;;  %v3637_v11 = vsel %vm8013_vm2, %v3573_v45, 0.0  ;;  %v3322_v53 = vadd.f32 %v3290_v60, %v2940_v42  ;;  %vm10408_vm6 = vnez %v10298_v3 }
 0x304   : > { %v3578_v50 = vsel %vm10402_vm10, %v10399_v61, %v10401_v23  ;;  %vm10404_vm15 = vmmov %vm10397_vm5  ;;  %v10406_v61 = vrot.slane %v7971_v55, %v6491_v22  ;;  %vm10407_vm5 = vnez %v10294_v13  ;;  %v3641_v45 = vsel %vm10408_vm6, %v3577_v35, 0.0 }
 0x305   : > { %v3579_v63 = vsel %vm10404_vm15, %v10401_v23, %v10403_v19  ;;  %v3321_v23 = vadd.f32 %v3289_v62, %v2939_v39  ;;  %v3640_v54 = vsel %vm10407_vm5, %v3576_v16, 0.0  ;;  %v8389_v19 = vpop.permute.xlu0 %3540  ;;  %v3642_v21 = vsel %vm8097_vm7, %v3578_v50, 0.0  ;;  %v8397_v62 = vpop.permute.xlu1 %3530 }
 0x306   : > { %2854 = vrot.lane.b32.xlu1 %v10406_v61, %s5670_s17  ;;  %v3643_v39 = vsel %vm8140_vm9, %v3579_v63, 0.0  ;;  %10409 = vst [vmem:[#allocation60_spill] sm:$0xff] %v8397_v62  ;;  %v3323_v24 = vadd.f32 %v3291_v26, %v2941_v15  ;;  %v3324_v61 = vadd.f32 %v3292_v1, %v2942_v8  ;;  %v3325_v29 = vadd.f32 %v3293_v49, %v2943_v28  ;;  %v10442_v49 = vld [vmem:[#allocation97_spill] sm:$0xff] }
 0x307   : > { %v3669_v18 = vadd.f32 %v3637_v11, %v3319_v36  ;;  %v10410_v16 = vrot.slane %v7989_v59, %v6470_v5  ;;  %v3670_v42 = vadd.f32 %v3638_v38, %v3320_v33  ;;  %v3671_v60 = vadd.f32 %v3639_v32, %v3321_v23  ;;  %v10439_v32 = vld [vmem:[#allocation95_spill] sm:$0xff]  ;;  %v10441_v38 = vld [vmem:[#allocation92_spill] sm:$0xff] }
 0x308   : > { %v3672_v35 = vadd.f32 %v3640_v54, %v3322_v53  ;;  %v10411_v50 = vrot.slane %v7971_v55, %v6513_v43  ;;  %v3673_v15 = vadd.f32 %v3641_v45, %v3323_v24  ;;  %v3674_v8 = vadd.f32 %v3642_v21, %v3324_v61  ;;  %v10444_v33 = vld [vmem:[#allocation16_spill] sm:$0xff] }
 0x309   : > { %3200 = vrot.lane.b32.xlu0 %v10410_v16, %s5671_s24  ;;  %v3675_v28 = vadd.f32 %v3643_v39, %v3325_v29  ;;  %v9913_v36 = vand.u32 63, %v8210_v6  ;;  %v8410_v26 = vpop.permute.xlu0 %3544  ;;  %v2247_v1 = vand.u32 63, %v8213_v25  ;;  %v8415_v11 = vpop.permute.xlu1 %3534  ;;  %v10413_v23 = vrot.slane %v7909_v4, %v6441_v40  ;;  %v10416_v39 = vld [vmem:[#allocation89_spill] sm:$0xff] }
 0x30a   : > { %2858 = vrot.lane.b32.xlu1 %v10411_v50, %s5670_s17  ;;  %10412 = vst [vmem:[#allocation55_spill] sm:$0xff] %v8410_v26  ;;  %v10414_v25 = vrot.slane %v7989_v59, %v6491_v22  ;;  %v10415_v53 = vrot.slane %v7909_v4, %v6494_v20  ;;  %vm10417_vm10 = vcmask 1039360   ;;  %v10419_v29 = vrot.slane %v7909_v4, %v6518_v46 }
 0x30b   : > { %v3881_v21 = vadd.f32 %v10413_v23, %v3669_v18  ;;  %v4135_v24 = vsel %vm10417_vm10, %v10220_v2, %v10416_v39  ;;  %v10418_v18 = vrot.slane %v7909_v4, %v6470_v5  ;;  %v10420_v50 = vrot.slane %v7989_v59, %v6494_v20  ;;  %v10421_v23 = vld [vmem:[#allocation83_spill] sm:$0xff]  ;;  %vm10422_vm15 = vmmov %vm10417_vm10 }
 0x30c   : > { %v3882_v45 = vadd.f32 %v10415_v53, %v3670_v42  ;;  %v3884_v16 = vadd.f32 %v10419_v29, %v3672_v35  ;;  %v4136_v42 = vsel %vm10422_vm15, %v10416_v39, %v10421_v23  ;;  %v10423_v2 = vrot.slane %v7909_v4, %v6491_v22  ;;  %v10429_v39 = vld [vmem:[#allocation91_spill] sm:$0xff]  ;;  %vm10431_vm9 = vmmov %vm10422_vm15 }
 0x30d   : > { %3204 = vrot.lane.b32.xlu0 %v10414_v25, %s5671_s24  ;;  %v3883_v61 = vadd.f32 %v10418_v18, %v3671_v60  ;;  %v10424_v60 = vrot.slane %v7909_v4, %v6541_v7  ;;  %v10425_v35 = vrot.slane %v7909_v4, %v6513_v43  ;;  %vm8459_vm10 = vcmp.gt.s32.totalorder %v9913_v36, 0  ;;  %vm10433_vm7 = vmmov %vm10431_vm9  ;;  %v8481_v36 = vpop.permute.xlu1 %3538 }
 0x30e   : > { %3198 = vrot.lane.b32.xlu1 %v10420_v50, %s5671_s24  ;;  %v3885_v25 = vadd.f32 %v10423_v2, %v3673_v15  ;;  %v10426_v29 = vmov 0  ;;  %v8463_v50 = vpop.permute.xlu0 %4092  ;;  %v4137_v15 = vsel %vm10422_vm15, %v10421_v23, %v10429_v39  ;;  %v10430_v2 = vld [vmem:[#allocation88_spill] sm:$0xff]  ;;  %vm10435_vm6 = vmmov %vm10433_vm7  ;;  %vm8477_vm5 = vcmp.gt.s32.totalorder %v2247_v1, 0 }
 0x30f   : > { %v3886_v53 = vadd.f32 %v10424_v60, %v3674_v8  ;;  %v3887_v18 = vadd.f32 %v10425_v35, %v3675_v28  ;;  %v10427_v29 = vsel %vm8459_vm10, 4294967295, %v10426_v29  ;;  %10428 = vst [vmem:[#allocation62_spill] sm:$0xff] %v8463_v50  ;;  %v4138_v8 = vsel %vm10431_vm9, %v10429_v39, %v10430_v2  ;;  %v10432_v60 = vld [vmem:[#allocation93_spill] sm:$0xff]  ;;  %v10434_v35 = vld [vmem:[#allocation90_spill] sm:$0xff]  ;;  %vm10440_vm9 = vmmov %vm10435_vm6 }
 0x310   : > { %v4139_v28 = vsel %vm10433_vm7, %v10430_v2, %v10432_v60  ;;  %v4140_v55 = vsel %vm10435_vm6, %v10432_v60, %v10434_v35  ;;  %v4199_v23 = vsel %vm8113_vm8, %v4135_v24, 0.0  ;;  %v4141_v39 = vsel %vm10440_vm9, %v10434_v35, %v10439_v32  ;;  %v10454_v32 = vld [vmem:[#allocation94_spill] sm:$0xff] }
 0x311   : > { %vm10443_vm7 = vcmask 531456   ;;  %vm8496_vm15 = vcmp.gt.s32.totalorder %v10446_v9, 0  ;;  %v10449_v24 = vand.u32 63, %v8219_v27  ;;  %v10450_v54 = vmov 0  ;;  %v8559_v12 = vpop.permute.xlu1 %3542 }
 0x312   : > { %v4484_v2 = vsel %vm10443_vm7, %v10442_v49, %v10441_v38  ;;  %vm10445_vm6 = vmmov %vm10443_vm7  ;;  %v10452_v49 = vrot.slane %v7989_v59, %v6513_v43  ;;  %v4203_v35 = vsel %vm8234_vm14, %v4139_v28, 0.0  ;;  %v8551_v26 = vpop.permute.xlu0 %4096  ;;  %v4231_v62 = vadd.f32 %v4199_v23, %v3881_v21  ;;  %v10471_v23 = vld [vmem:[#allocation33_spill] sm:$0xff] }
 0x313   : > { %v4485_v60 = vsel %vm10445_vm6, %v10441_v38, %v10444_v33  ;;  %vm8502_vm8 = vcmp.gt.s32.totalorder %v10449_v24, 0  ;;  %v4200_v38 = vsel %vm8119_vm11, %v4136_v42, 0.0  ;;  %vm10455_vm9 = vmmov %vm10445_vm6  ;;  %v10458_v24 = vld [vmem:[#allocation96_spill] sm:$0xff]  ;;  %v10462_v42 = vand.u32 63, %v8264_v47 }
 0x314   : > { %v10451_v54 = vsel %vm8502_vm8, 4294967295, %v10450_v54  ;;  %3208 = vrot.lane.b32.xlu0 %v10452_v49, %s5671_s24  ;;  %v4486_v9 = vsel %vm10455_vm9, %v10444_v33, %v10454_v32  ;;  %vm10457_vm7 = vmmov %vm10445_vm6  ;;  %v4488_v50 = vsel %vm10445_vm6, %v10456_v58, %v10458_v24  ;;  %vm8523_vm8 = vcmp.gt.s32.totalorder %v10459_v52, 0 }
 0x315   : > { %v4487_v48 = vsel %vm10457_vm7, %v10454_v32, %v10456_v58  ;;  %vm8529_vm11 = vcmp.gt.s32.totalorder %v10462_v42, 0  ;;  %v10463_v49 = vmov 0  ;;  %v10465_v33 = vand.u32 63, %v8307_v57 }
 0x316   : > { %v10464_v49 = vsel %vm8529_vm11, 4294967295, %v10463_v49  ;;  %v10466_v32 = vmov 0  ;;  %v10468_v58 = vrot.slane %v7989_v59, %v6518_v46  ;;  %v4201_v52 = vsel %vm8192_vm13, %v4137_v15, 0.0 }
 0x317   : > { %vm8535_vm9 = vcmp.gt.s32.totalorder %v10465_v33, 0  ;;  %v4202_v42 = vsel %vm8205_vm3, %v4138_v8, 0.0  ;;  %v4204_v33 = vsel %vm8240_vm12, %v4140_v55, 0.0  ;;  %v4205_v22 = vsel %vm8246_vm1, %v4141_v39, 0.0 }
 0x318   : > { %v10467_v32 = vsel %vm8535_vm9, 4294967295, %v10466_v32  ;;  %3202 = vrot.lane.b32.xlu1 %v10468_v58, %s5671_s24  ;;  %v4548_v58 = vsel %vm8013_vm2, %v4484_v2, 0.0  ;;  %v4549_v15 = vsel %vm8026_vm0, %v4485_v60, 0.0  ;;  %v4232_v8 = vadd.f32 %v4200_v38, %v3882_v45 }
 0x319   : > { %v4550_v28 = vsel %vm8051_vm4, %v4486_v9, 0.0  ;;  %vm10469_vm7 = vnez %v10294_v13  ;;  %vm10470_vm6 = vnez %v10298_v3  ;;  %v10472_v41 = vrot.slane %v10471_v23, %v6494_v20 }
 0x31a   : > { %v4551_v55 = vsel %vm10469_vm7, %v4487_v48, 0.0  ;;  %v4552_v21 = vsel %vm10470_vm6, %v4488_v50, 0.0  ;;  %v4233_v39 = vadd.f32 %v4201_v52, %v3883_v61  ;;  %v4234_v44 = vadd.f32 %v4202_v42, %v3884_v16  ;;  %v10479_v61 = vld [vmem:[#allocation61_spill] sm:$0xff]  ;;  %v10480_v16 = vld [vmem:[#allocation23_spill] sm:$0xff]  ;;  %v8596_v50 = vpop.permute.xlu0 %4100 }
 0x31b   : > { %3548 = vrot.lane.b32.xlu0 %v10472_v41, %s5672_s25  ;;  %v4235_v2 = vadd.f32 %v4203_v35, %v3885_v25  ;;  %v8571_v60 = vadd.f32 %v4204_v33, %v3886_v53  ;;  %vm8573_vm2 = vcmp.lt.s32.totalorder %v2247_v1, 63  ;;  %v10475_v13 = vrot.slane %v7989_v59, %v6541_v7  ;;  %v8619_v33 = vpop.permute.xlu1 %4094 }
 0x31c   : > { %v8581_v48 = vadd.f32 %v4205_v22, %v3887_v18  ;;  %v8583_v0 = vadd.f32 %v4548_v58, %v4231_v62  ;;  %v8585_v3 = vadd.f32 %v4549_v15, %v4232_v8  ;;  %vm10481_vm0 = vcmask 531456   ;;  %v10488_v18 = vld [vmem:[#allocation25_spill] sm:$0xff]  ;;  %v10498_v8 = vld [vmem:[#allocation12_spill] sm:$0xff] }
 0x31d   : > { %3206 = vrot.lane.b32.xlu1 %v10475_v13, %s5671_s24  ;;  %v2531_v25 = vsel %vm10481_vm0, %v10480_v16, %v10479_v61  ;;  %v10482_v1 = vand.u32 63, %v8216_v10  ;;  %v8598_v35 = vadd.f32 %v4550_v28, %v4233_v39  ;;  %v8600_v22 = vadd.f32 %v4551_v55, %v4234_v44  ;;  %vm10489_vm7 = vmmov %vm10481_vm0  ;;  %v10496_v58 = vld [vmem:[#allocation85_spill] sm:$0xff]  ;;  %v10500_v28 = vld [vmem:[#allocation58_spill] sm:$0xff] }
 0x31e   : > { %10476 = vst [vmem:[#allocation57_spill] sm:$0xff] %v8581_v48  ;;  %10477 = vst [vmem:[#allocation64_spill] sm:$0xff] %v8583_v0  ;;  %v8602_v62 = vadd.f32 %v4552_v21, %v4235_v2  ;;  %v2532_v38 = vsel %vm10489_vm7, %v10479_v61, %v10488_v18  ;;  %v10490_v9 = vand.u32 63, %v8219_v27  ;;  %v10491_v10 = vmov 0  ;;  %v10502_v55 = vld [vmem:[#allocation10_spill] sm:$0xff]  ;;  %v10505_v39 = vld [vmem:[#allocation75_spill] sm:$0xff] }
 0x31f   : > { %10478 = vst [vmem:[#allocation68_spill] sm:$0xff] %v8585_v3  ;;  %vm8592_vm4 = vcmp.lt.s32.totalorder %v10482_v1, 63  ;;  %10485 = vst [vmem:[#allocation65_spill] sm:$0xff] %v8598_v35  ;;  %v10493_v52 = vand.u32 63, %v8251_v14  ;;  %v10494_v42 = vmov 0  ;;  %v10504_v41 = vrot.slane %v10471_v23, %v6518_v46  ;;  %v10506_v2 = vld [vmem:[#allocation32_spill] sm:$0xff] }
 0x320   : > { %10486 = vst [vmem:[#allocation70_spill] sm:$0xff] %v8600_v22  ;;  %10487 = vst [vmem:[#allocation67_spill] sm:$0xff] %v8602_v62  ;;  %vm8609_vm6 = vcmp.lt.s32.totalorder %v10490_v9, 63  ;;  %v10508_v61 = vld [vmem:[#allocation29_spill] sm:$0xff]  ;;  %vm10521_vm13 = vnez %v10451_v54  ;;  %v10525_v62 = vand.u32 63, %v8264_v47 }
 0x321   : > { %v10492_v10 = vsel %vm8609_vm6, 4294967295, %v10491_v10  ;;  %vm8615_vm0 = vcmp.lt.s32.totalorder %v10493_v52, 63  ;;  %vm10497_vm1 = vmmov %vm10489_vm7  ;;  %3552 = vrot.lane.b32.xlu0 %v10504_v41, %s5672_s25  ;;  %v2596_v52 = vsel %vm8477_vm5, %v2532_v38, 0.0  ;;  %v10517_v41 = vld [vmem:[#allocation79_spill] sm:$0xff]  ;;  %v10534_v22 = vld [vmem:[#allocation41_spill] sm:$0xff] }
 0x322   : > { %v10495_v42 = vsel %vm8615_vm0, 4294967295, %v10494_v42  ;;  %v8624_v15 = vsel %vm10497_vm1, %v10458_v24, %v10496_v58  ;;  %vm10499_vm7 = vmmov %vm10497_vm1  ;;  %v2595_v24 = vsel %vm8459_vm10, %v2531_v25, 0.0  ;;  %v2535_v44 = vsel %vm10497_vm1, %v10502_v55, %v10505_v39  ;;  %v10554_v48 = vld [vmem:[#allocation53_spill] sm:$0xff] }
 0x323   : > { %v8629_v27 = vsel %vm10499_vm7, %v10496_v58, %v10498_v8  ;;  %vm10501_vm14 = vmmov %vm10497_vm1  ;;  %v10513_v25 = vrot.slane %v7989_v59, %v6558_v17  ;;  %v10514_v58 = vld [vmem:[#allocation11_spill] sm:$0xff]  ;;  %vm10544_vm10 = vcmask 7168  }
 0x324   : > { %v2533_v14 = vsel %vm10501_vm14, %v10488_v18, %v10500_v28  ;;  %vm10503_vm12 = vmmov %vm10497_vm1  ;;  %v10510_v18 = vand.u32 63, %v8210_v6 }
 0x325   : > { %v2534_v21 = vsel %vm10503_vm12, %v10500_v28, %v10502_v55  ;;  %vm10507_vm7 = vmmov %vm10497_vm1  ;;  %3210 = vrot.lane.b32.xlu1 %v10513_v25, %s5671_s24  ;;  %v10515_v28 = vld [vmem:[#allocation46_spill] sm:$0xff]  ;;  %v2597_v59 = vsel %vm8496_vm15, %v2533_v14, 0.0 }
 0x326   : > { %v2536_v13 = vsel %vm10507_vm7, %v10505_v39, %v10506_v2  ;;  %vm10509_vm14 = vmmov %vm10497_vm1  ;;  %vm8654_vm12 = vcmp.lt.s32.totalorder %v10510_v18, 63  ;;  %vm10516_vm1 = vcmask 523264   ;;  %v10519_v39 = vld [vmem:[#allocation34_spill] sm:$0xff]  ;;  %v8673_v18 = vpop.permute.xlu0 %4104  ;;  %v2598_v38 = vsel %vm10521_vm13, %v2534_v21, 0.0  ;;  %v8697_v21 = vpop.permute.xlu1 %4098 }
 0x327   : > { %v2537_v1 = vsel %vm10509_vm14, %v10506_v2, %v10508_v61  ;;  %v2881_v55 = vsel %vm10516_vm1, %v10515_v28, %v10514_v58  ;;  %vm10518_vm7 = vmmov %vm10516_vm1  ;;  %v10522_v25 = vld [vmem:[#allocation42_spill] sm:$0xff] }
 0x328   : > { %v2882_v6 = vsel %vm10518_vm7, %v10514_v58, %v10517_v41  ;;  %vm10520_vm14 = vmmov %vm10516_vm1  ;;  %v2885_v58 = vsel %vm10516_vm1, %v10522_v25, %v10524_v37  ;;  %vm8687_vm7 = vcmp.lt.s32.totalorder %v10525_v62, 63  ;;  %v2601_v47 = vsel %vm8535_vm9, %v2537_v1, 0.0  ;;  %v10531_v62 = vld [vmem:[#allocation3_spill] sm:$0xff]  ;;  %v10539_v28 = vld [vmem:[#allocation66_spill] sm:$0xff] }
 0x329   : > { %v2883_v2 = vsel %vm10520_vm14, %v10517_v41, %v10519_v39  ;;  %vm10523_vm3 = vmmov %vm10516_vm1  ;;  %vm8693_vm14 = vcmp.lt.s32.totalorder %v10528_v34, 63  ;;  %v10533_v34 = vrot.slane %v10471_v23, %v6541_v7  ;;  %v2945_v57 = vadd.f32 %v2881_v55, %v2595_v24 }
 0x32a   : > { %v2884_v61 = vsel %vm10523_vm3, %v10519_v39, %v10522_v25  ;;  %v2599_v39 = vsel %vm8523_vm8, %v2535_v44, 0.0  ;;  %v2600_v25 = vsel %vm8529_vm11, %v2536_v13, 0.0  ;;  %vm10532_vm3 = vmmov %vm10516_vm1  ;;  %v2946_v8 = vadd.f32 %v2882_v6, %v2596_v52  ;;  %v10535_v44 = vld [vmem:[#allocation52_spill] sm:$0xff]  ;;  %v8725_v52 = vpop.permute.xlu0 %4444  ;;  %v10541_v6 = vld [vmem:[#allocation47_spill] sm:$0xff] }
 0x32b   : > { %v2886_v31 = vsel %vm10532_vm3, %v10524_v37, %v10531_v62  ;;  %3556 = vrot.lane.b32.xlu0 %v10533_v34, %s5672_s25  ;;  %v2947_v56 = vadd.f32 %v2883_v2, %v2597_v59  ;;  %vm10536_vm1 = vcmask 515072   ;;  %v10537_v13 = vrot.slane %v10471_v23, %v6441_v40  ;;  %v10538_v37 = vld [vmem:[#allocation39_spill] sm:$0xff] }
 0x32c   : > { %v3232_v35 = vsel %vm10536_vm1, %v10535_v44, %v10534_v22  ;;  %v2948_v1 = vadd.f32 %v2884_v61, %v2598_v38  ;;  %v2949_v3 = vadd.f32 %v2885_v58, %v2599_v39  ;;  %v2887_v0 = vsel %vm10532_vm3, %v10531_v62, %v10538_v37  ;;  %vm10540_vm9 = vmmov %vm10536_vm1  ;;  %v10543_v59 = vld [vmem:[#allocation63_spill] sm:$0xff]  ;;  %v4103_v58 = vpop.permute.xlu1 %4102  ;;  %v10549_v62 = vld [vmem:[#allocation38_spill] sm:$0xff] }
 0x32d   : > { %3546 = vrot.lane.b32.xlu1 %v10537_v13, %s5672_s25  ;;  %v3233_v24 = vsel %vm10540_vm9, %v10534_v22, %v10539_v28  ;;  %v2950_v55 = vadd.f32 %v2886_v31, %v2600_v25  ;;  %v3234_v2 = vsel %vm10536_vm1, %v10539_v28, %v10541_v6  ;;  %vm10542_vm11 = vmmov %vm10536_vm1  ;;  %v3582_v38 = vsel %vm10544_vm10, %v10543_v59, %v8415_v11 }
 0x32e   : > { %v3235_v61 = vsel %vm10542_vm11, %v10541_v6, %v8313_v51  ;;  %v3296_v39 = vsel %vm8573_vm2, %v3232_v35, 0.0  ;;  %vm10545_vm9 = vmmov %vm10544_vm10  ;;  %vm10546_vm3 = vcmask 1039360   ;;  %v10548_v25 = vrot.slane %v10471_v23, %v6558_v17  ;;  %v10552_v17 = vld [vmem:[#allocation100_spill] sm:$0xff] }
 0x32f   : > { %v3583_v31 = vsel %vm10545_vm9, %v8415_v11, %v8341_v30  ;;  %v8743_v22 = vsel %vm10546_vm3, %v8596_v50, %v4103_v58  ;;  %vm10547_vm1 = vmmov %vm10546_vm3  ;;  %v3231_v35 = vsel %vm10542_vm11, %v10549_v62, %v10535_v44  ;;  %v3297_v11 = vsel %vm8592_vm4, %v3233_v24, 0.0 }
 0x330   : > { %v8747_v28 = vsel %vm10547_vm1, %v4103_v58, %v8673_v18  ;;  %3560 = vrot.lane.b32.xlu0 %v10548_v25, %s5672_s25  ;;  %vm10550_vm10 = vmmov %vm10545_vm9  ;;  %v3585_v13 = vsel %vm10545_vm9, %v8481_v36, %v8389_v19  ;;  %v10551_v6 = vrot.slane %v10471_v23, %v6470_v5  ;;  %v2951_v58 = vadd.f32 %v2887_v0, %v2601_v47 }
 0x331   : > { %v3584_v34 = vsel %vm10550_vm10, %v8341_v30, %v8481_v36  ;;  %v3298_v44 = vsel %vm8609_vm6, %v3234_v2, 0.0  ;;  %v3299_v24 = vsel %vm8615_vm0, %v3235_v61, 0.0  ;;  %v3646_v25 = vsel %vm8477_vm5, %v3582_v38, 0.0  ;;  %v8774_v30 = vpop.permute.xlu0 %4448  ;;  %vm10553_vm3 = vmmov %vm10542_vm11  ;;  %v8784_v2 = vpop.permute.xlu1 %4106 }
 0x332   : > { %3550 = vrot.lane.b32.xlu1 %v10551_v6, %s5672_s25  ;;  %v3328_v37 = vadd.f32 %v3296_v39, %v2946_v8  ;;  %v3236_v36 = vsel %vm10553_vm3, %v8313_v51, %v10552_v17  ;;  %vm10555_vm1 = vmmov %vm10553_vm3  ;;  %v3647_v47 = vsel %vm8496_vm15, %v3583_v31, 0.0  ;;  %v3295_v61 = vsel %vm8654_vm12, %v3231_v35, 0.0  ;;  %v10556_v51 = vld [vmem:[#allocation44_spill] sm:$0xff] }
 0x333   : > { %v3237_v0 = vsel %vm10555_vm1, %v10552_v17, %v10554_v48  ;;  %v3329_v38 = vadd.f32 %v3297_v11, %v2947_v56  ;;  %v3648_v8 = vsel %vm10521_vm13, %v3584_v34, 0.0  ;;  %v3649_v39 = vsel %vm8523_vm8, %v3585_v13, 0.0  ;;  %v10559_v56 = vld [vmem:[#allocation4_spill] sm:$0xff]  ;;  %vm10563_vm3 = vmmov %vm10545_vm9 }
 0x334   : > { %v10557_v6 = vrot.slane %v10556_v51, %v6441_v40  ;;  %v3330_v17 = vadd.f32 %v3298_v44, %v2948_v1  ;;  %v3331_v48 = vadd.f32 %v3299_v24, %v2949_v3  ;;  %v3678_v31 = vadd.f32 %v3646_v25, %v3328_v37  ;;  %v10562_v37 = vld [vmem:[#allocation60_spill] sm:$0xff]  ;;  %vm10565_vm1 = vmmov %vm10563_vm3 }
 0x335   : > { %vm10558_vm11 = vcmask 1039360   ;;  %v10560_v35 = vrot.slane %v10471_v23, %v10559_v56  ;;  %v3300_v11 = vsel %vm8687_vm7, %v3236_v36, 0.0  ;;  %v3301_v34 = vsel %vm8693_vm14, %v3237_v0, 0.0  ;;  %v8810_v1 = vpop.permute.xlu0 %4452 }
 0x336   : > { %4108 = vrot.lane.b32.xlu0 %v10557_v6, %s5668_s15  ;;  %v4144_v62 = vsel %vm10558_vm11, %v8619_v33, %v8551_v26  ;;  %v3679_v13 = vadd.f32 %v3647_v47, %v3329_v38  ;;  %vm10561_vm10 = vmmov %vm10558_vm11  ;;  %v3581_v44 = vsel %vm10545_vm9, %v10562_v37, %v10543_v59  ;;  %v3680_v24 = vadd.f32 %v3648_v8, %v3330_v17  ;;  %v8818_v6 = vpop.permute.xlu1 %4442  ;;  %v10564_v47 = vld [vmem:[#allocation55_spill] sm:$0xff] }
 0x337   : > { %3554 = vrot.lane.b32.xlu1 %v10560_v35, %s5672_s25  ;;  %v4145_v3 = vsel %vm10561_vm10, %v8551_v26, %v8697_v21  ;;  %v3681_v25 = vadd.f32 %v3649_v39, %v3331_v48  ;;  %v3586_v36 = vsel %vm10563_vm3, %v8389_v19, %v8559_v12  ;;  %v3327_v0 = vadd.f32 %v3295_v61, %v2945_v57  ;;  %v10568_v8 = vld [vmem:[#allocation31_spill] sm:$0xff]  ;;  %v10570_v39 = vld [vmem:[#allocation5_spill] sm:$0xff] }
 0x338   : > { %v3587_v38 = vsel %vm10565_vm1, %v8559_v12, %v10564_v47  ;;  %v4208_v26 = vsel %vm8573_vm2, %v4144_v62, 0.0  ;;  %vm10566_vm11 = vcmask 531456   ;;  %v10567_v48 = vrot.slane %v10556_v51, %v6470_v5 }
 0x339   : > { %v8828_v59 = vsel %vm10566_vm11, %v8818_v6, %v8725_v52  ;;  %v3332_v19 = vadd.f32 %v3300_v11, %v2950_v55  ;;  %v10569_v57 = vrot.slane %v10568_v8, %v6494_v20  ;;  %v4146_v12 = vsel %vm10561_vm10, %v8697_v21, %v8596_v50  ;;  %v8853_v50 = vpop.permute.xlu0 %4456  ;;  %vm10578_vm10 = vmmov %vm10566_vm11 }
 0x33a   : > { %4112 = vrot.lane.b32.xlu0 %v10567_v48, %s5668_s15  ;;  %v4209_v62 = vsel %vm8592_vm4, %v4145_v3, 0.0  ;;  %v10571_v17 = vrot.slane %v10471_v23, %v10570_v39  ;;  %v3333_v35 = vadd.f32 %v3301_v34, %v2951_v58  ;;  %vm10572_vm9 = vnez %v10427_v29 }
 0x33b   : > { %v3890_v61 = vadd.f32 %v10569_v57, %v3678_v31  ;;  %v3645_v55 = vsel %vm10572_vm9, %v3581_v44, 0.0  ;;  %vm10573_vm3 = vnez %v10464_v49  ;;  %v10574_v31 = vrot.slane %v10568_v8, %v6470_v5  ;;  %v4447_v57 = vpop.permute.xlu1 %4446 }
 0x33c   : > { %3558 = vrot.lane.b32.xlu1 %v10571_v17, %s5672_s25  ;;  %v3650_v11 = vsel %vm10573_vm3, %v3586_v36, 0.0  ;;  %vm10575_vm1 = vnez %v10467_v32  ;;  %v10576_v23 = vrot.slane %v10568_v8, %v6518_v46  ;;  %v10577_v34 = vrot.slane %v10568_v8, %v10559_v56 }
 0x33d   : > { %v3891_v48 = vadd.f32 %v10574_v31, %v3679_v13  ;;  %v3651_v21 = vsel %vm10575_vm1, %v3587_v38, 0.0  ;;  %v4240_v3 = vadd.f32 %v4208_v26, %v3890_v61  ;;  %v4210_v36 = vsel %vm8609_vm6, %v4146_v12, 0.0 }
 0x33e   : > { %v3892_v58 = vadd.f32 %v10576_v23, %v3680_v24  ;;  %v3893_v44 = vadd.f32 %v10577_v34, %v3681_v25  ;;  %v4493_v13 = vsel %vm10566_vm11, %v8725_v52, %v4447_v57  ;;  %v4494_v38 = vsel %vm10578_vm10, %v4447_v57, %v8774_v30  ;;  %v8901_v34 = vpop.permute.xlu0 %4791  ;;  %v10589_v57 = vld [vmem:[#allocation48_spill] sm:$0xff] }
 0x33f   : > { %v4241_v17 = vadd.f32 %v4209_v62, %v3891_v48  ;;  %v10579_v26 = vrot.slane %v10556_v51, %v10559_v56  ;;  %v3682_v24 = vadd.f32 %v3650_v11, %v3332_v19  ;;  %v4211_v25 = vsel %vm8615_vm0, %v8743_v22, 0.0  ;;  %v10581_v62 = vld [vmem:[#allocation50_spill] sm:$0xff] }
 0x340   : > { %v4557_v61 = vsel %vm8477_vm5, %v4493_v13, 0.0  ;;  %v4558_v12 = vsel %vm8496_vm15, %v4494_v38, 0.0  ;;  %v10580_v52 = vrot.slane %v10556_v51, %v6494_v20  ;;  %v10582_v31 = vand.u32 63, %v10581_v62 }
 0x341   : > { %4116 = vrot.lane.b32.xlu0 %v10579_v26, %s5668_s15  ;;  %v3683_v63 = vadd.f32 %v3651_v21, %v3333_v35  ;;  %vm10588_vm5 = vcmask 1039360   ;;  %v4589_v11 = vadd.f32 %v4557_v61, %v4240_v3  ;;  %v8899_v23 = vadd.f32 %v4558_v12, %v4241_v17  ;;  %v10591_v26 = vld [vmem:[#allocation62_spill] sm:$0xff]  ;;  %v4451_v35 = vpop.permute.xlu1 %4450  ;;  %v10599_v12 = vld [vmem:[#allocation87_spill] sm:$0xff] }
 0x342   : > { %4110 = vrot.lane.b32.xlu1 %v10580_v52, %s5668_s15  ;;  %vm8886_vm11 = vcmp.gt.s32.totalorder %v10582_v31, 0  ;;  %v10585_v19 = vmov %v10582_v31  ;;  %v4149_v4 = vsel %vm10588_vm5, %v8673_v18, %v8784_v2  ;;  %vm10590_vm15 = vnez %v10589_v57  ;;  %vm10592_vm0 = vmmov %vm10588_vm5  ;;  %v4796_v54 = vpop.permute.xlu0 %4795 }
 0x343   : > { %vm8892_vm10 = vcmp.lt.s32.totalorder %v10585_v19, 63  ;;  %v4553_v13 = vsel %vm10590_vm15, %v8624_v15, 0.0  ;;  %v3677_v38 = vadd.f32 %v3645_v55, %v3327_v0  ;;  %v4143_v52 = vsel %vm10592_vm0, %v10591_v26, %v8619_v33 }
 0x344   : > { %v4242_v62 = vadd.f32 %v4210_v36, %v3892_v58  ;;  %v4212_v18 = vsel %vm8687_vm7, %v8747_v28, 0.0  ;;  %v4243_v21 = vadd.f32 %v4211_v25, %v3893_v44  ;;  %vm10593_vm5 = vcmask 531456  }
 0x345   : > { %v4495_v3 = vsel %vm10593_vm5, %v8774_v30, %v4451_v35  ;;  %vm10594_vm6 = vmmov %vm10593_vm5  ;;  %v10595_v15 = vrot.slane %v10556_v51, %v10570_v39  ;;  %v10596_v33 = vrot.slane %v10568_v8, %v6541_v7  ;;  %v4213_v55 = vsel %vm8693_vm14, %v4149_v4, 0.0 }
 0x346   : > { %v4496_v17 = vsel %vm10594_vm6, %v4451_v35, %v8810_v1  ;;  %v4559_v28 = vsel %vm10521_vm13, %v4495_v3, 0.0  ;;  %v10597_v58 = vrot.slane %v10556_v51, %v6518_v46  ;;  %v4207_v44 = vsel %vm8654_vm12, %v4143_v52, 0.0  ;;  %v4455_v52 = vpop.permute.xlu1 %4454  ;;  %vm10603_vm6 = vmmov %vm10593_vm5  ;;  %v4800_v49 = vpop.permute.xlu0 %4799 }
 0x347   : > { %4120 = vrot.lane.b32.xlu0 %v10595_v15, %s5668_s15  ;;  %v3894_v0 = vadd.f32 %v10596_v33, %v3682_v24  ;;  %v4560_v30 = vsel %vm8523_vm8, %v4496_v17, 0.0  ;;  %v10598_v36 = vrot.slane %v10568_v8, %v10570_v39  ;;  %v4591_v25 = vadd.f32 %v4559_v28, %v4242_v62  ;;  %vm10602_vm8 = vmmov %vm10593_vm5  ;;  %v10610_v17 = vld [vmem:[#allocation56_spill] sm:$0xff]  ;;  %v10612_v33 = vld [vmem:[#allocation38_spill] sm:$0xff] }
 0x348   : > { %4114 = vrot.lane.b32.xlu1 %v10597_v58, %s5668_s15  ;;  %v8938_v61 = vadd.f32 %v4560_v30, %v4243_v21  ;;  %vm10600_vm13 = vnez %v10599_v12  ;;  %v8944_v31 = vadd.f32 %v4553_v13, %v8571_v60  ;;  %v10601_v19 = vrot.slane %v10568_v8, %v6441_v40  ;;  %v10604_v60 = vld [vmem:[#allocation37_spill] sm:$0xff]  ;;  %v10606_v21 = vld [vmem:[#allocation14_spill] sm:$0xff]  ;;  %v10619_v12 = vld [vmem:[#allocation59_spill] sm:$0xff] }
 0x349   : > { %v3895_v24 = vadd.f32 %v10598_v36, %v3683_v63  ;;  %v4554_v43 = vsel %vm10600_vm13, %v8629_v27, 0.0  ;;  %v4244_v57 = vadd.f32 %v4212_v18, %v3894_v0  ;;  %v4556_v63 = vsel %vm10572_vm9, %v8828_v59, 0.0  ;;  %vm10611_vm9 = vmmov %vm10593_vm5  ;;  %v10613_v0 = vld [vmem:[#allocation72_spill] sm:$0xff]  ;;  %v10615_v58 = vld [vmem:[#allocation57_spill] sm:$0xff] }
 0x34a   : > { %v3889_v4 = vadd.f32 %v10601_v19, %v3677_v38  ;;  %v4497_v62 = vsel %vm10602_vm8, %v8810_v1, %v4455_v52  ;;  %v4498_v27 = vsel %vm10603_vm6, %v4455_v52, %v8853_v50  ;;  %v10605_v13 = vrot.slane %v10604_v60, %v6494_v20  ;;  %v10607_v38 = vld [vmem:[#allocation13_spill] sm:$0xff]  ;;  %v10621_v52 = vld [vmem:[#allocation64_spill] sm:$0xff] }
 0x34b   : > { %v4245_v35 = vadd.f32 %v4213_v55, %v3895_v24  ;;  %vm10608_vm0 = vcmask 523264   ;;  %v4561_v29 = vsel %vm10573_vm3, %v4497_v62, 0.0  ;;  %v4562_v59 = vsel %vm10575_vm1, %v4498_v27, 0.0  ;;  %v10618_v24 = vld [vmem:[#allocation46_spill] sm:$0xff] }
 0x34c   : > { %4460 = vrot.lane.b32.xlu0 %v10605_v13, %s5669_s16  ;;  %v4833_v18 = vsel %vm10608_vm0, %v10607_v38, %v10606_v21  ;;  %v4239_v3 = vadd.f32 %v4207_v44, %v3889_v4  ;;  %v10609_v1 = vrot.slane %v10556_v51, %v6541_v7  ;;  %v2530_v15 = vsel %vm10611_vm9, %v10610_v17, %v10480_v16  ;;  %v10616_v44 = vld [vmem:[#allocation82_spill] sm:$0xff]  ;;  %vm10617_vm3 = vmmov %vm10608_vm0  ;;  %v4794_v4 = vpop.permute.xlu1 %4793 }
 0x34d   : > { %vm10614_vm15 = vcmask 515072   ;;  %v4593_v28 = vadd.f32 %v4561_v29, %v4244_v57  ;;  %v8977_v30 = vadd.f32 %v4562_v59, %v4245_v35  ;;  %v8980_v32 = vadd.f32 %v4554_v43, %v10615_v58  ;;  %vm10620_vm1 = vmmov %vm10608_vm0  ;;  %v10622_v57 = vld [vmem:[#allocation77_spill] sm:$0xff]  ;;  %v10629_v29 = vld [vmem:[#allocation68_spill] sm:$0xff] }
 0x34e   : > { %4118 = vrot.lane.b32.xlu1 %v10609_v1, %s5668_s15  ;;  %v3230_v55 = vsel %vm10614_vm15, %v10613_v0, %v10612_v33  ;;  %v4834_v36 = vsel %vm10617_vm3, %v10606_v21, %v10616_v44  ;;  %v2880_v19 = vsel %vm10620_vm1, %v10619_v12, %v10618_v24  ;;  %v4588_v16 = vadd.f32 %v4556_v63, %v4239_v3  ;;  %vm10624_vm13 = vmmov %vm10608_vm0  ;;  %v10630_v1 = vld [vmem:[#allocation20_spill] sm:$0xff]  ;;  %v10632_v33 = vld [vmem:[#allocation18_spill] sm:$0xff] }
 0x34f   : > { %v4897_v62 = vadd.f32 %v4833_v18, %v10621_v52  ;;  %vm10623_vm5 = vcmask 7168   ;;  %v4841_v43 = vsel %vm10624_vm13, %v8901_v34, %v4794_v4  ;;  %vm10625_vm8 = vmmov %vm10608_vm0  ;;  %v10626_v13 = vrot.slane %v10604_v60, %v6518_v46  ;;  %v10633_v58 = vld [vmem:[#allocation17_spill] sm:$0xff]  ;;  %v10636_v12 = vld [vmem:[#allocation28_spill] sm:$0xff] }
 0x350   : > { %v3580_v35 = vsel %vm10623_vm5, %v10622_v57, %v10562_v37  ;;  %v4842_v27 = vsel %vm10625_vm8, %v4794_v4, %v4796_v54  ;;  %v2594_v63 = vsel %vm8886_vm11, %v2530_v15, 0.0  ;;  %v3294_v21 = vsel %vm8892_vm10, %v3230_v55, 0.0  ;;  %v10627_v37 = vld [vmem:[#allocation6_spill] sm:$0xff]  ;;  %vm10631_vm6 = vmmov %vm10608_vm0  ;;  %v4804_v55 = vpop.permute.xlu0 %4803  ;;  %v4798_v52 = vpop.permute.xlu1 %4797 }
 0x351   : > { %4464 = vrot.lane.b32.xlu0 %v10626_v13, %s5669_s16  ;;  %v9003_v38 = vadd.f32 %v4841_v43, %v4588_v16  ;;  %v9005_v18 = vadd.f32 %v4842_v27, %v4589_v11  ;;  %v10628_v3 = vrot.slane %v10556_v51, %v10627_v37  ;;  %v4898_v59 = vadd.f32 %v4834_v36, %v10629_v29  ;;  %v10634_v11 = vld [vmem:[#allocation21_spill] sm:$0xff]  ;;  %vm10635_vm9 = vmmov %vm10614_vm15  ;;  %v10638_v16 = vld [vmem:[#allocation30_spill] sm:$0xff] }
 0x352   : > { %v4835_v17 = vsel %vm10631_vm6, %v10616_v44, %v10630_v1  ;;  %v4836_v15 = vsel %vm10608_vm0, %v10630_v1, %v10632_v33  ;;  %v2944_v0 = vadd.f32 %v2880_v19, %v2594_v63  ;;  %v5150_v24 = vsel %vm10635_vm9, %v10634_v11, %v10633_v58  ;;  %vm10637_vm15 = vmmov %vm10635_vm9  ;;  %v10639_v36 = vld [vmem:[#allocation76_spill] sm:$0xff]  ;;  %v10645_v63 = vld [vmem:[#allocation65_spill] sm:$0xff] }
 0x353   : > { %4122 = vrot.lane.b32.xlu1 %v10628_v3, %s5668_s15  ;;  %v5151_v51 = vsel %vm10637_vm15, %v10633_v58, %v10636_v12  ;;  %vm10640_vm3 = vmmov %vm10635_vm9  ;;  %v3644_v44 = vsel %vm8886_vm11, %v3580_v35, 0.0  ;;  %v10644_v13 = vrot.slane %v10604_v60, %v6541_v7  ;;  %v4899_v3 = vadd.f32 %v4835_v17, %v10645_v63  ;;  %v10646_v29 = vld [vmem:[#allocation70_spill] sm:$0xff]  ;;  %v10660_v63 = vld [vmem:[#allocation49_spill] sm:$0xff] }
 0x354   : > { %v5153_v4 = vsel %vm10640_vm3, %v10639_v36, %v10638_v16  ;;  %vm10641_vm1 = vmmov %vm10640_vm3  ;;  %v3326_v57 = vadd.f32 %v3294_v21, %v2944_v0  ;;  %v4900_v1 = vadd.f32 %v4836_v15, %v10646_v29  ;;  %v10648_v21 = vld [vmem:[#allocation86_spill] sm:$0xff]  ;;  %v10652_v15 = vld [vmem:[#allocation95_spill] sm:$0xff] }
 0x355   : > { %v5152_v19 = vsel %vm10641_vm1, %v10636_v12, %v10639_v36  ;;  %vm10642_vm5 = vmmov %vm10608_vm0  ;;  %4468 = vrot.lane.b32.xlu0 %v10644_v13, %s5669_s16  ;;  %v10650_v11 = vld [vmem:[#allocation54_spill] sm:$0xff]  ;;  %v9057_v36 = vpop.permute.xlu0 %5110  ;;  %v10658_v13 = vld [vmem:[#allocation43_spill] sm:$0xff]  ;;  %vm10661_vm1 = vnez %v10660_v63 }
 0x356   : > { %v4843_v43 = vsel %vm10642_vm5, %v4796_v54, %v4798_v52  ;;  %vm10643_vm13 = vmmov %vm10608_vm0  ;;  %v10647_v54 = vrot.slane %v10604_v60, %v6441_v40  ;;  %vm10651_vm6 = vnez %v10650_v11  ;;  %v3676_v17 = vadd.f32 %v3644_v44, %v3326_v57  ;;  %v4802_v44 = vpop.permute.xlu1 %4801  ;;  %v10662_v57 = vld [vmem:[#allocation45_spill] sm:$0xff]  ;;  %v10663_v29 = vld [vmem:[#allocation19_spill] sm:$0xff] }
 0x357   : > { %v4844_v27 = vsel %vm10643_vm13, %v4798_v52, %v4800_v49  ;;  %v9041_v35 = vadd.f32 %v4843_v43, %v8899_v23  ;;  %vm10649_vm8 = vmmov %vm10608_vm0  ;;  %v5217_v12 = vsel %vm10651_vm6, %v5153_v4, 0.0  ;;  %vm10653_vm0 = vcmask 1039360   ;;  %v10656_v43 = vld [vmem:[#allocation40_spill] sm:$0xff]  ;;  %v10670_v63 = vld [vmem:[#allocation22_spill] sm:$0xff] }
 0x358   : > { %v9043_v58 = vadd.f32 %v4844_v27, %v4591_v25  ;;  %4458 = vrot.lane.b32.xlu1 %v10647_v54, %s5669_s16  ;;  %v4837_v0 = vsel %vm10649_vm8, %v10632_v33, %v10648_v21  ;;  %v4142_v23 = vsel %vm10653_vm0, %v10652_v15, %v10591_v26  ;;  %v10654_v25 = vld [vmem:[#allocation15_spill] sm:$0xff]  ;;  %vm10655_vm9 = vmmov %vm10642_vm5  ;;  %vm10657_vm15 = vnez %v10656_v43  ;;  %v10665_v54 = vld [vmem:[#allocation12_spill] sm:$0xff] }
 0x359   : > { %v4838_v52 = vsel %vm10655_vm9, %v10648_v21, %v10654_v25  ;;  %v5214_v27 = vsel %vm10657_vm15, %v5150_v24, 0.0  ;;  %vm10659_vm3 = vnez %v10658_v13  ;;  %v5216_v4 = vsel %vm10661_vm1, %v5152_v19, 0.0  ;;  %vm10667_vm6 = vmmov %vm10649_vm8 }
 0x35a   : > { %v5215_v33 = vsel %vm10659_vm3, %v5151_v51, 0.0  ;;  %vm10664_vm5 = vcmask 515072   ;;  %vm10666_vm13 = vcmask 531456   ;;  %v4845_v21 = vsel %vm10649_vm8, %v4800_v49, %v4802_v44  ;;  %vm10671_vm0 = vmmov %vm10667_vm6 }
 0x35b   : > { %v5155_v26 = vsel %vm10664_vm5, %v10663_v29, %v10662_v57  ;;  %v4491_v11 = vsel %vm10666_vm13, %v10665_v54, %v8818_v6  ;;  %v4846_v15 = vsel %vm10667_vm6, %v4802_v44, %v4804_v55  ;;  %v10668_v24 = vrot.slane %v10604_v60, %v10627_v37  ;;  %vm10672_vm9 = vmmov %vm10664_vm5 }
 0x35c   : > { %v5249_v51 = vadd.f32 %v5217_v12, %v4900_v1  ;;  %v4206_v19 = vsel %vm8892_vm10, %v4142_v23, 0.0  ;;  %v9083_v43 = vadd.f32 %v4845_v21, %v8938_v61  ;;  %v9085_v13 = vadd.f32 %v4846_v15, %v4593_v28  ;;  %v10673_v12 = vld [vmem:[#allocation27_spill] sm:$0xff]  ;;  %v9101_v23 = vpop.permute.xlu0 %5114  ;;  %v10675_v15 = vld [vmem:[#allocation98_spill] sm:$0xff]  ;;  %vm10679_vm3 = vmmov %vm10664_vm5 }
 0x35d   : > { %4472 = vrot.lane.b32.xlu0 %v10668_v24, %s5669_s16  ;;  %v10669_v6 = vrot.slane %v10604_v60, %v6470_v5  ;;  %v4902_v49 = vadd.f32 %v4838_v52, %v8944_v31  ;;  %v4839_v44 = vsel %vm10671_vm0, %v10654_v25, %v10670_v63  ;;  %v5154_v1 = vsel %vm10672_vm9, %v10638_v16, %v10663_v29  ;;  %v9107_v52 = vpop.permute.xlu1 %4805  ;;  %vm10680_vm1 = vmmov %vm10671_vm0 }
 0x35e   : > { %v10674_v61 = vrot.slane %v10673_v12, %v10627_v37  ;;  %v5247_v54 = vadd.f32 %v5215_v33, %v4898_v59  ;;  %v5248_v21 = vadd.f32 %v5216_v4, %v4899_v3  ;;  %vm10676_vm15 = vnez %v10675_v15  ;;  %10677 = vst [vmem:[#allocation69_spill] sm:$0xff] %v9107_v52  ;;  %v10681_v59 = vld [vmem:[#allocation35_spill] sm:$0xff]  ;;  %vm10690_vm8 = vmmov %vm10679_vm3 }
 0x35f   : > { %4462 = vrot.lane.b32.xlu1 %v10669_v6, %s5669_s16  ;;  %v5219_v24 = vsel %vm10676_vm15, %v5155_v26, 0.0  ;;  %v4555_v31 = vsel %vm8886_vm11, %v4491_v11, 0.0  ;;  %v5246_v25 = vadd.f32 %v5214_v27, %v4897_v62  ;;  %v10678_v6 = vld [vmem:[#allocation26_spill] sm:$0xff]  ;;  %v10682_v3 = vrot.slane %v10681_v59, %v6441_v40  ;;  %v10683_v33 = vld [vmem:[#allocation51_spill] sm:$0xff]  ;;  %vm10685_vm11 = vmmov %vm10671_vm0 }
 0x360   : > { %v3888_v28 = vadd.f32 %v10674_v61, %v3676_v17  ;;  %v5156_v16 = vsel %vm10679_vm3, %v10662_v57, %v10678_v6  ;;  %v4847_v17 = vsel %vm10680_vm1, %v4804_v55, %v9107_v52  ;;  %vm10684_vm5 = vnez %v10683_v33  ;;  %v10687_v57 = vld [vmem:[#allocation67_spill] sm:$0xff]  ;;  %v9131_v12 = vpop.permute.xlu0 %5118  ;;  %vm10691_vm6 = vmmov %vm10679_vm3 }
 0x361   : > { %4807 = vrot.lane.b32.xlu0 %v10682_v3, %s5670_s17  ;;  %v5218_v48 = vsel %vm10684_vm5, %v5154_v1, 0.0  ;;  %v5352_v4 = vcombine.low %v5248_v21, %v5249_v51  ;;  %v4840_v62 = vsel %vm10685_vm11, %v10670_v63, %v8901_v34  ;;  %v9124_v27 = vadd.f32 %v4847_v17, %v8977_v30  ;;  %v10688_v63 = vld [vmem:[#allocation99_spill] sm:$0xff]  ;;  %v5109_v61 = vpop.permute.xlu1 %5108 }
 0x362   : > { %v4238_v29 = vadd.f32 %v4206_v19, %v3888_v28  ;;  %v10686_v55 = vrot.slane %v10604_v60, %v10559_v56  ;;  %v4901_v26 = vadd.f32 %v4837_v0, %v10687_v57  ;;  %v5251_v11 = vadd.f32 %v5219_v24, %v4902_v49  ;;  %v4935_v24 = vld [vmem:[#allocation2 + $0x1d8] ss:$8 sm:$0xf0] }
 0x363   : > { %v4734_v51 = vrot.slane %v10681_v59, %v6470_v5  ;;  %v4903_v1 = vadd.f32 %v4839_v44, %v8980_v32  ;;  %v5351_v34 = vcombine.low %v5246_v25, %v5247_v54  ;;  %vm10689_vm13 = vnez %v10688_v63  ;;  %v10692_v32 = vld [vmem:[#allocation24_spill] sm:$0xff] }
 0x364   : > { %4466 = vrot.lane.b32.xlu1 %v10686_v55, %s5669_s16  ;;  %v4587_v19 = vadd.f32 %v4555_v31, %v4238_v29  ;;  %v5220_v30 = vsel %vm10689_vm13, %v5156_v16, 0.0  ;;  %v4401_v28 = vrot.slane %v10604_v60, %v10570_v39  ;;  %v5250_v21 = vadd.f32 %v5218_v48, %v4901_v26  ;;  %v9154_v17 = vpop.permute.xlu0 %5122  ;;  %v4934_v3 = vld [vmem:[#allocation2 + $0x1d8] ss:$8 sm:$0xf] }
 0x365   : > { %v5157_v0 = vsel %vm10690_vm8, %v10678_v6, %v5109_v61  ;;  %v5158_v49 = vsel %vm10691_vm6, %v5109_v61, %v9057_v36  ;;  %4811 = vrot.lane.b32.xlu0 %v4734_v51, %s5670_s17  ;;  %v5368_v44 = vrot.slane %v5352_v4, %v10692_v32  ;;  %v4742_v60 = vrot.slane %v10681_v59, %v10559_v56  ;;  %v5113_v22 = vpop.permute.xlu1 %5112 }
 0x366   : > { %v4904_v15 = vadd.f32 %v4840_v62, %v4587_v19  ;;  %v5221_v54 = vsel %vm8892_vm10, %v5157_v0, 0.0  ;;  %v5222_v31 = vsel %vm8654_vm12, %v5158_v49, 0.0  ;;  %v5252_v25 = vadd.f32 %v5220_v30, %v4903_v1  ;;  %10693 = vst [vmem:[#allocation78_spill] sm:$0xff] %v9154_v17  ;;  %vm10694_vm12 = vmmov %vm10679_vm3 }
 0x367   : > { %v5353_v6 = vcombine.low %v5250_v21, %v5251_v11  ;;  %v5254_v29 = vadd.f32 %v5222_v31, %v9003_v38  ;;  %v5361_v33 = vrot.slane %v5351_v34, %v10692_v32  ;;  %v4730_v9 = vrot.slane %v10681_v59, %v6494_v20  ;;  %vm10695_vm10 = vmmov %vm10679_vm3 }
 0x368   : > { %4470 = vrot.lane.b32.xlu1 %v4401_v28, %s5669_s16  ;;  %v5253_v16 = vadd.f32 %v5221_v54, %v4904_v15  ;;  %v9159_v48 = vor.u32 %v4935_v24, %v4934_v3  ;;  %v5159_v62 = vsel %vm10694_vm12, %v9057_v36, %v5113_v22  ;;  %v5160_v55 = vsel %vm10695_vm10, %v5113_v22, %v9101_v23  ;;  %v9177_v34 = vpop.permute.xlu0 %2512 }
 0x369   : > { %4815 = vrot.lane.b32.xlu0 %v4742_v60, %s5670_s17  ;;  %v5383_v38 = vcombine.low %v5361_v33, %v5368_v44  ;;  %v5223_v57 = vsel %vm8573_vm2, %v5159_v62, 0.0  ;;  %v5224_v26 = vsel %vm8592_vm4, %v5160_v55, 0.0  ;;  %v4750_v11 = vrot.slane %v10681_v59, %v10570_v39  ;;  %v5117_v45 = vpop.permute.xlu1 %5116  ;;  %vm10696_vm2 = vmmov %vm10679_vm3 }
 0x36a   : > { %v5354_v4 = vcombine.low %v5252_v25, %v5253_v16  ;;  %v5375_v19 = vrot.slane %v5353_v6, %v10692_v32  ;;  %v5255_v51 = vadd.f32 %v5223_v57, %v9005_v18  ;;  %v5256_v1 = vadd.f32 %v5224_v26, %v9041_v35  ;;  %vm10697_vm4 = vmmov %vm10696_vm2 }
 0x36b   : > { %v4738_v53 = vrot.slane %v10681_v59, %v6518_v46  ;;  %v5161_v61 = vsel %vm10696_vm2, %v9101_v23, %v5117_v45  ;;  %v5162_v28 = vsel %vm10697_vm4, %v5117_v45, %v9131_v12  ;;  %vm10698_vm0 = vnez %v10492_v10  ;;  %vm10700_vm15 = vmmov %vm10696_vm2  ;;  %v10707_v45 = vld [vmem:[#allocation73_spill] sm:$0xff] }
 0x36c   : > { %4809 = vrot.lane.b32.xlu1 %v4730_v9, %s5670_s17  ;;  %v5382_v36 = vrot.slane %v5354_v4, %v10692_v32  ;;  %v5400_v30 = vcombine.low %v5254_v29, %v5255_v51  ;;  %v5225_v18 = vsel %vm10698_vm0, %v5161_v61, 0.0  ;;  %vm10699_vm9 = vnez %v10495_v42  ;;  %v9199_v10 = vpop.permute.xlu0 %3212  ;;  %vm10701_vm3 = vmmov %vm10696_vm2  ;;  %v4938_v61 = vld [vmem:[#allocation2 + $0x218] ss:$8 sm:$0x1] }
 0x36d   : > { %4819 = vrot.lane.b32.xlu0 %v4750_v11, %s5670_s17  ;;  %v5226_v35 = vsel %vm10699_vm9, %v5162_v28, 0.0  ;;  %v5047_v21 = vrot.slane %v9159_v48, %v6494_v20  ;;  %v5391_v15 = vrot.slane %v5383_v38, %v10692_v32  ;;  %v5257_v0 = vadd.f32 %v5225_v18, %v9043_v58  ;;  %v5121_v24 = vpop.permute.xlu1 %5120 }
 0x36e   : > { %v5384_v63 = vcombine.low %v5375_v19, %v5382_v36  ;;  %v9197_v49 = vadd.f32 %v5226_v35, %v9083_v43  ;;  %v4746_v42 = vrot.slane %v10681_v59, %v6541_v7  ;;  %v5163_v31 = vsel %vm10700_vm15, %v9131_v12, %v5121_v24 }
 0x36f   : > { %v5401_v54 = vcombine.low %v5256_v1, %v5257_v0  ;;  %v5164_v60 = vsel %vm10701_vm3, %v5121_v24, %v9154_v17  ;;  %v5227_v58 = vsel %vm8687_vm7, %v5163_v31, 0.0  ;;  %v5055_v25 = vrot.slane %v9159_v48, %v6518_v46 }
 0x370   : > { %4813 = vrot.lane.b32.xlu1 %v4738_v53, %s5670_s17  ;;  %v5398_v23 = vrot.slane %v5384_v63, %v10692_v32  ;;  %v5228_v43 = vsel %vm8693_vm14, %v5164_v60, 0.0  ;;  %v9217_v6 = vrot.slane %v5400_v30, %v10692_v32  ;;  %v9223_v16 = vadd.f32 %v5227_v58, %v9085_v13  ;;  %v2497_v14 = vpop.permute.xlu0 %2496 }
 0x371   : > { %5126 = vrot.lane.b32.xlu0 %v5047_v21, %s5671_s24  ;;  %v9220_v12 = vrot.slane %v5401_v54, %v10692_v32  ;;  %v9226_v41 = vadd.f32 %v5228_v43, %v9124_v27  ;;  %v9228_v29 = vpop.permute.xlu1 %2862  ;;  %v4754_v3 = vrot.slane %v10681_v59, %v10627_v37  ;;  %v5063_v27 = vrot.slane %v9159_v48, %v6541_v7 }
 0x372   : > { %v5399_v44 = vcombine.low %v5391_v15, %v5398_v23  ;;  %v5043_v4 = vrot.slane %v9159_v48, %v6441_v40  ;;  %v5071_v62 = vrot.slane %v9159_v48, %v10627_v37  ;;  %v5051_v38 = vrot.slane %v9159_v48, %v6470_v5 }
 0x373   : > { %10702 = vst [vmem:[#allocation71_spill] sm:$0xff] %v9226_v41  ;;  %vm10703_vm7 = vcmask 531456   ;;  %v5059_v36 = vrot.slane %v9159_v48, %v10559_v56  ;;  %v2221_v53 = vadd.s32 2944, %v10707_v45  ;;  %v9264_v63 = vadd.s32 3072, %v10707_v45 }
 0x374   : > { %4817 = vrot.lane.b32.xlu1 %v4746_v42, %s5670_s17  ;;  %5503 = vst [vmem:[%s7872_s29 + $0x8] sm:$0xff] %v5399_v44  ;;  %v2501_v13 = vpop.permute.xlu0 %2500  ;;  %vm10704_vm14 = vmmov %vm10703_vm7  ;;  %v9268_v28 = vadd.s32 3200, %v10707_v45  ;;  %v5067_v35 = vrot.slane %v9159_v48, %v10570_v39  ;;  %v9273_v21 = vadd.s32 3968, %v10707_v45  ;;  %v9283_v42 = vadd.s32 3328, %v10707_v45 }
 0x375   : > { %5130 = vrot.lane.b32.xlu0 %v5055_v25, %s5671_s24  ;;  %v9240_v9 = vpop.permute.xlu1 %3562  ;;  %vm10705_vm1 = vmmov %vm10703_vm7  ;;  %v2253_v0 = vand.u32 63, %v2221_v53  ;;  %v9956_v24 = vand.u32 63, %v9264_v63  ;;  %v5075_v44 = vrot.slane %v4938_v61, %v6441_v40  ;;  %v9288_v48 = vadd.s32 3456, %v10707_v45 }
 0x376   : > { %vm10706_vm5 = vmmov %vm10705_vm1  ;;  %v9955_v31 = vand.u32 63, %v9268_v28  ;;  %v9292_v60 = vadd.s32 3584, %v10707_v45  ;;  %v9951_v58 = vand.u32 63, %v9273_v21  ;;  %vm10726_vm9 = vcmask 523264  }
 0x377   : > { %vm10708_vm11 = vmmov %vm10705_vm1  ;;  %vm9298_vm12 = vcmp.gt.s32.totalorder %v2253_v0, 0  ;;  %vm9306_vm2 = vcmp.gt.s32.totalorder %v9956_v24, 0 }
 0x378   : > { %4821 = vrot.lane.b32.xlu1 %v4754_v3, %s5670_s17  ;;  %v2505_v59 = vpop.permute.xlu0 %2504  ;;  %vm10709_vm13 = vmmov %vm10705_vm1  ;;  %vm9318_vm4 = vcmp.gt.s32.totalorder %v9955_v31, 0  ;;  %vm9325_vm0 = vcmp.gt.s32.totalorder %v9951_v58, 0 }
 0x379   : > { %5134 = vrot.lane.b32.xlu0 %v5063_v27, %s5671_s24  ;;  %v2499_v55 = vpop.permute.xlu1 %2498  ;;  %vm10710_vm8 = vmmov %vm10705_vm1  ;;  %v10714_v27 = vld [vmem:[#allocation29_spill] sm:$0xff] }
 0x37a   : > { %v2539_v57 = vsel %vm10703_vm7, %v2497_v14, %v2499_v55  ;;  %v9252_v26 = vsel %vm10704_vm14, %v2499_v55, %v2501_v13  ;;  %vm10711_vm6 = vmmov %vm10705_vm1  ;;  %v9953_v55 = vand.u32 63, %v9288_v48 }
 0x37b   : > { %vm10715_vm10 = vmmov %vm10705_vm1  ;;  %v2603_v61 = vsel %vm9306_vm2, %v2539_v57, 0.0 }
 0x37c   : > { %5124 = vrot.lane.b32.xlu1 %v5043_v4, %s5671_s24  ;;  %v2509_v11 = vpop.permute.xlu0 %2508  ;;  %v2538_v4 = vsel %vm10715_vm10, %v10714_v27, %v2497_v14  ;;  %v10719_v14 = vmov 0  ;;  %vm10727_vm15 = vmmov %vm10726_vm9  ;;  %v9343_v27 = vadd.s32 3840, %v10707_v45  ;;  %vm9347_vm7 = vcmp.gt.s32.totalorder %v9953_v55, 0 }
 0x37d   : > { %5138 = vrot.lane.b32.xlu0 %v5071_v62, %s5671_s24  ;;  %v2503_v19 = vpop.permute.xlu1 %2502  ;;  %v9954_v62 = vand.u32 63, %v9283_v42  ;;  %v10720_v14 = vsel %vm9318_vm4, 4294967295, %v10719_v14  ;;  %v2602_v53 = vsel %vm9298_vm12, %v2538_v4, 0.0 }
 0x37e   : > { %v2541_v51 = vsel %vm10705_vm1, %v2501_v13, %v2503_v19  ;;  %v9260_v1 = vsel %vm10706_vm5, %v2503_v19, %v2505_v59  ;;  %10721 = vst [vmem:[#allocation74_spill] sm:$0xff] %v10720_v14  ;;  %v10722_v19 = vmov 0  ;;  %vm10735_vm1 = vmmov %vm10726_vm9  ;;  %v3707_v14 = vld [vmem:[#allocation2 + $0xcc] ss:$8 sm:$0xf0] }
 0x37f   : > { %v10723_v19 = vsel %vm9325_vm0, 4294967295, %v10722_v19  ;;  %vm9338_vm3 = vcmp.gt.s32.totalorder %v9954_v62, 0  ;;  %vm10736_vm5 = vmmov %vm10735_vm1 }
 0x380   : > { %5128 = vrot.lane.b32.xlu1 %v5051_v38, %s5671_s24  ;;  %v2849_v30 = vpop.permute.xlu0 %2848  ;;  %10724 = vst [vmem:[#allocation84_spill] sm:$0xff] %v10723_v19  ;;  %vm10744_vm10 = vmmov %vm10735_vm1 }
 0x381   : > { %v2507_v18 = vpop.permute.xlu1 %2506 }
 0x382   : > { %v9276_v15 = vsel %vm10708_vm11, %v2505_v59, %v2507_v18  ;;  %v9279_v23 = vsel %vm10709_vm13, %v2507_v18, %v2509_v11  ;;  %v10716_v59 = vmov 0  ;;  %v10725_v18 = vld [vmem:[#allocation39_spill] sm:$0xff]  ;;  %vm10737_vm11 = vmmov %vm10735_vm1  ;;  %vm9372_vm13 = vcmp.lt.s32.totalorder %v2253_v0, 63 }
 0x383   : > { %v10717_v59 = vsel %vm9306_vm2, 4294967295, %v10716_v59 }
 0x384   : > { %5132 = vrot.lane.b32.xlu1 %v5059_v36, %s5671_s24  ;;  %v2853_v54 = vpop.permute.xlu0 %2852  ;;  %10718 = vst [vmem:[#allocation80_spill] sm:$0xff] %v10717_v59 }
 0x385   : > { %v2511_v43 = vpop.permute.xlu1 %2510 }
 0x386   : > { %v2545_v25 = vsel %vm10710_vm8, %v2509_v11, %v2511_v43  ;;  %v2546_v3 = vsel %vm10711_vm6, %v2511_v43, %v9177_v34  ;;  %v9314_v34 = vadd.s32 3712, %v10707_v45  ;;  %v9952_v11 = vand.u32 63, %v9292_v60  ;;  %v10837_v45 = vld [vmem:[#allocation71_spill] sm:$0xff] }
 0x387   : > { %v10728_v43 = vmov 0  ;;  %vm10743_vm6 = vcmask 515072  }
 0x388   : > { %5136 = vrot.lane.b32.xlu1 %v5067_v35, %s5671_s24  ;;  %v2857_v38 = vpop.permute.xlu0 %2856  ;;  %v10729_v43 = vsel %vm9338_vm3, 4294967295, %v10728_v43  ;;  %v2259_v4 = vand.u32 63, %v9314_v34  ;;  %vm9357_vm14 = vcmp.gt.s32.totalorder %v9952_v11, 0  ;;  %v2605_v34 = vsel %vm9338_vm3, %v2541_v51, 0.0 }
 0x389   : > { %v2847_v36 = vpop.permute.xlu1 %2846  ;;  %10730 = vst [vmem:[#allocation89_spill] sm:$0xff] %v10729_v43  ;;  %v2260_v11 = vand.u32 63, %v9343_v27  ;;  %v10740_v51 = vmov 0  ;;  %v2607_v0 = vsel %vm9357_vm14, %v9276_v15, 0.0 }
 0x38a   : > { %v2888_v35 = vsel %vm10726_vm9, %v10725_v18, %v2847_v36  ;;  %v2604_v18 = vsel %vm9318_vm4, %v9252_v26, 0.0  ;;  %vm9379_vm8 = vcmp.gt.s32.totalorder %v2259_v4, 0  ;;  %vm10745_vm9 = vmmov %vm10735_vm1 }
 0x38b   : > { %v2952_v22 = vadd.f32 %v2888_v35, %v2602_v53  ;;  %v2610_v53 = vsel %vm9325_vm0, %v2546_v3, 0.0  ;;  %v10741_v51 = vsel %vm9379_vm8, 4294967295, %v10740_v51  ;;  %v2608_v15 = vsel %vm9379_vm8, %v9279_v23, 0.0 }
 0x38c   : > { %5140 = vrot.lane.b32.xlu1 %v5075_v44, %s5671_s24  ;;  %v2889_v44 = vsel %vm10727_vm15, %v2847_v36, %v2849_v30  ;;  %v2861_v36 = vpop.permute.xlu0 %2860  ;;  %vm9392_vm15 = vcmp.gt.s32.totalorder %v2260_v11, 0  ;;  %v10753_v23 = vmov 0 }
 0x38d   : > { %v2953_v33 = vadd.f32 %v2889_v44, %v2603_v61  ;;  %v2896_v61 = vsel %vm10735_vm1, %v2861_v36, %v9228_v29  ;;  %v2851_v35 = vpop.permute.xlu1 %2850  ;;  %v2606_v29 = vsel %vm9347_vm7, %v9260_v1, 0.0  ;;  %v10746_v1 = vmov 0 }
 0x38e   : > { %v9367_v44 = vadd.f32 %v2896_v61, %v2610_v53  ;;  %v2890_v26 = vsel %vm10736_vm5, %v2849_v30, %v2851_v35  ;;  %v2891_v58 = vsel %vm10737_vm11, %v2851_v35, %v2853_v54  ;;  %v10742_v30 = vld [vmem:[#allocation53_spill] sm:$0xff]  ;;  %v10747_v1 = vsel %vm9392_vm15, 4294967295, %v10746_v1  ;;  %vm10748_vm5 = vmmov %vm10735_vm1 }
 0x38f   : > { %v2954_v55 = vadd.f32 %v2890_v26, %v2604_v18  ;;  %v2955_v62 = vadd.f32 %v2891_v58, %v2605_v34 }
 0x390   : > { %v3197_v3 = vpop.permute.xlu0 %3196 }
 0x391   : > { %v3238_v53 = vsel %vm10743_vm6, %v10742_v30, %v3197_v3  ;;  %v2855_v61 = vpop.permute.xlu1 %2854 }
 0x392   : > { %v3302_v58 = vsel %vm9372_vm13, %v3238_v53, 0.0  ;;  %v2892_v27 = vsel %vm10744_vm10, %v2853_v54, %v2855_v61  ;;  %v2893_v18 = vsel %vm10745_vm9, %v2855_v61, %v2857_v38  ;;  %v2609_v53 = vsel %vm9392_vm15, %v2545_v25, 0.0 }
 0x393   : > { %v9396_v35 = vadd.f32 %v3302_v58, %v2952_v22  ;;  %v2956_v34 = vadd.f32 %v2892_v27, %v2606_v29  ;;  %v2957_v26 = vadd.f32 %v2893_v18, %v2607_v0  ;;  %v10749_v22 = vand.u32 63, %v9264_v63 }
 0x394   : > { %v3201_v30 = vpop.permute.xlu0 %3200  ;;  %v10750_v29 = vmov 0  ;;  %v10752_v0 = vand.u32 63, %v9268_v28  ;;  %vm10755_vm10 = vcmask 515072   ;;  %v10757_v28 = vand.u32 63, %v9283_v42 }
 0x395   : > { %v2859_v24 = vpop.permute.xlu1 %2858  ;;  %vm9407_vm11 = vcmp.lt.s32.totalorder %v10749_v22, 63  ;;  %vm10756_vm9 = vmmov %vm10755_vm10 }
 0x396   : > { %v2894_v54 = vsel %vm10735_vm1, %v2857_v38, %v2859_v24  ;;  %v2895_v61 = vsel %vm10748_vm5, %v2859_v24, %v2861_v36  ;;  %v10751_v29 = vsel %vm9407_vm11, 4294967295, %v10750_v29  ;;  %vm9413_vm6 = vcmp.lt.s32.totalorder %v10752_v0, 63 }
 0x397   : > { %v2958_v41 = vadd.f32 %v2894_v54, %v2608_v15  ;;  %v2959_v17 = vadd.f32 %v2895_v61, %v2609_v53  ;;  %v10754_v23 = vsel %vm9413_vm6, 4294967295, %v10753_v23  ;;  %vm9425_vm1 = vcmp.lt.s32.totalorder %v10757_v28, 63 }
 0x398   : > { %v3205_v52 = vpop.permute.xlu0 %3204  ;;  %v10760_v53 = vand.u32 63, %v9288_v48  ;;  %v10764_v48 = vand.u32 63, %v9292_v60 }
 0x399   : > { %v3199_v25 = vpop.permute.xlu1 %3198 }
 0x39a   : > { %v3239_v38 = vsel %vm10755_vm10, %v3197_v3, %v3199_v25  ;;  %v3240_v24 = vsel %vm10756_vm9, %v3199_v25, %v3201_v30  ;;  %vm9431_vm5 = vcmp.lt.s32.totalorder %v10760_v53, 63  ;;  %v10761_v3 = vmov 0  ;;  %vm10763_vm10 = vmmov %vm10756_vm9 }
 0x39b   : > { %v3303_v36 = vsel %vm9407_vm11, %v3239_v38, 0.0  ;;  %v3304_v63 = vsel %vm9413_vm6, %v3240_v24, 0.0  ;;  %v10762_v3 = vsel %vm9431_vm5, 4294967295, %v10761_v3  ;;  %vm9445_vm6 = vcmp.lt.s32.totalorder %v10764_v48, 63 }
 0x39c   : > { %v3335_v58 = vadd.f32 %v3303_v36, %v2953_v33  ;;  %v3336_v27 = vadd.f32 %v3304_v63, %v2954_v55  ;;  %v3209_v18 = vpop.permute.xlu0 %3208  ;;  %v10765_v38 = vmov 0  ;;  %vm9449_vm11 = vcmp.lt.s32.totalorder %v2259_v4, 63 }
 0x39d   : > { %v3203_v54 = vpop.permute.xlu1 %3202  ;;  %v10766_v38 = vsel %vm9445_vm6, 4294967295, %v10765_v38  ;;  %v10771_v4 = vmov 0 }
 0x39e   : > { %v3241_v61 = vsel %vm10763_vm10, %v3201_v30, %v3203_v54  ;;  %v3242_v22 = vsel %vm10756_vm9, %v3203_v54, %v3205_v52  ;;  %v10767_v30 = vmov 0  ;;  %vm10770_vm10 = vmmov %vm10756_vm9  ;;  %v10774_v54 = vand.u32 63, %v9273_v21 }
 0x39f   : > { %v3305_v33 = vsel %vm9425_vm1, %v3241_v61, 0.0  ;;  %v3306_v42 = vsel %vm9431_vm5, %v3242_v22, 0.0  ;;  %v10768_v30 = vsel %vm9449_vm11, 4294967295, %v10767_v30  ;;  %vm9463_vm5 = vcmp.lt.s32.totalorder %v2260_v11, 63 }
 0x3a0   : > { %v3337_v55 = vadd.f32 %v3305_v33, %v2955_v62  ;;  %v9441_v0 = vadd.f32 %v3306_v42, %v2956_v34  ;;  %v3549_v25 = vpop.permute.xlu0 %3548  ;;  %10769 = vst [vmem:[#allocation83_spill] sm:$0xff] %v10768_v30  ;;  %v10772_v4 = vsel %vm9463_vm5, 4294967295, %v10771_v4 }
 0x3a1   : > { %v3207_v24 = vpop.permute.xlu1 %3206  ;;  %10773 = vst [vmem:[#allocation91_spill] sm:$0xff] %v10772_v4 }
 0x3a2   : > { %v3243_v36 = vsel %vm10770_vm10, %v3205_v52, %v3207_v24  ;;  %v3244_v63 = vsel %vm10756_vm9, %v3207_v24, %v3209_v18  ;;  %vm9469_vm10 = vcmp.lt.s32.totalorder %v10774_v54, 63  ;;  %v10775_v52 = vmov 0 }
 0x3a3   : > { %v3307_v62 = vsel %vm9445_vm6, %v3243_v36, 0.0  ;;  %v3308_v34 = vsel %vm9449_vm11, %v3244_v63, 0.0  ;;  %v10776_v52 = vsel %vm9469_vm10, 4294967295, %v10775_v52  ;;  %vm10778_vm11 = vmmov %vm10756_vm9  ;;  %vm10779_vm6 = vcmask 7168  }
 0x3a4   : > { %v9459_v60 = vadd.f32 %v3307_v62, %v2957_v26  ;;  %v9461_v28 = vadd.f32 %v3308_v34, %v2958_v41  ;;  %v3553_v53 = vpop.permute.xlu0 %3552  ;;  %10777 = vst [vmem:[#allocation88_spill] sm:$0xff] %v10776_v52  ;;  %v3706_v52 = vld [vmem:[#allocation2 + $0xcc] ss:$8 sm:$0xf] }
 0x3a5   : > { %v3211_v61 = vpop.permute.xlu1 %3210  ;;  %v3708_v4 = vor.u32 %v3707_v14, %v3706_v52 }
 0x3a6   : > { %v3245_v22 = vsel %vm10756_vm9, %v3209_v18, %v3211_v61  ;;  %v3246_v26 = vsel %vm10778_vm11, %v3211_v61, %v9199_v10  ;;  %vm10780_vm11 = vmmov %vm10779_vm6 }
 0x3a7   : > { %v3309_v41 = vsel %vm9463_vm5, %v3245_v22, 0.0  ;;  %v3310_v11 = vsel %vm9469_vm10, %v3246_v26, 0.0  ;;  %vm10781_vm9 = vmmov %vm10779_vm6 }
 0x3a8   : > { %v9480_v33 = vadd.f32 %v3309_v41, %v2959_v17  ;;  %v3342_v21 = vadd.f32 %v3310_v11, %v9367_v44  ;;  %v3557_v42 = vpop.permute.xlu0 %3556  ;;  %vm10782_vm10 = vmmov %vm10779_vm6 }
 0x3a9   : > { %v3547_v48 = vpop.permute.xlu1 %3546 }
 0x3aa   : > { %v3589_v24 = vsel %vm10779_vm6, %v3547_v48, %v3549_v25  ;;  %v3588_v59 = vsel %vm10779_vm6, %v10564_v47, %v3547_v48 }
 0x3ab   : > { %v3653_v18 = vsel %vm9306_vm2, %v3589_v24, 0.0 }
 0x3ac   : > { %v9486_v36 = vadd.f32 %v3653_v18, %v3335_v58  ;;  %v3561_v10 = vpop.permute.xlu0 %3560 }
 0x3ad   : > { %v3596_v63 = vsel %vm10780_vm11, %v3561_v10, %v9240_v9  ;;  %v3551_v62 = vpop.permute.xlu1 %3550  ;;  %vm10790_vm11 = vmmov %vm10779_vm6 }
 0x3ae   : > { %v3660_v17 = vsel %vm9325_vm0, %v3596_v63, 0.0  ;;  %v3590_v34 = vsel %vm10781_vm9, %v3549_v25, %v3551_v62  ;;  %v3591_v44 = vsel %vm10782_vm10, %v3551_v62, %v3553_v53  ;;  %vm10789_vm10 = vmmov %vm10779_vm6 }
 0x3af   : > { %v9494_v54 = vadd.f32 %v3660_v17, %v3342_v21  ;;  %v3654_v61 = vsel %vm9318_vm4, %v3590_v34, 0.0  ;;  %v3655_v58 = vsel %vm9338_vm3, %v3591_v44, 0.0  ;;  %vm10791_vm9 = vmmov %vm10779_vm6 }
 0x3b0   : > { %v3686_v22 = vadd.f32 %v3654_v61, %v3336_v27  ;;  %v3687_v26 = vadd.f32 %v3655_v58, %v3337_v55  ;;  %v4109_v41 = vpop.permute.xlu0 %4108 }
 0x3b1   : > { %v3555_v9 = vpop.permute.xlu1 %3554 }
 0x3b4   : > { %v9500_v11 = vpop.permute.xlu0 %4112 }
 0x3b5   : > { %v3559_v24 = vpop.permute.xlu1 %3558 }
 0x3b6   : > { %v3594_v47 = vsel %vm10791_vm9, %v3557_v42, %v3559_v24  ;;  %v3595_v48 = vsel %vm10779_vm6, %v3559_v24, %v3561_v10  ;;  %v3824_v10 = vrot.slane %v3708_v4, %v6518_v46  ;;  %v3828_v24 = vrot.slane %v3708_v4, %v10559_v56 }
 0x3b7   : > { %v3840_v46 = vrot.slane %v3708_v4, %v10627_v37  ;;  %v10793_v56 = vcombine.low %v9217_v6, %v9220_v12  ;;  %vm10797_vm6 = vnez %v10751_v29 }
 0x3b8   : > { %v9502_v18 = vpop.permute.xlu0 %4116 }
 0x3b9   : > { %v4111_v25 = vpop.permute.xlu1 %4110  ;;  %v3904_v12 = vadd.f32 %v3840_v46, %v9494_v54 }
 0x3bc   : > { %v9504_v63 = vpop.permute.xlu0 %4120 }
 0x3bd   : > { %v4115_v21 = vpop.permute.xlu1 %4114 }
 0x3c0   : > { %v9506_v62 = vpop.permute.xlu0 %4460 }
 0x3c1   : > { %v4119_v17 = vpop.permute.xlu1 %4118 }
 0x3c4   : > { %v9508_v34 = vpop.permute.xlu0 %4464 }
 0x3c5   : > { %10783 = vst [vmem:[#allocation93_spill] sm:$0xff] %v9508_v34  ;;  %v9510_v19 = vpop.permute.xlu1 %4122 }
 0x3c8   : > { %v9512_v27 = vpop.permute.xlu0 %4468 }
 0x3c9   : > { %10784 = vst [vmem:[#allocation90_spill] sm:$0xff] %v9512_v27  ;;  %v3592_v27 = vsel %vm10789_vm10, %v3553_v53, %v3555_v9  ;;  %vm10792_vm10 = vcmask 1039360  }
 0x3ca   : > { %v9514_v55 = vpop.permute.xlu1 %4458  ;;  %v4150_v52 = vsel %vm10792_vm10, %v8784_v2, %v4109_v41  ;;  %v3658_v2 = vsel %vm9379_vm8, %v3594_v47, 0.0  ;;  %vm10796_vm9 = vmmov %vm10792_vm10  ;;  %vm10802_vm8 = vcmask 531456  }
 0x3cb   : > { %vm10801_vm0 = vmmov %vm10796_vm9 }
 0x3cc   : > { %v4156_v54 = vsel %vm10801_vm0, %v4119_v17, %v9504_v63  ;;  %v10816_v46 = vld [vmem:[#allocation93_spill] sm:$0xff] }
 0x3cf   : > { %v9516_v44 = vpop.permute.xlu0 %4472 }
 0x3d0   : > { %10785 = vst [vmem:[#allocation92_spill] sm:$0xff] %v9516_v44  ;;  %v3652_v44 = vsel %vm9298_vm12, %v3588_v59, 0.0 }
 0x3d1   : > { %v9518_v61 = vpop.permute.xlu1 %4462  ;;  %v3684_v53 = vadd.f32 %v3652_v44, %v9396_v35  ;;  %v3659_v44 = vsel %vm9392_vm15, %v3595_v48, 0.0  ;;  %vm10800_vm15 = vmmov %vm10796_vm9 }
 0x3d2   : > { %10786 = vst [vmem:[#allocation97_spill] sm:$0xff] %v9518_v61  ;;  %v3593_v61 = vsel %vm10790_vm11, %v3555_v9, %v3557_v42  ;;  %v3812_v9 = vrot.slane %v3708_v4, %v6441_v40  ;;  %v3820_v42 = vrot.slane %v3708_v4, %v6470_v5  ;;  %v3832_v40 = vrot.slane %v3708_v4, %v6541_v7  ;;  %vm10795_vm11 = vmmov %vm10792_vm10 }
 0x3d3   : > { %v9520_v58 = vpop.permute.xlu0 %4807  ;;  %v3657_v59 = vsel %vm9357_vm14, %v3593_v61, 0.0  ;;  %v4214_v61 = vsel %vm9372_vm13, %v4150_v52, 0.0  ;;  %v3836_v5 = vrot.slane %v3708_v4, %v10570_v39  ;;  %v4151_v48 = vsel %vm10795_vm11, %v4109_v41, %v4111_v25  ;;  %vm10798_vm10 = vmmov %vm10796_vm9 }
 0x3d4   : > { %10787 = vst [vmem:[#allocation16_spill] sm:$0xff] %v9520_v58  ;;  %v3656_v58 = vsel %vm9347_vm7, %v3592_v27, 0.0  ;;  %v3816_v27 = vrot.slane %v3708_v4, %v6494_v20  ;;  %v3689_v20 = vadd.f32 %v3657_v59, %v9459_v60  ;;  %v3691_v4 = vadd.f32 %v3659_v44, %v9480_v33  ;;  %vm10799_vm11 = vmmov %vm10796_vm9 }
 0x3d5   : > { %v3688_v35 = vadd.f32 %v3656_v58, %v9441_v0  ;;  %v9569_v0 = vrot.slane %v10793_v56, %v10692_v32  ;;  %v10794_v58 = vcombine.low %v9197_v49, %v9223_v16  ;;  %v3897_v6 = vadd.f32 %v3812_v9, %v9486_v36 }
 0x3d6   : > { %v9522_v43 = vpop.permute.xlu1 %4466  ;;  %v3898_v59 = vadd.f32 %v3816_v27, %v3686_v22  ;;  %v3899_v49 = vadd.f32 %v3820_v42, %v3687_v26  ;;  %v4215_v41 = vsel %vm10797_vm6, %v4151_v48, 0.0  ;;  %v4154_v33 = vsel %vm10799_vm11, %v4115_v21, %v9502_v18  ;;  %v10804_v27 = vld [vmem:[#allocation7_spill] sm:$0xff] }
 0x3d7   : > { %10788 = vst [vmem:[#allocation94_spill] sm:$0xff] %v9522_v43  ;;  %v9526_v34 = vpop.permute.xlu0 %4811  ;;  %v3808_v43 = vrot.slane %v10568_v8, %v10627_v37  ;;  %v9575_v7 = vrot.slane %v10794_v58, %v10692_v32  ;;  %v3690_v37 = vadd.f32 %v3658_v2, %v9461_v28  ;;  %v3900_v16 = vadd.f32 %v3824_v10, %v3688_v35  ;;  %v10810_v35 = vld [vmem:[#allocation83_spill] sm:$0xff] }
 0x3d8   : > { %v3901_v28 = vadd.f32 %v3828_v24, %v3689_v20  ;;  %v4155_v36 = vsel %vm10800_vm15, %v9502_v18, %v4119_v17  ;;  %v4499_v22 = vsel %vm10802_vm8, %v8853_v50, %v9514_v55  ;;  %v3903_v9 = vadd.f32 %v3836_v5, %v3691_v4 }
 0x3d9   : > { %v3896_v47 = vadd.f32 %v3808_v43, %v3684_v53  ;;  %v4152_v43 = vsel %vm10796_vm9, %v4111_v25, %v9500_v11  ;;  %v4153_v53 = vsel %vm10798_vm10, %v9500_v11, %v4115_v21  ;;  %v3902_v25 = vadd.f32 %v3832_v40, %v3690_v37  ;;  %vm10803_vm9 = vmmov %vm10801_vm0 }
 0x3da   : > { %v9529_v30 = vpop.permute.xlu1 %4470  ;;  %v4157_v11 = vsel %vm10803_vm9, %v9504_v63, %v9510_v19  ;;  %vm10805_vm10 = vmmov %vm10801_vm0  ;;  %vm10806_vm15 = vnez %v10754_v23  ;;  %v4247_v17 = vadd.f32 %v4215_v41, %v3897_v6  ;;  %v4217_v42 = vsel %vm9425_vm1, %v4153_v53, 0.0  ;;  %v10820_v6 = vld [vmem:[#allocation69_spill] sm:$0xff] }
 0x3db   : > { %v9540_v14 = vpop.permute.xlu0 %4815  ;;  %v4246_v52 = vadd.f32 %v4214_v61, %v3896_v47  ;;  %v4158_v21 = vsel %vm10805_vm10, %v9510_v19, %v10804_v27  ;;  %v4216_v18 = vsel %vm10806_vm15, %v4152_v43, 0.0  ;;  %vm10807_vm0 = vmmov %vm10802_vm8  ;;  %vm10808_vm8 = vnez %v10762_v3  ;;  %v10813_v61 = vld [vmem:[#allocation88_spill] sm:$0xff] }
 0x3dc   : > { %v4500_v50 = vsel %vm10807_vm0, %v9514_v55, %v9506_v62  ;;  %v4218_v24 = vsel %vm10808_vm8, %v4154_v33, 0.0  ;;  %vm10809_vm11 = vnez %v10766_v38  ;;  %vm10811_vm9 = vnez %v10810_v35  ;;  %v10815_v55 = vld [vmem:[#allocation97_spill] sm:$0xff]  ;;  %vm10817_vm8 = vmmov %vm10807_vm0  ;;  %v10819_v4 = vld [vmem:[#allocation16_spill] sm:$0xff] }
 0x3dd   : > { %v4219_v63 = vsel %vm10809_vm11, %v4155_v36, 0.0  ;;  %v4220_v19 = vsel %vm10811_vm9, %v4156_v54, 0.0  ;;  %v4563_v2 = vsel %vm9298_vm12, %v4499_v22, 0.0  ;;  %v4221_v40 = vsel %vm9463_vm5, %v4157_v11, 0.0 }
 0x3de   : > { %v9548_v8 = vpop.permute.xlu1 %4809  ;;  %vm10814_vm10 = vnez %v10813_v61  ;;  %v4501_v5 = vsel %vm10807_vm0, %v9506_v62, %v10815_v55  ;;  %v4502_v56 = vsel %vm10817_vm8, %v10815_v55, %v10816_v46  ;;  %v4248_v47 = vadd.f32 %v4216_v18, %v3898_v59  ;;  %v10824_v18 = vld [vmem:[#allocation94_spill] sm:$0xff]  ;;  %vm10827_vm8 = vmmov %vm10807_vm0 }
 0x3df   : > { %v9578_v60 = vpop.permute.xlu0 %4819  ;;  %v4222_v20 = vsel %vm10814_vm10, %v4158_v21, 0.0  ;;  %v4249_v48 = vadd.f32 %v4217_v42, %v3899_v49  ;;  %v4564_v37 = vsel %vm9306_vm2, %v4500_v50, 0.0  ;;  %vm10821_vm12 = vcmask 523264   ;;  %vm10825_vm2 = vmmov %vm10807_vm0 }
 0x3e0   : > { %v4848_v43 = vsel %vm10821_vm12, %v10820_v6, %v10819_v4  ;;  %v4250_v41 = vadd.f32 %v4218_v24, %v3900_v16  ;;  %v4251_v53 = vadd.f32 %v4219_v63, %v3901_v28  ;;  %v4252_v33 = vadd.f32 %v4220_v19, %v3902_v25  ;;  %v10826_v16 = vld [vmem:[#allocation90_spill] sm:$0xff]  ;;  %vm10828_vm0 = vmmov %vm10821_vm12  ;;  %v10833_v63 = vld [vmem:[#allocation8_spill] sm:$0xff] }
 0x3e1   : > { %v4595_v36 = vadd.f32 %v4563_v2, %v4246_v52  ;;  %v9641_v62 = vadd.f32 %v4221_v40, %v3903_v9  ;;  %v9643_v54 = vadd.f32 %v4222_v20, %v3904_v12  ;;  %v4565_v11 = vsel %vm9318_vm4, %v4501_v5, 0.0  ;;  %vm10829_vm4 = vmmov %vm10828_vm0  ;;  %v10834_v19 = vld [vmem:[#allocation92_spill] sm:$0xff] }
 0x3e2   : > { %v9580_v39 = vpop.permute.xlu1 %4813  ;;  %v4566_v49 = vsel %vm9338_vm3, %v4502_v56, 0.0  ;;  %v4596_v27 = vadd.f32 %v4564_v37, %v4247_v17  ;;  %v4503_v42 = vsel %vm10825_vm2, %v10816_v46, %v10824_v18  ;;  %v4504_v52 = vsel %vm10827_vm8, %v10824_v18, %v10826_v16  ;;  %v10830_v17 = vld [vmem:[#allocation78_spill] sm:$0xff]  ;;  %vm10835_vm8 = vmmov %vm10825_vm2 }
 0x3e3   : > { %v5127_v10 = vpop.permute.xlu0 %5126  ;;  %v4912_v21 = vadd.f32 %v4848_v43, %v4595_v36  ;;  %v4849_v12 = vsel %vm10828_vm0, %v10819_v4, %v9548_v8  ;;  %v4850_v9 = vsel %vm10829_vm4, %v9548_v8, %v9526_v34  ;;  %vm10831_vm3 = vcmask 515072   ;;  %vm10840_vm4 = vmmov %vm10825_vm2 }
 0x3e4   : > { %vm10832_vm12 = vmmov %vm10831_vm3  ;;  %v4507_v2 = vsel %vm10825_vm2, %v10834_v19, %v10833_v63  ;;  %v4597_v40 = vadd.f32 %v4565_v11, %v4248_v47  ;;  %v4598_v20 = vadd.f32 %v4566_v49, %v4249_v48  ;;  %v4567_v5 = vsel %vm9347_vm7, %v4503_v42, 0.0 }
 0x3e5   : > { %v4568_v8 = vsel %vm9357_vm14, %v4504_v52, 0.0  ;;  %v4505_v46 = vsel %vm10835_vm8, %v10826_v16, %v9529_v30  ;;  %v4913_v13 = vadd.f32 %v4849_v12, %v4596_v27  ;;  %v4851_v47 = vsel %vm10828_vm0, %v9526_v34, %v9580_v39  ;;  %vm10836_vm7 = vmmov %vm10828_vm0  ;;  %v10846_v52 = vld [vmem:[#allocation84_spill] sm:$0xff] }
 0x3e6   : > { %v9601_v26 = vpop.permute.xlu1 %4817  ;;  %v4914_v37 = vadd.f32 %v4850_v9, %v4597_v40  ;;  %v4852_v57 = vsel %vm10836_vm7, %v9580_v39, %v9540_v14  ;;  %vm10838_vm14 = vmmov %vm10831_vm3  ;;  %v4599_v36 = vadd.f32 %v4567_v5, %v4250_v41  ;;  %v4506_v22 = vsel %vm10840_vm4, %v9529_v30, %v10834_v19 }
 0x3e7   : > { %v5131_v28 = vpop.permute.xlu0 %5130  ;;  %v4915_v59 = vadd.f32 %v4851_v47, %v4598_v20  ;;  %vm10847_vm8 = vnez %v10846_v52  ;;  %v4600_v12 = vadd.f32 %v4568_v8, %v4251_v53  ;;  %vm10849_vm7 = vnez %v10747_v1 }
 0x3e8   : > { %v4570_v15 = vsel %vm10849_vm7, %v4506_v22, 0.0 }
 0x3e9   : > { %v4602_v20 = vadd.f32 %v4570_v15, %v9641_v62 }
 0x3ea   : > { %v9634_v58 = vpop.permute.xlu1 %4821 }
 0x3eb   : > { %v5135_v34 = vpop.permute.xlu0 %5134 }
 0x3ee   : > { %v5125_v25 = vpop.permute.xlu1 %5124 }
 0x3ef   : > { %v5165_v50 = vsel %vm10831_vm3, %v10830_v17, %v5125_v25  ;;  %v5166_v24 = vsel %vm10832_vm12, %v5125_v25, %v5127_v10  ;;  %vm10843_vm12 = vmmov %vm10828_vm0  ;;  %v4571_v25 = vsel %vm10847_vm8, %v4507_v2, 0.0  ;;  %v5139_v63 = vpop.permute.xlu0 %5138 }
 0x3f0   : > { %v5229_v55 = vsel %vm9372_vm13, %v5165_v50, 0.0  ;;  %v5230_v31 = vsel %vm10797_vm6, %v5166_v24, 0.0  ;;  %vm10839_vm13 = vmmov %vm10831_vm3  ;;  %vm10841_vm3 = vnez %v10741_v51  ;;  %v4854_v30 = vsel %vm10843_vm12, %v9601_v26, %v9578_v60 }
 0x3f1   : > { %v5261_v56 = vadd.f32 %v5229_v55, %v4912_v21  ;;  %v4569_v29 = vsel %vm10841_vm3, %v4505_v46, 0.0  ;;  %v5262_v39 = vadd.f32 %v5230_v31, %v4913_v13  ;;  %vm10842_vm6 = vmmov %vm10828_vm0  ;;  %vm10848_vm0 = vnez %v10762_v3  ;;  %v10853_v55 = vld [vmem:[#allocation9_spill] sm:$0xff] }
 0x3f2   : > { %v5129_v48 = vpop.permute.xlu1 %5128  ;;  %v4853_v41 = vsel %vm10842_vm6, %v9540_v14, %v9601_v26  ;;  %vm10845_vm2 = vmmov %vm10839_vm13  ;;  %v4601_v14 = vadd.f32 %v4569_v29, %v4252_v33  ;;  %v4603_v40 = vadd.f32 %v4571_v25, %v9643_v54 }
 0x3f3   : > { %v5403_v4 = vcombine.low %v10837_v45, %v5261_v56  ;;  %v5167_v6 = vsel %vm10838_vm14, %v5127_v10, %v5129_v48  ;;  %v5168_v43 = vsel %vm10839_vm13, %v5129_v48, %v5131_v28  ;;  %v4916_v10 = vadd.f32 %v4852_v57, %v4599_v36  ;;  %vm10851_vm14 = vmmov %vm10845_vm2 }
 0x3f4   : > { %v5231_v11 = vsel %vm10806_vm15, %v5167_v6, 0.0  ;;  %v5232_v51 = vsel %vm9425_vm1, %v5168_v43, 0.0  ;;  %vm10844_vm15 = vmmov %vm10839_vm13  ;;  %v4917_v50 = vadd.f32 %v4853_v41, %v4600_v12 }
 0x3f5   : > { %v5431_v49 = vrot.slane %v5403_v4, %v10692_v32  ;;  %v5263_v27 = vadd.f32 %v5231_v11, %v4914_v37  ;;  %v5264_v17 = vadd.f32 %v5232_v51, %v4915_v59  ;;  %vm10850_vm1 = vmmov %vm10842_vm6 }
 0x3f6   : > { %v5133_v21 = vpop.permute.xlu1 %5132  ;;  %v4855_v24 = vsel %vm10850_vm1, %v9578_v60, %v9634_v58  ;;  %vm10852_vm13 = vmmov %vm10845_vm2 }
 0x3f7   : > { %v5433_v23 = vcombine.low %v9575_v7, %v5431_v49  ;;  %v5449_v18 = vcombine.low %v5262_v39, %v5263_v27  ;;  %v5169_v42 = vsel %vm10844_vm15, %v5131_v28, %v5133_v21  ;;  %v5170_v16 = vsel %vm10845_vm2, %v5133_v21, %v5135_v34  ;;  %vm10854_vm4 = vmmov %vm10850_vm1 }
 0x3f8   : > { %v5233_v9 = vsel %vm10848_vm0, %v5169_v42, 0.0  ;;  %v4918_v28 = vadd.f32 %v4854_v30, %v4601_v14  ;;  %v5234_v53 = vsel %vm10809_vm11, %v5170_v16, 0.0  ;;  %v4856_v60 = vsel %vm10854_vm4, %v9634_v58, %v10853_v55  ;;  %vm10855_vm11 = vmmov %vm10845_vm2 }
 0x3f9   : > { %v5447_v26 = vrot.slane %v5433_v23, %v10692_v32  ;;  %v5265_v7 = vadd.f32 %v5233_v9, %v4916_v10  ;;  %v5459_v5 = vrot.slane %v5449_v18, %v10692_v32  ;;  %v4919_v56 = vadd.f32 %v4855_v24, %v4602_v20 }
 0x3fa   : > { %v5137_v3 = vpop.permute.xlu1 %5136  ;;  %v4920_v13 = vadd.f32 %v4856_v60, %v4603_v40 }
 0x3fb   : > { %v5448_v33 = vcombine.low %v9569_v0, %v5447_v26  ;;  %v5450_v1 = vcombine.low %v5264_v17, %v5265_v7  ;;  %v5171_v19 = vsel %vm10851_vm14, %v5135_v34, %v5137_v3  ;;  %v5172_v2 = vsel %vm10852_vm13, %v5137_v3, %v5139_v63 }
 0x3fc   : > { %v5235_v38 = vsel %vm10811_vm9, %v5171_v19, 0.0  ;;  %v5266_v0 = vadd.f32 %v5234_v53, %v4917_v50  ;;  %v5236_v54 = vsel %vm9463_vm5, %v5172_v2, 0.0 }
 0x3fd   : > { %5504 = vst [vmem:[%s7872_s29 + $0x10] sm:$0xff] %v5448_v33  ;;  %v5466_v8 = vrot.slane %v5450_v1, %v10692_v32  ;;  %v5267_v46 = vadd.f32 %v5235_v38, %v4918_v28  ;;  %v5268_v31 = vadd.f32 %v5236_v54, %v4919_v56 }
 0x3fe   : > { %v5141_v62 = vpop.permute.xlu1 %5140 }
 0x3ff   : > { %v5481_v37 = vcombine.low %v5459_v5, %v5466_v8  ;;  %v5451_v47 = vcombine.low %v5266_v0, %v5267_v46  ;;  %v5173_v58 = vsel %vm10855_vm11, %v5139_v63, %v5141_v62 }
 0x400   : > { %v5237_v35 = vsel %vm10814_vm10, %v5173_v58, 0.0 }
 0x401   : > { %v5269_v48 = vadd.f32 %v5237_v35, %v4920_v13  ;;  %v5473_v45 = vrot.slane %v5451_v47, %v10692_v32  ;;  %v5489_v44 = vrot.slane %v5481_v37, %v10692_v32 }
 0x403   : > { %v5452_v57 = vcombine.low %v5268_v31, %v5269_v48 }
 0x405   : > { %v5480_v4 = vrot.slane %v5452_v57, %v10692_v32 }
 0x407   : > { %v5482_v6 = vcombine.low %v5473_v45, %v5480_v4 }
 0x409   : > { %v5496_v43 = vrot.slane %v5482_v6, %v10692_v32 }
 0x40b   : > { %v5497_v36 = vcombine.low %v5489_v44, %v5496_v43 }
 0x40d   : > { %5505 = vst [vmem:[%s7872_s29 + $0x18] sm:$0xff] %v5497_v36 }
 0x40e PF: > { %s13_s12 = sadd.s32 1, %s5664_s12  }
 0x40f   : > { %p10_p4 = scmp.ge.s32.totalorder %s13_s12, 4  }
 0x411   :  { %12 = sbr.rel (!%p10_p4) target bundleno = 1 (0x1), region = 105 }

// kernel: encoder_forward.4
= control target key start
LH: loop header
LB: loop body
LE: loop exit
PB: predicated region body
PF: predicated region fallthrough
CT: control target
= control target key end

     0   :  { %vm104_vm0 = vcmask 1042432   ;;  %vm55_vm1 = vcmask 23552   ;;  %vm268_vm2 = vcmask 523264   ;;  %vm478_vm3 = vcmask 80896   ;;  %s2415_s2 = inlined_call_operand.vmem [shape: f32[3,64], index: 2, kind: input, shape index: {}]   ;;  %s2416_s0 = inlined_call_operand.vmem [shape: f32[128,3], index: 0, kind: input, shape index: {}]   ;;  %s2417_s4 = inlined_call_operand.vmem [shape: f32[64,10], index: 4, kind: input, shape index: {}]   ;;  %s2418_s6 = inlined_call_operand.vmem [shape: f32[3,10], index: 6, kind: input, shape index: {}]   ;;  %s2419_s1 = inlined_call_operand.vmem [shape: f32[512,3], index: 1, kind: input, shape index: {}]   ;;  %s2420_s3 = inlined_call_operand.vmem [shape: f32[1,64], index: 3, kind: input, shape index: {}]   ;;  %s2421_s7 = inlined_call_operand.vmem [shape: f32[1,10], index: 7, kind: input, shape index: {}]   ;;  %s2422_s9 = inlined_call_operand.vmem [shape: f32[512,10], index: 9, kind: output, shape index: {1}]   ;;  %s2423_s5 = inlined_call_operand.vmem [shape: f32[1,10], index: 5, kind: input, shape index: {}]   ;;  %s2424_s8 = inlined_call_operand.vmem [shape: f32[128,10], index: 8, kind: output, shape index: {0}]  }
   0x1   :  { %v47_v0 = vld [vmem:[%s2415_s2] sm:$0x7]  ;;  %v32_v2 = vld [vmem:[%s2416_s0 + $0x8] sm:$0xff]  ;;  %v33_v3 = vld [vmem:[%s2416_s0 + $0x10] sm:$0xff] }
   0x2   :  { %v31_v1 = vld [vmem:[%s2416_s0] sm:$0xff]  ;;  %1426 = vmatprep.subr.msk.mxu0 %vm104_vm0, %v47_v0  ;;  %v34_v4 = vld [vmem:[%s2416_s0 + $0x18] sm:$0xff]  ;;  %v259_v8 = vld [vmem:[%s2417_s4 + $0x30] sm:$0xff] }
   0x3   :  { %1428 = vmatprep.mubr.msk.f32.mxu0 %vm55_vm1, %v31_v1  ;;  %1427 = vmatpush3.msk.msra.mxu0 %vm104_vm0, %v47_v0  ;;  %v35_v5 = vld [vmem:[%s2416_s0 + $0x20] sm:$0xff]  ;;  %v260_v6 = vld [vmem:[%s2417_s4 + $0x38] sm:$0xff]  ;;  %v36_v9 = vld [vmem:[%s2416_s0 + $0x28] sm:$0xff] }
   0x4   :  { %1429 = vmatmul.mubr.msk.f32.vlgmr.msra.gmra.mxu0 %vm55_vm1, %v32_v2  ;;  %1452 = vmatprep.subr.mxu1 %v260_v6  ;;  %v1671_v7 = vld [vmem:[%s2418_s6] sm:$0x7]  ;;  %v258_v10 = vld [vmem:[%s2417_s4 + $0x28] sm:$0xff]  ;;  %v37_v11 = vld [vmem:[%s2416_s0 + $0x30] sm:$0xff] }
   0x5   :  { %1431 = vmatprep.mubr.msk.f32.mxu0 %vm55_vm1, %v33_v3  ;;  %1492 = vmatprep.subr.msk.mxu0 %vm104_vm0, %v1671_v7  ;;  %v257_v12 = vld [vmem:[%s2417_s4 + $0x20] sm:$0xff]  ;;  %v38_v13 = vld [vmem:[%s2416_s0 + $0x38] sm:$0xff]  ;;  %v255_v16 = vld [vmem:[%s2417_s4 + $0x10] sm:$0xff] }
   0x6   :  { %1453 = vmatpush3.msra.mxu1 %v260_v6  ;;  %1493 = vmatpush3.msk.msra.mxu0 %vm104_vm0, %v1671_v7  ;;  %v256_v14 = vld [vmem:[%s2417_s4 + $0x18] sm:$0xff]  ;;  %v39_v15 = vld [vmem:[%s2416_s0 + $0x40] sm:$0xff]  ;;  %v40_v17 = vld [vmem:[%s2416_s0 + $0x48] sm:$0xff] }
   0x7   :  { %1454 = vmatprep.subr.mxu1 %v259_v8  ;;  %v41_v18 = vld [vmem:[%s2416_s0 + $0x50] sm:$0xff]  ;;  %v42_v19 = vld [vmem:[%s2416_s0 + $0x58] sm:$0xff]  ;;  %v43_v20 = vld [vmem:[%s2416_s0 + $0x60] sm:$0xff] }
   0x8   :  { %1432 = vmatmul.mubr.msk.f32.gmra.mxu0 %vm55_vm1, %v34_v4  ;;  %1455 = vmatpush3.msra.mxu1 %v259_v8  ;;  %v44_v21 = vld [vmem:[%s2416_s0 + $0x68] sm:$0xff]  ;;  %v45_v22 = vld [vmem:[%s2416_s0 + $0x70] sm:$0xff]  ;;  %v46_v23 = vld [vmem:[%s2416_s0 + $0x78] sm:$0xff] }
   0x9   :  { %1434 = vmatprep.mubr.msk.f32.mxu0 %vm55_vm1, %v35_v5  ;;  %1456 = vmatprep.subr.mxu1 %v258_v10  ;;  %v254_v24 = vld [vmem:[%s2417_s4 + $0x8] sm:$0xff]  ;;  %v253_v25 = vld [vmem:[%s2417_s4] sm:$0xff]  ;;  %v497_v28 = vld [vmem:[%s2419_s1 + $0x10] sm:$0xff] }
   0xa   :  { %1457 = vmatpush3.msra.mxu1 %v258_v10  ;;  %v495_v26 = vld [vmem:[%s2419_s1] sm:$0xff]  ;;  %v496_v27 = vld [vmem:[%s2419_s1 + $0x8] sm:$0xff]  ;;  %v498_v29 = vld [vmem:[%s2419_s1 + $0x18] sm:$0xff] }
   0xb   :  { %1458 = vmatprep.subr.mxu1 %v257_v12  ;;  %v499_v30 = vld [vmem:[%s2419_s1 + $0x20] sm:$0xff]  ;;  %v500_v31 = vld [vmem:[%s2419_s1 + $0x28] sm:$0xff]  ;;  %v501_v32 = vld [vmem:[%s2419_s1 + $0x30] sm:$0xff] }
   0xc   :  { %1435 = vmatmul.mubr.msk.f32.gmra.mxu0 %vm55_vm1, %v36_v9  ;;  %1459 = vmatpush3.msra.mxu1 %v257_v12  ;;  %v502_v33 = vld [vmem:[%s2419_s1 + $0x38] sm:$0xff]  ;;  %v503_v34 = vld [vmem:[%s2419_s1 + $0x40] sm:$0xff]  ;;  %v504_v35 = vld [vmem:[%s2419_s1 + $0x48] sm:$0xff] }
   0xd   :  { %1437 = vmatprep.mubr.msk.f32.mxu0 %vm55_vm1, %v37_v11  ;;  %1460 = vmatprep.subr.mxu1 %v256_v14  ;;  %v505_v36 = vld [vmem:[%s2419_s1 + $0x50] sm:$0xff]  ;;  %v506_v37 = vld [vmem:[%s2419_s1 + $0x58] sm:$0xff]  ;;  %v507_v38 = vld [vmem:[%s2419_s1 + $0x60] sm:$0xff] }
   0xe   :  { %1461 = vmatpush3.msra.mxu1 %v256_v14  ;;  %v508_v39 = vld [vmem:[%s2419_s1 + $0x68] sm:$0xff]  ;;  %v509_v40 = vld [vmem:[%s2419_s1 + $0x70] sm:$0xff]  ;;  %v510_v41 = vld [vmem:[%s2419_s1 + $0x78] sm:$0xff] }
   0xf   :  { %1462 = vmatprep.subr.mxu1 %v255_v16  ;;  %v511_v42 = vld [vmem:[%s2419_s1 + $0x80] sm:$0xff]  ;;  %v512_v43 = vld [vmem:[%s2419_s1 + $0x88] sm:$0xff]  ;;  %v513_v44 = vld [vmem:[%s2419_s1 + $0x90] sm:$0xff] }
  0x10   :  { %1438 = vmatmul.mubr.msk.f32.gmra.mxu0 %vm55_vm1, %v38_v13  ;;  %1463 = vmatpush3.msra.mxu1 %v255_v16  ;;  %v514_v45 = vld [vmem:[%s2419_s1 + $0x98] sm:$0xff]  ;;  %v515_v46 = vld [vmem:[%s2419_s1 + $0xa0] sm:$0xff]  ;;  %v516_v47 = vld [vmem:[%s2419_s1 + $0xa8] sm:$0xff] }
  0x11   :  { %1440 = vmatprep.mubr.msk.f32.mxu0 %vm55_vm1, %v39_v15  ;;  %1464 = vmatprep.subr.mxu1 %v254_v24  ;;  %v517_v48 = vld [vmem:[%s2419_s1 + $0xb0] sm:$0xff]  ;;  %v518_v49 = vld [vmem:[%s2419_s1 + $0xb8] sm:$0xff]  ;;  %v519_v50 = vld [vmem:[%s2419_s1 + $0xc0] sm:$0xff] }
  0x12   :  { %1465 = vmatpush3.msra.mxu1 %v254_v24  ;;  %v520_v51 = vld [vmem:[%s2419_s1 + $0xc8] sm:$0xff]  ;;  %v521_v52 = vld [vmem:[%s2419_s1 + $0xd0] sm:$0xff]  ;;  %v522_v53 = vld [vmem:[%s2419_s1 + $0xd8] sm:$0xff] }
  0x13   :  { %1466 = vmatprep.subr.mxu1 %v253_v25  ;;  %v523_v54 = vld [vmem:[%s2419_s1 + $0xe0] sm:$0xff]  ;;  %v524_v55 = vld [vmem:[%s2419_s1 + $0xe8] sm:$0xff]  ;;  %v525_v56 = vld [vmem:[%s2419_s1 + $0xf0] sm:$0xff] }
  0x14   :  { %1441 = vmatmul.mubr.msk.f32.gmra.mxu0 %vm55_vm1, %v40_v17  ;;  %1467 = vmatpush3.msra.mxu1 %v253_v25  ;;  %v526_v57 = vld [vmem:[%s2419_s1 + $0xf8] sm:$0xff]  ;;  %v527_v58 = vld [vmem:[%s2419_s1 + $0x100] sm:$0xff]  ;;  %v528_v59 = vld [vmem:[%s2419_s1 + $0x108] sm:$0xff] }
  0x15   :  { %1443 = vmatprep.mubr.msk.f32.mxu0 %vm55_vm1, %v41_v18  ;;  %1590 = vmatprep.subr.msk.mxu1 %vm104_vm0, %v1671_v7  ;;  %v529_v60 = vld [vmem:[%s2419_s1 + $0x110] sm:$0xff]  ;;  %v530_v61 = vld [vmem:[%s2419_s1 + $0x118] sm:$0xff]  ;;  %v1219_v63 = vld [vmem:[%s2420_s3] ss:$0 sm:$0xff] }
  0x18   :  { %1444 = vmatmul.mubr.msk.f32.gmra.mxu0 %vm55_vm1, %v42_v19 }
  0x19   :  { %1446 = vmatprep.mubr.msk.f32.mxu0 %vm55_vm1, %v43_v20 }
  0x1c   :  { %1447 = vmatmul.mubr.msk.f32.gmra.mxu0 %vm55_vm1, %v44_v21 }
  0x1d   :  { %1449 = vmatprep.mubr.msk.f32.mxu0 %vm55_vm1, %v45_v22 }
  0x20   :  { %1450 = vmatmul.mubr.msk.f32.gmra.mxu0 %vm55_vm1, %v46_v23 }
  0x21   :  { %1494 = vmatprep.mubr.msk.f32.mxu0 %vm55_vm1, %v495_v26 }
  0x24   :  { %1495 = vmatmul.mubr.msk.f32.vlgmr.msra.gmra.mxu0 %vm55_vm1, %v496_v27 }
  0x25   :  { %1497 = vmatprep.mubr.msk.f32.mxu0 %vm55_vm1, %v497_v28 }
  0x28   :  { %1498 = vmatmul.mubr.msk.f32.gmra.mxu0 %vm55_vm1, %v498_v29 }
  0x29   :  { %1500 = vmatprep.mubr.msk.f32.mxu0 %vm55_vm1, %v499_v30 }
  0x2c   :  { %1501 = vmatmul.mubr.msk.f32.gmra.mxu0 %vm55_vm1, %v500_v31  ;;  %v531_v31 = vld [vmem:[%s2419_s1 + $0x120] sm:$0xff] }
  0x2d   :  { %1503 = vmatprep.mubr.msk.f32.mxu0 %vm55_vm1, %v501_v32  ;;  %v532_v32 = vld [vmem:[%s2419_s1 + $0x128] sm:$0xff] }
  0x30   :  { %1504 = vmatmul.mubr.msk.f32.gmra.mxu0 %vm55_vm1, %v502_v33  ;;  %v533_v33 = vld [vmem:[%s2419_s1 + $0x130] sm:$0xff] }
  0x31   :  { %1506 = vmatprep.mubr.msk.f32.mxu0 %vm55_vm1, %v503_v34  ;;  %v534_v34 = vld [vmem:[%s2419_s1 + $0x138] sm:$0xff] }
  0x34   :  { %1507 = vmatmul.mubr.msk.f32.gmra.mxu0 %vm55_vm1, %v504_v35  ;;  %v535_v35 = vld [vmem:[%s2419_s1 + $0x140] sm:$0xff] }
  0x35   :  { %1509 = vmatprep.mubr.msk.f32.mxu0 %vm55_vm1, %v505_v36  ;;  %v536_v36 = vld [vmem:[%s2419_s1 + $0x148] sm:$0xff] }
  0x38   :  { %1510 = vmatmul.mubr.msk.f32.gmra.mxu0 %vm55_vm1, %v506_v37  ;;  %v537_v37 = vld [vmem:[%s2419_s1 + $0x150] sm:$0xff] }
  0x39   :  { %1512 = vmatprep.mubr.msk.f32.mxu0 %vm55_vm1, %v507_v38  ;;  %v538_v38 = vld [vmem:[%s2419_s1 + $0x158] sm:$0xff] }
  0x3c   :  { %1513 = vmatmul.mubr.msk.f32.gmra.mxu0 %vm55_vm1, %v508_v39  ;;  %v539_v39 = vld [vmem:[%s2419_s1 + $0x160] sm:$0xff] }
  0x3d   :  { %1515 = vmatprep.mubr.msk.f32.mxu0 %vm55_vm1, %v509_v40  ;;  %v540_v40 = vld [vmem:[%s2419_s1 + $0x168] sm:$0xff] }
  0x40   :  { %1516 = vmatmul.mubr.msk.f32.gmra.mxu0 %vm55_vm1, %v510_v41  ;;  %v541_v41 = vld [vmem:[%s2419_s1 + $0x170] sm:$0xff] }
  0x41   :  { %1518 = vmatprep.mubr.msk.f32.mxu0 %vm55_vm1, %v511_v42  ;;  %v542_v42 = vld [vmem:[%s2419_s1 + $0x178] sm:$0xff] }
  0x44   :  { %1519 = vmatmul.mubr.msk.f32.gmra.mxu0 %vm55_vm1, %v512_v43  ;;  %v543_v43 = vld [vmem:[%s2419_s1 + $0x180] sm:$0xff] }
  0x45   :  { %1521 = vmatprep.mubr.msk.f32.mxu0 %vm55_vm1, %v513_v44  ;;  %v544_v44 = vld [vmem:[%s2419_s1 + $0x188] sm:$0xff] }
  0x48   :  { %1522 = vmatmul.mubr.msk.f32.gmra.mxu0 %vm55_vm1, %v514_v45  ;;  %v545_v45 = vld [vmem:[%s2419_s1 + $0x190] sm:$0xff] }
  0x49   :  { %1524 = vmatprep.mubr.msk.f32.mxu0 %vm55_vm1, %v515_v46  ;;  %v546_v46 = vld [vmem:[%s2419_s1 + $0x198] sm:$0xff] }
  0x4c   :  { %1525 = vmatmul.mubr.msk.f32.gmra.mxu0 %vm55_vm1, %v516_v47  ;;  %v547_v47 = vld [vmem:[%s2419_s1 + $0x1a0] sm:$0xff] }
  0x4d   :  { %1527 = vmatprep.mubr.msk.f32.mxu0 %vm55_vm1, %v517_v48  ;;  %v548_v48 = vld [vmem:[%s2419_s1 + $0x1a8] sm:$0xff] }
  0x50   :  { %1528 = vmatmul.mubr.msk.f32.gmra.mxu0 %vm55_vm1, %v518_v49  ;;  %v549_v49 = vld [vmem:[%s2419_s1 + $0x1b0] sm:$0xff] }
  0x51   :  { %1530 = vmatprep.mubr.msk.f32.mxu0 %vm55_vm1, %v519_v50  ;;  %v550_v50 = vld [vmem:[%s2419_s1 + $0x1b8] sm:$0xff] }
  0x54   :  { %1531 = vmatmul.mubr.msk.f32.gmra.mxu0 %vm55_vm1, %v520_v51  ;;  %v551_v51 = vld [vmem:[%s2419_s1 + $0x1c0] sm:$0xff] }
  0x55   :  { %1533 = vmatprep.mubr.msk.f32.mxu0 %vm55_vm1, %v521_v52  ;;  %v552_v52 = vld [vmem:[%s2419_s1 + $0x1c8] sm:$0xff] }
  0x58   :  { %1534 = vmatmul.mubr.msk.f32.gmra.mxu0 %vm55_vm1, %v522_v53  ;;  %v553_v53 = vld [vmem:[%s2419_s1 + $0x1d0] sm:$0xff] }
  0x59   :  { %1536 = vmatprep.mubr.msk.f32.mxu0 %vm55_vm1, %v523_v54  ;;  %v554_v54 = vld [vmem:[%s2419_s1 + $0x1d8] sm:$0xff] }
  0x5c   :  { %1537 = vmatmul.mubr.msk.f32.gmra.mxu0 %vm55_vm1, %v524_v55  ;;  %v555_v55 = vld [vmem:[%s2419_s1 + $0x1e0] sm:$0xff] }
  0x5d   :  { %1539 = vmatprep.mubr.msk.f32.mxu0 %vm55_vm1, %v525_v56  ;;  %v556_v56 = vld [vmem:[%s2419_s1 + $0x1e8] sm:$0xff] }
  0x60   :  { %1540 = vmatmul.mubr.msk.f32.gmra.mxu0 %vm55_vm1, %v526_v57  ;;  %v557_v57 = vld [vmem:[%s2419_s1 + $0x1f0] sm:$0xff] }
  0x61   :  { %1542 = vmatprep.mubr.msk.f32.mxu0 %vm55_vm1, %v527_v58 }
  0x64   :  { %1543 = vmatmul.mubr.msk.f32.gmra.mxu0 %vm55_vm1, %v528_v59  ;;  %v2021_v59 = vld [vmem:[%s2421_s7] ss:$0 sm:$0xff] }
  0x65   :  { %1545 = vmatprep.mubr.msk.f32.mxu0 %vm55_vm1, %v529_v60 }
  0x68   :  { %1546 = vmatmul.mubr.msk.f32.gmra.mxu0 %vm55_vm1, %v530_v61  ;;  %v558_v61 = vld [vmem:[%s2419_s1 + $0x1f8] sm:$0xff] }
  0xc4   :  { %v1430_v62 = vpop.f32.mrf.mxu0 }
  0xc5   :  { %v180_v2 = vadd.f32 %v1430_v62, %v1219_v63 }
  0xc6   :  { %v174_v0 = vpop.f32.mrf.mxu0 }
  0xc7   :  { %v175_v1 = vadd.f32 %v1219_v63, %v174_v0 }
  0xc8   :  { %v1433_v3 = vpop.f32.mrf.mxu0 }
  0xc9   :  { %1468 = vmatprep.mubr.msk.f32.mxu1 %vm268_vm2, %v175_v1  ;;  %v190_v6 = vadd.f32 %v1433_v3, %v1219_v63 }
  0xca   :  { %v184_v4 = vpop.f32.mrf.mxu0  ;;  %1469 = vmatmul.mubr.msk.f32.vlgmr.msra.gmra.mxu1 %vm268_vm2, %v180_v2 }
  0xcb   :  { %v185_v5 = vadd.f32 %v1219_v63, %v184_v4  ;;  %1591 = vmatpush3.msk.msra.mxu1 %vm104_vm0, %v1671_v7 }
  0xcc   :  { %v1436_v8 = vpop.f32.mrf.mxu0 }
  0xcd   :  { %1471 = vmatprep.mubr.msk.f32.mxu1 %vm268_vm2, %v185_v5  ;;  %v200_v11 = vadd.f32 %v1436_v8, %v1219_v63 }
  0xce   :  { %v194_v9 = vpop.f32.mrf.mxu0  ;;  %1472 = vmatmul.mubr.msk.f32.gmra.mxu1 %vm268_vm2, %v190_v6 }
  0xcf   :  { %v195_v10 = vadd.f32 %v1219_v63, %v194_v9 }
  0xd0   :  { %v1439_v12 = vpop.f32.mrf.mxu0 }
  0xd1   :  { %1474 = vmatprep.mubr.msk.f32.mxu1 %vm268_vm2, %v195_v10  ;;  %v210_v15 = vadd.f32 %v1439_v12, %v1219_v63 }
  0xd2   :  { %v204_v13 = vpop.f32.mrf.mxu0  ;;  %1475 = vmatmul.mubr.msk.f32.gmra.mxu1 %vm268_vm2, %v200_v11 }
  0xd3   :  { %v205_v14 = vadd.f32 %v1219_v63, %v204_v13 }
  0xd4   :  { %v1442_v16 = vpop.f32.mrf.mxu0 }
  0xd5   :  { %1477 = vmatprep.mubr.msk.f32.mxu1 %vm268_vm2, %v205_v14  ;;  %v220_v18 = vadd.f32 %v1442_v16, %v1219_v63 }
  0xd6   :  { %v214_v7 = vpop.f32.mrf.mxu0  ;;  %1478 = vmatmul.mubr.msk.f32.gmra.mxu1 %vm268_vm2, %v210_v15 }
  0xd7   :  { %v215_v17 = vadd.f32 %v1219_v63, %v214_v7 }
  0xd8   :  { %v1445_v19 = vpop.f32.mrf.mxu0 }
  0xd9   :  { %1480 = vmatprep.mubr.msk.f32.mxu1 %vm268_vm2, %v215_v17  ;;  %v230_v22 = vadd.f32 %v1445_v19, %v1219_v63 }
  0xda   :  { %v224_v20 = vpop.f32.mrf.mxu0  ;;  %1481 = vmatmul.mubr.msk.f32.gmra.mxu1 %vm268_vm2, %v220_v18 }
  0xdb   :  { %v225_v21 = vadd.f32 %v1219_v63, %v224_v20 }
  0xdc   :  { %v1448_v23 = vpop.f32.mrf.mxu0 }
  0xdd   :  { %1483 = vmatprep.mubr.msk.f32.mxu1 %vm268_vm2, %v225_v21  ;;  %v240_v26 = vadd.f32 %v1448_v23, %v1219_v63 }
  0xde   :  { %v234_v24 = vpop.f32.mrf.mxu0  ;;  %1484 = vmatmul.mubr.msk.f32.gmra.mxu1 %vm268_vm2, %v230_v22 }
  0xdf   :  { %v235_v25 = vadd.f32 %v1219_v63, %v234_v24 }
  0xe0   :  { %v1451_v27 = vpop.f32.mrf.mxu0 }
  0xe1   :  { %1486 = vmatprep.mubr.msk.f32.mxu1 %vm268_vm2, %v235_v25  ;;  %v250_v30 = vadd.f32 %v1451_v27, %v1219_v63 }
  0xe2   :  { %v244_v28 = vpop.f32.mrf.mxu0  ;;  %1487 = vmatmul.mubr.msk.f32.gmra.mxu1 %vm268_vm2, %v240_v26 }
  0xe3   :  { %v245_v29 = vadd.f32 %v1219_v63, %v244_v28 }
  0xe4   :  { %v1496_v58 = vpop.f32.mrf.mxu0 }
  0xe5   :  { %1489 = vmatprep.mubr.msk.f32.mxu1 %vm268_vm2, %v245_v29  ;;  %v834_v62 = vadd.f32 %v1496_v58, %v2021_v59 }
  0xe6   :  { %1490 = vmatmul.mubr.msk.f32.gmra.mxu1 %vm268_vm2, %v250_v30  ;;  %v828_v60 = vpop.f32.mrf.mxu0 }
  0xe7   :  { %1548 = vmatprep.mubr.msk.f32.mxu1 %vm55_vm1, %v531_v31  ;;  %v829_v63 = vadd.f32 %v2021_v59, %v828_v60  ;;  %1148 = vst.msk [vmem:[%s2422_s9 + $0x8] sm:$0xff] %vm478_vm3, %v834_v62 }
  0xe8   :  { %v1499_v0 = vpop.f32.mrf.mxu0 }
  0xe9   :  { %1147 = vst.msk [vmem:[%s2422_s9] sm:$0xff] %vm478_vm3, %v829_v63  ;;  %v844_v2 = vadd.f32 %v1499_v0, %v2021_v59 }
  0xea   :  { %1549 = vmatmul.mubr.msk.f32.vlgmr.msra.gmra.mxu1 %vm55_vm1, %v532_v32  ;;  %v838_v1 = vpop.f32.mrf.mxu0 }
  0xeb   :  { %1551 = vmatprep.mubr.msk.f32.mxu1 %vm55_vm1, %v533_v33  ;;  %v839_v3 = vadd.f32 %v2021_v59, %v838_v1  ;;  %1150 = vst.msk [vmem:[%s2422_s9 + $0x18] sm:$0xff] %vm478_vm3, %v844_v2 }
  0xec   :  { %v1502_v4 = vpop.f32.mrf.mxu0 }
  0xed   :  { %1149 = vst.msk [vmem:[%s2422_s9 + $0x10] sm:$0xff] %vm478_vm3, %v839_v3  ;;  %v854_v6 = vadd.f32 %v1502_v4, %v2021_v59 }
  0xee   :  { %1552 = vmatmul.mubr.msk.f32.gmra.mxu1 %vm55_vm1, %v534_v34  ;;  %v848_v5 = vpop.f32.mrf.mxu0 }
  0xef   :  { %1554 = vmatprep.mubr.msk.f32.mxu1 %vm55_vm1, %v535_v35  ;;  %v849_v8 = vadd.f32 %v2021_v59, %v848_v5  ;;  %1152 = vst.msk [vmem:[%s2422_s9 + $0x28] sm:$0xff] %vm478_vm3, %v854_v6  ;;  %v1237_v5 = vld [vmem:[%s2423_s5] ss:$0 sm:$0xff] }
  0xf0   :  { %v1505_v9 = vpop.f32.mrf.mxu0 }
  0xf1   :  { %1151 = vst.msk [vmem:[%s2422_s9 + $0x20] sm:$0xff] %vm478_vm3, %v849_v8  ;;  %v864_v11 = vadd.f32 %v1505_v9, %v2021_v59 }
  0xf2   :  { %1555 = vmatmul.mubr.msk.f32.gmra.mxu1 %vm55_vm1, %v536_v36  ;;  %v858_v10 = vpop.f32.mrf.mxu0 }
  0xf3   :  { %1557 = vmatprep.mubr.msk.f32.mxu1 %vm55_vm1, %v537_v37  ;;  %v859_v12 = vadd.f32 %v2021_v59, %v858_v10  ;;  %1154 = vst.msk [vmem:[%s2422_s9 + $0x38] sm:$0xff] %vm478_vm3, %v864_v11 }
  0xf4   :  { %v1508_v13 = vpop.f32.mrf.mxu0 }
  0xf5   :  { %1153 = vst.msk [vmem:[%s2422_s9 + $0x30] sm:$0xff] %vm478_vm3, %v859_v12  ;;  %v874_v15 = vadd.f32 %v1508_v13, %v2021_v59 }
  0xf6   :  { %1558 = vmatmul.mubr.msk.f32.gmra.mxu1 %vm55_vm1, %v538_v38  ;;  %v868_v14 = vpop.f32.mrf.mxu0 }
  0xf7   :  { %1560 = vmatprep.mubr.msk.f32.mxu1 %vm55_vm1, %v539_v39  ;;  %v869_v16 = vadd.f32 %v2021_v59, %v868_v14  ;;  %1156 = vst.msk [vmem:[%s2422_s9 + $0x48] sm:$0xff] %vm478_vm3, %v874_v15 }
  0xf8   :  { %v1511_v7 = vpop.f32.mrf.mxu0 }
  0xf9   :  { %1155 = vst.msk [vmem:[%s2422_s9 + $0x40] sm:$0xff] %vm478_vm3, %v869_v16  ;;  %v884_v17 = vadd.f32 %v1511_v7, %v2021_v59 }
  0xfa   :  { %1561 = vmatmul.mubr.msk.f32.gmra.mxu1 %vm55_vm1, %v540_v40  ;;  %v878_v18 = vpop.f32.mrf.mxu0 }
  0xfb   :  { %1563 = vmatprep.mubr.msk.f32.mxu1 %vm55_vm1, %v541_v41  ;;  %1158 = vst.msk [vmem:[%s2422_s9 + $0x58] sm:$0xff] %vm478_vm3, %v884_v17  ;;  %v879_v19 = vadd.f32 %v2021_v59, %v878_v18 }
  0xfc   :  { %v1514_v20 = vpop.f32.mrf.mxu0 }
  0xfd   :  { %1157 = vst.msk [vmem:[%s2422_s9 + $0x50] sm:$0xff] %vm478_vm3, %v879_v19  ;;  %v894_v21 = vadd.f32 %v1514_v20, %v2021_v59 }
  0xfe   :  { %1564 = vmatmul.mubr.msk.f32.gmra.mxu1 %vm55_vm1, %v542_v42  ;;  %v888_v22 = vpop.f32.mrf.mxu0 }
  0xff   :  { %1566 = vmatprep.mubr.msk.f32.mxu1 %vm55_vm1, %v543_v43  ;;  %1160 = vst.msk [vmem:[%s2422_s9 + $0x68] sm:$0xff] %vm478_vm3, %v894_v21  ;;  %v889_v23 = vadd.f32 %v2021_v59, %v888_v22 }
 0x100   :  { %v1517_v24 = vpop.f32.mrf.mxu0 }
 0x101   :  { %1159 = vst.msk [vmem:[%s2422_s9 + $0x60] sm:$0xff] %vm478_vm3, %v889_v23  ;;  %v904_v25 = vadd.f32 %v1517_v24, %v2021_v59 }
 0x102   :  { %1567 = vmatmul.mubr.msk.f32.gmra.mxu1 %vm55_vm1, %v544_v44  ;;  %v898_v26 = vpop.f32.mrf.mxu0 }
 0x103   :  { %1569 = vmatprep.mubr.msk.f32.mxu1 %vm55_vm1, %v545_v45  ;;  %1162 = vst.msk [vmem:[%s2422_s9 + $0x78] sm:$0xff] %vm478_vm3, %v904_v25  ;;  %v899_v27 = vadd.f32 %v2021_v59, %v898_v26 }
 0x104   :  { %v1520_v28 = vpop.f32.mrf.mxu0 }
 0x105   :  { %1161 = vst.msk [vmem:[%s2422_s9 + $0x70] sm:$0xff] %vm478_vm3, %v899_v27  ;;  %v914_v29 = vadd.f32 %v1520_v28, %v2021_v59 }
 0x106   :  { %1570 = vmatmul.mubr.msk.f32.gmra.mxu1 %vm55_vm1, %v546_v46  ;;  %v908_v30 = vpop.f32.mrf.mxu0 }
 0x107   :  { %1572 = vmatprep.mubr.msk.f32.mxu1 %vm55_vm1, %v547_v47  ;;  %1164 = vst.msk [vmem:[%s2422_s9 + $0x88] sm:$0xff] %vm478_vm3, %v914_v29  ;;  %v909_v31 = vadd.f32 %v2021_v59, %v908_v30 }
 0x108   :  { %v1523_v32 = vpop.f32.mrf.mxu0 }
 0x109   :  { %1163 = vst.msk [vmem:[%s2422_s9 + $0x80] sm:$0xff] %vm478_vm3, %v909_v31  ;;  %v924_v33 = vadd.f32 %v1523_v32, %v2021_v59 }
 0x10a   :  { %1573 = vmatmul.mubr.msk.f32.gmra.mxu1 %vm55_vm1, %v548_v48  ;;  %v918_v34 = vpop.f32.mrf.mxu0 }
 0x10b   :  { %1575 = vmatprep.mubr.msk.f32.mxu1 %vm55_vm1, %v549_v49  ;;  %1166 = vst.msk [vmem:[%s2422_s9 + $0x98] sm:$0xff] %vm478_vm3, %v924_v33  ;;  %v919_v35 = vadd.f32 %v2021_v59, %v918_v34 }
 0x10c   :  { %v1526_v36 = vpop.f32.mrf.mxu0 }
 0x10d   :  { %1165 = vst.msk [vmem:[%s2422_s9 + $0x90] sm:$0xff] %vm478_vm3, %v919_v35  ;;  %v934_v37 = vadd.f32 %v1526_v36, %v2021_v59 }
 0x10e   :  { %1576 = vmatmul.mubr.msk.f32.gmra.mxu1 %vm55_vm1, %v550_v50  ;;  %v928_v38 = vpop.f32.mrf.mxu0 }
 0x10f   :  { %1578 = vmatprep.mubr.msk.f32.mxu1 %vm55_vm1, %v551_v51  ;;  %1168 = vst.msk [vmem:[%s2422_s9 + $0xa8] sm:$0xff] %vm478_vm3, %v934_v37  ;;  %v929_v39 = vadd.f32 %v2021_v59, %v928_v38 }
 0x110   :  { %v1529_v40 = vpop.f32.mrf.mxu0 }
 0x111   :  { %1167 = vst.msk [vmem:[%s2422_s9 + $0xa0] sm:$0xff] %vm478_vm3, %v929_v39  ;;  %v944_v41 = vadd.f32 %v1529_v40, %v2021_v59 }
 0x112   :  { %1579 = vmatmul.mubr.msk.f32.gmra.mxu1 %vm55_vm1, %v552_v52  ;;  %v938_v42 = vpop.f32.mrf.mxu0 }
 0x113   :  { %1581 = vmatprep.mubr.msk.f32.mxu1 %vm55_vm1, %v553_v53  ;;  %1170 = vst.msk [vmem:[%s2422_s9 + $0xb8] sm:$0xff] %vm478_vm3, %v944_v41  ;;  %v939_v43 = vadd.f32 %v2021_v59, %v938_v42 }
 0x114   :  { %v1532_v44 = vpop.f32.mrf.mxu0 }
 0x115   :  { %1169 = vst.msk [vmem:[%s2422_s9 + $0xb0] sm:$0xff] %vm478_vm3, %v939_v43  ;;  %v954_v45 = vadd.f32 %v1532_v44, %v2021_v59 }
 0x116   :  { %1582 = vmatmul.mubr.msk.f32.gmra.mxu1 %vm55_vm1, %v554_v54  ;;  %v948_v46 = vpop.f32.mrf.mxu0 }
 0x117   :  { %1584 = vmatprep.mubr.msk.f32.mxu1 %vm55_vm1, %v555_v55  ;;  %1172 = vst.msk [vmem:[%s2422_s9 + $0xc8] sm:$0xff] %vm478_vm3, %v954_v45  ;;  %v949_v47 = vadd.f32 %v2021_v59, %v948_v46 }
 0x118   :  { %v1535_v48 = vpop.f32.mrf.mxu0 }
 0x119   :  { %1171 = vst.msk [vmem:[%s2422_s9 + $0xc0] sm:$0xff] %vm478_vm3, %v949_v47  ;;  %v964_v49 = vadd.f32 %v1535_v48, %v2021_v59 }
 0x11a   :  { %1585 = vmatmul.mubr.msk.f32.gmra.mxu1 %vm55_vm1, %v556_v56  ;;  %v958_v50 = vpop.f32.mrf.mxu0 }
 0x11b   :  { %1587 = vmatprep.mubr.msk.f32.mxu1 %vm55_vm1, %v557_v57  ;;  %1174 = vst.msk [vmem:[%s2422_s9 + $0xd8] sm:$0xff] %vm478_vm3, %v964_v49  ;;  %v959_v51 = vadd.f32 %v2021_v59, %v958_v50 }
 0x11c   :  { %v1538_v52 = vpop.f32.mrf.mxu0 }
 0x11d   :  { %1173 = vst.msk [vmem:[%s2422_s9 + $0xd0] sm:$0xff] %vm478_vm3, %v959_v51  ;;  %v974_v53 = vadd.f32 %v1538_v52, %v2021_v59 }
 0x11e   :  { %1588 = vmatmul.mubr.msk.f32.gmra.mxu1 %vm55_vm1, %v558_v61  ;;  %v968_v54 = vpop.f32.mrf.mxu0 }
 0x11f   :  { %1176 = vst.msk [vmem:[%s2422_s9 + $0xe8] sm:$0xff] %vm478_vm3, %v974_v53  ;;  %v969_v55 = vadd.f32 %v2021_v59, %v968_v54 }
 0x120   :  { %v1541_v56 = vpop.f32.mrf.mxu0 }
 0x121   :  { %1175 = vst.msk [vmem:[%s2422_s9 + $0xe0] sm:$0xff] %vm478_vm3, %v969_v55  ;;  %v984_v57 = vadd.f32 %v1541_v56, %v2021_v59 }
 0x122   :  { %v978_v58 = vpop.f32.mrf.mxu0 }
 0x123   :  { %1178 = vst.msk [vmem:[%s2422_s9 + $0xf8] sm:$0xff] %vm478_vm3, %v984_v57  ;;  %v979_v60 = vadd.f32 %v2021_v59, %v978_v58 }
 0x124   :  { %v1544_v61 = vpop.f32.mrf.mxu0 }
 0x125   :  { %1177 = vst.msk [vmem:[%s2422_s9 + $0xf0] sm:$0xff] %vm478_vm3, %v979_v60  ;;  %v994_v62 = vadd.f32 %v1544_v61, %v2021_v59 }
 0x126   :  { %v988_v63 = vpop.f32.mrf.mxu0 }
 0x127   :  { %1180 = vst.msk [vmem:[%s2422_s9 + $0x108] sm:$0xff] %vm478_vm3, %v994_v62  ;;  %v989_v0 = vadd.f32 %v2021_v59, %v988_v63 }
 0x128   :  { %v1547_v1 = vpop.f32.mrf.mxu0 }
 0x129   :  { %1179 = vst.msk [vmem:[%s2422_s9 + $0x100] sm:$0xff] %vm478_vm3, %v989_v0  ;;  %v1004_v2 = vadd.f32 %v1547_v1, %v2021_v59 }
 0x12a   :  { %v998_v3 = vpop.f32.mrf.mxu0 }
 0x12b   :  { %1182 = vst.msk [vmem:[%s2422_s9 + $0x118] sm:$0xff] %vm478_vm3, %v1004_v2  ;;  %v999_v4 = vadd.f32 %v2021_v59, %v998_v3 }
 0x12d   :  { %1181 = vst.msk [vmem:[%s2422_s9 + $0x110] sm:$0xff] %vm478_vm3, %v999_v4 }
 0x18a   :  { %v1470_v6 = vpop.f32.mrf.mxu1 }
 0x18b   :  { %v389_v8 = vadd.f32 %v1470_v6, %v1237_v5 }
 0x18c   :  { %v383_v9 = vpop.f32.mrf.mxu1 }
 0x18d   :  { %v463_v10 = vmul.f32 0.25, %v389_v8  ;;  %v384_v11 = vadd.f32 %v1237_v5, %v383_v9 }
 0x18e   :  { %v1473_v12 = vpop.f32.mrf.mxu1 }
 0x18f   :  { %480 = vst.msk [vmem:[%s2424_s8 + $0x8] sm:$0xff] %vm478_vm3, %v463_v10  ;;  %v462_v13 = vmul.f32 0.25, %v384_v11  ;;  %v399_v14 = vadd.f32 %v1473_v12, %v1237_v5 }
 0x190   :  { %v393_v15 = vpop.f32.mrf.mxu1 }
 0x191   :  { %479 = vst.msk [vmem:[%s2424_s8] sm:$0xff] %vm478_vm3, %v462_v13  ;;  %v465_v16 = vmul.f32 0.25, %v399_v14  ;;  %v394_v7 = vadd.f32 %v1237_v5, %v393_v15 }
 0x192   :  { %v1476_v17 = vpop.f32.mrf.mxu1 }
 0x193   :  { %482 = vst.msk [vmem:[%s2424_s8 + $0x18] sm:$0xff] %vm478_vm3, %v465_v16  ;;  %v464_v18 = vmul.f32 0.25, %v394_v7  ;;  %v409_v19 = vadd.f32 %v1476_v17, %v1237_v5 }
 0x194   :  { %v403_v20 = vpop.f32.mrf.mxu1 }
 0x195   :  { %481 = vst.msk [vmem:[%s2424_s8 + $0x10] sm:$0xff] %vm478_vm3, %v464_v18  ;;  %v467_v21 = vmul.f32 0.25, %v409_v19  ;;  %v404_v22 = vadd.f32 %v1237_v5, %v403_v20 }
 0x196   :  { %v1479_v23 = vpop.f32.mrf.mxu1 }
 0x197   :  { %484 = vst.msk [vmem:[%s2424_s8 + $0x28] sm:$0xff] %vm478_vm3, %v467_v21  ;;  %v466_v24 = vmul.f32 0.25, %v404_v22  ;;  %v419_v25 = vadd.f32 %v1479_v23, %v1237_v5 }
 0x198   :  { %v413_v26 = vpop.f32.mrf.mxu1 }
 0x199   :  { %483 = vst.msk [vmem:[%s2424_s8 + $0x20] sm:$0xff] %vm478_vm3, %v466_v24  ;;  %v469_v27 = vmul.f32 0.25, %v419_v25  ;;  %v414_v28 = vadd.f32 %v1237_v5, %v413_v26 }
 0x19a   :  { %v1482_v29 = vpop.f32.mrf.mxu1 }
 0x19b   :  { %486 = vst.msk [vmem:[%s2424_s8 + $0x38] sm:$0xff] %vm478_vm3, %v469_v27  ;;  %v468_v30 = vmul.f32 0.25, %v414_v28  ;;  %v429_v31 = vadd.f32 %v1482_v29, %v1237_v5 }
 0x19c   :  { %v423_v32 = vpop.f32.mrf.mxu1 }
 0x19d   :  { %485 = vst.msk [vmem:[%s2424_s8 + $0x30] sm:$0xff] %vm478_vm3, %v468_v30  ;;  %v471_v33 = vmul.f32 0.25, %v429_v31  ;;  %v424_v34 = vadd.f32 %v1237_v5, %v423_v32 }
 0x19e   :  { %v1485_v35 = vpop.f32.mrf.mxu1 }
 0x19f   :  { %488 = vst.msk [vmem:[%s2424_s8 + $0x48] sm:$0xff] %vm478_vm3, %v471_v33  ;;  %v470_v36 = vmul.f32 0.25, %v424_v34  ;;  %v439_v37 = vadd.f32 %v1485_v35, %v1237_v5 }
 0x1a0   :  { %v433_v38 = vpop.f32.mrf.mxu1 }
 0x1a1   :  { %487 = vst.msk [vmem:[%s2424_s8 + $0x40] sm:$0xff] %vm478_vm3, %v470_v36  ;;  %v473_v39 = vmul.f32 0.25, %v439_v37  ;;  %v434_v40 = vadd.f32 %v1237_v5, %v433_v38 }
 0x1a2   :  { %v1488_v41 = vpop.f32.mrf.mxu1 }
 0x1a3   :  { %490 = vst.msk [vmem:[%s2424_s8 + $0x58] sm:$0xff] %vm478_vm3, %v473_v39  ;;  %v472_v42 = vmul.f32 0.25, %v434_v40  ;;  %v449_v43 = vadd.f32 %v1488_v41, %v1237_v5 }
 0x1a4   :  { %v443_v44 = vpop.f32.mrf.mxu1 }
 0x1a5   :  { %489 = vst.msk [vmem:[%s2424_s8 + $0x50] sm:$0xff] %vm478_vm3, %v472_v42  ;;  %v475_v45 = vmul.f32 0.25, %v449_v43  ;;  %v444_v46 = vadd.f32 %v1237_v5, %v443_v44 }
 0x1a6   :  { %v1491_v47 = vpop.f32.mrf.mxu1 }
 0x1a7   :  { %492 = vst.msk [vmem:[%s2424_s8 + $0x68] sm:$0xff] %vm478_vm3, %v475_v45  ;;  %v474_v48 = vmul.f32 0.25, %v444_v46  ;;  %v459_v49 = vadd.f32 %v1491_v47, %v1237_v5 }
 0x1a8   :  { %v453_v50 = vpop.f32.mrf.mxu1 }
 0x1a9   :  { %491 = vst.msk [vmem:[%s2424_s8 + $0x60] sm:$0xff] %vm478_vm3, %v474_v48  ;;  %v477_v51 = vmul.f32 0.25, %v459_v49  ;;  %v454_v52 = vadd.f32 %v1237_v5, %v453_v50 }
 0x1aa   :  { %v1550_v53 = vpop.f32.mrf.mxu1 }
 0x1ab   :  { %494 = vst.msk [vmem:[%s2424_s8 + $0x78] sm:$0xff] %vm478_vm3, %v477_v51  ;;  %v476_v54 = vmul.f32 0.25, %v454_v52  ;;  %v1014_v55 = vadd.f32 %v1550_v53, %v2021_v59 }
 0x1ac   :  { %v1008_v56 = vpop.f32.mrf.mxu1 }
 0x1ad   :  { %493 = vst.msk [vmem:[%s2424_s8 + $0x70] sm:$0xff] %vm478_vm3, %v476_v54  ;;  %1184 = vst.msk [vmem:[%s2422_s9 + $0x128] sm:$0xff] %vm478_vm3, %v1014_v55  ;;  %v1009_v57 = vadd.f32 %v2021_v59, %v1008_v56 }
 0x1ae   :  { %v1553_v58 = vpop.f32.mrf.mxu1 }
 0x1af   :  { %1183 = vst.msk [vmem:[%s2422_s9 + $0x120] sm:$0xff] %vm478_vm3, %v1009_v57  ;;  %v1024_v60 = vadd.f32 %v1553_v58, %v2021_v59 }
 0x1b0   :  { %v1018_v61 = vpop.f32.mrf.mxu1 }
 0x1b1   :  { %1186 = vst.msk [vmem:[%s2422_s9 + $0x138] sm:$0xff] %vm478_vm3, %v1024_v60  ;;  %v1019_v62 = vadd.f32 %v2021_v59, %v1018_v61 }
 0x1b2   :  { %v1556_v63 = vpop.f32.mrf.mxu1 }
 0x1b3   :  { %1185 = vst.msk [vmem:[%s2422_s9 + $0x130] sm:$0xff] %vm478_vm3, %v1019_v62  ;;  %v1034_v0 = vadd.f32 %v1556_v63, %v2021_v59 }
 0x1b4   :  { %v1028_v1 = vpop.f32.mrf.mxu1 }
 0x1b5   :  { %1188 = vst.msk [vmem:[%s2422_s9 + $0x148] sm:$0xff] %vm478_vm3, %v1034_v0  ;;  %v1029_v2 = vadd.f32 %v2021_v59, %v1028_v1 }
 0x1b6   :  { %v1559_v3 = vpop.f32.mrf.mxu1 }
 0x1b7   :  { %1187 = vst.msk [vmem:[%s2422_s9 + $0x140] sm:$0xff] %vm478_vm3, %v1029_v2  ;;  %v1044_v4 = vadd.f32 %v1559_v3, %v2021_v59 }
 0x1b8   :  { %v1038_v5 = vpop.f32.mrf.mxu1 }
 0x1b9   :  { %1190 = vst.msk [vmem:[%s2422_s9 + $0x158] sm:$0xff] %vm478_vm3, %v1044_v4  ;;  %v1039_v6 = vadd.f32 %v2021_v59, %v1038_v5 }
 0x1ba   :  { %v1562_v8 = vpop.f32.mrf.mxu1 }
 0x1bb   :  { %1189 = vst.msk [vmem:[%s2422_s9 + $0x150] sm:$0xff] %vm478_vm3, %v1039_v6  ;;  %v1054_v9 = vadd.f32 %v1562_v8, %v2021_v59 }
 0x1bc   :  { %v1048_v10 = vpop.f32.mrf.mxu1 }
 0x1bd   :  { %1192 = vst.msk [vmem:[%s2422_s9 + $0x168] sm:$0xff] %vm478_vm3, %v1054_v9  ;;  %v1049_v11 = vadd.f32 %v2021_v59, %v1048_v10 }
 0x1be   :  { %v1565_v12 = vpop.f32.mrf.mxu1 }
 0x1bf   :  { %1191 = vst.msk [vmem:[%s2422_s9 + $0x160] sm:$0xff] %vm478_vm3, %v1049_v11  ;;  %v1064_v13 = vadd.f32 %v1565_v12, %v2021_v59 }
 0x1c0   :  { %v1058_v14 = vpop.f32.mrf.mxu1 }
 0x1c1   :  { %1194 = vst.msk [vmem:[%s2422_s9 + $0x178] sm:$0xff] %vm478_vm3, %v1064_v13  ;;  %v1059_v15 = vadd.f32 %v2021_v59, %v1058_v14 }
 0x1c2   :  { %v1568_v16 = vpop.f32.mrf.mxu1 }
 0x1c3   :  { %1193 = vst.msk [vmem:[%s2422_s9 + $0x170] sm:$0xff] %vm478_vm3, %v1059_v15  ;;  %v1074_v7 = vadd.f32 %v1568_v16, %v2021_v59 }
 0x1c4   :  { %v1068_v17 = vpop.f32.mrf.mxu1 }
 0x1c5   :  { %1196 = vst.msk [vmem:[%s2422_s9 + $0x188] sm:$0xff] %vm478_vm3, %v1074_v7  ;;  %v1069_v18 = vadd.f32 %v2021_v59, %v1068_v17 }
 0x1c6   :  { %v1571_v19 = vpop.f32.mrf.mxu1 }
 0x1c7   :  { %1195 = vst.msk [vmem:[%s2422_s9 + $0x180] sm:$0xff] %vm478_vm3, %v1069_v18  ;;  %v1084_v20 = vadd.f32 %v1571_v19, %v2021_v59 }
 0x1c8   :  { %v1078_v21 = vpop.f32.mrf.mxu1 }
 0x1c9   :  { %1198 = vst.msk [vmem:[%s2422_s9 + $0x198] sm:$0xff] %vm478_vm3, %v1084_v20  ;;  %v1079_v22 = vadd.f32 %v2021_v59, %v1078_v21 }
 0x1ca   :  { %v1574_v23 = vpop.f32.mrf.mxu1 }
 0x1cb   :  { %1197 = vst.msk [vmem:[%s2422_s9 + $0x190] sm:$0xff] %vm478_vm3, %v1079_v22  ;;  %v1094_v24 = vadd.f32 %v1574_v23, %v2021_v59 }
 0x1cc   :  { %v1088_v25 = vpop.f32.mrf.mxu1 }
 0x1cd   :  { %1200 = vst.msk [vmem:[%s2422_s9 + $0x1a8] sm:$0xff] %vm478_vm3, %v1094_v24  ;;  %v1089_v26 = vadd.f32 %v2021_v59, %v1088_v25 }
 0x1ce   :  { %v1577_v27 = vpop.f32.mrf.mxu1 }
 0x1cf   :  { %1199 = vst.msk [vmem:[%s2422_s9 + $0x1a0] sm:$0xff] %vm478_vm3, %v1089_v26  ;;  %v1104_v28 = vadd.f32 %v1577_v27, %v2021_v59 }
 0x1d0   :  { %v1098_v29 = vpop.f32.mrf.mxu1 }
 0x1d1   :  { %1202 = vst.msk [vmem:[%s2422_s9 + $0x1b8] sm:$0xff] %vm478_vm3, %v1104_v28  ;;  %v1099_v30 = vadd.f32 %v2021_v59, %v1098_v29 }
 0x1d2   :  { %v1580_v31 = vpop.f32.mrf.mxu1 }
 0x1d3   :  { %1201 = vst.msk [vmem:[%s2422_s9 + $0x1b0] sm:$0xff] %vm478_vm3, %v1099_v30  ;;  %v1114_v32 = vadd.f32 %v1580_v31, %v2021_v59 }
 0x1d4   :  { %v1108_v33 = vpop.f32.mrf.mxu1 }
 0x1d5   :  { %1204 = vst.msk [vmem:[%s2422_s9 + $0x1c8] sm:$0xff] %vm478_vm3, %v1114_v32  ;;  %v1109_v34 = vadd.f32 %v2021_v59, %v1108_v33 }
 0x1d6   :  { %v1583_v35 = vpop.f32.mrf.mxu1 }
 0x1d7   :  { %1203 = vst.msk [vmem:[%s2422_s9 + $0x1c0] sm:$0xff] %vm478_vm3, %v1109_v34  ;;  %v1124_v36 = vadd.f32 %v1583_v35, %v2021_v59 }
 0x1d8   :  { %v1118_v37 = vpop.f32.mrf.mxu1 }
 0x1d9   :  { %1206 = vst.msk [vmem:[%s2422_s9 + $0x1d8] sm:$0xff] %vm478_vm3, %v1124_v36  ;;  %v1119_v38 = vadd.f32 %v2021_v59, %v1118_v37 }
 0x1da   :  { %v1586_v39 = vpop.f32.mrf.mxu1 }
 0x1db   :  { %1205 = vst.msk [vmem:[%s2422_s9 + $0x1d0] sm:$0xff] %vm478_vm3, %v1119_v38  ;;  %v1134_v40 = vadd.f32 %v1586_v39, %v2021_v59 }
 0x1dc   :  { %v1128_v41 = vpop.f32.mrf.mxu1 }
 0x1dd   :  { %1208 = vst.msk [vmem:[%s2422_s9 + $0x1e8] sm:$0xff] %vm478_vm3, %v1134_v40  ;;  %v1129_v42 = vadd.f32 %v2021_v59, %v1128_v41 }
 0x1de   :  { %v1589_v43 = vpop.f32.mrf.mxu1 }
 0x1df   :  { %1207 = vst.msk [vmem:[%s2422_s9 + $0x1e0] sm:$0xff] %vm478_vm3, %v1129_v42  ;;  %v1144_v44 = vadd.f32 %v1589_v43, %v2021_v59 }
 0x1e0   :  { %v1138_v45 = vpop.f32.mrf.mxu1 }
 0x1e1   :  { %1210 = vst.msk [vmem:[%s2422_s9 + $0x1f8] sm:$0xff] %vm478_vm3, %v1144_v44  ;;  %v1139_v46 = vadd.f32 %v2021_v59, %v1138_v45 }
 0x1e3   :  { %1209 = vst.msk [vmem:[%s2422_s9 + $0x1f0] sm:$0xff] %vm478_vm3, %v1139_v46 }

// kernel: encoder_forward.5
= control target key start
LH: loop header
LB: loop body
LE: loop exit
PB: predicated region body
PF: predicated region fallthrough
CT: control target
= control target key end

     0   :  { %s1043_s21 = smov 0   ;;  %s1162_s0 = inlined_call_operand.vmem [shape: f32[2,16,256], index: 0, kind: input, shape index: {}]   ;;  %s1163_s1 = inlined_call_operand.vmem [shape: f32[2,40,16], index: 1, kind: input, shape index: {}]   ;;  %s1164_s2 = inlined_call_operand.vmem [shape: f32[16,32], index: 2, kind: input, shape index: {}]   ;;  %s1165_s3 = inlined_call_operand.vmem [shape: f32[32,16], index: 3, kind: input, shape index: {}]   ;;  %s1166_s4 = inlined_call_operand.vmem [shape: f32[32,16], index: 4, kind: input, shape index: {}]   ;;  %s1167_s5 = inlined_call_operand.vmem [shape: f32[16,32], index: 5, kind: input, shape index: {}]   ;;  %s1168_s6 = inlined_call_operand.vmem [shape: f32[2,40,256], index: 6, kind: output, shape index: {}]  }
   0x1 LB: > { %s895_s22 = sadd.s32 4294967295, %s1004_s21   ;;  %p899_p0 = scmp.ge.s32.totalorder %s1004_s21, 1  ;;  %s1004_s21 = sphi %s1043_s21, %s16_s21  }
   0x2   : > { %p222_p1 = scmp.lt.s32.totalorder %s1004_s21, 3 }
   0x4   : > { %p223_p2 = pnand %p899_p0, %p222_p1 }
   0x5   : > { %p257_p3 = scmp.lt.s32.totalorder (!%p223_p2), %s895_s22, 1 }
   0x6   : > { %226 = sbr.rel (%p223_p2) target bundleno = 653 (0x28d), region = 44 }
   0xb   : > { %v1006_v0 = vmov 0.0   ;;  %v478_v1 = vld [vmem:[%s1164_s2 + $0x8] sm:$0xff]  ;;  %v477_v2 = vld [vmem:[%s1164_s2] sm:$0xff]  ;;  %s1170_s22 = smov (!%p257_p3, %s895_s22), 1  ;;  %vm1007_vm0 = vmmov 0   ;;  %vm280_vm1 = vcmask 130048  }
   0xc   : > { %357 = vmatprep.mubr.f32.mxu0 %v1006_v0  ;;  %944 = vmatprep.subr.mxu1 %v1006_v0  ;;  %s927_s27 = sshll.u32 %s1170_s22, 5  ;;  %s986_s7 = smul.u32 40, %s1170_s22  ;;  %v272_v7 = vld [vmem:[%s1166_s4] sm:$0xff]  ;;  %v273_v10 = vld [vmem:[%s1166_s4 + $0x8] sm:$0xff]  ;;  %v274_v12 = vld [vmem:[%s1166_s4 + $0x10] sm:$0xff]  ;;  %vm384_vm2 = vcmask 261120  }
   0xd   : > { %945 = vmatpush3.msra.mxu1 %v478_v1  ;;  %948 = vmatprep.mubr.msk.f32.mxu1 %vm1007_vm0, %v1006_v0  ;;  %s261_s30 = scalar_lea.vmem %s1162_s0, %s927_s27  ;;  %v275_v14 = vld [vmem:[%s1166_s4 + $0x18] sm:$0xff]  ;;  %v382_v34 = vld [vmem:[%s1167_s5] sm:$0xff]  ;;  %v586_v36 = vld [vmem:[%s1165_s3 + $0x10] sm:$0xff]  ;;  %s987_s9 = smul.u32 80, %s1170_s22 }
   0xe   : > { %946 = vmatprep.subr.mxu1 %v1006_v0  ;;  %v279_v3 = vld [vmem:[%s261_s30 + $0x18] sm:$0xff]  ;;  %v278_v4 = vld [vmem:[%s261_s30 + $0x10] sm:$0xff]  ;;  %v277_v5 = vld [vmem:[%s261_s30 + $0x8] sm:$0xff]  ;;  %s266_s10 = scalar_lea.vmem %s1163_s1, %s986_s7 }
   0xf   : > { %947 = vmatpush3.msra.mxu1 %v477_v2  ;;  %321 = vmatprep.subr.mxu0 %v279_v3  ;;  %v276_v6 = vld [vmem:[%s261_s30] sm:$0xff]  ;;  %v473_v9 = vld [vmem:[%s266_s10 + $0x8] sm:$0xff]  ;;  %v474_v11 = vld [vmem:[%s266_s10 + $0x10] sm:$0xff]  ;;  %s271_s12 = scalar_lea.vmem %s1168_s6, %s987_s9 }
  0x10   : > { %322 = vmatpush1.msra.mxu0 %v278_v4  ;;  %v472_v8 = vld [vmem:[%s266_s10] sm:$0xff]  ;;  %v475_v13 = vld [vmem:[%s266_s10 + $0x18] sm:$0xff]  ;;  %v383_v37 = vld [vmem:[%s1167_s5 + $0x8] sm:$0xff] }
  0x11   : > { %323 = vmatprep.subr.mxu0 %v277_v5  ;;  %949 = vmatmul.mubr.msk.f32.vlgmr.msra.gmra.mxu1 %vm280_vm1, %v472_v8  ;;  %v476_v15 = vld [vmem:[%s266_s10 + $0x20] sm:$0xff]  ;;  %v587_v35 = vld [vmem:[%s1165_s3 + $0x18] sm:$0xff]  ;;  %v585_v38 = vld [vmem:[%s1165_s3 + $0x8] sm:$0xff] }
  0x12   : > { %324 = vmatpush1.msra.mxu0 %v276_v6  ;;  %951 = vmatprep.mubr.msk.f32.mxu1 %vm1007_vm0, %v1006_v0  ;;  %v584_v39 = vld [vmem:[%s1165_s3] sm:$0xff] }
  0x13   : > { %904 = vmatmul.mubr.msk.f32.vlgmr.msra.gmra.mxu0 %vm280_vm1, %v272_v7 }
  0x14   : > { %363 = vmatprep.mubr.f32.mxu0 %v1006_v0 }
  0x15   : > { %952 = vmatmul.mubr.msk.f32.gmra.mxu1 %vm280_vm1, %v473_v9 }
  0x16   : > { %954 = vmatprep.mubr.msk.f32.mxu1 %vm1007_vm0, %v1006_v0 }
  0x17   : > { %905 = vmatmul.mubr.msk.f32.gmra.mxu0 %vm280_vm1, %v273_v10 }
  0x18   : > { %369 = vmatprep.mubr.f32.mxu0 %v1006_v0 }
  0x19   : > { %955 = vmatmul.mubr.msk.f32.gmra.mxu1 %vm280_vm1, %v474_v11 }
  0x1a   : > { %957 = vmatprep.mubr.msk.f32.mxu1 %vm1007_vm0, %v1006_v0 }
  0x1b   : > { %906 = vmatmul.mubr.msk.f32.gmra.mxu0 %vm280_vm1, %v274_v12 }
  0x1c   : > { %375 = vmatprep.mubr.f32.mxu0 %v1006_v0 }
  0x1d   : > { %958 = vmatmul.mubr.msk.f32.gmra.mxu1 %vm280_vm1, %v475_v13 }
  0x1e   : > { %960 = vmatprep.mubr.msk.f32.mxu1 %vm1007_vm0, %v1006_v0 }
  0x1f   : > { %907 = vmatmul.mubr.msk.f32.gmra.mxu0 %vm280_vm1, %v275_v14 }
  0x20   : > { %455 = vmatprep.mubr.f32.mxu0 %v1006_v0 }
  0x21   : > { %961 = vmatmul.mubr.msk.f32.gmra.mxu1 %vm280_vm1, %v476_v15 }
  0x22   : > { %777 = vmatprep.mubr.f32.mxu1 %v1006_v0 }
  0xd1   : > { %v560_v16 = vpop.f32.mrf.mxu1 }
  0xd3   : > { %v359_v17 = vpop.f32.mrf.mxu0  ;;  %v950_v18 = vpop.f32.mrf.mxu1 }
  0xd5   : > { %v361_v19 = vpop.f32.mrf.mxu0  ;;  %v565_v20 = vpop.f32.mrf.mxu1 }
  0xd7   : > { %v365_v21 = vpop.f32.mrf.mxu0  ;;  %v953_v22 = vpop.f32.mrf.mxu1 }
  0xd9   : > { %v367_v23 = vpop.f32.mrf.mxu0  ;;  %v570_v24 = vpop.f32.mrf.mxu1 }
  0xdb   : > { %v371_v25 = vpop.f32.mrf.mxu0  ;;  %v956_v26 = vpop.f32.mrf.mxu1 }
  0xdd   : > { %v373_v27 = vpop.f32.mrf.mxu0  ;;  %v575_v28 = vpop.f32.mrf.mxu1 }
  0xdf   : > { %v377_v29 = vpop.f32.mrf.mxu0  ;;  %v959_v30 = vpop.f32.mrf.mxu1 }
  0xe1   : > { %v379_v31 = vpop.f32.mrf.mxu0  ;;  %v580_v32 = vpop.f32.mrf.mxu1 }
  0xe2   : > { %415 = vmatprep.subr.mxu0 %v379_v31 }
  0xe3   : > { %416 = vmatpush1.msra.mxu0 %v377_v29  ;;  %v962_v33 = vpop.f32.mrf.mxu1 }
  0xe4   : > { %417 = vmatprep.subr.mxu0 %v373_v27 }
  0xe5   : > { %418 = vmatpush1.msra.mxu0 %v371_v25 }
  0xe6   : > { %419 = vmatprep.subr.mxu0 %v367_v23 }
  0xe7   : > { %420 = vmatpush1.msra.mxu0 %v365_v21 }
  0xe8   : > { %421 = vmatprep.subr.mxu0 %v361_v19 }
  0xe9   : > { %422 = vmatpush1.msra.mxu0 %v359_v17 }
  0xea   : > { %908 = vmatmul.mubr.msk.f32.vlgmr.msra.gmra.mxu0 %vm384_vm2, %v382_v34  ;;  %963 = vmatprep.subr.mxu0 %v1006_v0 }
  0xeb   : > { %461 = vmatprep.mubr.f32.mxu0 %v1006_v0  ;;  %964 = vmatpush3.msra.mxu0 %v587_v35 }
  0xec   : > { %965 = vmatprep.subr.mxu0 %v1006_v0 }
  0xed   : > { %966 = vmatpush3.msra.mxu0 %v586_v36 }
  0xee   : > { %909 = vmatmul.mubr.msk.f32.gmra.mxu0 %vm384_vm2, %v383_v37  ;;  %967 = vmatprep.subr.mxu0 %v1006_v0 }
  0xef   : > { %968 = vmatpush3.msra.mxu0 %v585_v38  ;;  %971 = vmatprep.mubr.msk.f32.mxu0 %vm1007_vm0, %v1006_v0 }
  0xf0   : > { %969 = vmatprep.subr.mxu0 %v1006_v0 }
  0xf1   : > { %970 = vmatpush3.msra.mxu0 %v584_v39 }
  0xf2   : > { %972 = vmatmul.mubr.msk.f32.vlgmr.msra.gmra.mxu0 %vm384_vm2, %v560_v16 }
  0xf3   : > { %974 = vmatprep.mubr.msk.f32.mxu0 %vm1007_vm0, %v1006_v0 }
  0xf6   : > { %975 = vmatmul.mubr.msk.f32.gmra.mxu0 %vm384_vm2, %v565_v20 }
  0xf7   : > { %977 = vmatprep.mubr.msk.f32.mxu0 %vm1007_vm0, %v1006_v0 }
  0xfa   : > { %978 = vmatmul.mubr.msk.f32.gmra.mxu0 %vm384_vm2, %v570_v24 }
  0xfb   : > { %980 = vmatprep.mubr.msk.f32.mxu0 %vm1007_vm0, %v1006_v0 }
  0xfe   : > { %981 = vmatmul.mubr.msk.f32.gmra.mxu0 %vm384_vm2, %v575_v28 }
  0xff   : > { %983 = vmatprep.mubr.msk.f32.mxu0 %vm1007_vm0, %v1006_v0 }
 0x102   : > { %984 = vmatmul.mubr.msk.f32.gmra.mxu0 %vm384_vm2, %v580_v32 }
 0x1aa   : > { %v457_v40 = vpop.f32.mrf.mxu0 }
 0x1ab   : > { %v468_v49 = vmax.f32 %v457_v40, 0.0 }
 0x1ac   : > { %v459_v41 = vpop.f32.mrf.mxu0 }
 0x1ad   : > { %v469_v47 = vmax.f32 %v459_v41, 0.0 }
 0x1ae   : > { %v463_v42 = vpop.f32.mrf.mxu0 }
 0x1af   : > { %v470_v45 = vmax.f32 %v463_v42, 0.0 }
 0x1b0   : > { %v465_v43 = vpop.f32.mrf.mxu0 }
 0x1b1   : > { %v471_v44 = vmax.f32 %v465_v43, 0.0 }
 0x1b2   : > { %v669_v46 = vpop.f32.mrf.mxu0 }
 0x1b3   : > { %741 = vmatprep.subr.mxu1 %v471_v44  ;;  %v693_v48 = vmax.f32 %v669_v46, 0.0 }
 0x1b4   : > { %742 = vmatpush1.msra.mxu1 %v470_v45  ;;  %v973_v50 = vpop.f32.mrf.mxu0 }
 0x1b5   : > { %743 = vmatprep.subr.mxu1 %v469_v47 }
 0x1b6   : > { %744 = vmatpush1.msra.mxu1 %v468_v49  ;;  %v674_v51 = vpop.f32.mrf.mxu0 }
 0x1b7   : > { %920 = vmatmul.mubr.msk.f32.vlgmr.msra.gmra.mxu1 %vm280_vm1, %v693_v48  ;;  %v694_v52 = vmax.f32 %v674_v51, 0.0 }
 0x1b8   : > { %v976_v53 = vpop.f32.mrf.mxu0  ;;  %783 = vmatprep.mubr.f32.mxu1 %v1006_v0 }
 0x1ba   : > { %v679_v54 = vpop.f32.mrf.mxu0 }
 0x1bb   : > { %921 = vmatmul.mubr.msk.f32.gmra.mxu1 %vm280_vm1, %v694_v52  ;;  %v695_v55 = vmax.f32 %v679_v54, 0.0 }
 0x1bc   : > { %v979_v56 = vpop.f32.mrf.mxu0  ;;  %789 = vmatprep.mubr.f32.mxu1 %v1006_v0 }
 0x1be   : > { %v684_v57 = vpop.f32.mrf.mxu0 }
 0x1bf   : > { %922 = vmatmul.mubr.msk.f32.gmra.mxu1 %vm280_vm1, %v695_v55  ;;  %v696_v58 = vmax.f32 %v684_v57, 0.0 }
 0x1c0   : > { %v982_v59 = vpop.f32.mrf.mxu0  ;;  %795 = vmatprep.mubr.f32.mxu1 %v1006_v0 }
 0x1c2   : > { %v689_v60 = vpop.f32.mrf.mxu0 }
 0x1c3   : > { %923 = vmatmul.mubr.msk.f32.gmra.mxu1 %vm280_vm1, %v696_v58  ;;  %v697_v61 = vmax.f32 %v689_v60, 0.0 }
 0x1c4   : > { %v985_v62 = vpop.f32.mrf.mxu0  ;;  %801 = vmatprep.mubr.f32.mxu1 %v1006_v0 }
 0x1c7   : > { %924 = vmatmul.mubr.msk.f32.gmra.mxu1 %vm280_vm1, %v697_v61 }
 0x277   : > { %v779_v63 = vpop.f32.mrf.mxu1 }
 0x278   : > { %v808_v1 = vmul.f32 0.0625, %v779_v63 }
 0x279   : > { %v781_v2 = vpop.f32.mrf.mxu1 }
 0x27a   : > { %818 = vst [vmem:[%s271_s12] sm:$0xff] %v808_v1  ;;  %v809_v3 = vmul.f32 0.0625, %v781_v2 }
 0x27b   : > { %v785_v4 = vpop.f32.mrf.mxu1 }
 0x27c   : > { %819 = vst [vmem:[%s271_s12 + $0x8] sm:$0xff] %v809_v3  ;;  %v810_v5 = vmul.f32 0.0625, %v785_v4 }
 0x27d   : > { %v787_v6 = vpop.f32.mrf.mxu1 }
 0x27e   : > { %820 = vst [vmem:[%s271_s12 + $0x10] sm:$0xff] %v810_v5  ;;  %v811_v7 = vmul.f32 0.0625, %v787_v6 }
 0x27f   : > { %v791_v8 = vpop.f32.mrf.mxu1 }
 0x280   : > { %821 = vst [vmem:[%s271_s12 + $0x18] sm:$0xff] %v811_v7  ;;  %v812_v0 = vmul.f32 0.0625, %v791_v8 }
 0x281   : > { %v793_v9 = vpop.f32.mrf.mxu1 }
 0x282   : > { %822 = vst [vmem:[%s271_s12 + $0x20] sm:$0xff] %v812_v0  ;;  %v813_v10 = vmul.f32 0.0625, %v793_v9 }
 0x283   : > { %v797_v11 = vpop.f32.mrf.mxu1 }
 0x284   : > { %823 = vst [vmem:[%s271_s12 + $0x28] sm:$0xff] %v813_v10  ;;  %v814_v12 = vmul.f32 0.0625, %v797_v11 }
 0x285   : > { %v799_v13 = vpop.f32.mrf.mxu1 }
 0x286   : > { %824 = vst [vmem:[%s271_s12 + $0x30] sm:$0xff] %v814_v12  ;;  %v815_v14 = vmul.f32 0.0625, %v799_v13 }
 0x287   : > { %v803_v15 = vpop.f32.mrf.mxu1 }
 0x288   : > { %825 = vst [vmem:[%s271_s12 + $0x38] sm:$0xff] %v815_v14  ;;  %v816_v16 = vmul.f32 0.0625, %v803_v15 }
 0x289   : > { %v805_v17 = vpop.f32.mrf.mxu1 }
 0x28a   : > { %826 = vst [vmem:[%s271_s12 + $0x40] sm:$0xff] %v816_v16  ;;  %v817_v18 = vmul.f32 0.0625, %v805_v17 }
 0x28c   : > { %827 = vst [vmem:[%s271_s12 + $0x48] sm:$0xff] %v817_v18 }
 0x28d PF: > { %s16_s21 = sadd.s32 1, %s1004_s21  }
 0x28e   : > { %p13_p4 = scmp.ge.s32.totalorder %s16_s21, 4  }
 0x290   :  { %15 = sbr.rel (!%p13_p4) target bundleno = 1 (0x1), region = 77 }

</bundles_post_ra>
